<compile_context>
chip_gen: v5e
topology: v5e:2x2
jax: 0.10.0
libtpu: 0.0.40
codegen_flags: <defaults>
</compile_context>

<pallas_src>
import functools

import jax
import jax.numpy as jnp
from jax import lax
from jax.experimental import pallas as pl
from jax.experimental.pallas import tpu as pltpu


# --------------------------------------------------------------------------
# small helpers
# --------------------------------------------------------------------------
_VMEM_LIMIT_BYTES = 48 * 1024 * 1024          # explicit scoped-VMEM ceiling (v7x-safe)


def _cparams(semantics):
    return pltpu.CompilerParams(dimension_semantics=semantics,
                                vmem_limit_bytes=_VMEM_LIMIT_BYTES)


def _pick_row_tile(rows, target=512, min_steps=2):
    """Largest power-of-two row tile <= target dividing `rows`, preferring >=2
    grid steps so both v7x TensorCores get work on the 'parallel' axis."""
    cands = [t for t in (1024, 512, 256, 128, 64, 32, 16, 8) if t <= target]
    for t in cands:
        if t <= rows and rows % t == 0 and rows // t >= min_steps:
            return t
    for t in cands:                                   # tiny inputs: accept 1 step
        if t <= rows and rows % t == 0:
            return t
    return rows                                       # full block (small arrays only)


def _pick_col_tile(cols, target=512):
    """Decoder lane tile: multiple of 128 dividing `cols`, so the folded O(W^2)
    upsample matrices stay VMEM-bounded at large images (128 ideal on v5e)."""
    for t in (target, 384, 256, 128):
        if t <= cols and t % 128 == 0 and cols % t == 0:
            return t
    return cols


def _ln(x, g, b, eps=1e-5):
    """LayerNorm over last axis, single-pass float32 stats (PyTorch eps=1e-5)."""
    x = x.astype(jnp.float32)
    mu = jnp.mean(x, axis=-1, keepdims=True)
    ms = jnp.mean(x * x, axis=-1, keepdims=True)
    var = ms - mu * mu
    return (x - mu) * lax.rsqrt(var + eps) * g + b


# --------------------------------------------------------------------------
# Kernel 1: patch embed  =  (unfolded patches @ W + b) -> LN(pe) -> LN(norm0)
#           row-tiled, bf16 matmul operands; stage-0 feature emitted in bf16.
# --------------------------------------------------------------------------
def _patch_embed_kernel(p_ref, w_ref, b_ref, g1_ref, be1_ref, g2_ref, be2_ref,
                        t0_ref, f0_ref):
    acc = jnp.dot(p_ref[...], w_ref[...], preferred_element_type=jnp.float32)
    acc = acc + b_ref[...]
    t0 = _ln(acc, g1_ref[...], be1_ref[...])              # patch-embed LayerNorm
    t0_ref[...] = t0                                      # f32 tokens (for merging)
    f0_ref[...] = _ln(t0, g2_ref[...], be2_ref[...]).astype(f0_ref.dtype)  # bf16 feat


def patch_embed(p, w, b, ln_g, ln_b, n_g, n_b):
    rows, cin = p.shape
    cout = w.shape[1]
    tile = _pick_row_tile(rows)
    row_in = pl.BlockSpec((tile, cin), lambda i: (i, 0))
    row_out = pl.BlockSpec((tile, cout), lambda i: (i, 0))
    vec = pl.BlockSpec((1, cout), lambda i: (0, 0))
    return pl.pallas_call(
        _patch_embed_kernel,
        grid=(rows // tile,),
        in_specs=[row_in, pl.BlockSpec((cin, cout), lambda i: (0, 0)),
                  vec, vec, vec, vec, vec],
        out_specs=[row_out, row_out],
        out_shape=[jax.ShapeDtypeStruct((rows, cout), jnp.float32),
                   jax.ShapeDtypeStruct((rows, cout), jnp.bfloat16)],
        compiler_params=_cparams(("parallel",)),
    )(p.astype(jnp.bfloat16), w.astype(jnp.bfloat16),
      b.reshape(1, cout).astype(jnp.float32),
      ln_g.reshape(1, cout).astype(jnp.float32),
      ln_b.reshape(1, cout).astype(jnp.float32),
      n_g.reshape(1, cout).astype(jnp.float32),
      n_b.reshape(1, cout).astype(jnp.float32))


# --------------------------------------------------------------------------
# Kernel 2: patch merging  =  LN(4C) -> Linear(4C->2C, no bias) -> LN(stage out)
#           stage feature emitted in the dtype the consumer needs (bf16 / f32).
# --------------------------------------------------------------------------
def _merge_kernel(x_ref, g1_ref, b1_ref, w_ref, g2_ref, b2_ref, tok_ref, f_ref):
    xn = _ln(x_ref[...], g1_ref[...], b1_ref[...])                  # LN(4C)
    tok = jnp.dot(xn.astype(jnp.bfloat16), w_ref[...],
                  preferred_element_type=jnp.float32)               # 4C -> 2C
    tok_ref[...] = tok
    f_ref[...] = _ln(tok, g2_ref[...], b2_ref[...]).astype(f_ref.dtype)


def patch_merge(x_cat, ln_g, ln_b, w_reduce, n_g, n_b, feat_dtype=jnp.bfloat16):
    rows, c4 = x_cat.shape
    c2 = w_reduce.shape[1]
    tile = _pick_row_tile(rows)
    row_in = pl.BlockSpec((tile, c4), lambda i: (i, 0))
    row_out = pl.BlockSpec((tile, c2), lambda i: (i, 0))
    vec4 = pl.BlockSpec((1, c4), lambda i: (0, 0))
    vec2 = pl.BlockSpec((1, c2), lambda i: (0, 0))
    return pl.pallas_call(
        _merge_kernel,
        grid=(rows // tile,),
        in_specs=[row_in, vec4, vec4,
                  pl.BlockSpec((c4, c2), lambda i: (0, 0)), vec2, vec2],
        out_specs=[row_out, row_out],
        out_shape=[jax.ShapeDtypeStruct((rows, c2), jnp.float32),
                   jax.ShapeDtypeStruct((rows, c2), feat_dtype)],
        compiler_params=_cparams(("parallel",)),
    )(x_cat.astype(jnp.float32),
      ln_g.reshape(1, c4).astype(jnp.float32),
      ln_b.reshape(1, c4).astype(jnp.float32),
      w_reduce.astype(jnp.bfloat16),
      n_g.reshape(1, c2).astype(jnp.float32),
      n_b.reshape(1, c2).astype(jnp.float32))


# --------------------------------------------------------------------------
# Kernel 3: all three decoders + sigmoid + weighted fusion, fused.
# Grid = (batch, column-tile of K*W_out).  Per decoder d:
#     A = feat_d (H_s, W_s*C) @ M_d[:, ntile]     # 1x1 conv folded into width upsample
#     Y = Uh_d (H_out, H_s) @ A                   # height upsample (f32 matmul)
#     s = sigmoid(Y + bias_d)                     # (H_out, ntile)
# Aux outputs (pre-fusion sigmoids) packed into one bf16 tensor; fused stays f32.
# --------------------------------------------------------------------------
def _decoder_fuse_kernel(f1_ref, f2_ref, f3_ref, m_ref, uh_ref, b_ref,
                         aux_ref, fuse_ref, *, hs_list):
    planes = []
    for d, (f_ref, hs) in enumerate(zip((f1_ref, f2_ref, f3_ref), hs_list)):
        a = jnp.dot(f_ref[0], m_ref[d], preferred_element_type=jnp.float32)
        u = uh_ref[d][:, :hs]                               # f32 (H_out, H_s)
        y = jnp.dot(u, a, preferred_element_type=jnp.float32)
        s = jax.nn.sigmoid(y + b_ref[d])                    # f32 elementwise/EUP
        aux_ref[d, 0] = s.astype(aux_ref.dtype)             # bf16 writeback
        planes.append(s)
    fuse_ref[0] = 0.3 * planes[0] + 0.4 * planes[1] + 0.3 * planes[2]  # w=[.3,.4,.3]


def decoder_fuse(feats, m_pack, uh_pack, b_pack, h_out, kw_out, hs_list):
    bsz = feats[0].shape[0]
    col_tile = _pick_col_tile(kw_out)
    ncol = kw_out // col_tile
    kernel = functools.partial(_decoder_fuse_kernel, hs_list=hs_list)
    in_specs = [
        pl.BlockSpec((1,) + feats[0].shape[1:], lambda b, n: (b, 0, 0)),
        pl.BlockSpec((1,) + feats[1].shape[1:], lambda b, n: (b, 0, 0)),
        pl.BlockSpec((1,) + feats[2].shape[1:], lambda b, n: (b, 0, 0)),
        pl.BlockSpec((3, m_pack.shape[1], col_tile), lambda b, n: (0, 0, n)),
        pl.BlockSpec(uh_pack.shape, lambda b, n: (0, 0, 0)),
        pl.BlockSpec((3, 1, col_tile), lambda b, n: (0, 0, n)),
    ]
    out_specs = [
        pl.BlockSpec((3, 1, h_out, col_tile), lambda b, n: (0, b, 0, n)),
        pl.BlockSpec((1, h_out, col_tile), lambda b, n: (b, 0, n)),
    ]
    out_shape = [
        jax.ShapeDtypeStruct((3, bsz, h_out, kw_out), jnp.bfloat16),
        jax.ShapeDtypeStruct((bsz, h_out, kw_out), jnp.float32),
    ]
    return pl.pallas_call(
        kernel,
        grid=(bsz, ncol),
        in_specs=in_specs,
        out_specs=out_specs,
        out_shape=out_shape,
        compiler_params=_cparams(("parallel", "parallel")),
    )(*feats, m_pack, uh_pack, b_pack)


# --------------------------------------------------------------------------
# Glue (reshapes / constant construction) in plain JAX
# --------------------------------------------------------------------------
def bilinear_matrix(n_in, n_out):
    """Interpolation matrix for bilinear upsampling with align_corners=True."""
    if n_in == 1:
        return jnp.ones((n_out, 1), jnp.float32)
    src = jnp.arange(n_out, dtype=jnp.float32) * (n_in - 1) / (n_out - 1)
    i0 = jnp.clip(jnp.floor(src).astype(jnp.int32), 0, n_in - 2)
    frac = src - i0.astype(jnp.float32)
    rows = jnp.arange(n_out)
    m = jnp.zeros((n_out, n_in), jnp.float32)
    m = m.at[rows, i0].add(1.0 - frac)
    m = m.at[rows, i0 + 1].add(frac)
    return m


def _decoder_consts(w_conv, bias, hs, ws, scale, hs_max):
    """Fold Conv2d(C, K, 1) into the width-upsample matrix (bf16); Uh stays f32
    and is padded to hs_max columns so the three decoders pack into one slab.
    Bias passes through bilinear upsampling unchanged (rows of Uh/Uw sum to 1)."""
    c, k = w_conv.shape
    ho, wo = hs * scale, ws * scale
    uh = jnp.pad(bilinear_matrix(hs, ho), ((0, 0), (0, hs_max - hs)))   # (Hout, hs_max)
    uw = bilinear_matrix(ws, wo)                                        # (Wout, W_s)
    # M[(w*C + c), (k*Wout + wo)] = Uw[wo, w] * w_conv[c, k]
    m = jnp.einsum('ow,ck->wcko', uw, w_conv).reshape(ws * c, k * wo)
    bexp = jnp.repeat(bias, wo).reshape(1, k * wo)
    return m.astype(jnp.bfloat16), uh.astype(jnp.float32), bexp.astype(jnp.float32)


def _concat2x2(tok):
    """Swin PatchMerging 2x2 spatial concat: (B,H,W,C) -> (B*H/2*W/2, 4C)."""
    B, H, W, C = tok.shape
    x0 = tok[:, 0::2, 0::2, :]
    x1 = tok[:, 1::2, 0::2, :]
    x2 = tok[:, 0::2, 1::2, :]
    x3 = tok[:, 1::2, 1::2, :]
    x = jnp.concatenate([x0, x1, x2, x3], axis=-1)
    return x.reshape(B * (H // 2) * (W // 2), 4 * C)


def swin_mil_forward(params, x):
    """x: (B, 3, H, W) NCHW.  Returns (x1, x2, x3, x_fused, x3_) like the module."""
    B, Cin, H, W = x.shape
    H1, W1 = H // 4, W // 4
    H2, W2 = H1 // 2, W1 // 2
    H3, W3 = H2 // 2, W2 // 2
    K = params['d1_w'].shape[1]

    # ---- backbone skeleton -------------------------------------------------
    # PatchEmbed: Conv2d(3, 96, k=4, s=4) as unfold + fused matmul/LN/LN kernel.
    p = x.reshape(B, Cin, H1, 4, W1, 4).transpose(0, 2, 4, 1, 3, 5)
    p = p.reshape(B * H1 * W1, Cin * 16)
    t0, f0 = patch_embed(p, params['pe_w'], params['pe_b'],
                         params['pe_ln_g'], params['pe_ln_b'],
                         params['n0_g'], params['n0_b'])
    # TODO(synk): Swin window-attention blocks of stages 0/1/2 are not reproduced.
    # TODO(synk): the 2x2 PatchMerging gather still runs as XLA slices+concat; a
    # quadrant-major token order would remove it but forces a decoder-side transpose.

    xcat1 = _concat2x2(t0.reshape(B, H1, W1, 96))
    tok1, f1 = patch_merge(xcat1, params['m1_ln_g'], params['m1_ln_b'],
                           params['m1_w'], params['n1_g'], params['n1_b'],
                           feat_dtype=jnp.bfloat16)
    xcat2 = _concat2x2(tok1.reshape(B, H2, W2, 192))
    _tok2, f2 = patch_merge(xcat2, params['m2_ln_g'], params['m2_ln_b'],
                            params['m2_w'], params['n2_g'], params['n2_b'],
                            feat_dtype=jnp.float32)     # f32: returned as x3_

    x3_ = f2.reshape(B, H3, W3, 384).transpose(0, 3, 1, 2)      # (B,384,H/16,W/16)

    # ---- decoders + fusion (single fused Pallas kernel) ---------------------
    feats = [f0.reshape(B, H1, W1 * 96),                        # bf16, lane-dense
             f1.reshape(B, H2, W2 * 192),                       # bf16
             f2.astype(jnp.bfloat16).reshape(B, H3, W3 * 384)]  # tiny cast for decoder
    cfg = [(params['d1_w'], params['d1_b'], H1, W1, 4),
           (params['d2_w'], params['d2_b'], H2, W2, 8),
           (params['d3_w'], params['d3_b'], H3, W3, 16)]
    mats, uhs, biases = [], [], []
    for wc, bc, hs, ws, sc in cfg:
        m, u, be = _decoder_consts(wc, bc, hs, ws, sc, H1)
        mats.append(m)
        uhs.append(u)
        biases.append(be)
    m_pack = jnp.stack(mats)          # (3, W_s*C, K*W_out)  (rows equal for all stages)
    uh_pack = jnp.stack(uhs)          # (3, H_out, H/4) f32, zero-padded
    b_pack = jnp.stack(biases)        # (3, 1, K*W_out) f32

    aux, fused = decoder_fuse(feats, m_pack, uh_pack, b_pack,
                              h_out=H, kw_out=K * W, hs_list=(H1, H2, H3))

    # (d, B, H, K*W) bf16 -> NCHW f32 in one fused transpose+convert.
    aux = aux.reshape(3, B, H, K, W).transpose(0, 1, 3, 2, 4).astype(jnp.float32)
    x1, x2, x3 = aux[0], aux[1], aux[2]
    xf = fused.reshape(B, H, K, W).transpose(0, 2, 1, 3)
    return x1, x2, x3, xf, x3_


# --------------------------------------------------------------------------
# Deterministic parameter construction (synthetic; shapes from the module)
# --------------------------------------------------------------------------
def init_params(key, classes):
    keys = jax.random.split(key, 8)

    def normal(k, shape, scale=0.02):
        return scale * jax.random.normal(k, shape, jnp.float32)

    def xavier(k, cin, cout):
        lim = (6.0 / (cin + cout)) ** 0.5
        return jax.random.uniform(k, (cin, cout), jnp.float32, -lim, lim)

    return {
        # patch embed (Conv2d 3->96, k=4, s=4) + its LayerNorm
        'pe_w': normal(keys[0], (48, 96)), 'pe_b': jnp.zeros((96,), jnp.float32),
        'pe_ln_g': jnp.ones((96,), jnp.float32), 'pe_ln_b': jnp.zeros((96,), jnp.float32),
        # per-stage output norms (norm0/1/2)
        'n0_g': jnp.ones((96,), jnp.float32), 'n0_b': jnp.zeros((96,), jnp.float32),
        'n1_g': jnp.ones((192,), jnp.float32), 'n1_b': jnp.zeros((192,), jnp.float32),
        'n2_g': jnp.ones((384,), jnp.float32), 'n2_b': jnp.zeros((384,), jnp.float32),
        # patch merging 1: LN(384) + Linear(384 -> 192, no bias)
        'm1_ln_g': jnp.ones((384,), jnp.float32), 'm1_ln_b': jnp.zeros((384,), jnp.float32),
        'm1_w': normal(keys[1], (384, 192)),
        # patch merging 2: LN(768) + Linear(768 -> 384, no bias)
        'm2_ln_g': jnp.ones((768,), jnp.float32), 'm2_ln_b': jnp.zeros((768,), jnp.float32),
        'm2_w': normal(keys[2], (768, 384)),
        # decoder 1x1 convs (xavier_uniform like the module's pretrain init)
        'd1_w': xavier(keys[3], 96, classes), 'd1_b': jnp.zeros((classes,), jnp.float32),
        'd2_w': xavier(keys[4], 192, classes), 'd2_b': jnp.zeros((classes,), jnp.float32),
        'd3_w': xavier(keys[5], 384, classes), 'd3_b': jnp.zeros((classes,), jnp.float32),
    }


if __name__ == "__main__":
    classes = 2
    B, Cin, H, W = 2, 3, 64, 64          # NCHW, H/W divisible by 16 (Swin strides)

    kx, kp = jax.random.split(jax.random.PRNGKey(0))
    x = jax.random.normal(kx, (B, Cin, H, W), jnp.float32)
    params = init_params(kp, classes)

    fwd = jax.jit(swin_mil_forward)
    x1, x2, x3, xfused, x3_ = fwd(params, x)
    jax.tree_util.tree_map(jax.block_until_ready, (x1, x2, x3, xfused, x3_))

    assert x1.shape == (B, classes, H, W)
    assert x2.shape == (B, classes, H, W)
    assert x3.shape == (B, classes, H, W)
    assert xfused.shape == (B, classes, H, W)
    assert x3_.shape == (B, 384, H // 16, W // 16)
    assert bool(jnp.all(jnp.isfinite(xfused)))
    assert bool(jnp.all((xfused >= 0.0) & (xfused <= 1.0)))
    print("KERNEL_OK")
</pallas_src>

<mosaic_0001>
module attributes {stable_mosaic.version = 11 : i64} {
  func.func @_patch_embed_kernel(%arg0: i32, %arg1: memref<256x48xbf16, #tpu.memory_space<vmem>>, %arg2: memref<48x96xbf16, #tpu.memory_space<vmem>>, %arg3: memref<1x96xf32, #tpu.memory_space<vmem>>, %arg4: memref<1x96xf32, #tpu.memory_space<vmem>>, %arg5: memref<1x96xf32, #tpu.memory_space<vmem>>, %arg6: memref<1x96xf32, #tpu.memory_space<vmem>>, %arg7: memref<1x96xf32, #tpu.memory_space<vmem>>, %arg8: memref<256x96xf32, #tpu.memory_space<vmem>>, %arg9: memref<256x96xbf16, #tpu.memory_space<vmem>>) attributes {dimension_semantics = [#tpu.dimension_semantics<parallel>], iteration_bounds = array<i64: 2>, scalar_prefetch = 0 : i64, scratch_operands = 0 : i64, tpu.core_type = #tpu.core_type<tc>, window_params = [{transform_indices = @transform_0, window_bounds = array<i64: 256, 48>}, {pipeline_mode = #tpu.pipeline_mode<synchronous>, transform_indices = @transform_1, window_bounds = array<i64: 48, 96>}, {pipeline_mode = #tpu.pipeline_mode<synchronous>, transform_indices = @transform_2, window_bounds = array<i64: 1, 96>}, {pipeline_mode = #tpu.pipeline_mode<synchronous>, transform_indices = @transform_3, window_bounds = array<i64: 1, 96>}, {pipeline_mode = #tpu.pipeline_mode<synchronous>, transform_indices = @transform_4, window_bounds = array<i64: 1, 96>}, {pipeline_mode = #tpu.pipeline_mode<synchronous>, transform_indices = @transform_5, window_bounds = array<i64: 1, 96>}, {pipeline_mode = #tpu.pipeline_mode<synchronous>, transform_indices = @transform_6, window_bounds = array<i64: 1, 96>}, {transform_indices = @transform_7, window_bounds = array<i64: 256, 96>}, {transform_indices = @transform_8, window_bounds = array<i64: 256, 96>}]} {
    %c0 = arith.constant 0 : index
    %c0_0 = arith.constant 0 : index
    %0 = vector.load %arg1[%c0, %c0_0] : memref<256x48xbf16, #tpu.memory_space<vmem>>, vector<256x48xbf16>
    %c0_1 = arith.constant 0 : index
    %c0_2 = arith.constant 0 : index
    %1 = vector.load %arg2[%c0_1, %c0_2] : memref<48x96xbf16, #tpu.memory_space<vmem>>, vector<48x96xbf16>
    %cst = arith.constant dense<0.000000e+00> : vector<256x96xf32>
    %2 = tpu.matmul %0, %1, %cst {dimension_numbers = #tpu.dot_dimension_numbers<[1], [0], [0], [1], [0, 0, 1, 1], [], []>} : vector<256x48xbf16>, vector<48x96xbf16>, vector<256x96xf32> -> vector<256x96xf32>
    %c0_3 = arith.constant 0 : index
    %c0_4 = arith.constant 0 : index
    %3 = vector.load %arg3[%c0_3, %c0_4] : memref<1x96xf32, #tpu.memory_space<vmem>>, vector<1x96xf32>
    %4 = vector.broadcast %3 : vector<1x96xf32> to vector<256x96xf32>
    %5 = arith.addf %2, %4 : vector<256x96xf32>
    %c0_5 = arith.constant 0 : index
    %c0_6 = arith.constant 0 : index
    %6 = vector.load %arg4[%c0_5, %c0_6] : memref<1x96xf32, #tpu.memory_space<vmem>>, vector<1x96xf32>
    %c0_7 = arith.constant 0 : index
    %c0_8 = arith.constant 0 : index
    %7 = vector.load %arg5[%c0_7, %c0_8] : memref<1x96xf32, #tpu.memory_space<vmem>>, vector<1x96xf32>
    %cst_9 = arith.constant dense<0.000000e+00> : vector<256xf32>
    %8 = vector.multi_reduction <add>, %5, %cst_9 [1] : vector<256x96xf32> to vector<256xf32>
    %9 = vector.shape_cast %8 : vector<256xf32> to vector<256x1xf32>
    %cst_10 = arith.constant 9.600000e+01 : f32
    %10 = vector.broadcast %cst_10 : f32 to vector<256x1xf32>
    %11 = arith.divf %9, %10 : vector<256x1xf32>
    %12 = arith.mulf %5, %5 : vector<256x96xf32>
    %cst_11 = arith.constant dense<0.000000e+00> : vector<256xf32>
    %13 = vector.multi_reduction <add>, %12, %cst_11 [1] : vector<256x96xf32> to vector<256xf32>
    %14 = vector.shape_cast %13 : vector<256xf32> to vector<256x1xf32>
    %cst_12 = arith.constant 9.600000e+01 : f32
    %15 = vector.broadcast %cst_12 : f32 to vector<256x1xf32>
    %16 = arith.divf %14, %15 : vector<256x1xf32>
    %17 = arith.mulf %11, %11 : vector<256x1xf32>
    %18 = arith.subf %16, %17 : vector<256x1xf32>
    %19 = vector.broadcast %11 : vector<256x1xf32> to vector<256x96xf32>
    %20 = arith.subf %5, %19 : vector<256x96xf32>
    %cst_13 = arith.constant 9.99999974E-6 : f32
    %21 = vector.broadcast %cst_13 : f32 to vector<256x1xf32>
    %22 = arith.addf %18, %21 : vector<256x1xf32>
    %23 = math.rsqrt %22 : vector<256x1xf32>
    %24 = vector.broadcast %23 : vector<256x1xf32> to vector<256x96xf32>
    %25 = arith.mulf %20, %24 : vector<256x96xf32>
    %26 = vector.broadcast %6 : vector<1x96xf32> to vector<256x96xf32>
    %27 = arith.mulf %25, %26 : vector<256x96xf32>
    %28 = vector.broadcast %7 : vector<1x96xf32> to vector<256x96xf32>
    %29 = arith.addf %27, %28 : vector<256x96xf32>
    %c0_14 = arith.constant 0 : index
    %c0_15 = arith.constant 0 : index
    %30 = vector.load %arg8[%c0_14, %c0_15] : memref<256x96xf32, #tpu.memory_space<vmem>>, vector<256x96xf32>
    tpu.vector_store %arg8[%c0_14, %c0_15], %29 {strides = array<i32>} : memref<256x96xf32, #tpu.memory_space<vmem>>, vector<256x96xf32>,
    %c0_16 = arith.constant 0 : index
    %c0_17 = arith.constant 0 : index
    %31 = vector.load %arg6[%c0_16, %c0_17] : memref<1x96xf32, #tpu.memory_space<vmem>>, vector<1x96xf32>
    %c0_18 = arith.constant 0 : index
    %c0_19 = arith.constant 0 : index
    %32 = vector.load %arg7[%c0_18, %c0_19] : memref<1x96xf32, #tpu.memory_space<vmem>>, vector<1x96xf32>
    %cst_20 = arith.constant dense<0.000000e+00> : vector<256xf32>
    %33 = vector.multi_reduction <add>, %29, %cst_20 [1] : vector<256x96xf32> to vector<256xf32>
    %34 = vector.shape_cast %33 : vector<256xf32> to vector<256x1xf32>
    %cst_21 = arith.constant 9.600000e+01 : f32
    %35 = vector.broadcast %cst_21 : f32 to vector<256x1xf32>
    %36 = arith.divf %34, %35 : vector<256x1xf32>
    %37 = arith.mulf %29, %29 : vector<256x96xf32>
    %cst_22 = arith.constant dense<0.000000e+00> : vector<256xf32>
    %38 = vector.multi_reduction <add>, %37, %cst_22 [1] : vector<256x96xf32> to vector<256xf32>
    %39 = vector.shape_cast %38 : vector<256xf32> to vector<256x1xf32>
    %cst_23 = arith.constant 9.600000e+01 : f32
    %40 = vector.broadcast %cst_23 : f32 to vector<256x1xf32>
    %41 = arith.divf %39, %40 : vector<256x1xf32>
    %42 = arith.mulf %36, %36 : vector<256x1xf32>
    %43 = arith.subf %41, %42 : vector<256x1xf32>
    %44 = vector.broadcast %36 : vector<256x1xf32> to vector<256x96xf32>
    %45 = arith.subf %29, %44 : vector<256x96xf32>
    %cst_24 = arith.constant 9.99999974E-6 : f32
    %46 = vector.broadcast %cst_24 : f32 to vector<256x1xf32>
    %47 = arith.addf %43, %46 : vector<256x1xf32>
    %48 = math.rsqrt %47 : vector<256x1xf32>
    %49 = vector.broadcast %48 : vector<256x1xf32> to vector<256x96xf32>
    %50 = arith.mulf %45, %49 : vector<256x96xf32>
    %51 = vector.broadcast %31 : vector<1x96xf32> to vector<256x96xf32>
    %52 = arith.mulf %50, %51 : vector<256x96xf32>
    %53 = vector.broadcast %32 : vector<1x96xf32> to vector<256x96xf32>
    %54 = arith.addf %52, %53 : vector<256x96xf32>
    %55 = arith.truncf %54 : vector<256x96xf32> to vector<256x96xbf16>
    %c0_25 = arith.constant 0 : index
    %c0_26 = arith.constant 0 : index
    %56 = vector.load %arg9[%c0_25, %c0_26] : memref<256x96xbf16, #tpu.memory_space<vmem>>, vector<256x96xbf16>
    tpu.vector_store %arg9[%c0_25, %c0_26], %55 {strides = array<i32>} : memref<256x96xbf16, #tpu.memory_space<vmem>>, vector<256x96xbf16>,
    return
  }
  func.func @transform_0(%arg0: i32) -> (i32, i32) {
    %c0_i32 = arith.constant 0 : i32
    %c0_i32_0 = arith.constant 0 : i32
    return %arg0, %c0_i32 : i32, i32
  }
  func.func @transform_1(%arg0: i32) -> (i32, i32) {
    %c0_i32 = arith.constant 0 : i32
    %c0_i32_0 = arith.constant 0 : i32
    %c0_i32_1 = arith.constant 0 : i32
    return %c0_i32, %c0_i32_0 : i32, i32
  }
  func.func @transform_2(%arg0: i32) -> (i32, i32) {
    %c0_i32 = arith.constant 0 : i32
    %c0_i32_0 = arith.constant 0 : i32
    %c0_i32_1 = arith.constant 0 : i32
    return %c0_i32, %c0_i32_0 : i32, i32
  }
  func.func @transform_3(%arg0: i32) -> (i32, i32) {
    %c0_i32 = arith.constant 0 : i32
    %c0_i32_0 = arith.constant 0 : i32
    %c0_i32_1 = arith.constant 0 : i32
    return %c0_i32, %c0_i32_0 : i32, i32
  }
  func.func @transform_4(%arg0: i32) -> (i32, i32) {
    %c0_i32 = arith.constant 0 : i32
    %c0_i32_0 = arith.constant 0 : i32
    %c0_i32_1 = arith.constant 0 : i32
    return %c0_i32, %c0_i32_0 : i32, i32
  }
  func.func @transform_5(%arg0: i32) -> (i32, i32) {
    %c0_i32 = arith.constant 0 : i32
    %c0_i32_0 = arith.constant 0 : i32
    %c0_i32_1 = arith.constant 0 : i32
    return %c0_i32, %c0_i32_0 : i32, i32
  }
  func.func @transform_6(%arg0: i32) -> (i32, i32) {
    %c0_i32 = arith.constant 0 : i32
    %c0_i32_0 = arith.constant 0 : i32
    %c0_i32_1 = arith.constant 0 : i32
    return %c0_i32, %c0_i32_0 : i32, i32
  }
  func.func @transform_7(%arg0: i32) -> (i32, i32) {
    %c0_i32 = arith.constant 0 : i32
    %c0_i32_0 = arith.constant 0 : i32
    return %arg0, %c0_i32 : i32, i32
  }
  func.func @transform_8(%arg0: i32) -> (i32, i32) {
    %c0_i32 = arith.constant 0 : i32
    %c0_i32_0 = arith.constant 0 : i32
    return %arg0, %c0_i32 : i32, i32
  }
}

module attributes {stable_mosaic.version = 11 : i64} {
  func.func @_merge_kernel(%arg0: i32, %arg1: memref<64x384xf32, #tpu.memory_space<vmem>>, %arg2: memref<1x384xf32, #tpu.memory_space<vmem>>, %arg3: memref<1x384xf32, #tpu.memory_space<vmem>>, %arg4: memref<384x192xbf16, #tpu.memory_space<vmem>>, %arg5: memref<1x192xf32, #tpu.memory_space<vmem>>, %arg6: memref<1x192xf32, #tpu.memory_space<vmem>>, %arg7: memref<64x192xf32, #tpu.memory_space<vmem>>, %arg8: memref<64x192xbf16, #tpu.memory_space<vmem>>) attributes {dimension_semantics = [#tpu.dimension_semantics<parallel>], iteration_bounds = array<i64: 2>, scalar_prefetch = 0 : i64, scratch_operands = 0 : i64, tpu.core_type = #tpu.core_type<tc>, window_params = [{transform_indices = @transform_0, window_bounds = array<i64: 64, 384>}, {pipeline_mode = #tpu.pipeline_mode<synchronous>, transform_indices = @transform_1, window_bounds = array<i64: 1, 384>}, {pipeline_mode = #tpu.pipeline_mode<synchronous>, transform_indices = @transform_2, window_bounds = array<i64: 1, 384>}, {pipeline_mode = #tpu.pipeline_mode<synchronous>, transform_indices = @transform_3, window_bounds = array<i64: 384, 192>}, {pipeline_mode = #tpu.pipeline_mode<synchronous>, transform_indices = @transform_4, window_bounds = array<i64: 1, 192>}, {pipeline_mode = #tpu.pipeline_mode<synchronous>, transform_indices = @transform_5, window_bounds = array<i64: 1, 192>}, {transform_indices = @transform_6, window_bounds = array<i64: 64, 192>}, {transform_indices = @transform_7, window_bounds = array<i64: 64, 192>}]} {
    %c0 = arith.constant 0 : index
    %c0_0 = arith.constant 0 : index
    %0 = vector.load %arg1[%c0, %c0_0] : memref<64x384xf32, #tpu.memory_space<vmem>>, vector<64x384xf32>
    %c0_1 = arith.constant 0 : index
    %c0_2 = arith.constant 0 : index
    %1 = vector.load %arg2[%c0_1, %c0_2] : memref<1x384xf32, #tpu.memory_space<vmem>>, vector<1x384xf32>
    %c0_3 = arith.constant 0 : index
    %c0_4 = arith.constant 0 : index
    %2 = vector.load %arg3[%c0_3, %c0_4] : memref<1x384xf32, #tpu.memory_space<vmem>>, vector<1x384xf32>
    %cst = arith.constant dense<0.000000e+00> : vector<64xf32>
    %3 = vector.multi_reduction <add>, %0, %cst [1] : vector<64x384xf32> to vector<64xf32>
    %4 = vector.shape_cast %3 : vector<64xf32> to vector<64x1xf32>
    %cst_5 = arith.constant 3.840000e+02 : f32
    %5 = vector.broadcast %cst_5 : f32 to vector<64x1xf32>
    %6 = arith.divf %4, %5 : vector<64x1xf32>
    %7 = arith.mulf %0, %0 : vector<64x384xf32>
    %cst_6 = arith.constant dense<0.000000e+00> : vector<64xf32>
    %8 = vector.multi_reduction <add>, %7, %cst_6 [1] : vector<64x384xf32> to vector<64xf32>
    %9 = vector.shape_cast %8 : vector<64xf32> to vector<64x1xf32>
    %cst_7 = arith.constant 3.840000e+02 : f32
    %10 = vector.broadcast %cst_7 : f32 to vector<64x1xf32>
    %11 = arith.divf %9, %10 : vector<64x1xf32>
    %12 = arith.mulf %6, %6 : vector<64x1xf32>
    %13 = arith.subf %11, %12 : vector<64x1xf32>
    %14 = vector.broadcast %6 : vector<64x1xf32> to vector<64x384xf32>
    %15 = arith.subf %0, %14 : vector<64x384xf32>
    %cst_8 = arith.constant 9.99999974E-6 : f32
    %16 = vector.broadcast %cst_8 : f32 to vector<64x1xf32>
    %17 = arith.addf %13, %16 : vector<64x1xf32>
    %18 = math.rsqrt %17 : vector<64x1xf32>
    %19 = vector.broadcast %18 : vector<64x1xf32> to vector<64x384xf32>
    %20 = arith.mulf %15, %19 : vector<64x384xf32>
    %21 = vector.broadcast %1 : vector<1x384xf32> to vector<64x384xf32>
    %22 = arith.mulf %20, %21 : vector<64x384xf32>
    %23 = vector.broadcast %2 : vector<1x384xf32> to vector<64x384xf32>
    %24 = arith.addf %22, %23 : vector<64x384xf32>
    %25 = arith.truncf %24 : vector<64x384xf32> to vector<64x384xbf16>
    %c0_9 = arith.constant 0 : index
    %c0_10 = arith.constant 0 : index
    %26 = vector.load %arg4[%c0_9, %c0_10] : memref<384x192xbf16, #tpu.memory_space<vmem>>, vector<384x192xbf16>
    %cst_11 = arith.constant dense<0.000000e+00> : vector<64x192xf32>
    %27 = tpu.matmul %25, %26, %cst_11 {dimension_numbers = #tpu.dot_dimension_numbers<[1], [0], [0], [1], [0, 0, 1, 1], [], []>} : vector<64x384xbf16>, vector<384x192xbf16>, vector<64x192xf32> -> vector<64x192xf32>
    %c0_12 = arith.constant 0 : index
    %c0_13 = arith.constant 0 : index
    %28 = vector.load %arg7[%c0_12, %c0_13] : memref<64x192xf32, #tpu.memory_space<vmem>>, vector<64x192xf32>
    tpu.vector_store %arg7[%c0_12, %c0_13], %27 {strides = array<i32>} : memref<64x192xf32, #tpu.memory_space<vmem>>, vector<64x192xf32>,
    %c0_14 = arith.constant 0 : index
    %c0_15 = arith.constant 0 : index
    %29 = vector.load %arg5[%c0_14, %c0_15] : memref<1x192xf32, #tpu.memory_space<vmem>>, vector<1x192xf32>
    %c0_16 = arith.constant 0 : index
    %c0_17 = arith.constant 0 : index
    %30 = vector.load %arg6[%c0_16, %c0_17] : memref<1x192xf32, #tpu.memory_space<vmem>>, vector<1x192xf32>
    %cst_18 = arith.constant dense<0.000000e+00> : vector<64xf32>
    %31 = vector.multi_reduction <add>, %27, %cst_18 [1] : vector<64x192xf32> to vector<64xf32>
    %32 = vector.shape_cast %31 : vector<64xf32> to vector<64x1xf32>
    %cst_19 = arith.constant 1.920000e+02 : f32
    %33 = vector.broadcast %cst_19 : f32 to vector<64x1xf32>
    %34 = arith.divf %32, %33 : vector<64x1xf32>
    %35 = arith.mulf %27, %27 : vector<64x192xf32>
    %cst_20 = arith.constant dense<0.000000e+00> : vector<64xf32>
    %36 = vector.multi_reduction <add>, %35, %cst_20 [1] : vector<64x192xf32> to vector<64xf32>
    %37 = vector.shape_cast %36 : vector<64xf32> to vector<64x1xf32>
    %cst_21 = arith.constant 1.920000e+02 : f32
    %38 = vector.broadcast %cst_21 : f32 to vector<64x1xf32>
    %39 = arith.divf %37, %38 : vector<64x1xf32>
    %40 = arith.mulf %34, %34 : vector<64x1xf32>
    %41 = arith.subf %39, %40 : vector<64x1xf32>
    %42 = vector.broadcast %34 : vector<64x1xf32> to vector<64x192xf32>
    %43 = arith.subf %27, %42 : vector<64x192xf32>
    %cst_22 = arith.constant 9.99999974E-6 : f32
    %44 = vector.broadcast %cst_22 : f32 to vector<64x1xf32>
    %45 = arith.addf %41, %44 : vector<64x1xf32>
    %46 = math.rsqrt %45 : vector<64x1xf32>
    %47 = vector.broadcast %46 : vector<64x1xf32> to vector<64x192xf32>
    %48 = arith.mulf %43, %47 : vector<64x192xf32>
    %49 = vector.broadcast %29 : vector<1x192xf32> to vector<64x192xf32>
    %50 = arith.mulf %48, %49 : vector<64x192xf32>
    %51 = vector.broadcast %30 : vector<1x192xf32> to vector<64x192xf32>
    %52 = arith.addf %50, %51 : vector<64x192xf32>
    %53 = arith.truncf %52 : vector<64x192xf32> to vector<64x192xbf16>
    %c0_23 = arith.constant 0 : index
    %c0_24 = arith.constant 0 : index
    %54 = vector.load %arg8[%c0_23, %c0_24] : memref<64x192xbf16, #tpu.memory_space<vmem>>, vector<64x192xbf16>
    tpu.vector_store %arg8[%c0_23, %c0_24], %53 {strides = array<i32>} : memref<64x192xbf16, #tpu.memory_space<vmem>>, vector<64x192xbf16>,
    return
  }
  func.func @transform_0(%arg0: i32) -> (i32, i32) {
    %c0_i32 = arith.constant 0 : i32
    %c0_i32_0 = arith.constant 0 : i32
    return %arg0, %c0_i32 : i32, i32
  }
  func.func @transform_1(%arg0: i32) -> (i32, i32) {
    %c0_i32 = arith.constant 0 : i32
    %c0_i32_0 = arith.constant 0 : i32
    %c0_i32_1 = arith.constant 0 : i32
    return %c0_i32, %c0_i32_0 : i32, i32
  }
  func.func @transform_2(%arg0: i32) -> (i32, i32) {
    %c0_i32 = arith.constant 0 : i32
    %c0_i32_0 = arith.constant 0 : i32
    %c0_i32_1 = arith.constant 0 : i32
    return %c0_i32, %c0_i32_0 : i32, i32
  }
  func.func @transform_3(%arg0: i32) -> (i32, i32) {
    %c0_i32 = arith.constant 0 : i32
    %c0_i32_0 = arith.constant 0 : i32
    %c0_i32_1 = arith.constant 0 : i32
    return %c0_i32, %c0_i32_0 : i32, i32
  }
  func.func @transform_4(%arg0: i32) -> (i32, i32) {
    %c0_i32 = arith.constant 0 : i32
    %c0_i32_0 = arith.constant 0 : i32
    %c0_i32_1 = arith.constant 0 : i32
    return %c0_i32, %c0_i32_0 : i32, i32
  }
  func.func @transform_5(%arg0: i32) -> (i32, i32) {
    %c0_i32 = arith.constant 0 : i32
    %c0_i32_0 = arith.constant 0 : i32
    %c0_i32_1 = arith.constant 0 : i32
    return %c0_i32, %c0_i32_0 : i32, i32
  }
  func.func @transform_6(%arg0: i32) -> (i32, i32) {
    %c0_i32 = arith.constant 0 : i32
    %c0_i32_0 = arith.constant 0 : i32
    return %arg0, %c0_i32 : i32, i32
  }
  func.func @transform_7(%arg0: i32) -> (i32, i32) {
    %c0_i32 = arith.constant 0 : i32
    %c0_i32_0 = arith.constant 0 : i32
    return %arg0, %c0_i32 : i32, i32
  }
}

module attributes {stable_mosaic.version = 11 : i64} {
  func.func @_merge_kernel(%arg0: i32, %arg1: memref<16x768xf32, #tpu.memory_space<vmem>>, %arg2: memref<1x768xf32, #tpu.memory_space<vmem>>, %arg3: memref<1x768xf32, #tpu.memory_space<vmem>>, %arg4: memref<768x384xbf16, #tpu.memory_space<vmem>>, %arg5: memref<1x384xf32, #tpu.memory_space<vmem>>, %arg6: memref<1x384xf32, #tpu.memory_space<vmem>>, %arg7: memref<16x384xf32, #tpu.memory_space<vmem>>, %arg8: memref<16x384xf32, #tpu.memory_space<vmem>>) attributes {dimension_semantics = [#tpu.dimension_semantics<parallel>], iteration_bounds = array<i64: 2>, scalar_prefetch = 0 : i64, scratch_operands = 0 : i64, tpu.core_type = #tpu.core_type<tc>, window_params = [{transform_indices = @transform_0, window_bounds = array<i64: 16, 768>}, {pipeline_mode = #tpu.pipeline_mode<synchronous>, transform_indices = @transform_1, window_bounds = array<i64: 1, 768>}, {pipeline_mode = #tpu.pipeline_mode<synchronous>, transform_indices = @transform_2, window_bounds = array<i64: 1, 768>}, {pipeline_mode = #tpu.pipeline_mode<synchronous>, transform_indices = @transform_3, window_bounds = array<i64: 768, 384>}, {pipeline_mode = #tpu.pipeline_mode<synchronous>, transform_indices = @transform_4, window_bounds = array<i64: 1, 384>}, {pipeline_mode = #tpu.pipeline_mode<synchronous>, transform_indices = @transform_5, window_bounds = array<i64: 1, 384>}, {transform_indices = @transform_6, window_bounds = array<i64: 16, 384>}, {transform_indices = @transform_7, window_bounds = array<i64: 16, 384>}]} {
    %c0 = arith.constant 0 : index
    %c0_0 = arith.constant 0 : index
    %0 = vector.load %arg1[%c0, %c0_0] : memref<16x768xf32, #tpu.memory_space<vmem>>, vector<16x768xf32>
    %c0_1 = arith.constant 0 : index
    %c0_2 = arith.constant 0 : index
    %1 = vector.load %arg2[%c0_1, %c0_2] : memref<1x768xf32, #tpu.memory_space<vmem>>, vector<1x768xf32>
    %c0_3 = arith.constant 0 : index
    %c0_4 = arith.constant 0 : index
    %2 = vector.load %arg3[%c0_3, %c0_4] : memref<1x768xf32, #tpu.memory_space<vmem>>, vector<1x768xf32>
    %cst = arith.constant dense<0.000000e+00> : vector<16xf32>
    %3 = vector.multi_reduction <add>, %0, %cst [1] : vector<16x768xf32> to vector<16xf32>
    %4 = vector.shape_cast %3 : vector<16xf32> to vector<16x1xf32>
    %cst_5 = arith.constant 7.680000e+02 : f32
    %5 = vector.broadcast %cst_5 : f32 to vector<16x1xf32>
    %6 = arith.divf %4, %5 : vector<16x1xf32>
    %7 = arith.mulf %0, %0 : vector<16x768xf32>
    %cst_6 = arith.constant dense<0.000000e+00> : vector<16xf32>
    %8 = vector.multi_reduction <add>, %7, %cst_6 [1] : vector<16x768xf32> to vector<16xf32>
    %9 = vector.shape_cast %8 : vector<16xf32> to vector<16x1xf32>
    %cst_7 = arith.constant 7.680000e+02 : f32
    %10 = vector.broadcast %cst_7 : f32 to vector<16x1xf32>
    %11 = arith.divf %9, %10 : vector<16x1xf32>
    %12 = arith.mulf %6, %6 : vector<16x1xf32>
    %13 = arith.subf %11, %12 : vector<16x1xf32>
    %14 = vector.broadcast %6 : vector<16x1xf32> to vector<16x768xf32>
    %15 = arith.subf %0, %14 : vector<16x768xf32>
    %cst_8 = arith.constant 9.99999974E-6 : f32
    %16 = vector.broadcast %cst_8 : f32 to vector<16x1xf32>
    %17 = arith.addf %13, %16 : vector<16x1xf32>
    %18 = math.rsqrt %17 : vector<16x1xf32>
    %19 = vector.broadcast %18 : vector<16x1xf32> to vector<16x768xf32>
    %20 = arith.mulf %15, %19 : vector<16x768xf32>
    %21 = vector.broadcast %1 : vector<1x768xf32> to vector<16x768xf32>
    %22 = arith.mulf %20, %21 : vector<16x768xf32>
    %23 = vector.broadcast %2 : vector<1x768xf32> to vector<16x768xf32>
    %24 = arith.addf %22, %23 : vector<16x768xf32>
    %25 = arith.truncf %24 : vector<16x768xf32> to vector<16x768xbf16>
    %c0_9 = arith.constant 0 : index
    %c0_10 = arith.constant 0 : index
    %26 = vector.load %arg4[%c0_9, %c0_10] : memref<768x384xbf16, #tpu.memory_space<vmem>>, vector<768x384xbf16>
    %cst_11 = arith.constant dense<0.000000e+00> : vector<16x384xf32>
    %27 = tpu.matmul %25, %26, %cst_11 {dimension_numbers = #tpu.dot_dimension_numbers<[1], [0], [0], [1], [0, 0, 1, 1], [], []>} : vector<16x768xbf16>, vector<768x384xbf16>, vector<16x384xf32> -> vector<16x384xf32>
    %c0_12 = arith.constant 0 : index
    %c0_13 = arith.constant 0 : index
    %28 = vector.load %arg7[%c0_12, %c0_13] : memref<16x384xf32, #tpu.memory_space<vmem>>, vector<16x384xf32>
    tpu.vector_store %arg7[%c0_12, %c0_13], %27 {strides = array<i32>} : memref<16x384xf32, #tpu.memory_space<vmem>>, vector<16x384xf32>,
    %c0_14 = arith.constant 0 : index
    %c0_15 = arith.constant 0 : index
    %29 = vector.load %arg5[%c0_14, %c0_15] : memref<1x384xf32, #tpu.memory_space<vmem>>, vector<1x384xf32>
    %c0_16 = arith.constant 0 : index
    %c0_17 = arith.constant 0 : index
    %30 = vector.load %arg6[%c0_16, %c0_17] : memref<1x384xf32, #tpu.memory_space<vmem>>, vector<1x384xf32>
    %cst_18 = arith.constant dense<0.000000e+00> : vector<16xf32>
    %31 = vector.multi_reduction <add>, %27, %cst_18 [1] : vector<16x384xf32> to vector<16xf32>
    %32 = vector.shape_cast %31 : vector<16xf32> to vector<16x1xf32>
    %cst_19 = arith.constant 3.840000e+02 : f32
    %33 = vector.broadcast %cst_19 : f32 to vector<16x1xf32>
    %34 = arith.divf %32, %33 : vector<16x1xf32>
    %35 = arith.mulf %27, %27 : vector<16x384xf32>
    %cst_20 = arith.constant dense<0.000000e+00> : vector<16xf32>
    %36 = vector.multi_reduction <add>, %35, %cst_20 [1] : vector<16x384xf32> to vector<16xf32>
    %37 = vector.shape_cast %36 : vector<16xf32> to vector<16x1xf32>
    %cst_21 = arith.constant 3.840000e+02 : f32
    %38 = vector.broadcast %cst_21 : f32 to vector<16x1xf32>
    %39 = arith.divf %37, %38 : vector<16x1xf32>
    %40 = arith.mulf %34, %34 : vector<16x1xf32>
    %41 = arith.subf %39, %40 : vector<16x1xf32>
    %42 = vector.broadcast %34 : vector<16x1xf32> to vector<16x384xf32>
    %43 = arith.subf %27, %42 : vector<16x384xf32>
    %cst_22 = arith.constant 9.99999974E-6 : f32
    %44 = vector.broadcast %cst_22 : f32 to vector<16x1xf32>
    %45 = arith.addf %41, %44 : vector<16x1xf32>
    %46 = math.rsqrt %45 : vector<16x1xf32>
    %47 = vector.broadcast %46 : vector<16x1xf32> to vector<16x384xf32>
    %48 = arith.mulf %43, %47 : vector<16x384xf32>
    %49 = vector.broadcast %29 : vector<1x384xf32> to vector<16x384xf32>
    %50 = arith.mulf %48, %49 : vector<16x384xf32>
    %51 = vector.broadcast %30 : vector<1x384xf32> to vector<16x384xf32>
    %52 = arith.addf %50, %51 : vector<16x384xf32>
    %c0_23 = arith.constant 0 : index
    %c0_24 = arith.constant 0 : index
    %53 = vector.load %arg8[%c0_23, %c0_24] : memref<16x384xf32, #tpu.memory_space<vmem>>, vector<16x384xf32>
    tpu.vector_store %arg8[%c0_23, %c0_24], %52 {strides = array<i32>} : memref<16x384xf32, #tpu.memory_space<vmem>>, vector<16x384xf32>,
    return
  }
  func.func @transform_0(%arg0: i32) -> (i32, i32) {
    %c0_i32 = arith.constant 0 : i32
    %c0_i32_0 = arith.constant 0 : i32
    return %arg0, %c0_i32 : i32, i32
  }
  func.func @transform_1(%arg0: i32) -> (i32, i32) {
    %c0_i32 = arith.constant 0 : i32
    %c0_i32_0 = arith.constant 0 : i32
    %c0_i32_1 = arith.constant 0 : i32
    return %c0_i32, %c0_i32_0 : i32, i32
  }
  func.func @transform_2(%arg0: i32) -> (i32, i32) {
    %c0_i32 = arith.constant 0 : i32
    %c0_i32_0 = arith.constant 0 : i32
    %c0_i32_1 = arith.constant 0 : i32
    return %c0_i32, %c0_i32_0 : i32, i32
  }
  func.func @transform_3(%arg0: i32) -> (i32, i32) {
    %c0_i32 = arith.constant 0 : i32
    %c0_i32_0 = arith.constant 0 : i32
    %c0_i32_1 = arith.constant 0 : i32
    return %c0_i32, %c0_i32_0 : i32, i32
  }
  func.func @transform_4(%arg0: i32) -> (i32, i32) {
    %c0_i32 = arith.constant 0 : i32
    %c0_i32_0 = arith.constant 0 : i32
    %c0_i32_1 = arith.constant 0 : i32
    return %c0_i32, %c0_i32_0 : i32, i32
  }
  func.func @transform_5(%arg0: i32) -> (i32, i32) {
    %c0_i32 = arith.constant 0 : i32
    %c0_i32_0 = arith.constant 0 : i32
    %c0_i32_1 = arith.constant 0 : i32
    return %c0_i32, %c0_i32_0 : i32, i32
  }
  func.func @transform_6(%arg0: i32) -> (i32, i32) {
    %c0_i32 = arith.constant 0 : i32
    %c0_i32_0 = arith.constant 0 : i32
    return %arg0, %c0_i32 : i32, i32
  }
  func.func @transform_7(%arg0: i32) -> (i32, i32) {
    %c0_i32 = arith.constant 0 : i32
    %c0_i32_0 = arith.constant 0 : i32
    return %arg0, %c0_i32 : i32, i32
  }
}

module attributes {stable_mosaic.version = 11 : i64} {
  func.func @_decoder_fuse_kernel(%arg0: i32, %arg1: i32, %arg2: memref<1x16x1536xbf16, #tpu.memory_space<vmem>>, %arg3: memref<1x8x1536xbf16, #tpu.memory_space<vmem>>, %arg4: memref<1x4x1536xbf16, #tpu.memory_space<vmem>>, %arg5: memref<3x1536x128xbf16, #tpu.memory_space<vmem>>, %arg6: memref<3x64x16xf32, #tpu.memory_space<vmem>>, %arg7: memref<3x1x128xf32, #tpu.memory_space<vmem>>, %arg8: memref<3x1x64x128xbf16, #tpu.memory_space<vmem>>, %arg9: memref<1x64x128xf32, #tpu.memory_space<vmem>>) attributes {dimension_semantics = [#tpu.dimension_semantics<parallel>, #tpu.dimension_semantics<parallel>], iteration_bounds = array<i64: 2, 1>, scalar_prefetch = 0 : i64, scratch_operands = 0 : i64, tpu.core_type = #tpu.core_type<tc>, window_params = [{transform_indices = @transform_0, window_bounds = array<i64: 1, 16, 1536>}, {transform_indices = @transform_1, window_bounds = array<i64: 1, 8, 1536>}, {transform_indices = @transform_2, window_bounds = array<i64: 1, 4, 1536>}, {transform_indices = @transform_3, window_bounds = array<i64: 3, 1536, 128>}, {pipeline_mode = #tpu.pipeline_mode<synchronous>, transform_indices = @transform_4, window_bounds = array<i64: 3, 64, 16>}, {transform_indices = @transform_5, window_bounds = array<i64: 3, 1, 128>}, {transform_indices = @transform_6, window_bounds = array<i64: 3, 1, 64, 128>}, {transform_indices = @transform_7, window_bounds = array<i64: 1, 64, 128>}]} {
    %c0 = arith.constant 0 : index
    %c0_0 = arith.constant 0 : index
    %c0_1 = arith.constant 0 : index
    %0 = vector.load %arg2[%c0, %c0_0, %c0_1] : memref<1x16x1536xbf16, #tpu.memory_space<vmem>>, vector<1x16x1536xbf16>
    %1 = vector.shape_cast %0 : vector<1x16x1536xbf16> to vector<16x1536xbf16>
    %c0_2 = arith.constant 0 : index
    %c0_3 = arith.constant 0 : index
    %c0_4 = arith.constant 0 : index
    %2 = vector.load %arg5[%c0_2, %c0_3, %c0_4] : memref<3x1536x128xbf16, #tpu.memory_space<vmem>>, vector<1x1536x128xbf16>
    %3 = vector.shape_cast %2 : vector<1x1536x128xbf16> to vector<1536x128xbf16>
    %cst = arith.constant dense<0.000000e+00> : vector<16x128xf32>
    %4 = tpu.matmul %1, %3, %cst {dimension_numbers = #tpu.dot_dimension_numbers<[1], [0], [0], [1], [0, 0, 1, 1], [], []>} : vector<16x1536xbf16>, vector<1536x128xbf16>, vector<16x128xf32> -> vector<16x128xf32>
    %c0_5 = arith.constant 0 : index
    %c0_6 = arith.constant 0 : index
    %c0_7 = arith.constant 0 : index
    %5 = vector.load %arg6[%c0_5, %c0_6, %c0_7] : memref<3x64x16xf32, #tpu.memory_space<vmem>>, vector<1x64x16xf32>
    %6 = vector.shape_cast %5 : vector<1x64x16xf32> to vector<64x16xf32>
    %cst_8 = arith.constant dense<0.000000e+00> : vector<64x128xf32>
    %7 = tpu.matmul %6, %4, %cst_8 {dimension_numbers = #tpu.dot_dimension_numbers<[1], [0], [0], [1], [0, 0, 1, 1], [], []>} : vector<64x16xf32>, vector<16x128xf32>, vector<64x128xf32> -> vector<64x128xf32>
    %c0_9 = arith.constant 0 : index
    %c0_10 = arith.constant 0 : index
    %c0_11 = arith.constant 0 : index
    %8 = vector.load %arg7[%c0_9, %c0_10, %c0_11] : memref<3x1x128xf32, #tpu.memory_space<vmem>>, vector<1x1x128xf32>
    %9 = vector.shape_cast %8 : vector<1x1x128xf32> to vector<1x128xf32>
    %10 = vector.broadcast %9 : vector<1x128xf32> to vector<64x128xf32>
    %11 = arith.addf %7, %10 : vector<64x128xf32>
    %12 = arith.negf %11 : vector<64x128xf32>
    %13 = math.exp %12 : vector<64x128xf32>
    %cst_12 = arith.constant 1.000000e+00 : f32
    %14 = vector.broadcast %cst_12 : f32 to vector<64x128xf32>
    %15 = arith.addf %14, %13 : vector<64x128xf32>
    %16 = arith.divf %14, %15 : vector<64x128xf32>
    %17 = arith.truncf %16 : vector<64x128xf32> to vector<64x128xbf16>
    %c0_13 = arith.constant 0 : index
    %c0_14 = arith.constant 0 : index
    %c0_15 = arith.constant 0 : index
    %c0_16 = arith.constant 0 : index
    %18 = vector.load %arg8[%c0_13, %c0_14, %c0_15, %c0_16] : memref<3x1x64x128xbf16, #tpu.memory_space<vmem>>, vector<1x1x64x128xbf16>
    %19 = vector.shape_cast %18 : vector<1x1x64x128xbf16> to vector<64x128xbf16>
    %20 = vector.shape_cast %17 : vector<64x128xbf16> to vector<1x1x64x128xbf16>
    tpu.vector_store %arg8[%c0_13, %c0_14, %c0_15, %c0_16], %20 {strides = array<i32>} : memref<3x1x64x128xbf16, #tpu.memory_space<vmem>>, vector<1x1x64x128xbf16>,
    %c0_17 = arith.constant 0 : index
    %c0_18 = arith.constant 0 : index
    %c0_19 = arith.constant 0 : index
    %21 = vector.load %arg3[%c0_17, %c0_18, %c0_19] : memref<1x8x1536xbf16, #tpu.memory_space<vmem>>, vector<1x8x1536xbf16>
    %22 = vector.shape_cast %21 : vector<1x8x1536xbf16> to vector<8x1536xbf16>
    %c1 = arith.constant 1 : index
    %c0_20 = arith.constant 0 : index
    %c0_21 = arith.constant 0 : index
    %23 = vector.load %arg5[%c1, %c0_20, %c0_21] : memref<3x1536x128xbf16, #tpu.memory_space<vmem>>, vector<1x1536x128xbf16>
    %24 = vector.shape_cast %23 : vector<1x1536x128xbf16> to vector<1536x128xbf16>
    %cst_22 = arith.constant dense<0.000000e+00> : vector<8x128xf32>
    %25 = tpu.matmul %22, %24, %cst_22 {dimension_numbers = #tpu.dot_dimension_numbers<[1], [0], [0], [1], [0, 0, 1, 1], [], []>} : vector<8x1536xbf16>, vector<1536x128xbf16>, vector<8x128xf32> -> vector<8x128xf32>
    %c1_23 = arith.constant 1 : index
    %c0_24 = arith.constant 0 : index
    %c0_25 = arith.constant 0 : index
    %26 = vector.load %arg6[%c1_23, %c0_24, %c0_25] : memref<3x64x16xf32, #tpu.memory_space<vmem>>, vector<1x64x16xf32>
    %27 = vector.shape_cast %26 : vector<1x64x16xf32> to vector<64x16xf32>
    %28 = vector.extract_strided_slice %27 {offsets = [0, 0], sizes = [64, 8], strides = [1, 1]} : vector<64x16xf32> to vector<64x8xf32>
    %cst_26 = arith.constant dense<0.000000e+00> : vector<64x128xf32>
    %29 = tpu.matmul %28, %25, %cst_26 {dimension_numbers = #tpu.dot_dimension_numbers<[1], [0], [0], [1], [0, 0, 1, 1], [], []>} : vector<64x8xf32>, vector<8x128xf32>, vector<64x128xf32> -> vector<64x128xf32>
    %c1_27 = arith.constant 1 : index
    %c0_28 = arith.constant 0 : index
    %c0_29 = arith.constant 0 : index
    %30 = vector.load %arg7[%c1_27, %c0_28, %c0_29] : memref<3x1x128xf32, #tpu.memory_space<vmem>>, vector<1x1x128xf32>
    %31 = vector.shape_cast %30 : vector<1x1x128xf32> to vector<1x128xf32>
    %32 = vector.broadcast %31 : vector<1x128xf32> to vector<64x128xf32>
    %33 = arith.addf %29, %32 : vector<64x128xf32>
    %34 = arith.negf %33 : vector<64x128xf32>
    %35 = math.exp %34 : vector<64x128xf32>
    %cst_30 = arith.constant 1.000000e+00 : f32
    %36 = vector.broadcast %cst_30 : f32 to vector<64x128xf32>
    %37 = arith.addf %36, %35 : vector<64x128xf32>
    %38 = arith.divf %36, %37 : vector<64x128xf32>
    %39 = arith.truncf %38 : vector<64x128xf32> to vector<64x128xbf16>
    %c1_31 = arith.constant 1 : index
    %c0_32 = arith.constant 0 : index
    %c0_33 = arith.constant 0 : index
    %c0_34 = arith.constant 0 : index
    %40 = vector.load %arg8[%c1_31, %c0_32, %c0_33, %c0_34] : memref<3x1x64x128xbf16, #tpu.memory_space<vmem>>, vector<1x1x64x128xbf16>
    %41 = vector.shape_cast %40 : vector<1x1x64x128xbf16> to vector<64x128xbf16>
    %42 = vector.shape_cast %39 : vector<64x128xbf16> to vector<1x1x64x128xbf16>
    tpu.vector_store %arg8[%c1_31, %c0_32, %c0_33, %c0_34], %42 {strides = array<i32>} : memref<3x1x64x128xbf16, #tpu.memory_space<vmem>>, vector<1x1x64x128xbf16>,
    %c0_35 = arith.constant 0 : index
    %c0_36 = arith.constant 0 : index
    %c0_37 = arith.constant 0 : index
    %43 = vector.load %arg4[%c0_35, %c0_36, %c0_37] : memref<1x4x1536xbf16, #tpu.memory_space<vmem>>, vector<1x4x1536xbf16>
    %44 = vector.shape_cast %43 : vector<1x4x1536xbf16> to vector<4x1536xbf16>
    %c2 = arith.constant 2 : index
    %c0_38 = arith.constant 0 : index
    %c0_39 = arith.constant 0 : index
    %45 = vector.load %arg5[%c2, %c0_38, %c0_39] : memref<3x1536x128xbf16, #tpu.memory_space<vmem>>, vector<1x1536x128xbf16>
    %46 = vector.shape_cast %45 : vector<1x1536x128xbf16> to vector<1536x128xbf16>
    %cst_40 = arith.constant dense<0.000000e+00> : vector<4x128xf32>
    %47 = tpu.matmul %44, %46, %cst_40 {dimension_numbers = #tpu.dot_dimension_numbers<[1], [0], [0], [1], [0, 0, 1, 1], [], []>} : vector<4x1536xbf16>, vector<1536x128xbf16>, vector<4x128xf32> -> vector<4x128xf32>
    %c2_41 = arith.constant 2 : index
    %c0_42 = arith.constant 0 : index
    %c0_43 = arith.constant 0 : index
    %48 = vector.load %arg6[%c2_41, %c0_42, %c0_43] : memref<3x64x16xf32, #tpu.memory_space<vmem>>, vector<1x64x16xf32>
    %49 = vector.shape_cast %48 : vector<1x64x16xf32> to vector<64x16xf32>
    %50 = vector.extract_strided_slice %49 {offsets = [0, 0], sizes = [64, 4], strides = [1, 1]} : vector<64x16xf32> to vector<64x4xf32>
    %cst_44 = arith.constant dense<0.000000e+00> : vector<64x128xf32>
    %51 = tpu.matmul %50, %47, %cst_44 {dimension_numbers = #tpu.dot_dimension_numbers<[1], [0], [0], [1], [0, 0, 1, 1], [], []>} : vector<64x4xf32>, vector<4x128xf32>, vector<64x128xf32> -> vector<64x128xf32>
    %c2_45 = arith.constant 2 : index
    %c0_46 = arith.constant 0 : index
    %c0_47 = arith.constant 0 : index
    %52 = vector.load %arg7[%c2_45, %c0_46, %c0_47] : memref<3x1x128xf32, #tpu.memory_space<vmem>>, vector<1x1x128xf32>
    %53 = vector.shape_cast %52 : vector<1x1x128xf32> to vector<1x128xf32>
    %54 = vector.broadcast %53 : vector<1x128xf32> to vector<64x128xf32>
    %55 = arith.addf %51, %54 : vector<64x128xf32>
    %56 = arith.negf %55 : vector<64x128xf32>
    %57 = math.exp %56 : vector<64x128xf32>
    %cst_48 = arith.constant 1.000000e+00 : f32
    %58 = vector.broadcast %cst_48 : f32 to vector<64x128xf32>
    %59 = arith.addf %58, %57 : vector<64x128xf32>
    %60 = arith.divf %58, %59 : vector<64x128xf32>
    %61 = arith.truncf %60 : vector<64x128xf32> to vector<64x128xbf16>
    %c2_49 = arith.constant 2 : index
    %c0_50 = arith.constant 0 : index
    %c0_51 = arith.constant 0 : index
    %c0_52 = arith.constant 0 : index
    %62 = vector.load %arg8[%c2_49, %c0_50, %c0_51, %c0_52] : memref<3x1x64x128xbf16, #tpu.memory_space<vmem>>, vector<1x1x64x128xbf16>
    %63 = vector.shape_cast %62 : vector<1x1x64x128xbf16> to vector<64x128xbf16>
    %64 = vector.shape_cast %61 : vector<64x128xbf16> to vector<1x1x64x128xbf16>
    tpu.vector_store %arg8[%c2_49, %c0_50, %c0_51, %c0_52], %64 {strides = array<i32>} : memref<3x1x64x128xbf16, #tpu.memory_space<vmem>>, vector<1x1x64x128xbf16>,
    %cst_53 = arith.constant 3.000000e-01 : f32
    %65 = vector.broadcast %cst_53 : f32 to vector<64x128xf32>
    %66 = arith.mulf %65, %16 : vector<64x128xf32>
    %cst_54 = arith.constant 4.000000e-01 : f32
    %67 = vector.broadcast %cst_54 : f32 to vector<64x128xf32>
    %68 = arith.mulf %67, %38 : vector<64x128xf32>
    %69 = arith.addf %66, %68 : vector<64x128xf32>
    %cst_55 = arith.constant 3.000000e-01 : f32
    %70 = vector.broadcast %cst_55 : f32 to vector<64x128xf32>
    %71 = arith.mulf %70, %60 : vector<64x128xf32>
    %72 = arith.addf %69, %71 : vector<64x128xf32>
    %c0_56 = arith.constant 0 : index
    %c0_57 = arith.constant 0 : index
    %c0_58 = arith.constant 0 : index
    %73 = vector.load %arg9[%c0_56, %c0_57, %c0_58] : memref<1x64x128xf32, #tpu.memory_space<vmem>>, vector<1x64x128xf32>
    %74 = vector.shape_cast %73 : vector<1x64x128xf32> to vector<64x128xf32>
    %75 = vector.shape_cast %72 : vector<64x128xf32> to vector<1x64x128xf32>
    tpu.vector_store %arg9[%c0_56, %c0_57, %c0_58], %75 {strides = array<i32>} : memref<1x64x128xf32, #tpu.memory_space<vmem>>, vector<1x64x128xf32>,
    return
  }
  func.func @transform_0(%arg0: i32, %arg1: i32) -> (i32, i32, i32) {
    %c0_i32 = arith.constant 0 : i32
    %c0_i32_0 = arith.constant 0 : i32
    %c0_i32_1 = arith.constant 0 : i32
    return %arg0, %c0_i32, %c0_i32_0 : i32, i32, i32
  }
  func.func @transform_1(%arg0: i32, %arg1: i32) -> (i32, i32, i32) {
    %c0_i32 = arith.constant 0 : i32
    %c0_i32_0 = arith.constant 0 : i32
    %c0_i32_1 = arith.constant 0 : i32
    return %arg0, %c0_i32, %c0_i32_0 : i32, i32, i32
  }
  func.func @transform_2(%arg0: i32, %arg1: i32) -> (i32, i32, i32) {
    %c0_i32 = arith.constant 0 : i32
    %c0_i32_0 = arith.constant 0 : i32
    %c0_i32_1 = arith.constant 0 : i32
    return %arg0, %c0_i32, %c0_i32_0 : i32, i32, i32
  }
  func.func @transform_3(%arg0: i32, %arg1: i32) -> (i32, i32, i32) {
    %c0_i32 = arith.constant 0 : i32
    %c0_i32_0 = arith.constant 0 : i32
    %c0_i32_1 = arith.constant 0 : i32
    return %c0_i32, %c0_i32_0, %arg1 : i32, i32, i32
  }
  func.func @transform_4(%arg0: i32, %arg1: i32) -> (i32, i32, i32) {
    %c0_i32 = arith.constant 0 : i32
    %c0_i32_0 = arith.constant 0 : i32
    %c0_i32_1 = arith.constant 0 : i32
    %c0_i32_2 = arith.constant 0 : i32
    return %c0_i32, %c0_i32_0, %c0_i32_1 : i32, i32, i32
  }
  func.func @transform_5(%arg0: i32, %arg1: i32) -> (i32, i32, i32) {
    %c0_i32 = arith.constant 0 : i32
    %c0_i32_0 = arith.constant 0 : i32
    %c0_i32_1 = arith.constant 0 : i32
    return %c0_i32, %c0_i32_0, %arg1 : i32, i32, i32
  }
  func.func @transform_6(%arg0: i32, %arg1: i32) -> (i32, i32, i32, i32) {
    %c0_i32 = arith.constant 0 : i32
    %c0_i32_0 = arith.constant 0 : i32
    %c0_i32_1 = arith.constant 0 : i32
    return %c0_i32, %arg0, %c0_i32_0, %arg1 : i32, i32, i32, i32
  }
  func.func @transform_7(%arg0: i32, %arg1: i32) -> (i32, i32, i32) {
    %c0_i32 = arith.constant 0 : i32
    %c0_i32_0 = arith.constant 0 : i32
    return %arg0, %c0_i32, %arg1 : i32, i32, i32
  }
}

</mosaic_0001>

<bundles_post_ra>
// kernel: swin_mil_forward.4
= control target key start
LH: loop header
LB: loop body
LE: loop exit
PB: predicated region body
PF: predicated region fallthrough
CT: control target
= control target key end

     0   :  { %s2812_s27 = smov 0   ;;  %s5098_s0 = inlined_call_operand.vmem [shape: bf16[512,48], index: 0, kind: input, shape index: {}]   ;;  %s5099_s1 = inlined_call_operand.vmem [shape: bf16[48,96], index: 1, kind: input, shape index: {}]   ;;  %s5100_s2 = inlined_call_operand.vmem [shape: f32[1,96], index: 2, kind: input, shape index: {}]   ;;  %s5101_s3 = inlined_call_operand.vmem [shape: f32[1,96], index: 3, kind: input, shape index: {}]   ;;  %s5102_s4 = inlined_call_operand.vmem [shape: f32[1,96], index: 4, kind: input, shape index: {}]   ;;  %s5103_s5 = inlined_call_operand.vmem [shape: f32[1,96], index: 5, kind: input, shape index: {}]   ;;  %s5104_s6 = inlined_call_operand.vmem [shape: f32[1,96], index: 6, kind: input, shape index: {}]   ;;  %s5105_s7 = inlined_call_operand.vmem [shape: f32[512,96], index: 7, kind: output, shape index: {0}]   ;;  %s5106_s8 = inlined_call_operand.vmem [shape: bf16[512,96], index: 8, kind: output, shape index: {1}]  }
   0x1 LB: > { %s2477_s28 = sadd.s32 4294967295, %s2764_s27   ;;  %p2481_p0 = scmp.ge.s32.totalorder %s2764_s27, 1  ;;  %s2764_s27 = sphi %s2812_s27, %s19_s27  }
   0x2   : > { %p266_p1 = scmp.lt.s32.totalorder %s2764_s27, 3 }
   0x4   : > { %p267_p2 = pnand %p2481_p0, %p266_p1 }
   0x6   : > { %270 = sbr.rel (%p267_p2) target bundleno = 641 (0x281), region = 48 }
   0xb   : > { %v2600_v0 = vld [vmem:[%s5099_s1 + $0x10] sm:$0xff]  ;;  %s2482_s9 = sshll.u32 %s2477_s28, 5  ;;  %v2599_v1 = vld [vmem:[%s5099_s1 + $0x8] sm:$0xff]  ;;  %v2598_v2 = vld [vmem:[%s5099_s1] sm:$0xff]  ;;  %vm464_vm0 = vcmask 392192   ;;  %vm604_vm1 = vcmask 785408  }
   0xc   : > { %p306_p3 = scmp.lt.s32.totalorder %s2482_s9, 63  ;;  %518 = vmatpush.bf16.msra.mxu0 %v2600_v0  ;;  %2601 = vmatpush.bf16.msra.mxu1 %v2600_v0  ;;  %v2874_v19 = vld [vmem:[%s5100_s2] ss:$0 sm:$0xff] }
   0xd   : > { %2602 = vmatpush.bf16.msra.mxu2 %v2600_v0  ;;  %2603 = vmatpush.bf16.msra.mxu3 %v2600_v0 }
   0xe   : > { %s5208_s9 = smov (!%p306_p3, %s2482_s9), 63 }
   0xf   : > { %s2483_s12 = sshll.u32 %s5208_s9, 2  ;;  %s2485_s22 = sshll.u32 %s5208_s9, 3 }
  0x10   : > { %519 = vmatpush.bf16.msra.mxu0 %v2599_v1  ;;  %2604 = vmatpush.bf16.msra.mxu1 %v2599_v1  ;;  %s2837_s17 = scalar_lea.vmem %s5098_s0, %s2483_s12  ;;  %s3171_s28 = scalar_lea.vmem %s5105_s7, %s2485_s22 }
  0x11   : > { %2605 = vmatpush.bf16.msra.mxu2 %v2599_v1  ;;  %2606 = vmatpush.bf16.msra.mxu3 %v2599_v1  ;;  %v2582_v3 = vld [vmem:[%s2837_s17] sm:$0xff]  ;;  %v2583_v7 = vld [vmem:[%s2837_s17 + $0x8] sm:$0xff]  ;;  %v2584_v11 = vld [vmem:[%s2837_s17 + $0x10] sm:$0xff]  ;;  %s4527_s19 = scalar_lea.vmem %s5106_s8, %s2483_s12 }
  0x12   : > { %v2586_v4 = vld [vmem:[%s2837_s17 + $0x20] sm:$0xff]  ;;  %v2587_v8 = vld [vmem:[%s2837_s17 + $0x28] sm:$0xff]  ;;  %v2588_v12 = vld [vmem:[%s2837_s17 + $0x30] sm:$0xff] }
  0x13   : > { %v2590_v5 = vld [vmem:[%s2837_s17 + $0x40] sm:$0xff]  ;;  %v2595_v9 = vld [vmem:[%s2837_s17 + $0x68] sm:$0xff]  ;;  %v2596_v13 = vld [vmem:[%s2837_s17 + $0x70] sm:$0xff] }
  0x14   : > { %520 = vmatpush.bf16.msra.mxu0 %v2598_v2  ;;  %2607 = vmatpush.bf16.msra.mxu1 %v2598_v2  ;;  %v2594_v6 = vld [vmem:[%s2837_s17 + $0x60] sm:$0xff]  ;;  %v2591_v10 = vld [vmem:[%s2837_s17 + $0x48] sm:$0xff]  ;;  %v2592_v14 = vld [vmem:[%s2837_s17 + $0x50] sm:$0xff] }
  0x15   : > { %2608 = vmatpush.bf16.msra.mxu2 %v2598_v2  ;;  %2609 = vmatpush.bf16.msra.mxu3 %v2598_v2  ;;  %v2589_v15 = vld [vmem:[%s2837_s17 + $0x38] sm:$0xff] }
  0x16   : > { %v2585_v16 = vld [vmem:[%s2837_s17 + $0x18] sm:$0xff] }
  0x17   : > { %2564 = vmatmul.msk.bf16.vlgmr.msra.gmra.mxu0 %vm464_vm0, %v2582_v3  ;;  %2568 = vmatmul.msk.bf16.vlgmr.msra.gmra.mxu1 %vm464_vm0, %v2586_v4  ;;  %v2593_v17 = vld [vmem:[%s2837_s17 + $0x58] sm:$0xff] }
  0x18   : > { %2572 = vmatmul.msk.bf16.vlgmr.msra.gmra.mxu2 %vm464_vm0, %v2590_v5  ;;  %2576 = vmatmul.msk.bf16.vlgmr.msra.gmra.mxu3 %vm464_vm0, %v2594_v6  ;;  %v2597_v18 = vld [vmem:[%s2837_s17 + $0x78] sm:$0xff] }
  0x27   : > { %2565 = vmatmul.msk.bf16.gmra.mxu0 %vm464_vm0, %v2583_v7  ;;  %2569 = vmatmul.msk.bf16.gmra.mxu1 %vm464_vm0, %v2587_v8 }
  0x28   : > { %2577 = vmatmul.msk.bf16.gmra.mxu3 %vm464_vm0, %v2595_v9  ;;  %2573 = vmatmul.msk.bf16.gmra.mxu2 %vm464_vm0, %v2591_v10 }
  0x37   : > { %2566 = vmatmul.msk.bf16.gmra.mxu0 %vm464_vm0, %v2584_v11  ;;  %2570 = vmatmul.msk.bf16.gmra.mxu1 %vm464_vm0, %v2588_v12 }
  0x38   : > { %2578 = vmatmul.msk.bf16.gmra.mxu3 %vm464_vm0, %v2596_v13  ;;  %2574 = vmatmul.msk.bf16.gmra.mxu2 %vm464_vm0, %v2592_v14 }
  0x47   : > { %2571 = vmatmul.msk.bf16.gmra.mxu1 %vm464_vm0, %v2589_v15  ;;  %2567 = vmatmul.msk.bf16.gmra.mxu0 %vm464_vm0, %v2585_v16 }
  0x48   : > { %2575 = vmatmul.msk.bf16.gmra.mxu2 %vm464_vm0, %v2593_v17  ;;  %2579 = vmatmul.msk.bf16.gmra.mxu3 %vm464_vm0, %v2597_v18 }
  0x94   : > { %v522_v20 = vpop.f32.mrf.mxu0  ;;  %v542_v21 = vpop.f32.mrf.mxu1 }
  0x95   : > { %v2877_v22 = vadd.f32 %v2874_v19, %v522_v20  ;;  %v2880_v23 = vadd.f32 %v2874_v19, %v542_v21 }
  0x97   : > { %v629_v24 = vsel %vm604_vm1, %v2880_v23, 0.0  ;;  %v605_v25 = vsel %vm604_vm1, %v2877_v22, 0.0  ;;  %v748_v26 = vmul.f32 %v2880_v23, %v2880_v23  ;;  %v740_v30 = vmul.f32 %v2877_v22, %v2877_v22 }
  0x98   : > { %630 = vadd.xlane.f32.xlu2 %v629_v24  ;;  %606 = vadd.xlane.f32.xlu0 %v605_v25 }
  0x99   : > { %v796_v27 = vsel %vm604_vm1, %v748_v26, 0.0  ;;  %v772_v34 = vsel %vm604_vm1, %v740_v30, 0.0 }
  0x9a   : > { %797 = vadd.xlane.f32.xlu1 %v796_v27 }
  0x9b   : > { %v562_v28 = vpop.f32.mrf.mxu2  ;;  %v582_v29 = vpop.f32.mrf.mxu3 }
  0x9c   : > { %v2892_v31 = vadd.f32 %v2874_v19, %v562_v28  ;;  %v2895_v32 = vadd.f32 %v2874_v19, %v582_v29  ;;  %v524_v36 = vpop.f32.mrf.mxu0  ;;  %v544_v40 = vpop.f32.mrf.mxu1 }
  0x9d   : > { %v2903_v37 = vadd.f32 %v2874_v19, %v524_v36  ;;  %v2911_v42 = vadd.f32 %v2874_v19, %v544_v40 }
  0x9e   : > { %v677_v33 = vsel %vm604_vm1, %v2895_v32, 0.0  ;;  %v653_v35 = vsel %vm604_vm1, %v2892_v31, 0.0  ;;  %v764_v39 = vmul.f32 %v2895_v32, %v2895_v32  ;;  %v756_v56 = vmul.f32 %v2892_v31, %v2892_v31 }
  0x9f   : > { %v608_v44 = vsel %vm604_vm1, %v2903_v37, 0.0  ;;  %v749_v48 = vmul.f32 %v2911_v42, %v2911_v42  ;;  %v632_v50 = vsel %vm604_vm1, %v2911_v42, 0.0  ;;  %v741_v62 = vmul.f32 %v2903_v37, %v2903_v37 }
  0xa0   : > { %773 = vadd.xlane.f32.xlu2 %v772_v34  ;;  %678 = vadd.xlane.f32.xlu0 %v677_v33  ;;  %v844_v43 = vsel %vm604_vm1, %v764_v39, 0.0  ;;  %v820_v59 = vsel %vm604_vm1, %v756_v56, 0.0 }
  0xa1   : > { %v799_v49 = vsel %vm604_vm1, %v749_v48, 0.0  ;;  %v775_v1 = vsel %vm604_vm1, %v741_v62, 0.0 }
  0xa2   : > { %654 = vadd.xlane.f32.xlu1 %v653_v35 }
  0xa3   : > { %v584_v38 = vpop.f32.mrf.mxu3  ;;  %v564_v52 = vpop.f32.mrf.mxu2 }
  0xa4   : > { %v2908_v41 = vadd.f32 %v2874_v19, %v584_v38  ;;  %v527_v46 = vpop.f32.mrf.mxu0  ;;  %v547_v53 = vpop.f32.mrf.mxu1  ;;  %v2929_v54 = vadd.f32 %v2874_v19, %v564_v52 }
  0xa5   : > { %v2919_v47 = vadd.f32 %v2874_v19, %v527_v46  ;;  %v2932_v55 = vadd.f32 %v2874_v19, %v547_v53 }
  0xa6   : > { %v680_v45 = vsel %vm604_vm1, %v2908_v41, 0.0  ;;  %v656_v58 = vsel %vm604_vm1, %v2929_v54, 0.0  ;;  %v757_v0 = vmul.f32 %v2929_v54, %v2929_v54  ;;  %v765_v6 = vmul.f32 %v2908_v41, %v2908_v41 }
  0xa7   : > { %v611_v51 = vsel %vm604_vm1, %v2919_v47, 0.0  ;;  %v635_v60 = vsel %vm604_vm1, %v2932_v55, 0.0  ;;  %v742_v8 = vmul.f32 %v2919_v47, %v2919_v47  ;;  %v750_v14 = vmul.f32 %v2932_v55, %v2932_v55 }
  0xa8   : > { %845 = vadd.xlane.f32.xlu2 %v844_v43  ;;  %609 = vadd.xlane.f32.xlu0 %v608_v44  ;;  %v823_v3 = vsel %vm604_vm1, %v757_v0, 0.0  ;;  %v847_v10 = vsel %vm604_vm1, %v765_v6, 0.0 }
  0xa9   : > { %v778_v11 = vsel %vm604_vm1, %v742_v8, 0.0  ;;  %v802_v17 = vsel %vm604_vm1, %v750_v14, 0.0 }
  0xaa   : > { %681 = vadd.xlane.f32.xlu1 %v680_v45 }
  0xab   : > { %v587_v57 = vpop.f32.mrf.mxu3  ;;  %v567_v4 = vpop.f32.mrf.mxu2 }
  0xac   : > { %v2942_v61 = vadd.f32 %v2874_v19, %v587_v57  ;;  %v549_v2 = vpop.f32.mrf.mxu1  ;;  %v2958_v7 = vadd.f32 %v2874_v19, %v567_v4  ;;  %v529_v13 = vpop.f32.mrf.mxu0 }
  0xad   : > { %v2953_v5 = vadd.f32 %v2874_v19, %v549_v2  ;;  %v2971_v15 = vadd.f32 %v2874_v19, %v529_v13 }
  0xae   : > { %v683_v63 = vsel %vm604_vm1, %v2942_v61, 0.0  ;;  %v758_v12 = vmul.f32 %v2958_v7, %v2958_v7  ;;  %v659_v21 = vsel %vm604_vm1, %v2958_v7, 0.0  ;;  %v766_v24 = vmul.f32 %v2942_v61, %v2942_v61 }
  0xaf   : > { %v638_v9 = vsel %vm604_vm1, %v2953_v5, 0.0  ;;  %v614_v18 = vsel %vm604_vm1, %v2971_v15, 0.0  ;;  %v743_v20 = vmul.f32 %v2971_v15, %v2971_v15  ;;  %v751_v34 = vmul.f32 %v2953_v5, %v2953_v5 }
  0xb0   : > { %800 = vadd.xlane.f32.xlu2 %v799_v49  ;;  %633 = vadd.xlane.f32.xlu0 %v632_v50  ;;  %v826_v16 = vsel %vm604_vm1, %v758_v12, 0.0  ;;  %v850_v28 = vsel %vm604_vm1, %v766_v24, 0.0 }
  0xb1   : > { %v781_v26 = vsel %vm604_vm1, %v743_v20, 0.0  ;;  %v805_v39 = vsel %vm604_vm1, %v751_v34, 0.0 }
  0xb2   : > { %612 = vadd.xlane.f32.xlu1 %v611_v51 }
  0xb3   : > { %v589_v27 = vpop.f32.mrf.mxu3  ;;  %v569_v40 = vpop.f32.mrf.mxu2 }
  0xb4   : > { %v532_v25 = vpop.f32.mrf.mxu0  ;;  %v2989_v30 = vadd.f32 %v2874_v19, %v589_v27  ;;  %v552_v36 = vpop.f32.mrf.mxu1  ;;  %v3004_v44 = vadd.f32 %v2874_v19, %v569_v40 }
  0xb5   : > { %v2986_v29 = vadd.f32 %v2874_v19, %v532_v25  ;;  %v2998_v38 = vadd.f32 %v2874_v19, %v552_v36 }
  0xb6   : > { %v686_v35 = vsel %vm604_vm1, %v2989_v30, 0.0  ;;  %v767_v43 = vmul.f32 %v2989_v30, %v2989_v30  ;;  %v662_v48 = vsel %vm604_vm1, %v3004_v44, 0.0  ;;  %v759_v52 = vmul.f32 %v3004_v44, %v3004_v44 }
  0xb7   : > { %v617_v33 = vsel %vm604_vm1, %v2986_v29, 0.0  ;;  %v641_v45 = vsel %vm604_vm1, %v2998_v38, 0.0  ;;  %v752_v51 = vmul.f32 %v2998_v38, %v2998_v38 }
  0xb8   : > { %657 = vadd.xlane.f32.xlu2 %v656_v58  ;;  %821 = vadd.xlane.f32.xlu0 %v820_v59  ;;  %v853_v46 = vsel %vm604_vm1, %v767_v43, 0.0  ;;  %v829_v57 = vsel %vm604_vm1, %v759_v52, 0.0  ;;  %v2766_v59 = vmov 96.0  }
  0xb9   : > { %v808_v56 = vsel %vm604_vm1, %v752_v51, 0.0  ;;  %2624 = vrcp.f32 %v2766_v59 }
  0xba   : > { %636 = vadd.xlane.f32.xlu1 %v635_v60 }
  0xbb   : > { %v592_v49 = vpop.f32.mrf.mxu3  ;;  %v572_v53 = vpop.f32.mrf.mxu2 }
  0xbc   : > { %v3012_v50 = vadd.f32 %v2874_v19, %v592_v49  ;;  %v3023_v60 = vadd.f32 %v2874_v19, %v572_v53  ;;  %v554_v62 = vpop.f32.mrf.mxu1  ;;  %v534_v4 = vpop.f32.mrf.mxu0 }
  0xbd   : > { %v3028_v0 = vadd.f32 %v2874_v19, %v554_v62 }
  0xbe   : > { %v689_v58 = vsel %vm604_vm1, %v3012_v50, 0.0 }
  0xbf   : > { %v2625_v2 = vpop.eup %2624  ;;  %v644_v6 = vsel %vm604_vm1, %v3028_v0, 0.0 }
  0xc0   : > { %684 = vadd.xlane.f32.xlu2 %v683_v63  ;;  %776 = vadd.xlane.f32.xlu0 %v775_v1  ;;  %v744_v63 = vmul.f32 %v2986_v29, %v2986_v29  ;;  %v665_v1 = vsel %vm604_vm1, %v3023_v60, 0.0  ;;  %v702_v8 = vmul.f32 96.0, %v2625_v2  ;;  %vm706_vm2 = vweird.f32 %v2625_v2 }
  0xc2   : > { %824 = vadd.xlane.f32.xlu1 %v823_v3  ;;  %v784_v3 = vsel %vm604_vm1, %v744_v63, 0.0  ;;  %v703_v12 = vsub.f32 1.0, %v702_v8 }
  0xc8   : > { %639 = vadd.xlane.f32.xlu2 %v638_v9  ;;  %848 = vadd.xlane.f32.xlu0 %v847_v10  ;;  %v3036_v9 = vadd.f32 %v2874_v19, %v534_v4  ;;  %v768_v10 = vmul.f32 %v3012_v50, %v3012_v50 }
  0xca   : > { %779 = vadd.xlane.f32.xlu1 %v778_v11  ;;  %v760_v11 = vmul.f32 %v3023_v60, %v3023_v60  ;;  %v620_v13 = vsel %vm604_vm1, %v3036_v9, 0.0  ;;  %v856_v14 = vsel %vm604_vm1, %v768_v10, 0.0  ;;  %v745_v24 = vmul.f32 %v3036_v9, %v3036_v9 }
  0xcc   : > { %v787_v34 = vsel %vm604_vm1, %v745_v24, 0.0 }
  0xd0   : > { %827 = vadd.xlane.f32.xlu2 %v826_v16  ;;  %803 = vadd.xlane.f32.xlu0 %v802_v17  ;;  %v832_v16 = vsel %vm604_vm1, %v760_v11, 0.0  ;;  %v594_v17 = vpop.f32.mrf.mxu3 }
  0xd1   : > { %v3047_v20 = vadd.f32 %v2874_v19, %v594_v17 }
  0xd2   : > { %615 = vadd.xlane.f32.xlu1 %v614_v18  ;;  %v704_v18 = vmul.f32 %v2625_v2, %v703_v12 }
  0xd3   : > { %v692_v27 = vsel %vm604_vm1, %v3047_v20, 0.0  ;;  %v769_v49 = vmul.f32 %v3047_v20, %v3047_v20 }
  0xd4   : > { %v705_v25 = vadd.f32 %v2625_v2, %v704_v18 }
  0xd5   : > { %v859_v59 = vsel %vm604_vm1, %v769_v49, 0.0 }
  0xd8   : > { %782 = vadd.xlane.f32.xlu2 %v781_v26  ;;  %660 = vadd.xlane.f32.xlu0 %v659_v21  ;;  %v753_v21 = vmul.f32 %v3028_v0, %v3028_v0  ;;  %v557_v26 = vpop.f32.mrf.mxu1  ;;  %v597_v17 = vpop.f32.mrf.mxu3 }
  0xd9   : > { %v3060_v36 = vadd.f32 %v2874_v19, %v557_v26  ;;  %v3100_v18 = vadd.f32 %v2874_v19, %v597_v17 }
  0xda   : > { %851 = vadd.xlane.f32.xlu1 %v850_v28  ;;  %v811_v28 = vsel %vm604_vm1, %v753_v21, 0.0 }
  0xdb   : > { %v754_v4 = vmul.f32 %v3060_v36, %v3060_v36 }
  0xe0   : > { %618 = vadd.xlane.f32.xlu2 %v617_v33  ;;  %687 = vadd.xlane.f32.xlu0 %v686_v35  ;;  %v574_v33 = vpop.f32.mrf.mxu2  ;;  %v3057_v35 = vsel %vm706_vm2, %v2625_v2, %v705_v25 }
  0xe2   : > { %806 = vadd.xlane.f32.xlu1 %v805_v39  ;;  %v3063_v39 = vadd.f32 %v2874_v19, %v574_v33 }
  0xe4   : > { %v668_v53 = vsel %vm604_vm1, %v3063_v39, 0.0 }
  0xe8   : > { %854 = vadd.xlane.f32.xlu2 %v853_v46  ;;  %642 = vadd.xlane.f32.xlu0 %v641_v45  ;;  %v577_v24 = vpop.f32.mrf.mxu2 }
  0xe9   : > { %v3107_v26 = vadd.f32 %v2874_v19, %v577_v24 }
  0xea   : > { %663 = vadd.xlane.f32.xlu1 %v662_v48  ;;  %v647_v48 = vsel %vm604_vm1, %v3060_v36, 0.0 }
  0xf0   : > { %809 = vadd.xlane.f32.xlu2 %v808_v56  ;;  %830 = vadd.xlane.f32.xlu0 %v829_v57  ;;  %v537_v56 = vpop.f32.mrf.mxu0 }
  0xf2   : > { %690 = vadd.xlane.f32.xlu1 %v689_v58  ;;  %v3078_v58 = vadd.f32 %v2874_v19, %v537_v56  ;;  %v671_v56 = vsel %vm604_vm1, %v3107_v26, 0.0 }
  0xf4   : > { %v623_v11 = vsel %vm604_vm1, %v3078_v58, 0.0  ;;  %v746_v33 = vmul.f32 %v3078_v58, %v3078_v58 }
  0xf8   : > { %666 = vadd.xlane.f32.xlu2 %v665_v1  ;;  %785 = vadd.xlane.f32.xlu0 %v784_v3  ;;  %v761_v3 = vmul.f32 %v3063_v39, %v3063_v39 }
  0xfa   : > { %645 = vadd.xlane.f32.xlu1 %v644_v6 }
 0x100   : > { %621 = vadd.xlane.f32.xlu2 %v620_v13  ;;  %857 = vadd.xlane.f32.xlu0 %v856_v14  ;;  %v835_v13 = vsel %vm604_vm1, %v761_v3, 0.0  ;;  %v814_v14 = vsel %vm604_vm1, %v754_v4, 0.0  ;;  %v539_v3 = vpop.f32.mrf.mxu0 }
 0x101   : > { %v3133_v17 = vadd.f32 %v2874_v19, %v539_v3 }
 0x102   : > { %833 = vadd.xlane.f32.xlu1 %v832_v16 }
 0x108   : > { %693 = vadd.xlane.f32.xlu2 %v692_v27  ;;  %812 = vadd.xlane.f32.xlu0 %v811_v28 }
 0x10a   : > { %788 = vadd.xlane.f32.xlu1 %v787_v34 }
 0x10b   : > { %v631_v40 = vpop.xlane.xlu2 %630  ;;  %v607_v43 = vpop.xlane.xlu0 %606 }
 0x10c   : > { %v3066_v45 = vmul.f32 %v3057_v35, %v631_v40  ;;  %v3082_v62 = vmul.f32 %v3057_v35, %v607_v43 }
 0x10d   : > { %v798_v46 = vpop.xlane.xlu1 %797 }
 0x10e   : > { %v908_v51 = vmul.f32 %v3066_v45, %v3066_v45  ;;  %v876_v52 = vmul.f32 %v798_v46, %v3057_v35  ;;  %v900_v6 = vmul.f32 %v3082_v62, %v3082_v62 }
 0x110   : > { %648 = vadd.xlane.f32.xlu2 %v647_v48  ;;  %669 = vadd.xlane.f32.xlu0 %v668_v53  ;;  %v940_v57 = vsub.f32 %v876_v52, %v908_v51  ;;  %v695_v48 = vsel %vm604_vm1, %v3100_v18, 0.0  ;;  %v559_v52 = vpop.f32.mrf.mxu1  ;;  %v790_v53 = vsel %vm604_vm1, %v746_v33, 0.0 }
 0x112   : > { %860 = vadd.xlane.f32.xlu1 %v859_v59  ;;  %v1004_v63 = vadd.f32 1e-05, %v940_v57 }
 0x113   : > { %v774_v1 = vpop.xlane.xlu2 %773  ;;  %v679_v2 = vpop.xlane.xlu0 %678 }
 0x114   : > { %v868_v8 = vmul.f32 %v774_v1, %v3057_v35  ;;  %2626 = vrsqrt.f32 %v1004_v63  ;;  %v3104_v21 = vmul.f32 %v3057_v35, %v679_v2  ;;  %vm1114_vm4 = vweird.f32 %v1004_v63 }
 0x115   : > { %v3091_v10 = vpop.xlane.xlu1 %654 }
 0x116   : > { %v932_v12 = vsub.f32 %v868_v8, %v900_v6  ;;  %v924_v40 = vmul.f32 %v3104_v21, %v3104_v21  ;;  %v3127_v6 = vadd.f32 %v2874_v19, %v559_v52  ;;  %v3157_v52 = vld [vmem:[%s5102_s4] ss:$0 sm:$0xff] }
 0x118   : > { %v3097_v16 = vadd.f32 1e-05, %v932_v12  ;;  %836 = vadd.xlane.f32.xlu2 %v835_v13  ;;  %624 = vadd.xlane.f32.xlu0 %v623_v11  ;;  %v770_v13 = vmul.f32 %v3100_v18, %v3100_v18 }
 0x11a   : > { %2628 = vrsqrt.f32 %v3097_v16  ;;  %815 = vadd.xlane.f32.xlu1 %v814_v14  ;;  %v2627_v25 = vpop.eup %2626  ;;  %vm1034_vm7 = vweird.f32 %v3097_v16 }
 0x11b   : > { %v846_v27 = vpop.xlane.xlu2 %845  ;;  %v3109_v28 = vpop.xlane.xlu0 %609  ;;  %v1109_v34 = vmul.f32 %v2627_v25, %v1004_v63  ;;  %vm1115_vm3 = vweird.f32 %v2627_v25 }
 0x11c   : > { %v892_v43 = vmul.f32 %v846_v27, %v3057_v35  ;;  %v972_v27 = vsub.f32 %v2880_v23, %v3066_v45  ;;  %vm1116_vm5 = vmor %vm1114_vm4, %vm1115_vm3 }
 0x11d   : > { %v3116_v46 = vpop.xlane.xlu1 %681  ;;  %v1110_v49 = vmul.f32 %v2627_v25, %v1109_v34  ;;  %v3143_v34 = vld [vmem:[%s5101_s3] ss:$0 sm:$0xff] }
 0x11e   : > { %v956_v51 = vsub.f32 %v892_v43, %v924_v40 }
 0x11f   : > { %v1111_v59 = vmul.f32 0.5, %v1110_v49  ;;  %v650_v49 = vsel %vm604_vm1, %v3127_v6, 0.0 }
 0x120   : > { %v2629_v57 = vpop.eup %2628  ;;  %v3123_v1 = vadd.f32 1e-05, %v956_v51  ;;  %791 = vadd.xlane.f32.xlu2 %v790_v53  ;;  %696 = vadd.xlane.f32.xlu0 %v695_v48  ;;  %v862_v51 = vsel %vm604_vm1, %v770_v13, 0.0  ;;  %v3161_v53 = vmul.f32 %v3057_v35, %v3091_v10  ;;  %v964_v10 = vsub.f32 %v2877_v22, %v3082_v62 }
 0x121   : > { %v1029_v2 = vmul.f32 %v2629_v57, %v3097_v16  ;;  %v1112_v4 = vsub.f32 1.5, %v1111_v59  ;;  %vm1035_vm6 = vweird.f32 %v2629_v57  ;;  %v626_v59 = vsel %vm604_vm1, %v3133_v17, 0.0 }
 0x122   : > { %2630 = vrsqrt.f32 %v3123_v1  ;;  %672 = vadd.xlane.f32.xlu1 %v671_v56  ;;  %vm1036_vm8 = vmor %vm1034_vm7, %vm1035_vm6  ;;  %v755_v16 = vmul.f32 %v3127_v6, %v3127_v6  ;;  %v916_v62 = vmul.f32 %v3161_v53, %v3161_v53  ;;  %vm1274_vm10 = vweird.f32 %v3123_v1 }
 0x123   : > { %v1030_v8 = vmul.f32 %v2629_v57, %v1029_v2  ;;  %v801_v11 = vpop.xlane.xlu2 %800  ;;  %v634_v12 = vpop.xlane.xlu0 %633  ;;  %v1113_v14 = vmul.f32 %v2627_v25, %v1112_v4 }
 0x124   : > { %v3136_v24 = vmul.f32 %v3057_v35, %v634_v12  ;;  %v877_v63 = vmul.f32 %v801_v11, %v3057_v35 }
 0x125   : > { %v1031_v33 = vmul.f32 0.5, %v1030_v8  ;;  %v3145_v40 = vpop.xlane.xlu1 %612  ;;  %v1117_v43 = vsel %vm1116_vm5, %v2627_v25, %v1113_v14  ;;  %v599_v8 = vpop.f32.mrf.mxu3 }
 0x126   : > { %v909_v48 = vmul.f32 %v3136_v24, %v3136_v24  ;;  %v1356_v23 = vmul.f32 %v1117_v43, %v972_v27 }
 0x127   : > { %v1032_v45 = vsub.f32 1.5, %v1031_v33  ;;  %v762_v33 = vmul.f32 %v3107_v26, %v3107_v26 }
 0x128   : > { %v2631_v25 = vpop.eup %2630  ;;  %v941_v56 = vsub.f32 %v877_v63, %v909_v48  ;;  %863 = vadd.xlane.f32.xlu2 %v862_v51  ;;  %651 = vadd.xlane.f32.xlu0 %v650_v49  ;;  %v1391_v4 = vmul.f32 %v3143_v34, %v1356_v23  ;;  %v579_v48 = vpop.f32.mrf.mxu2  ;;  %v3189_v49 = vadd.f32 %v2874_v19, %v599_v8 }
 0x129   : > { %v1033_v2 = vmul.f32 %v2629_v57, %v1032_v45  ;;  %v1269_v3 = vmul.f32 %v2631_v25, %v3123_v1  ;;  %v817_v45 = vsel %vm604_vm1, %v755_v16, 0.0  ;;  %vm1275_vm9 = vweird.f32 %v2631_v25 }
 0x12a   : > { %v3176_v11 = vadd.f32 1e-05, %v941_v56  ;;  %627 = vadd.xlane.f32.xlu1 %v626_v59  ;;  %v3183_v43 = vadd.f32 %v3157_v52, %v1391_v4  ;;  %5126 = vst [vmem:[#allocation3_spill] sm:$0xff] %v3189_v49  ;;  %v3205_v4 = vadd.f32 %v2874_v19, %v579_v48  ;;  %vm1276_vm11 = vmor %vm1274_vm10, %vm1275_vm9 }
 0x12b   : > { %v1037_v12 = vsel %vm1036_vm8, %v2629_v57, %v1033_v2  ;;  %v1270_v13 = vmul.f32 %v2631_v25, %v1269_v3  ;;  %v658_v14 = vpop.xlane.xlu2 %657  ;;  %v822_v27 = vpop.xlane.xlu0 %821  ;;  %v838_v2 = vsel %vm604_vm1, %v762_v33, 0.0  ;;  %v3202_v3 = vmul.f32 %v3057_v35, %v3109_v28 }
 0x12c   : > { %5125 = vst [vmem:[#allocation2_spill] sm:$0xff] %v3183_v43  ;;  %v1348_v22 = vmul.f32 %v1037_v12, %v964_v10  ;;  %2632 = vrsqrt.f32 %v3176_v11  ;;  %v884_v57 = vmul.f32 %v822_v27, %v3057_v35  ;;  %v698_v12 = vsel %vm604_vm1, %v3189_v49, 0.0 }
 0x12d   : > { %v1271_v63 = vmul.f32 0.5, %v1270_v13  ;;  %v3192_v23 = vpop.xlane.xlu1 %636  ;;  %1458 = vst.msk [vmem:[%s3171_s28 + $0x40] sm:$0xff] %vm604_vm1, %v3183_v43  ;;  %v988_v28 = vsub.f32 %v2895_v32, %v3104_v21  ;;  %v3218_v19 = vmul.f32 %v3057_v35, %v658_v14  ;;  %v901_v21 = vmul.f32 %v3202_v3, %v3202_v3 }
 0x12e   : > { %v1383_v51 = vmul.f32 %v3143_v34, %v1348_v22  ;;  %v948_v59 = vsub.f32 %v884_v57, %v916_v62  ;;  %5127 = vst [vmem:[#allocation4_spill] sm:$0xff] %v3205_v4  ;;  %v747_v62 = vmul.f32 %v3133_v17, %v3133_v17  ;;  %vm1124_vm13 = vweird.f32 %v3176_v11 }
 0x12f   : > { %v1272_v56 = vsub.f32 1.5, %v1271_v63  ;;  %v763_v63 = vmul.f32 %v3205_v4, %v3205_v4  ;;  %v917_v57 = vmul.f32 %v3218_v19, %v3218_v19 }
 0x130   : > { %818 = vadd.xlane.f32.xlu2 %v817_v45  ;;  %839 = vadd.xlane.f32.xlu0 %v838_v2  ;;  %v3208_v10 = vadd.f32 %v3157_v52, %v1383_v51  ;;  %v3211_v16 = vadd.f32 1e-05, %v948_v59  ;;  %v674_v59 = vsel %vm604_vm1, %v3205_v4, 0.0  ;;  %v793_v2 = vsel %vm604_vm1, %v747_v62, 0.0 }
 0x131   : > { %v1273_v8 = vmul.f32 %v2631_v25, %v1272_v56  ;;  %v3253_v62 = vmul.f32 %v3057_v35, %v3145_v40  ;;  %v1620_v40 = vmul.f32 %v3183_v43, %v3183_v43 }
 0x132   : > { %5128 = vst [vmem:[#allocation5_spill] sm:$0xff] %v3208_v10  ;;  %v2633_v13 = vpop.eup %2632  ;;  %699 = vadd.xlane.f32.xlu1 %v698_v12  ;;  %2634 = vrsqrt.f32 %v3211_v16  ;;  %vm1194_vm0 = vweird.f32 %v3211_v16 }
 0x133   : > { %1450 = vst.msk [vmem:[%s3171_s28] sm:$0xff] %vm604_vm1, %v3208_v10  ;;  %v1277_v27 = vsel %vm1276_vm11, %v2631_v25, %v1273_v8  ;;  %v1119_v1 = vmul.f32 %v2633_v13, %v3176_v11  ;;  %v3225_v33 = vpop.xlane.xlu2 %684  ;;  %v777_v22 = vpop.xlane.xlu0 %776  ;;  %vm1125_vm12 = vweird.f32 %v2633_v13 }
 0x134   : > { %v1372_v32 = vmul.f32 %v1277_v27, %v988_v28  ;;  %v869_v14 = vmul.f32 %v777_v22, %v3057_v35  ;;  %v841_v27 = vsel %vm604_vm1, %v763_v63, 0.0  ;;  %v3246_v22 = vmul.f32 %v3057_v35, %v3116_v46  ;;  %vm1126_vm14 = vmor %vm1124_vm13, %vm1125_vm12 }
 0x135   : > { %v1120_v25 = vmul.f32 %v2633_v13, %v1119_v1  ;;  %v825_v48 = vpop.xlane.xlu1 %824  ;;  %v771_v63 = vmul.f32 %v3189_v49, %v3189_v49 }
 0x136   : > { %v933_v45 = vsub.f32 %v869_v14, %v901_v21  ;;  %v885_v51 = vmul.f32 %v825_v48, %v3057_v35  ;;  %v1407_v8 = vmul.f32 %v3143_v34, %v1372_v32  ;;  %v925_v11 = vmul.f32 %v3246_v22, %v3246_v22 }
 0x137   : > { %v1121_v56 = vmul.f32 0.5, %v1120_v25 }
 0x138   : > { %v3241_v12 = vadd.f32 1e-05, %v933_v45  ;;  %v949_v28 = vsub.f32 %v885_v51, %v917_v57  ;;  %675 = vadd.xlane.f32.xlu2 %v674_v59  ;;  %794 = vadd.xlane.f32.xlu0 %v793_v2  ;;  %v2635_v1 = vpop.eup %2634  ;;  %v3249_v14 = vadd.f32 %v3157_v52, %v1407_v8  ;;  %v973_v45 = vsub.f32 %v2911_v42, %v3136_v24 }
 0x139   : > { %v1122_v21 = vsub.f32 1.5, %v1121_v56  ;;  %v1189_v32 = vmul.f32 %v2635_v1, %v3211_v16  ;;  %vm1195_vm15 = vweird.f32 %v2635_v1 }
 0x13a   : > { %5129 = vst [vmem:[#allocation6_spill] sm:$0xff] %v3249_v14  ;;  %2636 = vrsqrt.f32 %v3241_v12  ;;  %842 = vadd.xlane.f32.xlu1 %v841_v27  ;;  %v3260_v46 = vadd.f32 1e-05, %v949_v28  ;;  %v865_v27 = vsel %vm604_vm1, %v771_v63, 0.0  ;;  %vm1196_vm2 = vmor %vm1194_vm0, %vm1195_vm15  ;;  %vm1044_vm4 = vweird.f32 %v3241_v12 }
 0x13b   : > { %v1123_v25 = vmul.f32 %v2633_v13, %v1122_v21  ;;  %v3262_v48 = vpop.xlane.xlu2 %639  ;;  %v849_v57 = vpop.xlane.xlu0 %848  ;;  %1474 = vst.msk [vmem:[%s3171_s28 + $0xc0] sm:$0xff] %vm604_vm1, %v3249_v14  ;;  %v1190_v51 = vmul.f32 %v2635_v1, %v1189_v32  ;;  %v902_v21 = vmul.f32 %v3253_v62, %v3253_v62  ;;  %v1668_v32 = vsel %vm604_vm1, %v1620_v40, 0.0 }
 0x13c   : > { %v893_v56 = vmul.f32 %v849_v57, %v3057_v35  ;;  %2638 = vrsqrt.f32 %v3260_v46  ;;  %v1484_v40 = vsel %vm604_vm1, %v3208_v10, 0.0  ;;  %vm1204_vm7 = vweird.f32 %v3260_v46 }
 0x13d   : > { %v1127_v59 = vsel %vm1126_vm14, %v2633_v13, %v1123_v25  ;;  %v780_v2 = vpop.xlane.xlu1 %779  ;;  %v1191_v28 = vmul.f32 0.5, %v1190_v51  ;;  %v980_v13 = vsub.f32 %v2892_v31, %v3161_v53  ;;  %v3295_v31 = vmul.f32 %v3057_v35, %v3192_v23 }
 0x13e   : > { %v1357_v8 = vmul.f32 %v1127_v59, %v973_v45  ;;  %v957_v42 = vsub.f32 %v893_v56, %v925_v11  ;;  %v870_v24 = vmul.f32 %v780_v2, %v3057_v35  ;;  %v965_v59 = vsub.f32 %v2903_v37, %v3202_v3 }
 0x13f   : > { %v1192_v4 = vsub.f32 1.5, %v1191_v28 }
 0x140   : > { %v3281_v57 = vpop.eup %2636  ;;  %v1392_v25 = vmul.f32 %v3143_v34, %v1357_v8  ;;  %1669 = vadd.xlane.f32.xlu2 %v1668_v32  ;;  %866 = vadd.xlane.f32.xlu0 %v865_v27  ;;  %v3288_v45 = vadd.f32 1e-05, %v957_v42  ;;  %v934_v51 = vsub.f32 %v870_v24, %v902_v21  ;;  %v1612_v21 = vmul.f32 %v3208_v10, %v3208_v10 }
 0x141   : > { %v1039_v63 = vmul.f32 %v3281_v57, %v3241_v12  ;;  %v1193_v56 = vmul.f32 %v2635_v1, %v1192_v4  ;;  %v1508_v24 = vsel %vm604_vm1, %v3183_v43, 0.0  ;;  %v910_v32 = vmul.f32 %v3295_v31, %v3295_v31 }
 0x142   : > { %1485 = vadd.xlane.f32.xlu1 %v1484_v40  ;;  %v3298_v53 = vadd.f32 %v3157_v52, %v1392_v25  ;;  %v3300_v11 = vpop.eup %2638  ;;  %2640 = vrsqrt.f32 %v3288_v45  ;;  %v3306_v4 = vadd.f32 1e-05, %v934_v51  ;;  %vm1045_vm3 = vweird.f32 %v3281_v57 }
 0x143   : > { %v1040_v2 = vmul.f32 %v3281_v57, %v1039_v63  ;;  %v828_v16 = vpop.xlane.xlu2 %827  ;;  %v804_v8 = vpop.xlane.xlu0 %803  ;;  %v1197_v28 = vsel %vm1196_vm2, %v2635_v1, %v1193_v56  ;;  %v1199_v27 = vmul.f32 %v3300_v11, %v3260_v46  ;;  %v981_v1 = vsub.f32 %v2929_v54, %v3218_v19  ;;  %vm1046_vm5 = vmor %vm1044_vm4, %vm1045_vm3 }
 0x144   : > { %5130 = vst [vmem:[#allocation7_spill] sm:$0xff] %v3298_v53  ;;  %v1364_v37 = vmul.f32 %v1197_v28, %v980_v13  ;;  %2642 = vrsqrt.f32 %v3306_v4  ;;  %v878_v63 = vmul.f32 %v804_v8, %v3057_v35  ;;  %v3328_v13 = vmul.f32 %v3057_v35, %v3225_v33 }
 0x145   : > { %1459 = vst.msk [vmem:[%s3171_s28 + $0x48] sm:$0xff] %vm604_vm1, %v3298_v53  ;;  %v1041_v3 = vmul.f32 0.5, %v1040_v2  ;;  %v616_v42 = vpop.xlane.xlu1 %615  ;;  %v1200_v25 = vmul.f32 %v3300_v11, %v1199_v27  ;;  %v1644_v19 = vsel %vm604_vm1, %v1612_v21, 0.0  ;;  %v1556_v28 = vsel %vm604_vm1, %v3249_v14, 0.0 }
 0x146   : > { %v1399_v40 = vmul.f32 %v3143_v34, %v1364_v37  ;;  %v942_v54 = vsub.f32 %v878_v63, %v910_v32  ;;  %v3338_v33 = vmul.f32 %v3057_v35, %v616_v42  ;;  %vm1205_vm6 = vweird.f32 %v3300_v11 }
 0x147   : > { %v1042_v51 = vsub.f32 1.5, %v1041_v3  ;;  %v1201_v56 = vmul.f32 0.5, %v1200_v25  ;;  %v926_v42 = vmul.f32 %v3328_v13, %v3328_v13  ;;  %vm3367_vm8 = vmor %vm1204_vm7, %vm1205_vm6  ;;  %vm1284_vm10 = vweird.f32 %v3288_v45 }
 0x148   : > { %1509 = vadd.xlane.f32.xlu0 %v1508_v24  ;;  %v3334_v2 = vpop.eup %2640  ;;  %v3343_v27 = vadd.f32 %v3157_v52, %v1399_v40  ;;  %v3348_v37 = vadd.f32 1e-05, %v942_v54  ;;  %vm1054_vm12 = vweird.f32 %v3306_v4 }
 0x149   : > { %v1043_v8 = vmul.f32 %v3281_v57, %v1042_v51  ;;  %v1202_v12 = vsub.f32 1.5, %v1201_v56  ;;  %v1279_v21 = vmul.f32 %v3334_v2, %v3288_v45  ;;  %vm1285_vm9 = vweird.f32 %v3334_v2 }
 0x14a   : > { %5131 = vst [vmem:[#allocation8_spill] sm:$0xff] %v3343_v27  ;;  %1557 = vadd.xlane.f32.xlu1 %v1556_v28  ;;  %v3350_v3 = vpop.eup %2642  ;;  %v1532_v25 = vsel %vm604_vm1, %v3343_v27, 0.0  ;;  %2644 = vrsqrt.f32 %v3348_v37  ;;  %v1636_v28 = vmul.f32 %v3249_v14, %v3249_v14  ;;  %v3389_v14 = vmul.f32 %v3057_v35, %v3262_v48  ;;  %vm1286_vm11 = vmor %vm1284_vm10, %vm1285_vm9 }
 0x14b   : > { %v1047_v24 = vsel %vm1046_vm5, %v3281_v57, %v1043_v8  ;;  %v783_v32 = vpop.xlane.xlu2 %782  ;;  %1466 = vst.msk [vmem:[%s3171_s28 + $0x80] sm:$0xff] %vm604_vm1, %v3343_v27  ;;  %v661_v63 = vpop.xlane.xlu0 %660  ;;  %v1203_v40 = vmul.f32 %v3300_v11, %v1202_v12  ;;  %v1280_v56 = vmul.f32 %v3334_v2, %v1279_v21  ;;  %v1049_v54 = vmul.f32 %v3350_v3, %v3306_v4 }
 0x14c   : > { %v1349_v51 = vmul.f32 %v1047_v24, %v965_v59  ;;  %1533 = vadd.xlane.f32.xlu2 %v1532_v25  ;;  %v903_v57 = vmul.f32 %v3338_v33, %v3338_v33  ;;  %v871_v59 = vmul.f32 %v783_v32, %v3057_v35  ;;  %v886_v24 = vmul.f32 %v828_v16, %v3057_v35 }
 0x14d   : > { %v852_v8 = vpop.xlane.xlu1 %851  ;;  %v1207_v12 = vsel %vm3367_vm8, %v3300_v11, %v1203_v40  ;;  %v1281_v21 = vmul.f32 0.5, %v1280_v56  ;;  %v3382_v25 = vmul.f32 %v3057_v35, %v661_v63  ;;  %v1050_v23 = vmul.f32 %v3350_v3, %v1049_v54 }
 0x14e   : > { %v935_v43 = vsub.f32 %v871_v59, %v903_v57  ;;  %v894_v10 = vmul.f32 %v852_v8, %v3057_v35  ;;  %v1384_v32 = vmul.f32 %v3143_v34, %v1349_v51  ;;  %v1511_v40 = vsel %vm604_vm1, %v3298_v53, 0.0 }
 0x14f   : > { %v1282_v49 = vsub.f32 1.5, %v1281_v21  ;;  %v918_v11 = vmul.f32 %v3382_v25, %v3382_v25  ;;  %v1365_v56 = vmul.f32 %v1207_v12, %v981_v1  ;;  %v5135_v57 = vsub.f32 %v2908_v41, %v3246_v22 }
 0x150   : > { %1645 = vadd.xlane.f32.xlu0 %v1644_v19  ;;  %v3394_v16 = vadd.f32 1e-05, %v935_v43  ;;  %v958_v63 = vsub.f32 %v894_v10, %v926_v42  ;;  %v3399_v51 = vadd.f32 %v3157_v52, %v1384_v32  ;;  %v3403_v46 = vpop.eup %2644  ;;  %v1051_v43 = vmul.f32 0.5, %v1050_v23 }
 0x151   : > { %v1283_v48 = vmul.f32 %v3334_v2, %v1282_v49  ;;  %v950_v54 = vsub.f32 %v886_v24, %v918_v11  ;;  %v1129_v23 = vmul.f32 %v3403_v46, %v3348_v37  ;;  %v1628_v21 = vmul.f32 %v3343_v27, %v3343_v27 }
 0x152   : > { %5134 = vst [vmem:[#allocation9_spill] sm:$0xff] %v3399_v51  ;;  %1512 = vadd.xlane.f32.xlu1 %v1511_v40  ;;  %2646 = vrsqrt.f32 %v3394_v16  ;;  %v3406_v10 = vadd.f32 1e-05, %v958_v63  ;;  %v1487_v42 = vsel %vm604_vm1, %v3399_v51, 0.0  ;;  %v974_v24 = vsub.f32 %v2932_v55, %v3295_v31 }
 0x153   : > { %v3408_v19 = vpop.xlane.xlu2 %618  ;;  %1451 = vst.msk [vmem:[%s3171_s28 + $0x8] sm:$0xff] %vm604_vm1, %v3399_v51  ;;  %v688_v49 = vpop.xlane.xlu0 %687  ;;  %v1287_v1 = vsel %vm1286_vm11, %v3334_v2, %v1283_v48  ;;  %v3423_v8 = vadd.f32 1e-05, %v950_v54  ;;  %v1130_v2 = vmul.f32 %v3403_v46, %v1129_v23  ;;  %v1716_v32 = vsel %vm604_vm1, %v1636_v28, 0.0 }
 0x154   : > { %1488 = vadd.xlane.f32.xlu2 %v1487_v42  ;;  %v1373_v59 = vmul.f32 %v1287_v1, %v5135_v57  ;;  %2648 = vrsqrt.f32 %v3406_v10  ;;  %v1400_v11 = vmul.f32 %v3143_v34, %v1365_v56  ;;  %v911_v41 = vmul.f32 %v3389_v14, %v3389_v14 }
 0x155   : > { %v807_v12 = vpop.xlane.xlu1 %806  ;;  %v1052_v22 = vsub.f32 1.5, %v1051_v43  ;;  %2650 = vrsqrt.f32 %v3423_v8  ;;  %v1131_v55 = vmul.f32 0.5, %v1130_v2  ;;  %v3441_v31 = vmul.f32 %v3057_v35, %v688_v49 }
 0x156   : > { %v879_v63 = vmul.f32 %v807_v12, %v3057_v35  ;;  %v1692_v48 = vsel %vm604_vm1, %v1628_v21, 0.0  ;;  %v1408_v54 = vmul.f32 %v3143_v34, %v1373_v59  ;;  %v1621_v43 = vmul.f32 %v3298_v53, %v3298_v53 }
 0x157   : > { %vm1055_vm13 = vweird.f32 %v3350_v3  ;;  %v1132_v42 = vsub.f32 1.5, %v1131_v55  ;;  %vm1135_vm14 = vweird.f32 %v3403_v46  ;;  %v3452_v49 = vadd.f32 %v3157_v52, %v1400_v11 }
 0x158   : > { %1717 = vadd.xlane.f32.xlu0 %v1716_v32  ;;  %v3443_v28 = vpop.eup %2646  ;;  %v943_v56 = vsub.f32 %v879_v63, %v911_v41  ;;  %v1053_v23 = vmul.f32 %v3350_v3, %v1052_v22  ;;  %vm1134_vm15 = vweird.f32 %v3348_v37  ;;  %v3461_v12 = vadd.f32 %v3157_v52, %v1408_v54  ;;  %vm3492_vm2 = vmor %vm1054_vm12, %vm1055_vm13 }
 0x159   : > { %v1133_v2 = vmul.f32 %v3403_v46, %v1132_v42  ;;  %v1059_v32 = vmul.f32 %v3443_v28, %v3394_v16  ;;  %v927_v41 = vmul.f32 %v3441_v31, %v3441_v31  ;;  %1467 = vst.msk [vmem:[%s3171_s28 + $0x88] sm:$0xff] %vm604_vm1, %v3452_v49  ;;  %vm1136_vm0 = vmor %vm1134_vm15, %vm1135_vm14  ;;  %v1671_v40 = vsel %vm604_vm1, %v1621_v43, 0.0 }
 0x15a   : > { %1693 = vadd.xlane.f32.xlu1 %v1692_v48  ;;  %v3454_v1 = vpop.eup %2648  ;;  %v3458_v57 = vadd.f32 1e-05, %v943_v56  ;;  %v1559_v63 = vsel %vm604_vm1, %v3461_v12, 0.0  ;;  %1475 = vst.msk [vmem:[%s3171_s28 + $0xc8] sm:$0xff] %vm604_vm1, %v3461_v12  ;;  %v1613_v56 = vmul.f32 %v3399_v51, %v3399_v51  ;;  %v1057_v48 = vsel %vm3492_vm2, %v3350_v3, %v1053_v23 }
 0x15b   : > { %v855_v59 = vpop.xlane.xlu2 %854  ;;  %v643_v21 = vpop.xlane.xlu0 %642  ;;  %v1289_v11 = vmul.f32 %v3454_v1, %v3406_v10  ;;  %v1137_v42 = vsel %vm1136_vm0, %v3403_v46, %v1133_v2  ;;  %v967_v53 = vsub.f32 %v2971_v15, %v3338_v33  ;;  %v1060_v27 = vmul.f32 %v3443_v28, %v1059_v32 }
 0x15c   : > { %v3473_v37 = vpop.eup %2650  ;;  %2652 = vrsqrt.f32 %v3458_v57  ;;  %v895_v22 = vmul.f32 %v855_v59, %v3057_v35  ;;  %1560 = vadd.xlane.f32.xlu2 %v1559_v63  ;;  %v1358_v45 = vmul.f32 %v1137_v42, %v974_v24  ;;  %v982_v46 = vsub.f32 %v2958_v7, %v3382_v25 }
 0x15d   : > { %v664_v55 = vpop.xlane.xlu1 %663  ;;  %v1209_v59 = vmul.f32 %v3473_v37, %v3423_v8  ;;  %v1290_v51 = vmul.f32 %v3454_v1, %v1289_v11  ;;  %vm1294_vm3 = vweird.f32 %v3406_v10  ;;  %v1647_v3 = vsel %vm604_vm1, %v1613_v56, 0.0 }
 0x15e   : > { %v959_v4 = vsub.f32 %v895_v22, %v927_v41  ;;  %v5138_v24 = vsub.f32 %v2919_v47, %v3253_v62  ;;  %vm1295_vm4 = vweird.f32 %v3454_v1  ;;  %v3519_v32 = vmul.f32 %v3057_v35, %v664_v55 }
 0x15f   : > { %v1210_v2 = vmul.f32 %v3473_v37, %v1209_v59  ;;  %v1291_v43 = vmul.f32 0.5, %v1290_v51  ;;  %v1393_v56 = vmul.f32 %v3143_v34, %v1358_v45  ;;  %v1061_v62 = vmul.f32 0.5, %v1060_v27  ;;  %vm3557_vm7 = vmor %vm1294_vm3, %vm1295_vm4 }
 0x160   : > { %1672 = vadd.xlane.f32.xlu0 %v1671_v40  ;;  %v3511_v63 = vadd.f32 1e-05, %v959_v4  ;;  %v1350_v23 = vmul.f32 %v1057_v48, %v5138_v24  ;;  %v3525_v40 = vmul.f32 %v3057_v35, %v643_v21  ;;  %vm1215_vm5 = vweird.f32 %v3473_v37 }
 0x161   : > { %v1211_v11 = vmul.f32 0.5, %v1210_v2  ;;  %v1292_v51 = vsub.f32 1.5, %v1291_v43  ;;  %v3536_v59 = vadd.f32 %v3157_v52, %v1393_v56  ;;  %v919_v2 = vmul.f32 %v3519_v32, %v3519_v32 }
 0x162   : > { %1648 = vadd.xlane.f32.xlu1 %v1647_v3  ;;  %v3521_v41 = vpop.eup %2652  ;;  %2654 = vrsqrt.f32 %v3511_v63  ;;  %v912_v42 = vmul.f32 %v3525_v40, %v3525_v40  ;;  %vm1214_vm6 = vweird.f32 %v3423_v8  ;;  %v3574_v8 = vmul.f32 %v3057_v35, %v3408_v19 }
 0x163   : > { %v810_v22 = vpop.xlane.xlu2 %809  ;;  %v831_v47 = vpop.xlane.xlu0 %830  ;;  %v1212_v48 = vsub.f32 1.5, %v1211_v11  ;;  %v1139_v55 = vmul.f32 %v3521_v41, %v3458_v57  ;;  %v1293_v54 = vmul.f32 %v3454_v1, %v1292_v51  ;;  %v1514_v24 = vsel %vm604_vm1, %v3536_v59, 0.0  ;;  %1460 = vst.msk [vmem:[%s3171_s28 + $0x50] sm:$0xff] %vm604_vm1, %v3536_v59  ;;  %vm3565_vm8 = vmor %vm1214_vm6, %vm1215_vm5 }
 0x164   : > { %v880_v21 = vmul.f32 %v810_v22, %v3057_v35  ;;  %v887_v43 = vmul.f32 %v831_v47, %v3057_v35  ;;  %v1535_v11 = vsel %vm604_vm1, %v3452_v49, 0.0  ;;  %v1637_v51 = vmul.f32 %v3461_v12, %v3461_v12  ;;  %1515 = vadd.xlane.f32.xlu2 %v1514_v24 }
 0x165   : > { %v691_v45 = vpop.xlane.xlu1 %690  ;;  %v1213_v4 = vmul.f32 %v3473_v37, %v1212_v48  ;;  %v1140_v27 = vmul.f32 %v3521_v41, %v1139_v55  ;;  %v1062_v22 = vsub.f32 1.5, %v1061_v62  ;;  %v1297_v10 = vsel %vm3557_vm7, %v3454_v1, %v1293_v54 }
 0x166   : > { %v944_v3 = vsub.f32 %v880_v21, %v912_v42  ;;  %v951_v48 = vsub.f32 %v887_v43, %v919_v2  ;;  %v1385_v21 = vmul.f32 %v3143_v34, %v1350_v23  ;;  %vm1064_vm9 = vweird.f32 %v3394_v16 }
 0x167   : > { %v1141_v47 = vmul.f32 0.5, %v1140_v27  ;;  %v1217_v27 = vsel %vm3565_vm8, %v3473_v37, %v1213_v4  ;;  %vm1065_vm10 = vweird.f32 %v3443_v28  ;;  %v1719_v19 = vsel %vm604_vm1, %v1637_v51, 0.0 }
 0x168   : > { %1536 = vadd.xlane.f32.xlu0 %v1535_v11  ;;  %v3561_v55 = vpop.eup %2654  ;;  %v3576_v42 = vadd.f32 1e-05, %v944_v3  ;;  %v3584_v24 = vadd.f32 1e-05, %v951_v48  ;;  %v1063_v54 = vmul.f32 %v3443_v28, %v1062_v22  ;;  %v5143_v37 = vsub.f32 %v2942_v61, %v3328_v13  ;;  %vm3615_vm12 = vmor %vm1064_vm9, %vm1065_vm10 }
 0x169   : > { %v1142_v2 = vsub.f32 1.5, %v1141_v47  ;;  %v1299_v43 = vmul.f32 %v3561_v55, %v3511_v63  ;;  %v1366_v11 = vmul.f32 %v1217_v27, %v982_v46  ;;  %v1629_v51 = vmul.f32 %v3452_v49, %v3452_v49 }
 0x16a   : > { %2656 = vrsqrt.f32 %v3576_v42  ;;  %v1374_v4 = vmul.f32 %v1297_v10, %v5143_v37  ;;  %1720 = vadd.xlane.f32.xlu1 %v1719_v19  ;;  %v3603_v47 = vadd.f32 %v3157_v52, %v1385_v21  ;;  %v904_v61 = vmul.f32 %v3574_v8, %v3574_v8 }
 0x16b   : > { %v667_v1 = vpop.xlane.xlu2 %666  ;;  %v786_v23 = vpop.xlane.xlu0 %785  ;;  %v1300_v3 = vmul.f32 %v3561_v55, %v1299_v43  ;;  %2658 = vrsqrt.f32 %v3584_v24  ;;  %v1143_v48 = vmul.f32 %v3521_v41, %v1142_v2  ;;  %vm1145_vm11 = vweird.f32 %v3521_v41 }
 0x16c   : > { %v872_v56 = vmul.f32 %v786_v23, %v3057_v35  ;;  %5144 = vst [vmem:[#allocation10_spill] sm:$0xff] %v3603_v47  ;;  %vm1144_vm13 = vweird.f32 %v3458_v57  ;;  %v1695_v46 = vsel %vm604_vm1, %v1629_v51, 0.0  ;;  %v1622_v62 = vmul.f32 %v3536_v59, %v3536_v59 }
 0x16d   : > { %v646_v22 = vpop.xlane.xlu1 %645  ;;  %1452 = vst.msk [vmem:[%s3171_s28 + $0x10] sm:$0xff] %vm604_vm1, %v3603_v47  ;;  %v1067_v16 = vsel %vm3615_vm12, %v3443_v28, %v1063_v54  ;;  %v1301_v10 = vmul.f32 0.5, %v1300_v3  ;;  %1696 = vadd.xlane.f32.xlu2 %v1695_v46  ;;  %v1401_v57 = vmul.f32 %v3143_v34, %v1366_v11  ;;  %vm3636_vm14 = vmor %vm1144_vm13, %vm1145_vm11  ;;  %v3641_v19 = vmul.f32 %v3057_v35, %v691_v45 }
 0x16e   : > { %v936_v27 = vsub.f32 %v872_v56, %v904_v61  ;;  %v1490_v28 = vsel %vm604_vm1, %v3603_v47, 0.0  ;;  %v1409_v23 = vmul.f32 %v3143_v34, %v1374_v4  ;;  %v1147_v37 = vsel %vm3636_vm14, %v3521_v41, %v1143_v48 }
 0x16f   : > { %v3654_v11 = vmul.f32 %v3057_v35, %v667_v1  ;;  %v1674_v4 = vsel %vm604_vm1, %v1622_v62, 0.0  ;;  %v1614_v61 = vmul.f32 %v3603_v47, %v3603_v47  ;;  %v1302_v7 = vsub.f32 1.5, %v1301_v10 }
 0x170   : > { %v3633_v2 = vpop.eup %2656  ;;  %v3656_v51 = vadd.f32 1e-05, %v936_v27  ;;  %1491 = vadd.xlane.f32.xlu0 %v1490_v28  ;;  %v3664_v48 = vadd.f32 %v3157_v52, %v1409_v23  ;;  %vm1304_vm15 = vweird.f32 %v3511_v63  ;;  %v928_v27 = vmul.f32 %v3641_v19, %v3641_v19 }
 0x171   : > { %v3646_v54 = vpop.eup %2658  ;;  %v1149_v3 = vmul.f32 %v3633_v2, %v3576_v42  ;;  %v920_v46 = vmul.f32 %v3654_v11, %v3654_v11  ;;  %v1351_v10 = vmul.f32 %v1067_v16, %v967_v53  ;;  %v5149_v23 = vsub.f32 %v2953_v5, %v3389_v14 }
 0x172   : > { %v1219_v45 = vmul.f32 %v3646_v54, %v3584_v24  ;;  %2660 = vrsqrt.f32 %v3656_v51  ;;  %1675 = vadd.xlane.f32.xlu1 %v1674_v4  ;;  %1476 = vst.msk [vmem:[%s3171_s28 + $0xd0] sm:$0xff] %vm604_vm1, %v3664_v48  ;;  %v3686_v4 = vadd.f32 %v3157_v52, %v1401_v57  ;;  %vm1305_vm0 = vweird.f32 %v3561_v55 }
 0x173   : > { %v622_v56 = vpop.xlane.xlu2 %621  ;;  %v858_v41 = vpop.xlane.xlu0 %857  ;;  %v1150_v1 = vmul.f32 %v3633_v2, %v1149_v3  ;;  %v1359_v3 = vmul.f32 %v1147_v37, %v5149_v23  ;;  %v1650_v13 = vsel %vm604_vm1, %v1614_v61, 0.0  ;;  %v1303_v25 = vmul.f32 %v3561_v55, %v1302_v7  ;;  %vm3717_vm4 = vmor %vm1304_vm15, %vm1305_vm0 }
 0x174   : > { %v1220_v62 = vmul.f32 %v3646_v54, %v1219_v45  ;;  %v896_v43 = vmul.f32 %v858_v41, %v3057_v35  ;;  %v3692_v15 = vmul.f32 %v3057_v35, %v646_v22  ;;  %1468 = vst.msk [vmem:[%s3171_s28 + $0x90] sm:$0xff] %vm604_vm1, %v3686_v4  ;;  %vm1224_vm2 = vweird.f32 %v3584_v24 }
 0x175   : > { %v834_v28 = vpop.xlane.xlu1 %833  ;;  %v1151_v47 = vmul.f32 0.5, %v1150_v1  ;;  %1651 = vadd.xlane.f32.xlu2 %v1650_v13  ;;  %v1562_v33 = vsel %vm604_vm1, %v3664_v48, 0.0  ;;  %vm1154_vm3 = vweird.f32 %v3576_v42  ;;  %v3706_v22 = vmul.f32 %v3057_v35, %v622_v56 }
 0x176   : > { %v888_v45 = vmul.f32 %v834_v28, %v3057_v35  ;;  %v1221_v41 = vmul.f32 0.5, %v1220_v62  ;;  %v960_v21 = vsub.f32 %v896_v43, %v928_v27  ;;  %v1538_v57 = vsel %vm604_vm1, %v3686_v4, 0.0 }
 0x177   : > { %v1394_v37 = vmul.f32 %v3143_v34, %v1359_v3  ;;  %v1638_v7 = vmul.f32 %v3664_v48, %v3664_v48  ;;  %v1307_v63 = vsel %vm3717_vm4, %v3561_v55, %v1303_v25  ;;  %v1152_v62 = vsub.f32 1.5, %v1151_v47 }
 0x178   : > { %v952_v5 = vsub.f32 %v888_v45, %v920_v46  ;;  %v1222_v14 = vsub.f32 1.5, %v1221_v41  ;;  %v3698_v53 = vadd.f32 1e-05, %v960_v21  ;;  %v3702_v16 = vpop.eup %2660  ;;  %1563 = vadd.xlane.f32.xlu0 %v1562_v33  ;;  %v1386_v46 = vmul.f32 %v3143_v34, %v1351_v10 }
 0x179   : > { %v1069_v56 = vmul.f32 %v3702_v16, %v3656_v51  ;;  %v913_v27 = vmul.f32 %v3692_v15, %v3692_v15  ;;  %vm1155_vm5 = vweird.f32 %v3633_v2  ;;  %vm1225_vm6 = vweird.f32 %v3646_v54 }
 0x17a   : > { %v3708_v13 = vadd.f32 1e-05, %v952_v5  ;;  %2662 = vrsqrt.f32 %v3698_v53  ;;  %1539 = vadd.xlane.f32.xlu1 %v1538_v57  ;;  %v1223_v43 = vmul.f32 %v3646_v54, %v1222_v14  ;;  %v905_v55 = vmul.f32 %v3706_v22, %v3706_v22  ;;  %vm3754_vm7 = vmor %vm1224_vm2, %vm1225_vm6 }
 0x17b   : > { %v694_v61 = vpop.xlane.xlu2 %693  ;;  %v813_v1 = vpop.xlane.xlu0 %812  ;;  %v1070_v28 = vmul.f32 %v3702_v16, %v1069_v56  ;;  %v3742_v23 = vadd.f32 %v3157_v52, %v1394_v37  ;;  %v5152_v3 = vsub.f32 %v2989_v30, %v3441_v31  ;;  %v1722_v5 = vsel %vm604_vm1, %v1638_v7, 0.0  ;;  %vm3788_vm10 = vmor %vm1154_vm3, %vm1155_vm5 }
 0x17c   : > { %2664 = vrsqrt.f32 %v3708_v13  ;;  %v881_v47 = vmul.f32 %v813_v1, %v3057_v35  ;;  %v3749_v14 = vadd.f32 %v3157_v52, %v1386_v46  ;;  %v1153_v33 = vmul.f32 %v3633_v2, %v1152_v62 }
 0x17d   : > { %v789_v10 = vpop.xlane.xlu1 %788  ;;  %v1375_v45 = vmul.f32 %v1307_v63, %v5152_v3  ;;  %v1071_v41 = vmul.f32 0.5, %v1070_v28  ;;  %vm1074_vm8 = vweird.f32 %v3656_v51  ;;  %1723 = vadd.xlane.f32.xlu2 %v1722_v5  ;;  %1461 = vst.msk [vmem:[%s3171_s28 + $0x58] sm:$0xff] %vm604_vm1, %v3742_v23  ;;  %v1227_v21 = vsel %vm3754_vm7, %v3646_v54, %v1223_v43 }
 0x17e   : > { %v873_v25 = vmul.f32 %v789_v10, %v3057_v35  ;;  %v945_v30 = vsub.f32 %v881_v47, %v913_v27  ;;  %vm1075_vm9 = vweird.f32 %v3702_v16  ;;  %v1517_v24 = vsel %vm604_vm1, %v3742_v23, 0.0  ;;  %1453 = vst.msk [vmem:[%s3171_s28 + $0x18] sm:$0xff] %vm604_vm1, %v3749_v14 }
 0x17f   : > { %v1072_v56 = vsub.f32 1.5, %v1071_v41  ;;  %v3778_v46 = vmul.f32 %v3057_v35, %v694_v61  ;;  %v1493_v43 = vsel %vm604_vm1, %v3749_v14, 0.0  ;;  %v1623_v28 = vmul.f32 %v3742_v23, %v3742_v23  ;;  %vm3805_vm11 = vmor %vm1074_vm8, %vm1075_vm9 }
 0x180   : > { %v937_v31 = vsub.f32 %v873_v25, %v905_v55  ;;  %v3762_v37 = vpop.eup %2662  ;;  %v3780_v63 = vadd.f32 1e-05, %v945_v30  ;;  %1518 = vadd.xlane.f32.xlu0 %v1517_v24  ;;  %v1410_v55 = vmul.f32 %v3143_v34, %v1375_v45  ;;  %v1157_v42 = vsel %vm3788_vm10, %v3633_v2, %v1153_v33 }
 0x181   : > { %v1309_v1 = vmul.f32 %v3762_v37, %v3698_v53  ;;  %v1073_v27 = vmul.f32 %v3702_v16, %v1072_v56  ;;  %v1630_v3 = vmul.f32 %v3686_v4, %v3686_v4  ;;  %v5159_v45 = vsub.f32 %v3004_v44, %v3519_v32 }
 0x182   : > { %v3773_v7 = vpop.eup %2664  ;;  %v3782_v54 = vadd.f32 1e-05, %v937_v31  ;;  %2666 = vrsqrt.f32 %v3780_v63  ;;  %1494 = vadd.xlane.f32.xlu1 %v1493_v43  ;;  %v976_v33 = vsub.f32 %v2998_v38, %v3525_v40  ;;  %v992_v57 = vsub.f32 %v3012_v50, %v3641_v19 }
 0x183   : > { %v649_v61 = vpop.xlane.xlu2 %648  ;;  %v670_v10 = vpop.xlane.xlu0 %669  ;;  %v1310_v25 = vmul.f32 %v3762_v37, %v1309_v1  ;;  %v1367_v2 = vmul.f32 %v1227_v21, %v5159_v45  ;;  %v1077_v51 = vsel %vm3805_vm11, %v3702_v16, %v1073_v27  ;;  %v1229_v41 = vmul.f32 %v3773_v7, %v3708_v13 }
 0x184   : > { %2668 = vrsqrt.f32 %v3782_v54  ;;  %v929_v44 = vmul.f32 %v3778_v46, %v3778_v46  ;;  %v1677_v31 = vsel %vm604_vm1, %v1623_v28, 0.0  ;;  %v3833_v21 = vadd.f32 %v3157_v52, %v1410_v55 }
 0x185   : > { %v861_v5 = vpop.xlane.xlu1 %860  ;;  %v1311_v30 = vmul.f32 0.5, %v1310_v25  ;;  %v1360_v56 = vmul.f32 %v1157_v42, %v976_v33  ;;  %v5160_v38 = vsub.f32 %v2986_v29, %v3574_v8  ;;  %v977_v24 = vsub.f32 %v3028_v0, %v3692_v15  ;;  %1678 = vadd.xlane.f32.xlu2 %v1677_v31 }
 0x186   : > { %v897_v32 = vmul.f32 %v861_v5, %v3057_v35  ;;  %v1230_v27 = vmul.f32 %v3773_v7, %v1229_v41  ;;  %v1698_v43 = vsel %vm604_vm1, %v1630_v3, 0.0  ;;  %1477 = vst.msk [vmem:[%s3171_s28 + $0xd8] sm:$0xff] %vm604_vm1, %v3833_v21  ;;  %v1402_v52 = vmul.f32 %v3143_v34, %v1367_v2 }
 0x187   : > { %v1352_v40 = vmul.f32 %v1077_v51, %v5160_v38  ;;  %vm1314_vm12 = vweird.f32 %v3698_v53  ;;  %v3852_v29 = vmul.f32 %v3057_v35, %v649_v61  ;;  %v3855_v8 = vmul.f32 %v3057_v35, %v670_v10  ;;  %v3868_v61 = vld [vmem:[%s5102_s4] ss:$0 sm:$0xff] }
 0x188   : > { %v961_v1 = vsub.f32 %v897_v32, %v929_v44  ;;  %v3848_v28 = vpop.eup %2666  ;;  %1699 = vadd.xlane.f32.xlu0 %v1698_v43  ;;  %v1312_v47 = vsub.f32 1.5, %v1311_v30  ;;  %v1565_v25 = vsel %vm604_vm1, %v3833_v21, 0.0  ;;  %v3871_v10 = vadd.f32 %v3868_v61, %v1402_v52  ;;  %v3879_v51 = vld [vmem:[%s5101_s3] ss:$0 sm:$0xff] }
 0x189   : > { %v1159_v34 = vmul.f32 %v3848_v28, %v3780_v63  ;;  %v1395_v41 = vmul.f32 %v3879_v51, %v1360_v56  ;;  %v1387_v5 = vmul.f32 %v3879_v51, %v1352_v40  ;;  %v1231_v33 = vmul.f32 0.5, %v1230_v27 }
 0x18a   : > { %v3857_v55 = vadd.f32 1e-05, %v961_v1  ;;  %v3859_v42 = vpop.eup %2668  ;;  %1566 = vadd.xlane.f32.xlu1 %v1565_v25  ;;  %v914_v32 = vmul.f32 %v3852_v29, %v3852_v29  ;;  %1469 = vst.msk [vmem:[%s3171_s28 + $0x98] sm:$0xff] %vm604_vm1, %v3871_v10  ;;  %v1615_v31 = vmul.f32 %v3749_v14, %v3749_v14  ;;  %vm1315_vm13 = vweird.f32 %v3762_v37 }
 0x18b   : > { %v837_v3 = vpop.xlane.xlu2 %836  ;;  %v625_v45 = vpop.xlane.xlu0 %624  ;;  %v1079_v2 = vmul.f32 %v3859_v42, %v3782_v54  ;;  %v1160_v44 = vmul.f32 %v3848_v28, %v1159_v34  ;;  %v921_v56 = vmul.f32 %v3855_v8, %v3855_v8  ;;  %v1313_v1 = vmul.f32 %v3762_v37, %v1312_v47  ;;  %vm3914_vm15 = vmor %vm1314_vm12, %vm1315_vm13 }
 0x18c   : > { %2670 = vrsqrt.f32 %v3857_v55  ;;  %v889_v40 = vmul.f32 %v837_v3, %v3057_v35  ;;  %v1541_v43 = vsel %vm604_vm1, %v3871_v10, 0.0  ;;  %vm1234_vm14 = vweird.f32 %v3708_v13 }
 0x18d   : > { %v816_v30 = vpop.xlane.xlu1 %815  ;;  %v1080_v38 = vmul.f32 %v3859_v42, %v1079_v2  ;;  %v1161_v27 = vmul.f32 0.5, %v1160_v44  ;;  %1542 = vadd.xlane.f32.xlu2 %v1541_v43  ;;  %v3902_v25 = vadd.f32 %v3868_v61, %v1395_v41  ;;  %v3905_v2 = vadd.f32 %v3868_v61, %v1387_v5 }
 0x18e   : > { %v882_v52 = vmul.f32 %v816_v30, %v3057_v35  ;;  %v953_v34 = vsub.f32 %v889_v40, %v921_v56  ;;  %v1232_v3 = vsub.f32 1.5, %v1231_v33  ;;  %v1653_v44 = vsel %vm604_vm1, %v1615_v31, 0.0 }
 0x18f   : > { %v1162_v62 = vsub.f32 1.5, %v1161_v27  ;;  %vm1165_vm0 = vweird.f32 %v3848_v28  ;;  %v1081_v41 = vmul.f32 0.5, %v1080_v38  ;;  %v3922_v33 = vmul.f32 %v3057_v35, %v625_v45  ;;  %1462 = vst.msk [vmem:[%s3171_s28 + $0x60] sm:$0xff] %vm604_vm1, %v3902_v25 }
 0x190   : > { %v946_v47 = vsub.f32 %v882_v52, %v914_v32  ;;  %v3919_v5 = vadd.f32 1e-05, %v953_v34  ;;  %1654 = vadd.xlane.f32.xlu0 %v1653_v44  ;;  %v1317_v53 = vsel %vm3914_vm15, %v3762_v37, %v1313_v1  ;;  %v1520_v38 = vsel %vm604_vm1, %v3902_v25, 0.0  ;;  %1454 = vst.msk [vmem:[%s3171_s28 + $0x20] sm:$0xff] %vm604_vm1, %v3905_v2 }
 0x191   : > { %v1163_v40 = vmul.f32 %v3848_v28, %v1162_v62  ;;  %v906_v37 = vmul.f32 %v3922_v33, %v3922_v33  ;;  %v1233_v27 = vmul.f32 %v3773_v7, %v1232_v3  ;;  %vm1235_vm2 = vweird.f32 %v3773_v7 }
 0x192   : > { %v3908_v16 = vpop.eup %2670  ;;  %v3932_v31 = vadd.f32 1e-05, %v946_v47  ;;  %2672 = vrsqrt.f32 %v3919_v5  ;;  %1521 = vadd.xlane.f32.xlu1 %v1520_v38  ;;  %v993_v43 = vsub.f32 %v3047_v20, %v3778_v46  ;;  %v1376_v62 = vmul.f32 %v1317_v53, %v992_v57  ;;  %vm3967_vm6 = vmor %vm1234_vm14, %vm1235_vm2 }
 0x193   : > { %v1319_v32 = vmul.f32 %v3908_v16, %v3857_v55  ;;  %v792_v56 = vpop.xlane.xlu2 %791  ;;  %v697_v45 = vpop.xlane.xlu0 %696  ;;  %vm1164_vm3 = vweird.f32 %v3780_v63  ;;  %v1082_v34 = vsub.f32 1.5, %v1081_v41  ;;  %vm1084_vm5 = vweird.f32 %v3782_v54 }
 0x194   : > { %v874_v1 = vmul.f32 %v792_v56, %v3057_v35  ;;  %2674 = vrsqrt.f32 %v3932_v31  ;;  %vm3955_vm4 = vmor %vm1164_vm3, %vm1165_vm0  ;;  %v1496_v30 = vsel %vm604_vm1, %v3905_v2, 0.0  ;;  %v1639_v50 = vmul.f32 %v3833_v21, %v3833_v21 }
 0x195   : > { %v673_v52 = vpop.xlane.xlu1 %672  ;;  %v1320_v44 = vmul.f32 %v3908_v16, %v1319_v32  ;;  %v1167_v63 = vsel %vm3955_vm4, %v3848_v28, %v1163_v40  ;;  %v978_v57 = vsub.f32 %v3060_v36, %v3852_v29  ;;  %1497 = vadd.xlane.f32.xlu2 %v1496_v30  ;;  %v1631_v53 = vmul.f32 %v3871_v10, %v3871_v10 }
 0x196   : > { %v938_v47 = vsub.f32 %v874_v1, %v906_v37  ;;  %v1237_v13 = vsel %vm3967_vm6, %v3773_v7, %v1233_v27  ;;  %vm1085_vm7 = vweird.f32 %v3859_v42  ;;  %v985_v32 = vsub.f32 %v3063_v39, %v3855_v8 }
 0x197   : > { %v1725_v28 = vsel %vm604_vm1, %v1639_v50, 0.0  ;;  %v1083_v56 = vmul.f32 %v3859_v42, %v1082_v34  ;;  %v3992_v40 = vmul.f32 %v3057_v35, %v697_v45  ;;  %v1411_v37 = vmul.f32 %v3879_v51, %v1376_v62  ;;  %vm4024_vm9 = vmor %vm1084_vm5, %vm1085_vm7 }
 0x198   : > { %v3976_v41 = vadd.f32 1e-05, %v938_v47  ;;  %v3987_v38 = vpop.eup %2672  ;;  %1726 = vadd.xlane.f32.xlu0 %v1725_v28  ;;  %v1361_v1 = vmul.f32 %v1167_v63, %v977_v24  ;;  %v1321_v27 = vmul.f32 0.5, %v1320_v44  ;;  %v1701_v34 = vsel %vm604_vm1, %v1631_v53, 0.0 }
 0x199   : > { %v1239_v47 = vmul.f32 %v3987_v38, %v3919_v5  ;;  %v930_v62 = vmul.f32 %v3992_v40, %v3992_v40  ;;  %v4009_v0 = vadd.f32 %v3868_v61, %v1411_v37  ;;  %v5167_v15 = vsub.f32 %v3023_v60, %v3654_v11 }
 0x19a   : > { %2676 = vrsqrt.f32 %v3976_v41  ;;  %v3995_v7 = vpop.eup %2674  ;;  %1702 = vadd.xlane.f32.xlu1 %v1701_v34  ;;  %vm1324_vm8 = vweird.f32 %v3857_v55  ;;  %v970_v19 = vsub.f32 %v3078_v58, %v3922_v33  ;;  %v1624_v53 = vmul.f32 %v3902_v25, %v3902_v25 }
 0x19b   : > { %v864_v3 = vpop.xlane.xlu2 %863  ;;  %v652_v30 = vpop.xlane.xlu0 %651  ;;  %v1169_v45 = vmul.f32 %v3995_v7, %v3932_v31  ;;  %v1368_v24 = vmul.f32 %v1237_v13, %v5167_v15  ;;  %v1240_v44 = vmul.f32 %v3987_v38, %v1239_v47  ;;  %vm1325_vm10 = vweird.f32 %v3908_v16  ;;  %1478 = vst.msk [vmem:[%s3171_s28 + $0xe0] sm:$0xff] %vm604_vm1, %v4009_v0 }
 0x19c   : > { %v898_v50 = vmul.f32 %v864_v3, %v3057_v35  ;;  %v4031_v11 = vmul.f32 %v3057_v35, %v673_v52  ;;  %v1087_v37 = vsel %vm4024_vm9, %v3859_v42, %v1083_v56  ;;  %v1322_v54 = vsub.f32 1.5, %v1321_v27  ;;  %vm4083_vm14 = vmor %vm1324_vm8, %vm1325_vm10 }
 0x19d   : > { %v628_v63 = vpop.xlane.xlu1 %627  ;;  %v1170_v60 = vmul.f32 %v3995_v7, %v1169_v45  ;;  %v1241_v47 = vmul.f32 0.5, %v1240_v44  ;;  %v1568_v34 = vsel %vm604_vm1, %v4009_v0, 0.0  ;;  %v4046_v52 = vmul.f32 %v3057_v35, %v652_v30 }
 0x19e   : > { %v962_v13 = vsub.f32 %v898_v50, %v930_v62  ;;  %1569 = vadd.xlane.f32.xlu2 %v1568_v34  ;;  %v1616_v45 = vmul.f32 %v3905_v2, %v3905_v2  ;;  %v1396_v62 = vmul.f32 %v3879_v51, %v1361_v1  ;;  %vm1244_vm11 = vweird.f32 %v3919_v5 }
 0x19f   : > { %v1171_v42 = vmul.f32 0.5, %v1170_v60  ;;  %v1680_v27 = vsel %vm604_vm1, %v1624_v53, 0.0  ;;  %v5170_v50 = vsub.f32 %v3036_v9, %v3706_v22  ;;  %v1242_v28 = vsub.f32 1.5, %v1241_v47 }
 0x1a0   : > { %v4041_v3 = vpop.eup %2676  ;;  %v4043_v15 = vadd.f32 1e-05, %v962_v13  ;;  %v922_v30 = vmul.f32 %v4031_v11, %v4031_v11  ;;  %1681 = vadd.xlane.f32.xlu0 %v1680_v27  ;;  %v1323_v1 = vmul.f32 %v3908_v16, %v1322_v54  ;;  %vm1174_vm12 = vweird.f32 %v3932_v31 }
 0x1a1   : > { %v1089_v56 = vmul.f32 %v4041_v3, %v3976_v41  ;;  %v1353_v44 = vmul.f32 %v1087_v37, %v5170_v50  ;;  %v1656_v53 = vsel %vm604_vm1, %v1616_v45, 0.0  ;;  %v4066_v9 = vadd.f32 %v3868_v61, %v1396_v62 }
 0x1a2   : > { %2678 = vrsqrt.f32 %v4043_v15  ;;  %v915_v37 = vmul.f32 %v4046_v52, %v4046_v52  ;;  %1657 = vadd.xlane.f32.xlu1 %v1656_v53  ;;  %v1403_v34 = vmul.f32 %v3879_v51, %v1368_v24  ;;  %vm1245_vm13 = vweird.f32 %v3987_v38 }
 0x1a3   : > { %v1090_v60 = vmul.f32 %v4041_v3, %v1089_v56  ;;  %v819_v13 = vpop.xlane.xlu2 %818  ;;  %v840_v22 = vpop.xlane.xlu0 %839  ;;  %v1172_v56 = vsub.f32 1.5, %v1171_v42  ;;  %1463 = vst.msk [vmem:[%s3171_s28 + $0x68] sm:$0xff] %vm604_vm1, %v4066_v9  ;;  %v1243_v24 = vmul.f32 %v3987_v38, %v1242_v28  ;;  %v4089_v42 = vmul.f32 %v3057_v35, %v628_v63  ;;  %vm4113_vm15 = vmor %vm1244_vm11, %vm1245_vm13 }
 0x1a4   : > { %v883_v47 = vmul.f32 %v819_v13, %v3057_v35  ;;  %v890_v54 = vmul.f32 %v840_v22, %v3057_v35  ;;  %v1327_v13 = vsel %vm4083_vm14, %v3908_v16, %v1323_v1  ;;  %v1523_v22 = vsel %vm604_vm1, %v4066_v9, 0.0 }
 0x1a5   : > { %v1091_v27 = vmul.f32 0.5, %v1090_v60  ;;  %v700_v62 = vpop.xlane.xlu1 %699  ;;  %v4097_v55 = vadd.f32 %v3868_v61, %v1403_v34  ;;  %v1640_v45 = vmul.f32 %v4009_v0, %v4009_v0  ;;  %v1173_v1 = vmul.f32 %v3995_v7, %v1172_v56 }
 0x1a6   : > { %v947_v60 = vsub.f32 %v883_v47, %v915_v37  ;;  %v954_v53 = vsub.f32 %v890_v54, %v922_v30  ;;  %v986_v37 = vsub.f32 %v3107_v26, %v4031_v11  ;;  %1524 = vadd.xlane.f32.xlu2 %v1523_v22  ;;  %vm1175_vm0 = vweird.f32 %v3995_v7 }
 0x1a7   : > { %v1092_v63 = vsub.f32 1.5, %v1091_v27  ;;  %1470 = vst.msk [vmem:[%s3171_s28 + $0xa0] sm:$0xff] %vm604_vm1, %v4097_v55  ;;  %v1388_v34 = vmul.f32 %v3879_v51, %v1353_v44  ;;  %v1377_v5 = vmul.f32 %v1327_v13, %v993_v43  ;;  %v1247_v27 = vsel %vm4113_vm15, %v3987_v38, %v1243_v24  ;;  %vm4141_vm2 = vmor %vm1174_vm12, %vm1175_vm0 }
 0x1a8   : > { %v4101_v28 = vpop.eup %2678  ;;  %v4105_v30 = vadd.f32 1e-05, %v947_v60  ;;  %v4107_v47 = vadd.f32 1e-05, %v954_v53  ;;  %v907_v56 = vmul.f32 %v4089_v42, %v4089_v42  ;;  %v1544_v44 = vsel %vm604_vm1, %v4097_v55, 0.0 }
 0x1a9   : > { %v1329_v54 = vmul.f32 %v4101_v28, %v4043_v15  ;;  %v1728_v60 = vsel %vm604_vm1, %v1640_v45, 0.0  ;;  %v1093_v38 = vmul.f32 %v4041_v3, %v1092_v63  ;;  %vm1095_vm3 = vweird.f32 %v4041_v3  ;;  %1545 = vadd.xlane.f32.xlu0 %v1544_v44 }
 0x1aa   : > { %2680 = vrsqrt.f32 %v4105_v30  ;;  %1729 = vadd.xlane.f32.xlu1 %v1728_v60  ;;  %v1632_v45 = vmul.f32 %v4097_v55, %v4097_v55  ;;  %v1177_v31 = vsel %vm4141_vm2, %v3995_v7, %v1173_v1  ;;  %v4157_v63 = vadd.f32 %v3868_v61, %v1388_v34 }
 0x1ab   : > { %v1330_v50 = vmul.f32 %v4101_v28, %v1329_v54  ;;  %2682 = vrsqrt.f32 %v4107_v47  ;;  %v676_v20 = vpop.xlane.xlu2 %675  ;;  %v795_v46 = vpop.xlane.xlu0 %794  ;;  %v1369_v16 = vmul.f32 %v1247_v27, %v985_v32  ;;  %vm1094_vm4 = vweird.f32 %v3976_v41 }
 0x1ac   : > { %v4148_v24 = vmul.f32 %v3057_v35, %v676_v20  ;;  %v875_v13 = vmul.f32 %v795_v46, %v3057_v35  ;;  %vm4166_vm5 = vmor %vm1094_vm4, %vm1095_vm3  ;;  %v979_v1 = vsub.f32 %v3127_v6, %v4046_v52  ;;  %v1704_v34 = vsel %vm604_vm1, %v1632_v45, 0.0  ;;  %1455 = vst.msk [vmem:[%s3171_s28 + $0x28] sm:$0xff] %vm604_vm1, %v4157_v63 }
 0x1ad   : > { %v1331_v53 = vmul.f32 0.5, %v1330_v50  ;;  %v843_v22 = vpop.xlane.xlu1 %842  ;;  %v1625_v39 = vmul.f32 %v4066_v9, %v4066_v9  ;;  %v1362_v41 = vmul.f32 %v1177_v31, %v978_v57  ;;  %v1097_v32 = vsel %vm4166_vm5, %v4041_v3, %v1093_v38 }
 0x1ae   : > { %v923_v54 = vmul.f32 %v4148_v24, %v4148_v24  ;;  %v891_v44 = vmul.f32 %v843_v22, %v3057_v35  ;;  %v939_v50 = vsub.f32 %v875_v13, %v907_v56  ;;  %v4187_v27 = vmul.f32 %v3057_v35, %v700_v62  ;;  %1705 = vadd.xlane.f32.xlu2 %v1704_v34 }
 0x1af   : > { %v1332_v20 = vsub.f32 1.5, %v1331_v53  ;;  %v1412_v36 = vmul.f32 %v3879_v51, %v1377_v5  ;;  %v1499_v3 = vsel %vm604_vm1, %v4157_v63, 0.0  ;;  %v1404_v62 = vmul.f32 %v3879_v51, %v1369_v16 }
 0x1b0   : > { %v4178_v8 = vpop.eup %2680  ;;  %v955_v56 = vsub.f32 %v891_v44, %v923_v54  ;;  %v4193_v43 = vadd.f32 1e-05, %v939_v50  ;;  %v1683_v45 = vsel %vm604_vm1, %v1625_v39, 0.0  ;;  %v1617_v31 = vmul.f32 %v4157_v63, %v4157_v63 }
 0x1b1   : > { %v4189_v60 = vpop.eup %2682  ;;  %v1179_v46 = vmul.f32 %v4178_v8, %v4105_v30  ;;  %vm1335_vm6 = vweird.f32 %v4101_v28  ;;  %v931_v13 = vmul.f32 %v4187_v27, %v4187_v27  ;;  %1500 = vadd.xlane.f32.xlu0 %v1499_v3  ;;  %v1333_v22 = vmul.f32 %v4101_v28, %v1332_v20 }
 0x1b2   : > { %v1249_v29 = vmul.f32 %v4189_v60, %v4107_v47  ;;  %v4198_v57 = vadd.f32 1e-05, %v955_v56  ;;  %2684 = vrsqrt.f32 %v4193_v43  ;;  %1684 = vadd.xlane.f32.xlu1 %v1683_v45  ;;  %v4216_v7 = vadd.f32 %v3868_v61, %v1412_v36 }
 0x1b3   : > { %v1180_v38 = vmul.f32 %v4178_v8, %v1179_v46  ;;  %v867_v5 = vpop.xlane.xlu0 %866  ;;  %v1354_v34 = vmul.f32 %v1097_v32, %v970_v19  ;;  %v4222_v39 = vadd.f32 %v3868_v61, %v1404_v62  ;;  %v1397_v56 = vmul.f32 %v3879_v51, %v1362_v41  ;;  %v1670_v46 = vpop.xlane.xlu2 %1669 }
 0x1b4   : > { %v1250_v53 = vmul.f32 %v4189_v60, %v1249_v29  ;;  %2686 = vrsqrt.f32 %v4198_v57  ;;  %v899_v54 = vmul.f32 %v867_v5, %v3057_v35  ;;  %5179 = vst [vmem:[#allocation11_spill] sm:$0xff] %v4216_v7  ;;  %vm1334_vm7 = vweird.f32 %v4043_v15 }
 0x1b5   : > { %v1181_v16 = vmul.f32 0.5, %v1180_v38  ;;  %v1486_v44 = vpop.xlane.xlu1 %1485  ;;  %v1659_v29 = vsel %vm604_vm1, %v1617_v31, 0.0  ;;  %1479 = vst.msk [vmem:[%s3171_s28 + $0xe8] sm:$0xff] %vm604_vm1, %v4216_v7  ;;  %vm4232_vm8 = vmor %vm1334_vm7, %vm1335_vm6  ;;  %v971_v33 = vsub.f32 %v3133_v17, %v4089_v42  ;;  %vm1254_vm9 = vweird.f32 %v4107_v47 }
 0x1b6   : > { %v1251_v50 = vmul.f32 0.5, %v1250_v53  ;;  %v963_v3 = vsub.f32 %v899_v54, %v931_v13  ;;  %vm1255_vm10 = vweird.f32 %v4189_v60  ;;  %1660 = vadd.xlane.f32.xlu2 %v1659_v29  ;;  %1471 = vst.msk [vmem:[%s3171_s28 + $0xa8] sm:$0xff] %vm604_vm1, %v4222_v39  ;;  %v1337_v41 = vsel %vm4232_vm8, %v4101_v28, %v1333_v22  ;;  %v5184_v54 = vld [vmem:[#allocation3_spill] sm:$0xff] }
 0x1b7   : > { %v1182_v20 = vsub.f32 1.5, %v1181_v16  ;;  %vm1185_vm11 = vweird.f32 %v4178_v8  ;;  %v4252_v36 = vadd.f32 %v3868_v61, %v1397_v56  ;;  %v1389_v31 = vmul.f32 %v3879_v51, %v1354_v34  ;;  %vm4261_vm12 = vmor %vm1254_vm9, %vm1255_vm10 }
 0x1b8   : > { %v1252_v19 = vsub.f32 1.5, %v1251_v50  ;;  %v4243_v15 = vpop.eup %2684  ;;  %v4249_v32 = vadd.f32 1e-05, %v963_v3  ;;  %v1571_v53 = vsel %vm604_vm1, %v4216_v7, 0.0  ;;  %v1547_v13 = vsel %vm604_vm1, %v4222_v39, 0.0 }
 0x1b9   : > { %v1183_v62 = vmul.f32 %v4178_v8, %v1182_v20  ;;  %v1099_v45 = vmul.f32 %v4243_v15, %v4193_v43  ;;  %1464 = vst.msk [vmem:[%s3171_s28 + $0x70] sm:$0xff] %vm604_vm1, %v4252_v36  ;;  %vm1184_vm13 = vweird.f32 %v4105_v30  ;;  %v995_v34 = vsub.f32 %v5184_v54, %v4187_v27  ;;  %1572 = vadd.xlane.f32.xlu0 %v1571_v53 }
 0x1ba   : > { %v4254_v47 = vpop.eup %2686  ;;  %v1253_v38 = vmul.f32 %v4189_v60, %v1252_v19  ;;  %2688 = vrsqrt.f32 %v4249_v32  ;;  %1548 = vadd.xlane.f32.xlu1 %v1547_v13  ;;  %v5185_v56 = vsub.f32 %v3100_v18, %v3992_v40  ;;  %vm4287_vm14 = vmor %vm1184_vm13, %vm1185_vm11  ;;  %v4304_v19 = vadd.f32 %v3868_v61, %v1389_v31 }
 0x1bb   : > { %v1259_v5 = vmul.f32 %v4254_v47, %v4198_v57  ;;  %v1510_v22 = vpop.xlane.xlu0 %1509  ;;  %v1100_v50 = vmul.f32 %v4243_v15, %v1099_v45  ;;  %v1187_v18 = vsel %vm4287_vm14, %v4178_v8, %v1183_v62  ;;  %vm1104_vm15 = vweird.f32 %v4193_v43 }
 0x1bc   : > { %v1257_v16 = vsel %vm4261_vm12, %v4189_v60, %v1253_v38  ;;  %v1378_v20 = vmul.f32 %v1337_v41, %v5185_v56  ;;  %v1626_v60 = vmul.f32 %v4252_v36, %v4252_v36  ;;  %v4295_v3 = vmul.f32 %v1510_v22, %v3057_v35  ;;  %1456 = vst.msk [vmem:[%s3171_s28 + $0x30] sm:$0xff] %vm604_vm1, %v4304_v19 }
 0x1bd   : > { %v1260_v30 = vmul.f32 %v4254_v47, %v1259_v5  ;;  %v1370_v40 = vmul.f32 %v1257_v16, %v986_v37  ;;  %v1101_v58 = vmul.f32 0.5, %v1100_v50  ;;  %v1748_v38 = vmul.f32 %v1670_v46, %v3057_v35  ;;  %v1558_v5 = vpop.xlane.xlu1 %1557  ;;  %v5188_v50 = vld [vmem:[#allocation4_spill] sm:$0xff] }
 0x1be   : > { %v1686_v45 = vsel %vm604_vm1, %v1626_v60, 0.0  ;;  %v1780_v28 = vmul.f32 %v4295_v3, %v4295_v3  ;;  %vm1105_vm0 = vweird.f32 %v4243_v15  ;;  %v4313_v26 = vmul.f32 %v1486_v44, %v3057_v35 }
 0x1bf   : > { %v1261_v41 = vmul.f32 0.5, %v1260_v30  ;;  %v1534_v53 = vpop.xlane.xlu2 %1533  ;;  %v1102_v13 = vsub.f32 1.5, %v1101_v58  ;;  %1687 = vadd.xlane.f32.xlu2 %v1686_v45  ;;  %v1363_v37 = vmul.f32 %v1187_v18, %v979_v1  ;;  %vm1265_vm2 = vweird.f32 %v4254_v47  ;;  %vm1106_vm3 = vmor %vm1104_vm15, %vm1105_vm0 }
 0x1c0   : > { %v4318_v11 = vpop.eup %2688  ;;  %v1812_v46 = vsub.f32 %v1748_v38, %v1780_v28  ;;  %v1526_v62 = vsel %vm604_vm1, %v4252_v36, 0.0  ;;  %v1405_v31 = vmul.f32 %v3879_v51, %v1370_v40  ;;  %v1502_v6 = vsel %vm604_vm1, %v4304_v19, 0.0 }
 0x1c1   : > { %v1262_v8 = vsub.f32 1.5, %v1261_v41  ;;  %v1103_v43 = vmul.f32 %v4243_v15, %v1102_v13  ;;  %v1339_v44 = vmul.f32 %v4318_v11, %v4249_v32  ;;  %v1413_v1 = vmul.f32 %v3879_v51, %v1378_v20  ;;  %1527 = vadd.xlane.f32.xlu0 %v1526_v62  ;;  %v5192_v13 = vld [vmem:[#allocation5_spill] sm:$0xff] }
 0x1c2   : > { %v4331_v16 = vadd.f32 1e-05, %v1812_v46  ;;  %v987_v56 = vsub.f32 %v5188_v50, %v4148_v24  ;;  %1503 = vadd.xlane.f32.xlu1 %v1502_v6  ;;  %vm1264_vm4 = vweird.f32 %v4198_v57  ;;  %v1772_v18 = vmul.f32 %v4313_v26, %v4313_v26  ;;  %v5194_v50 = vld [vmem:[#allocation2_spill] sm:$0xff] }
 0x1c3   : > { %v1263_v22 = vmul.f32 %v4254_v47, %v1262_v8  ;;  %v1646_v52 = vpop.xlane.xlu0 %1645  ;;  %v1107_v29 = vsel %vm1106_vm3, %v4243_v15, %v1103_v43  ;;  %v1340_v30 = vmul.f32 %v4318_v11, %v1339_v44  ;;  %vm4349_vm5 = vmor %vm1264_vm4, %vm1265_vm2  ;;  %v4354_v20 = vadd.f32 %v3868_v61, %v1405_v31 }
 0x1c4   : > { %v1355_v60 = vmul.f32 %v1107_v29, %v971_v33  ;;  %2690 = vrsqrt.f32 %v4331_v16  ;;  %v1740_v17 = vmul.f32 %v1646_v52, %v3057_v35  ;;  %v1633_v42 = vmul.f32 %v4222_v39, %v4222_v39 }
 0x1c5   : > { %v1341_v15 = vmul.f32 0.5, %v1340_v30  ;;  %v1267_v57 = vsel %vm4349_vm5, %v4254_v47, %v1263_v22  ;;  %v1513_v33 = vpop.xlane.xlu1 %1512  ;;  %v4363_v58 = vadd.f32 %v3868_v61, %v1413_v1  ;;  %v1398_v38 = vmul.f32 %v3879_v51, %v1363_v37  ;;  %1472 = vst.msk [vmem:[%s3171_s28 + $0xb0] sm:$0xff] %vm604_vm1, %v4354_v20 }
 0x1c6   : > { %v1390_v41 = vmul.f32 %v3879_v51, %v1355_v60  ;;  %vm1345_vm6 = vweird.f32 %v4318_v11  ;;  %v1550_v28 = vsel %vm604_vm1, %v4354_v20, 0.0  ;;  %v1804_v47 = vsub.f32 %v1740_v17, %v1772_v18  ;;  %v5195_v18 = vld [vmem:[#allocation6_spill] sm:$0xff] }
 0x1c7   : > { %v1489_v40 = vpop.xlane.xlu2 %1488  ;;  %5191 = vst [vmem:[#allocation3_spill] sm:$0xff] %v4363_v58  ;;  %v1342_v45 = vsub.f32 1.5, %v1341_v15  ;;  %v1836_v8 = vsub.f32 %v5192_v13, %v4313_v26  ;;  %v4376_v46 = vmul.f32 %v1558_v5, %v3057_v35  ;;  %1551 = vadd.xlane.f32.xlu2 %v1550_v28  ;;  %v1371_v43 = vmul.f32 %v1267_v57, %v987_v56  ;;  %v5196_v15 = vld [vmem:[#allocation8_spill] sm:$0xff] }
 0x1c8   : > { %1480 = vst.msk [vmem:[%s3171_s28 + $0xf0] sm:$0xff] %vm604_vm1, %v4363_v58  ;;  %v4382_v37 = vadd.f32 %v3868_v61, %v1390_v41  ;;  %vm1344_vm7 = vweird.f32 %v4249_v32  ;;  %v4386_v62 = vadd.f32 1e-05, %v1804_v47  ;;  %v4391_v5 = vmul.f32 %v1534_v53, %v3057_v35 }
 0x1c9   : > { %v1343_v44 = vmul.f32 %v4318_v11, %v1342_v45  ;;  %vm1346_vm8 = vmor %vm1344_vm7, %vm1345_vm6  ;;  %v1707_v22 = vsel %vm604_vm1, %v1633_v42, 0.0  ;;  %v1574_v6 = vsel %vm604_vm1, %v4363_v58, 0.0  ;;  %v4400_v32 = vadd.f32 %v3868_v61, %v1398_v38 }
 0x1ca   : > { %5193 = vst [vmem:[#allocation4_spill] sm:$0xff] %v4382_v37  ;;  %v4388_v31 = vpop.eup %2690  ;;  %v1844_v56 = vsub.f32 %v5194_v50, %v4295_v3  ;;  %2692 = vrsqrt.f32 %v4386_v62  ;;  %1708 = vadd.xlane.f32.xlu0 %v1707_v22  ;;  %1575 = vadd.xlane.f32.xlu1 %v1574_v6  ;;  %v1796_v30 = vmul.f32 %v4376_v46, %v4376_v46  ;;  %v1505_v27 = vsel %vm604_vm1, %v4382_v37, 0.0 }
 0x1cb   : > { %1457 = vst.msk [vmem:[%s3171_s28 + $0x38] sm:$0xff] %vm604_vm1, %v4382_v37  ;;  %v1718_v52 = vpop.xlane.xlu0 %1717  ;;  %v1347_v1 = vsel %vm1346_vm8, %v4318_v11, %v1343_v44  ;;  %v1981_v53 = vmul.f32 %v4388_v31, %v4331_v16  ;;  %v1618_v11 = vmul.f32 %v4304_v19, %v4304_v19  ;;  %v1406_v54 = vmul.f32 %v3879_v51, %v1371_v43 }
 0x1cc   : > { %v1379_v29 = vmul.f32 %v1347_v1, %v995_v34  ;;  %v1764_v60 = vmul.f32 %v1718_v52, %v3057_v35  ;;  %1465 = vst.msk [vmem:[%s3171_s28 + $0x78] sm:$0xff] %vm604_vm1, %v4400_v32  ;;  %v1788_v34 = vmul.f32 %v4391_v5, %v4391_v5  ;;  %v4430_v42 = vmul.f32 %v1513_v33, %v3057_v35 }
 0x1cd   : > { %v1982_v3 = vmul.f32 %v4388_v31, %v1981_v53  ;;  %v1694_v41 = vpop.xlane.xlu1 %1693  ;;  %vm1986_vm9 = vweird.f32 %v4331_v16  ;;  %v4436_v47 = vmul.f32 %v1489_v40, %v3057_v35  ;;  %v1662_v33 = vsel %vm604_vm1, %v1618_v11, 0.0 }
 0x1ce   : > { %v1828_v57 = vsub.f32 %v1764_v60, %v1796_v30  ;;  %v1756_v45 = vmul.f32 %v1694_v41, %v3057_v35  ;;  %v1414_v28 = vmul.f32 %v3879_v51, %v1379_v29  ;;  %v4442_v22 = vadd.f32 %v3868_v61, %v1406_v54  ;;  %v5197_v30 = vld [vmem:[#allocation7_spill] sm:$0xff] }
 0x1cf   : > { %v1983_v38 = vmul.f32 0.5, %v1982_v3  ;;  %1506 = vadd.xlane.f32.xlu2 %v1505_v27  ;;  %v1561_v44 = vpop.xlane.xlu2 %1560  ;;  %vm1987_vm10 = vweird.f32 %v4388_v31  ;;  %v1781_v50 = vmul.f32 %v4430_v42, %v4430_v42  ;;  %v1529_v53 = vsel %vm604_vm1, %v4400_v32, 0.0  ;;  %v4470_v27 = vld [vmem:[%s5103_s5] ss:$0 sm:$0xff] }
 0x1d0   : > { %v4438_v43 = vadd.f32 1e-05, %v1828_v57  ;;  %v4444_v6 = vpop.eup %2692  ;;  %v1820_v1 = vsub.f32 %v1756_v45, %v1788_v34  ;;  %v4448_v51 = vadd.f32 %v3868_v61, %v1414_v28  ;;  %1473 = vst.msk [vmem:[%s3171_s28 + $0xb8] sm:$0xff] %vm604_vm1, %v4442_v22  ;;  %vm2354_vm11 = vcmask 781312   ;;  %vm1988_vm12 = vmor %vm1986_vm9, %vm1987_vm10  ;;  %v5198_v57 = vld [vmem:[#allocation9_spill] sm:$0xff] }
 0x1d1   : > { %v1984_v52 = vsub.f32 1.5, %v1983_v38  ;;  %v1901_v40 = vmul.f32 %v4444_v6, %v4386_v62  ;;  %v1627_v3 = vmul.f32 %v4400_v32, %v4400_v32  ;;  %v1773_v34 = vmul.f32 %v4436_v47, %v4436_v47 }
 0x1d2   : > { %2694 = vrsqrt.f32 %v4438_v43  ;;  %v4463_v11 = vadd.f32 1e-05, %v1820_v1  ;;  %1663 = vadd.xlane.f32.xlu0 %v1662_v33  ;;  %1530 = vadd.xlane.f32.xlu1 %v1529_v53  ;;  %1481 = vst.msk [vmem:[%s3171_s28 + $0xf8] sm:$0xff] %vm604_vm1, %v4448_v51  ;;  %v1577_v16 = vsel %vm604_vm1, %v4448_v51, 0.0  ;;  %v1634_v28 = vmul.f32 %v4354_v20, %v4354_v20  ;;  %v4494_v33 = vld [vmem:[%s5104_s6] ss:$0 sm:$0xff] }
 0x1d3   : > { %v1673_v29 = vpop.xlane.xlu0 %1672  ;;  %v1985_v61 = vmul.f32 %v4388_v31, %v1984_v52  ;;  %v1902_v54 = vmul.f32 %v4444_v6, %v1901_v40  ;;  %vm1906_vm13 = vweird.f32 %v4386_v62  ;;  %v1641_v41 = vmul.f32 %v4216_v7, %v4216_v7 }
 0x1d4   : > { %v1749_v38 = vmul.f32 %v1673_v29, %v3057_v35  ;;  %2696 = vrsqrt.f32 %v4463_v11  ;;  %v1689_v29 = vsel %vm604_vm1, %v1627_v3, 0.0  ;;  %vm1907_vm14 = vweird.f32 %v4444_v6 }
 0x1d5   : > { %v1989_v45 = vsel %vm1988_vm12, %v4388_v31, %v1985_v61  ;;  %v1903_v1 = vmul.f32 0.5, %v1902_v54  ;;  %v1649_v53 = vpop.xlane.xlu1 %1648  ;;  %v1619_v61 = vmul.f32 %v4382_v37, %v4382_v37  ;;  %v4512_v54 = vmul.f32 %v1561_v44, %v3057_v35  ;;  %vm1908_vm15 = vmor %vm1906_vm13, %vm1907_vm14 }
 0x1d6   : > { %v2228_v52 = vmul.f32 %v1989_v45, %v1844_v56  ;;  %v1813_v40 = vsub.f32 %v1749_v38, %v1781_v50  ;;  %v1741_v31 = vmul.f32 %v1649_v53, %v3057_v35  ;;  %v1710_v45 = vsel %vm604_vm1, %v1634_v28, 0.0 }
 0x1d7   : > { %v1904_v56 = vsub.f32 1.5, %v1903_v1  ;;  %1578 = vadd.xlane.f32.xlu2 %v1577_v16  ;;  %v1516_v1 = vpop.xlane.xlu2 %1515  ;;  %v1635_v16 = vmul.f32 %v4442_v22, %v4442_v22  ;;  %v1642_v28 = vmul.f32 %v4363_v58, %v4363_v58  ;;  %vm2146_vm0 = vweird.f32 %v4438_v43 }
 0x1d8   : > { %v4503_v60 = vpop.eup %2694  ;;  %v2263_v17 = vmul.f32 %v4470_v27, %v2228_v52  ;;  %v4507_v50 = vadd.f32 1e-05, %v1813_v40  ;;  %v1805_v38 = vsub.f32 %v1741_v31, %v1773_v34  ;;  %v1665_v34 = vsel %vm604_vm1, %v1619_v61, 0.0 }
 0x1d9   : > { %v2141_v3 = vmul.f32 %v4503_v60, %v4438_v43  ;;  %v1905_v52 = vmul.f32 %v4444_v6, %v1904_v56  ;;  %vm2066_vm2 = vweird.f32 %v4463_v11  ;;  %vm2147_vm3 = vweird.f32 %v4503_v60 }
 0x1da   : > { %v2298_v53 = vadd.f32 %v4494_v33, %v2263_v17  ;;  %2698 = vrsqrt.f32 %v4507_v50  ;;  %v4520_v24 = vpop.eup %2696  ;;  %v4534_v44 = vadd.f32 1e-05, %v1805_v38  ;;  %1690 = vadd.xlane.f32.xlu0 %v1689_v29  ;;  %1711 = vadd.xlane.f32.xlu1 %v1710_v45  ;;  %v1713_v45 = vsel %vm604_vm1, %v1635_v16, 0.0  ;;  %vm2148_vm4 = vmor %vm2146_vm0, %vm2147_vm3 }
 0x1db   : > { %v1537_v40 = vpop.xlane.xlu0 %1536  ;;  %v2142_v17 = vmul.f32 %v4503_v60, %v2141_v3  ;;  %v1909_v56 = vsel %vm1908_vm15, %v4444_v6, %v1905_v52  ;;  %v2061_v62 = vmul.f32 %v4520_v24, %v4463_v11  ;;  %v1797_v6 = vmul.f32 %v4512_v54, %v4512_v54 }
 0x1dc   : > { %v2330_v31 = vpack.c.bf16 %v2298_v53, %v2298_v53  ;;  %v2220_v3 = vmul.f32 %v1909_v56, %v1836_v8  ;;  %2700 = vrsqrt.f32 %v4534_v44  ;;  %v4548_v29 = vmul.f32 %v1537_v40, %v3057_v35 }
 0x1dd   : > { %v2143_v38 = vmul.f32 0.5, %v2142_v17  ;;  %v2062_v61 = vmul.f32 %v4520_v24, %v2061_v62  ;;  %v1721_v53 = vpop.xlane.xlu1 %1720  ;;  %v1553_v17 = vsel %vm604_vm1, %v4442_v22, 0.0  ;;  %v1734_v56 = vsel %vm604_vm1, %v1642_v28, 0.0 }
 0x1de   : > { %2363 = vst.msk [vmem:[%s4527_s19 + $0x20] sm:$0xf] %vm2354_vm11, %v2330_v31  ;;  %v2255_v26 = vmul.f32 %v4470_v27, %v2220_v3  ;;  %v1765_v8 = vmul.f32 %v1721_v53, %v3057_v35  ;;  %v1731_v31 = vsel %vm604_vm1, %v1641_v41, 0.0  ;;  %vm2067_vm5 = vweird.f32 %v4520_v24 }
 0x1df   : > { %v2144_v13 = vsub.f32 1.5, %v2143_v38  ;;  %v2063_v40 = vmul.f32 0.5, %v2062_v61  ;;  %1714 = vadd.xlane.f32.xlu2 %v1713_v45  ;;  %v1789_v38 = vmul.f32 %v4548_v29, %v4548_v29  ;;  %v4576_v41 = vmul.f32 %v1516_v1, %v3057_v35  ;;  %vm2068_vm7 = vmor %vm2066_vm2, %vm2067_vm5 }
 0x1e0   : > { %v4560_v52 = vpop.eup %2698  ;;  %v2290_v16 = vadd.f32 %v4494_v33, %v2255_v26  ;;  %v1829_v28 = vsub.f32 %v1765_v8, %v1797_v6  ;;  %v1697_v45 = vpop.xlane.xlu2 %1696  ;;  %v5199_v43 = vsub.f32 %v5195_v18, %v4376_v46  ;;  %vm1996_vm6 = vweird.f32 %v4507_v50 }
 0x1e1   : > { %v2145_v62 = vmul.f32 %v4503_v60, %v2144_v13  ;;  %v1991_v3 = vmul.f32 %v4560_v52, %v4507_v50  ;;  %v2064_v61 = vsub.f32 1.5, %v2063_v40  ;;  %v1757_v7 = vmul.f32 %v1697_v45, %v3057_v35 }
 0x1e2   : > { %v4578_v53 = vpop.eup %2700  ;;  %v2322_v26 = vpack.c.bf16 %v2290_v16, %v2290_v16  ;;  %1554 = vadd.xlane.f32.xlu0 %v1553_v17  ;;  %1666 = vadd.xlane.f32.xlu1 %v1665_v34  ;;  %v4596_v8 = vadd.f32 1e-05, %v1829_v28  ;;  %v5200_v11 = vsub.f32 %v5196_v15, %v4391_v5  ;;  %vm1997_vm8 = vweird.f32 %v4560_v52 }
 0x1e3   : > { %v2149_v13 = vsel %vm2148_vm4, %v4503_v60, %v2145_v62  ;;  %v1992_v58 = vmul.f32 %v4560_v52, %v1991_v3  ;;  %v2065_v37 = vmul.f32 %v4520_v24, %v2064_v61  ;;  %v1911_v1 = vmul.f32 %v4578_v53, %v4534_v44  ;;  %v1492_v6 = vpop.xlane.xlu0 %1491  ;;  %vm1998_vm9 = vmor %vm1996_vm6, %vm1997_vm8 }
 0x1e4   : > { %v2244_v40 = vmul.f32 %v2149_v13, %v5199_v43  ;;  %2355 = vst.msk [vmem:[%s4527_s19] sm:$0xf] %vm2354_vm11, %v2322_v26  ;;  %v1821_v46 = vsub.f32 %v1757_v7, %v1789_v38  ;;  %v4599_v18 = vmul.f32 %v1492_v6, %v3057_v35  ;;  %v1782_v62 = vmul.f32 %v4576_v41, %v4576_v41 }
 0x1e5   : > { %v1993_v60 = vmul.f32 0.5, %v1992_v58  ;;  %v2069_v16 = vsel %vm2068_vm7, %v4520_v24, %v2065_v37  ;;  %v1912_v34 = vmul.f32 %v4578_v53, %v1911_v1  ;;  %v1676_v3 = vpop.xlane.xlu1 %1675  ;;  %2702 = vrsqrt.f32 %v4596_v8 }
 0x1e6   : > { %v2279_v17 = vmul.f32 %v4470_v27, %v2244_v40  ;;  %v2236_v58 = vmul.f32 %v2069_v16, %v5200_v11  ;;  %v4612_v28 = vadd.f32 1e-05, %v1821_v46  ;;  %v1643_v37 = vmul.f32 %v4448_v51, %v4448_v51 }
 0x1e7   : > { %v1994_v61 = vsub.f32 1.5, %v1993_v60  ;;  %v1913_v38 = vmul.f32 0.5, %v1912_v34  ;;  %1732 = vadd.xlane.f32.xlu2 %v1731_v31  ;;  %v1774_v15 = vmul.f32 %v4599_v18, %v4599_v18  ;;  %v1750_v45 = vmul.f32 %v1676_v3, %v3057_v35 }
 0x1e8   : > { %v2314_v7 = vadd.f32 %v4494_v33, %v2279_v17  ;;  %v2271_v24 = vmul.f32 %v4470_v27, %v2236_v58  ;;  %vm1917_vm10 = vweird.f32 %v4578_v53  ;;  %2704 = vrsqrt.f32 %v4612_v28  ;;  %v1652_v31 = vpop.xlane.xlu2 %1651 }
 0x1e9   : > { %v1995_v5 = vmul.f32 %v4560_v52, %v1994_v61  ;;  %v1914_v13 = vsub.f32 1.5, %v1913_v38  ;;  %v1814_v1 = vsub.f32 %v1750_v45, %v1782_v62  ;;  %v1742_v6 = vmul.f32 %v1652_v31, %v3057_v35 }
 0x1ea   : > { %v2346_v26 = vpack.c.bf16 %v2314_v7, %v2314_v7  ;;  %v2306_v43 = vadd.f32 %v4494_v33, %v2271_v24  ;;  %1735 = vadd.xlane.f32.xlu0 %v1734_v56  ;;  %v5201_v50 = vsub.f32 %v5197_v30, %v4430_v42  ;;  %vm1916_vm12 = vweird.f32 %v4534_v44 }
 0x1eb   : > { %v1999_v40 = vsel %vm1998_vm9, %v4560_v52, %v1995_v5  ;;  %v1915_v46 = vmul.f32 %v4578_v53, %v1914_v13  ;;  %v1737_v17 = vsel %vm604_vm1, %v1643_v37, 0.0  ;;  %v1564_v16 = vpop.xlane.xlu0 %1563  ;;  %v2703_v34 = vpop.eup %2702  ;;  %vm1918_vm13 = vmor %vm1916_vm12, %vm1917_vm10  ;;  %v4638_v56 = vadd.f32 1e-05, %v1814_v1 }
 0x1ec   : > { %2379 = vst.msk [vmem:[%s4527_s19 + $0x60] sm:$0xf] %vm2354_vm11, %v2346_v26  ;;  %v2229_v60 = vmul.f32 %v1999_v40, %v5201_v50  ;;  %v2338_v52 = vpack.c.bf16 %v2306_v43, %v2306_v43  ;;  %v1806_v62 = vsub.f32 %v1742_v6, %v1774_v15  ;;  %1738 = vadd.xlane.f32.xlu1 %v1737_v17  ;;  %vm2157_vm1 = vweird.f32 %v2703_v34 }
 0x1ed   : > { %v4641_v42 = vmul.f32 %v1564_v16, %v3057_v35  ;;  %v1919_v3 = vsel %vm1918_vm13, %v4578_v53, %v1915_v46  ;;  %v2151_v44 = vmul.f32 %v2703_v34, %v4596_v8  ;;  %v1540_v11 = vpop.xlane.xlu1 %1539  ;;  %v5202_v58 = vsub.f32 %v5198_v57, %v4436_v47 }
 0x1ee   : > { %v2264_v30 = vmul.f32 %v4470_v27, %v2229_v60  ;;  %2371 = vst.msk [vmem:[%s4527_s19 + $0x40] sm:$0xf] %vm2354_vm11, %v2338_v52  ;;  %2706 = vrsqrt.f32 %v4638_v56  ;;  %v4652_v7 = vadd.f32 1e-05, %v1806_v62  ;;  %v2705_v38 = vpop.eup %2704  ;;  %v1861_v17 = vsub.f32 %v3461_v12, %v4512_v54 }
 0x1ef   : > { %v2221_v61 = vmul.f32 %v1919_v3, %v5202_v58  ;;  %v2152_v24 = vmul.f32 %v2703_v34, %v2151_v44  ;;  %v2071_v5 = vmul.f32 %v2705_v38, %v4612_v28  ;;  %v1798_v15 = vmul.f32 %v4641_v42, %v4641_v42 }
 0x1f0   : > { %v2299_v37 = vadd.f32 %v4494_v33, %v2264_v30  ;;  %2708 = vrsqrt.f32 %v4652_v7  ;;  %v1724_v45 = vpop.xlane.xlu2 %1723  ;;  %vm2156_vm14 = vweird.f32 %v4596_v8  ;;  %vm2076_vm0 = vweird.f32 %v4612_v28 }
 0x1f1   : > { %v2256_v53 = vmul.f32 %v4470_v27, %v2221_v61  ;;  %v2153_v57 = vmul.f32 0.5, %v2152_v24  ;;  %v2072_v13 = vmul.f32 %v2705_v38, %v2071_v5  ;;  %v1766_v31 = vmul.f32 %v1724_v45, %v3057_v35  ;;  %vm2158_vm15 = vmor %vm2156_vm14, %vm2157_vm1 }
 0x1f2   : > { %v2331_v47 = vpack.c.bf16 %v2299_v37, %v2299_v37  ;;  %vm2077_vm2 = vweird.f32 %v2705_v38  ;;  %v4678_v54 = vmul.f32 %v1540_v11, %v3057_v35  ;;  %v1846_v28 = vsub.f32 %v3536_v59, %v4576_v41 }
 0x1f3   : > { %v2291_v26 = vadd.f32 %v4494_v33, %v2256_v53  ;;  %v2154_v43 = vsub.f32 1.5, %v2153_v57  ;;  %v1519_v40 = vpop.xlane.xlu0 %1518  ;;  %v2073_v50 = vmul.f32 0.5, %v2072_v13  ;;  %v1830_v60 = vsub.f32 %v1766_v31, %v1798_v15  ;;  %vm2078_vm3 = vmor %vm2076_vm0, %vm2077_vm2 }
 0x1f4   : > { %2364 = vst.msk [vmem:[%s4527_s19 + $0x24] sm:$0xf] %vm2354_vm11, %v2331_v47  ;;  %v2707_v1 = vpop.eup %2706  ;;  %v4665_v46 = vmul.f32 %v1519_v40, %v3057_v35  ;;  %v1853_v53 = vsub.f32 %v3452_v49, %v4548_v29  ;;  %vm2006_vm4 = vweird.f32 %v4638_v56  ;;  %v1790_v49 = vmul.f32 %v4678_v54, %v4678_v54 }
 0x1f5   : > { %v2323_v6 = vpack.c.bf16 %v2291_v26, %v2291_v26  ;;  %v2155_v16 = vmul.f32 %v2703_v34, %v2154_v43  ;;  %v2001_v52 = vmul.f32 %v2707_v1, %v4638_v56  ;;  %v1495_v62 = vpop.xlane.xlu1 %1494  ;;  %v2074_v3 = vsub.f32 1.5, %v2073_v50 }
 0x1f6   : > { %v2709_v30 = vpop.eup %2708  ;;  %v4674_v44 = vadd.f32 1e-05, %v1830_v60  ;;  %v1783_v24 = vmul.f32 %v4665_v46, %v4665_v46  ;;  %vm2007_vm5 = vweird.f32 %v2707_v1  ;;  %vm1926_vm8 = vweird.f32 %v4652_v7 }
 0x1f7   : > { %2356 = vst.msk [vmem:[%s4527_s19 + $0x4] sm:$0xf] %vm2354_vm11, %v2323_v6  ;;  %v2159_v58 = vsel %vm2158_vm15, %v2703_v34, %v2155_v16  ;;  %v2002_v61 = vmul.f32 %v2707_v1, %v2001_v52  ;;  %v1921_v12 = vmul.f32 %v2709_v30, %v4652_v7  ;;  %v2075_v37 = vmul.f32 %v2705_v38, %v2074_v3  ;;  %vm2008_vm7 = vmor %vm2006_vm4, %vm2007_vm5 }
 0x1f8   : > { %v2245_v8 = vmul.f32 %v2159_v58, %v1861_v17  ;;  %2710 = vrsqrt.f32 %v4674_v44  ;;  %v1679_v15 = vpop.xlane.xlu2 %1678  ;;  %vm1927_vm6 = vweird.f32 %v2709_v30  ;;  %v4708_v56 = vmul.f32 %v1495_v62, %v3057_v35 }
 0x1f9   : > { %v2003_v34 = vmul.f32 0.5, %v2002_v61  ;;  %v1922_v5 = vmul.f32 %v2709_v30, %v1921_v12  ;;  %v2079_v47 = vsel %vm2078_vm3, %v2705_v38, %v2075_v37  ;;  %v1751_v57 = vmul.f32 %v1679_v15, %v3057_v35  ;;  %v5203_v12 = vld [vmem:[#allocation10_spill] sm:$0xff]  ;;  %vm1928_vm9 = vmor %vm1926_vm8, %vm1927_vm6 }
 0x1fa   : > { %v2280_v11 = vmul.f32 %v4470_v27, %v2245_v8  ;;  %v2237_v45 = vmul.f32 %v2079_v47, %v1853_v53  ;;  %v1838_v8 = vsub.f32 %v5203_v12, %v4599_v18  ;;  %vm2166_vm12 = vweird.f32 %v4674_v44 }
 0x1fb   : > { %v2004_v26 = vsub.f32 1.5, %v2003_v34  ;;  %v1923_v13 = vmul.f32 0.5, %v1922_v5  ;;  %v1700_v31 = vpop.xlane.xlu0 %1699  ;;  %v1815_v29 = vsub.f32 %v1751_v57, %v1783_v24 }
 0x1fc   : > { %v2315_v59 = vadd.f32 %v4494_v33, %v2280_v11  ;;  %v1758_v41 = vmul.f32 %v1700_v31, %v3057_v35  ;;  %v2272_v38 = vmul.f32 %v4470_v27, %v2237_v45 }
 0x1fd   : > { %v2005_v43 = vmul.f32 %v2707_v1, %v2004_v26  ;;  %v1924_v40 = vsub.f32 1.5, %v1923_v13  ;;  %v1567_v6 = vpop.xlane.xlu1 %1566  ;;  %v4698_v17 = vadd.f32 1e-05, %v1815_v29 }
 0x1fe   : > { %v2711_v50 = vpop.eup %2710  ;;  %v2347_v60 = vpack.c.bf16 %v2315_v59, %v2315_v59  ;;  %v1822_v16 = vsub.f32 %v1758_v41, %v1790_v49  ;;  %v2307_v52 = vadd.f32 %v4494_v33, %v2272_v38  ;;  %v1862_v38 = vsub.f32 %v3664_v48, %v4641_v42 }
 0x1ff   : > { %v2009_v3 = vsel %vm2008_vm7, %v2707_v1, %v2005_v43  ;;  %v1925_v58 = vmul.f32 %v2709_v30, %v1924_v40  ;;  %v2161_v61 = vmul.f32 %v2711_v50, %v4674_v44  ;;  %2712 = vrsqrt.f32 %v4698_v17 }
 0x200   : > { %2380 = vst.msk [vmem:[%s4527_s19 + $0x64] sm:$0xf] %vm2354_vm11, %v2347_v60  ;;  %v2230_v37 = vmul.f32 %v2009_v3, %v1846_v28  ;;  %v2339_v7 = vpack.c.bf16 %v2307_v52, %v2307_v52  ;;  %v4711_v53 = vadd.f32 1e-05, %v1822_v16  ;;  %v1543_v34 = vpop.xlane.xlu2 %1542  ;;  %vm2167_vm10 = vweird.f32 %v2711_v50 }
 0x201   : > { %v1929_v24 = vsel %vm1928_vm9, %v2709_v30, %v1925_v58  ;;  %v2162_v1 = vmul.f32 %v2711_v50, %v2161_v61  ;;  %v1775_v30 = vmul.f32 %v4708_v56, %v4708_v56  ;;  %vm2168_vm13 = vmor %vm2166_vm12, %vm2167_vm10  ;;  %v4730_v43 = vmul.f32 %v1567_v6, %v3057_v35 }
 0x202   : > { %v2265_v5 = vmul.f32 %v4470_v27, %v2230_v37  ;;  %v2222_v15 = vmul.f32 %v1929_v24, %v1838_v8  ;;  %2372 = vst.msk [vmem:[%s4527_s19 + $0x44] sm:$0xf] %vm2354_vm11, %v2339_v7  ;;  %2714 = vrsqrt.f32 %v4711_v53  ;;  %v4735_v3 = vmul.f32 %v1543_v34, %v3057_v35 }
 0x203   : > { %v2163_v18 = vmul.f32 0.5, %v2162_v1  ;;  %v1655_v28 = vpop.xlane.xlu0 %1654  ;;  %v1847_v37 = vsub.f32 %v3742_v23, %v4665_v46  ;;  %vm2016_vm14 = vweird.f32 %v4698_v17  ;;  %vm2086_vm2 = vweird.f32 %v4711_v53 }
 0x204   : > { %v2300_v62 = vadd.f32 %v4494_v33, %v2265_v5  ;;  %v2257_v11 = vmul.f32 %v4470_v27, %v2222_v15  ;;  %v1743_v47 = vmul.f32 %v1655_v28, %v3057_v35  ;;  %v1791_v24 = vmul.f32 %v4735_v3, %v4735_v3 }
 0x205   : > { %v2164_v57 = vsub.f32 1.5, %v2163_v18  ;;  %v1522_v45 = vpop.xlane.xlu1 %1521  ;;  %v2713_v26 = vpop.eup %2712 }
 0x206   : > { %v2332_v13 = vpack.c.bf16 %v2300_v62, %v2300_v62  ;;  %v2292_v31 = vadd.f32 %v4494_v33, %v2257_v11  ;;  %v1807_v59 = vsub.f32 %v1743_v47, %v1775_v30  ;;  %v2011_v29 = vmul.f32 %v2713_v26, %v4698_v17 }
 0x207   : > { %v2165_v49 = vmul.f32 %v2711_v50, %v2164_v57  ;;  %vm2017_vm1 = vweird.f32 %v2713_v26  ;;  %v4753_v62 = vmul.f32 %v1522_v45, %v3057_v35  ;;  %v1854_v17 = vsub.f32 %v3686_v4, %v4678_v54 }
 0x208   : > { %2365 = vst.msk [vmem:[%s4527_s19 + $0x28] sm:$0xf] %vm2354_vm11, %v2332_v13  ;;  %v2324_v41 = vpack.c.bf16 %v2292_v31, %v2292_v31  ;;  %v4732_v40 = vadd.f32 1e-05, %v1807_v59  ;;  %v2715_v60 = vpop.eup %2714  ;;  %v2012_v52 = vmul.f32 %v2713_v26, %v2011_v29  ;;  %v1498_v44 = vpop.xlane.xlu2 %1497  ;;  %vm2018_vm0 = vmor %vm2016_vm14, %vm2017_vm1 }
 0x209   : > { %v2169_v16 = vsel %vm2168_vm13, %v2711_v50, %v2165_v49  ;;  %v2081_v61 = vmul.f32 %v2715_v60, %v4711_v53  ;;  %v1799_v50 = vmul.f32 %v4730_v43, %v4730_v43  ;;  %vm2087_vm15 = vweird.f32 %v2715_v60 }
 0x20a   : > { %2357 = vst.msk [vmem:[%s4527_s19 + $0x8] sm:$0xf] %vm2354_vm11, %v2324_v41  ;;  %v2246_v58 = vmul.f32 %v2169_v16, %v1862_v38  ;;  %2716 = vrsqrt.f32 %v4732_v40  ;;  %v2013_v48 = vmul.f32 0.5, %v2012_v52  ;;  %vm2088_vm3 = vmor %vm2086_vm2, %vm2087_vm15  ;;  %v4771_v52 = vmul.f32 %v1498_v44, %v3057_v35 }
 0x20b   : > { %v1727_v42 = vpop.xlane.xlu0 %1726  ;;  %v2082_v12 = vmul.f32 %v2715_v60, %v2081_v61  ;;  %vm1936_vm5 = vweird.f32 %v4732_v40 }
 0x20c   : > { %v2281_v6 = vmul.f32 %v4470_v27, %v2246_v58  ;;  %v1767_v8 = vmul.f32 %v1727_v42, %v3057_v35  ;;  %v2014_v7 = vsub.f32 1.5, %v2013_v48 }
 0x20d   : > { %v1703_v1 = vpop.xlane.xlu1 %1702  ;;  %v2083_v5 = vmul.f32 0.5, %v2082_v12 }
 0x20e   : > { %v2316_v34 = vadd.f32 %v4494_v33, %v2281_v6  ;;  %v1831_v15 = vsub.f32 %v1767_v8, %v1799_v50  ;;  %v1759_v18 = vmul.f32 %v1703_v1, %v3057_v35  ;;  %v2015_v28 = vmul.f32 %v2713_v26, %v2014_v7 }
 0x20f   : > { %v2084_v11 = vsub.f32 1.5, %v2083_v5  ;;  %v1776_v50 = vmul.f32 %v4771_v52, %v4771_v52 }
 0x210   : > { %v2717_v23 = vpop.eup %2716  ;;  %v2348_v46 = vpack.c.bf16 %v2316_v34, %v2316_v34  ;;  %v4755_v30 = vadd.f32 1e-05, %v1831_v15  ;;  %v1823_v47 = vsub.f32 %v1759_v18, %v1791_v24  ;;  %v2019_v57 = vsel %vm2018_vm0, %v2713_v26, %v2015_v28 }
 0x211   : > { %v1931_v13 = vmul.f32 %v2717_v23, %v4732_v40  ;;  %v1570_v31 = vpop.xlane.xlu2 %1569  ;;  %v2231_v59 = vmul.f32 %v2019_v57, %v1847_v37  ;;  %v2085_v49 = vmul.f32 %v2715_v60, %v2084_v11  ;;  %v1784_v26 = vmul.f32 %v4753_v62, %v4753_v62 }
 0x212   : > { %2381 = vst.msk [vmem:[%s4527_s19 + $0x68] sm:$0xf] %vm2354_vm11, %v2348_v46  ;;  %2718 = vrsqrt.f32 %v4755_v30  ;;  %v4767_v29 = vadd.f32 1e-05, %v1823_v47  ;;  %vm1937_vm4 = vweird.f32 %v2717_v23  ;;  %v1839_v34 = vsub.f32 %v3749_v14, %v4708_v56 }
 0x213   : > { %v1932_v45 = vmul.f32 %v2717_v23, %v1931_v13  ;;  %v1682_v41 = vpop.xlane.xlu0 %1681  ;;  %v2266_v38 = vmul.f32 %v4470_v27, %v2231_v59  ;;  %v2089_v16 = vsel %vm2088_vm3, %v2715_v60, %v2085_v49  ;;  %vm1938_vm6 = vmor %vm1936_vm5, %vm1937_vm4  ;;  %v4792_v47 = vmul.f32 %v1570_v31, %v3057_v35 }
 0x214   : > { %v1752_v53 = vmul.f32 %v1682_v41, %v3057_v35  ;;  %v2238_v58 = vmul.f32 %v2089_v16, %v1854_v17  ;;  %2720 = vrsqrt.f32 %v4767_v29  ;;  %v1863_v59 = vsub.f32 %v3833_v21, %v4730_v43 }
 0x215   : > { %v1933_v61 = vmul.f32 0.5, %v1932_v45  ;;  %v1658_v4 = vpop.xlane.xlu1 %1657  ;;  %v2301_v54 = vadd.f32 %v4494_v33, %v2266_v38  ;;  %v1855_v41 = vsub.f32 %v3871_v10, %v4735_v3  ;;  %v1800_v21 = vmul.f32 %v4792_v47, %v4792_v47 }
 0x216   : > { %v1816_v48 = vsub.f32 %v1752_v53, %v1784_v26  ;;  %v2273_v42 = vmul.f32 %v4470_v27, %v2238_v58  ;;  %v1744_v60 = vmul.f32 %v1658_v4, %v3057_v35  ;;  %vm2176_vm8 = vweird.f32 %v4755_v30 }
 0x217   : > { %v1934_v6 = vsub.f32 1.5, %v1933_v61  ;;  %v2333_v44 = vpack.c.bf16 %v2301_v54, %v2301_v54  ;;  %vm2096_vm12 = vweird.f32 %v4767_v29 }
 0x218   : > { %v2719_v12 = vpop.eup %2718  ;;  %v4780_v8 = vadd.f32 1e-05, %v1816_v48  ;;  %v2308_v37 = vadd.f32 %v4494_v33, %v2273_v42  ;;  %v1808_v5 = vsub.f32 %v1744_v60, %v1776_v50 }
 0x219   : > { %v1935_v7 = vmul.f32 %v2717_v23, %v1934_v6  ;;  %v2171_v24 = vmul.f32 %v2719_v12, %v4755_v30  ;;  %v1525_v1 = vpop.xlane.xlu2 %1524  ;;  %2366 = vst.msk [vmem:[%s4527_s19 + $0x2c] sm:$0xf] %vm2354_vm11, %v2333_v44  ;;  %vm2177_vm7 = vweird.f32 %v2719_v12 }
 0x21a   : > { %2722 = vrsqrt.f32 %v4780_v8  ;;  %v2721_v15 = vpop.eup %2720  ;;  %v2340_v18 = vpack.c.bf16 %v2308_v37, %v2308_v37  ;;  %v4794_v57 = vadd.f32 1e-05, %v1808_v5  ;;  %vm2178_vm9 = vmor %vm2176_vm8, %vm2177_vm7  ;;  %v4820_v44 = vmul.f32 %v1525_v1, %v3057_v35 }
 0x21b   : > { %v1939_v28 = vsel %vm1938_vm6, %v2717_v23, %v1935_v7  ;;  %v2172_v46 = vmul.f32 %v2719_v12, %v2171_v24  ;;  %v2091_v40 = vmul.f32 %v2721_v15, %v4767_v29  ;;  %vm2097_vm10 = vweird.f32 %v2721_v15 }
 0x21c   : > { %v2223_v11 = vmul.f32 %v1939_v28, %v1839_v34  ;;  %2373 = vst.msk [vmem:[%s4527_s19 + $0x48] sm:$0xf] %vm2354_vm11, %v2340_v18  ;;  %v1546_v56 = vpop.xlane.xlu0 %1545  ;;  %2724 = vrsqrt.f32 %v4794_v57  ;;  %vm2098_vm13 = vmor %vm2096_vm12, %vm2097_vm10  ;;  %vm2026_vm1 = vweird.f32 %v4780_v8  ;;  %vm1946_vm2 = vweird.f32 %v4794_v57 }
 0x21d   : > { %v2173_v14 = vmul.f32 0.5, %v2172_v46  ;;  %v1730_v13 = vpop.xlane.xlu1 %1729  ;;  %v2092_v23 = vmul.f32 %v2721_v15, %v2091_v40  ;;  %v4803_v31 = vmul.f32 %v1546_v56, %v3057_v35  ;;  %v1785_v40 = vmul.f32 %v4820_v44, %v4820_v44 }
 0x21e   : > { %v2258_v49 = vmul.f32 %v4470_v27, %v2223_v11  ;;  %v1768_v45 = vmul.f32 %v1730_v13, %v3057_v35 }
 0x21f   : > { %v2174_v17 = vsub.f32 1.5, %v2173_v14  ;;  %v2093_v16 = vmul.f32 0.5, %v2092_v23  ;;  %v1792_v58 = vmul.f32 %v4803_v31, %v4803_v31 }
 0x220   : > { %v2723_v26 = vpop.eup %2722  ;;  %v2293_v38 = vadd.f32 %v4494_v33, %v2258_v49  ;;  %v1832_v10 = vsub.f32 %v1768_v45, %v1800_v21  ;;  %v1848_v49 = vsub.f32 %v3902_v25, %v4753_v62 }
 0x221   : > { %v2175_v43 = vmul.f32 %v2719_v12, %v2174_v17  ;;  %v2021_v53 = vmul.f32 %v2723_v26, %v4780_v8  ;;  %v1706_v61 = vpop.xlane.xlu2 %1705  ;;  %v2094_v54 = vsub.f32 1.5, %v2093_v16  ;;  %vm2027_vm14 = vweird.f32 %v2723_v26 }
 0x222   : > { %v2325_v4 = vpack.c.bf16 %v2293_v38, %v2293_v38  ;;  %v1760_v42 = vmul.f32 %v1706_v61, %v3057_v35  ;;  %v2725_v6 = vpop.eup %2724  ;;  %v4822_v50 = vadd.f32 1e-05, %v1832_v10  ;;  %vm2028_vm15 = vmor %vm2026_vm1, %vm2027_vm14 }
 0x223   : > { %v2179_v3 = vsel %vm2178_vm9, %v2719_v12, %v2175_v43  ;;  %v2022_v48 = vmul.f32 %v2723_v26, %v2021_v53  ;;  %v2095_v60 = vmul.f32 %v2721_v15, %v2094_v54  ;;  %v1941_v12 = vmul.f32 %v2725_v6, %v4794_v57 }
 0x224   : > { %2358 = vst.msk [vmem:[%s4527_s19 + $0xc] sm:$0xf] %vm2354_vm11, %v2325_v4  ;;  %v2247_v30 = vmul.f32 %v2179_v3, %v1863_v59  ;;  %v1824_v29 = vsub.f32 %v1760_v42, %v1792_v58  ;;  %v1501_v7 = vpop.xlane.xlu0 %1500  ;;  %2726 = vrsqrt.f32 %v4822_v50  ;;  %vm1947_vm0 = vweird.f32 %v2725_v6 }
 0x225   : > { %v2023_v37 = vmul.f32 0.5, %v2022_v48  ;;  %v1685_v24 = vpop.xlane.xlu1 %1684  ;;  %v2099_v5 = vsel %vm2098_vm13, %v2721_v15, %v2095_v60  ;;  %v1942_v28 = vmul.f32 %v2725_v6, %v1941_v12  ;;  %v4834_v14 = vmul.f32 %v1501_v7, %v3057_v35  ;;  %vm1948_vm3 = vmor %vm1946_vm2, %vm1947_vm0 }
 0x226   : > { %v2282_v34 = vmul.f32 %v4470_v27, %v2247_v30  ;;  %v2239_v18 = vmul.f32 %v2099_v5, %v1855_v41  ;;  %v4828_v46 = vadd.f32 1e-05, %v1824_v29  ;;  %v1753_v56 = vmul.f32 %v1685_v24, %v3057_v35 }
 0x227   : > { %v2024_v1 = vsub.f32 1.5, %v2023_v37  ;;  %v1943_v59 = vmul.f32 0.5, %v1942_v28  ;;  %v1777_v17 = vmul.f32 %v4834_v14, %v4834_v14  ;;  %vm2186_vm5 = vweird.f32 %v4822_v50 }
 0x228   : > { %v2317_v11 = vadd.f32 %v4494_v33, %v2282_v34  ;;  %v2274_v15 = vmul.f32 %v4470_v27, %v2239_v18  ;;  %2728 = vrsqrt.f32 %v4828_v46  ;;  %v1817_v16 = vsub.f32 %v1753_v56, %v1785_v40 }
 0x229   : > { %v2025_v13 = vmul.f32 %v2723_v26, %v2024_v1  ;;  %v1944_v38 = vsub.f32 1.5, %v1943_v59  ;;  %v1661_v21 = vpop.xlane.xlu2 %1660  ;;  %v1864_v18 = vsub.f32 %v4009_v0, %v4792_v47  ;;  %vm2106_vm8 = vweird.f32 %v4828_v46 }
 0x22a   : > { %v2349_v23 = vpack.c.bf16 %v2317_v11, %v2317_v11  ;;  %v2309_v45 = vadd.f32 %v4494_v33, %v2274_v15  ;;  %v2727_v43 = vpop.eup %2726  ;;  %v1745_v62 = vmul.f32 %v1661_v21, %v3057_v35  ;;  %v4858_v54 = vadd.f32 1e-05, %v1817_v16 }
 0x22b   : > { %v2029_v41 = vsel %vm2028_vm15, %v2723_v26, %v2025_v13  ;;  %v1945_v8 = vmul.f32 %v2725_v6, %v1944_v38  ;;  %v2181_v58 = vmul.f32 %v2727_v43, %v4822_v50  ;;  %v1840_v26 = vsub.f32 %v3905_v2, %v4771_v52 }
 0x22c   : > { %2382 = vst.msk [vmem:[%s4527_s19 + $0x6c] sm:$0xf] %vm2354_vm11, %v2349_v23  ;;  %v2232_v25 = vmul.f32 %v2029_v41, %v1848_v49  ;;  %v2341_v53 = vpack.c.bf16 %v2309_v45, %v2309_v45  ;;  %v4852_v61 = vpop.xlane.xlu0 %1572  ;;  %v1809_v10 = vsub.f32 %v1745_v62, %v1777_v17  ;;  %2730 = vrsqrt.f32 %v4858_v54 }
 0x22d   : > { %v1949_v48 = vsel %vm1948_vm3, %v2725_v6, %v1945_v8  ;;  %v2182_v57 = vmul.f32 %v2727_v43, %v2181_v58  ;;  %v1549_v42 = vpop.xlane.xlu1 %1548  ;;  %vm2187_vm4 = vweird.f32 %v2727_v43  ;;  %v1856_v50 = vsub.f32 %v4097_v55, %v4803_v31 }
 0x22e   : > { %v2267_v4 = vmul.f32 %v4470_v27, %v2232_v25  ;;  %v2729_v3 = vpop.eup %2728  ;;  %2374 = vst.msk [vmem:[%s4527_s19 + $0x4c] sm:$0xf] %vm2354_vm11, %v2341_v53  ;;  %v2224_v60 = vmul.f32 %v1949_v48, %v1840_v26  ;;  %v4865_v52 = vadd.f32 1e-05, %v1809_v10  ;;  %vm2188_vm6 = vmor %vm2186_vm5, %vm2187_vm4  ;;  %vm2036_vm12 = vweird.f32 %v4858_v54 }
 0x22f   : > { %v2101_v37 = vmul.f32 %v2729_v3, %v4828_v46  ;;  %v2183_v2 = vmul.f32 0.5, %v2182_v57  ;;  %vm2107_vm7 = vweird.f32 %v2729_v3 }
 0x230   : > { %v2302_v30 = vadd.f32 %v4494_v33, %v2267_v4  ;;  %v2259_v29 = vmul.f32 %v4470_v27, %v2224_v60  ;;  %2732 = vrsqrt.f32 %v4865_v52  ;;  %vm2108_vm9 = vmor %vm2106_vm8, %vm2107_vm7  ;;  %v1849_v60 = vsub.f32 %v4066_v9, %v4820_v44 }
 0x231   : > { %v2102_v7 = vmul.f32 %v2729_v3, %v2101_v37  ;;  %v2184_v24 = vsub.f32 1.5, %v2183_v2  ;;  %vm1956_vm14 = vweird.f32 %v4865_v52 }
 0x232   : > { %v2334_v12 = vpack.c.bf16 %v2302_v30, %v2302_v30  ;;  %v1688_v6 = vpop.xlane.xlu2 %1687  ;;  %v2294_v34 = vadd.f32 %v4494_v33, %v2259_v29  ;;  %v2731_v15 = vpop.eup %2730 }
 0x233   : > { %v2103_v5 = vmul.f32 0.5, %v2102_v7  ;;  %v2185_v1 = vmul.f32 %v2727_v43, %v2184_v24  ;;  %v2031_v0 = vmul.f32 %v2731_v15, %v4858_v54  ;;  %v1754_v23 = vmul.f32 %v1688_v6, %v3057_v35 }
 0x234   : > { %2367 = vst.msk [vmem:[%s4527_s19 + $0x30] sm:$0xf] %vm2354_vm11, %v2334_v12  ;;  %v1528_v28 = vpop.xlane.xlu0 %1527  ;;  %v2326_v11 = vpack.c.bf16 %v2294_v34, %v2294_v34  ;;  %vm2037_vm10 = vweird.f32 %v2731_v15  ;;  %v1841_v7 = vsub.f32 %v4157_v63, %v4834_v14 }
 0x235   : > { %v2104_v40 = vsub.f32 1.5, %v2103_v5  ;;  %v4876_v56 = vmul.f32 %v1528_v28, %v3057_v35  ;;  %v2189_v13 = vsel %vm2188_vm6, %v2727_v43, %v2185_v1  ;;  %v1504_v45 = vpop.xlane.xlu1 %1503  ;;  %v2032_v16 = vmul.f32 %v2731_v15, %v2031_v0  ;;  %vm2038_vm1 = vmor %vm2036_vm12, %vm2037_vm10 }
 0x236   : > { %2359 = vst.msk [vmem:[%s4527_s19 + $0x10] sm:$0xf] %vm2354_vm11, %v2326_v11  ;;  %v2248_v59 = vmul.f32 %v2189_v13, %v1864_v18  ;;  %v2733_v47 = vpop.eup %2732  ;;  %v4890_v43 = vmul.f32 %v1549_v42, %v3057_v35  ;;  %v4918_v9 = vmul.f32 %v1504_v45, %v3057_v35 }
 0x237   : > { %v2105_v49 = vmul.f32 %v2729_v3, %v2104_v40  ;;  %v1786_v17 = vmul.f32 %v4876_v56, %v4876_v56  ;;  %v1951_v21 = vmul.f32 %v2733_v47, %v4865_v52  ;;  %v2033_v62 = vmul.f32 0.5, %v2032_v16  ;;  %v4923_v52 = vld [vmem:[%s5103_s5] ss:$0 sm:$0xff] }
 0x238   : > { %v2283_v41 = vmul.f32 %v4470_v27, %v2248_v59  ;;  %v1793_v57 = vmul.f32 %v4890_v43, %v4890_v43  ;;  %vm1957_vm13 = vweird.f32 %v2733_v47 }
 0x239   : > { %v2109_v38 = vsel %vm2108_vm9, %v2729_v3, %v2105_v49  ;;  %v1818_v25 = vsub.f32 %v1754_v23, %v1786_v17  ;;  %v1952_v53 = vmul.f32 %v2733_v47, %v1951_v21  ;;  %v2034_v10 = vsub.f32 1.5, %v2033_v62  ;;  %vm1958_vm15 = vmor %vm1956_vm14, %vm1957_vm13  ;;  %v4935_v49 = vld [vmem:[%s5104_s6] ss:$0 sm:$0xff] }
 0x23a   : > { %v2240_v46 = vmul.f32 %v2109_v38, %v1856_v50  ;;  %v4892_v55 = vpop.xlane.xlu2 %1551  ;;  %v2318_v31 = vadd.f32 %v4494_v33, %v2283_v41 }
 0x23b   : > { %v4896_v58 = vadd.f32 1e-05, %v1818_v25  ;;  %v1953_v3 = vmul.f32 0.5, %v1952_v53  ;;  %v4952_v21 = vmul.f32 %v4892_v55, %v3057_v35 }
 0x23c   : > { %v2275_v8 = vmul.f32 %v4470_v27, %v2240_v46  ;;  %v2350_v4 = vpack.c.bf16 %v2318_v31, %v2318_v31  ;;  %v2035_v27 = vmul.f32 %v2731_v15, %v2034_v10 }
 0x23d   : > { %v1709_v26 = vpop.xlane.xlu0 %1708  ;;  %2734 = vrsqrt.f32 %v4896_v58  ;;  %v1954_v42 = vsub.f32 1.5, %v1953_v3  ;;  %v4908_v2 = vpop.xlane.xlu1 %1575  ;;  %vm2046_vm2 = vweird.f32 %v4896_v58 }
 0x23e   : > { %v2310_v48 = vadd.f32 %v4494_v33, %v2275_v8  ;;  %2383 = vst.msk [vmem:[%s4527_s19 + $0x70] sm:$0xf] %vm2354_vm11, %v2350_v4  ;;  %v1761_v30 = vmul.f32 %v1709_v26, %v3057_v35  ;;  %v2039_v54 = vsel %vm2038_vm1, %v2731_v15, %v2035_v27  ;;  %v1778_v15 = vmul.f32 %v4918_v9, %v4918_v9 }
 0x23f   : > { %v1955_v12 = vmul.f32 %v2733_v47, %v1954_v42  ;;  %v2233_v24 = vmul.f32 %v2039_v54, %v1849_v60  ;;  %v1850_v8 = vsub.f32 %v4252_v36, %v4876_v56 }
 0x240   : > { %v2342_v37 = vpack.c.bf16 %v2310_v48, %v2310_v48  ;;  %v1825_v29 = vsub.f32 %v1761_v30, %v1793_v57  ;;  %v1794_v48 = vmul.f32 %v4952_v21, %v4952_v21 }
 0x241   : > { %v1959_v34 = vsel %vm1958_vm15, %v2733_v47, %v1955_v12  ;;  %v2268_v18 = vmul.f32 %v4923_v52, %v2233_v24 }
 0x242   : > { %2375 = vst.msk [vmem:[%s4527_s19 + $0x50] sm:$0xf] %vm2354_vm11, %v2342_v37  ;;  %v4915_v6 = vpop.xlane.xlu2 %1506  ;;  %v1889_v44 = vadd.f32 1e-05, %v1825_v29  ;;  %v2225_v1 = vmul.f32 %v1959_v34, %v1841_v7  ;;  %v1857_v7 = vsub.f32 %v4222_v39, %v4890_v43  ;;  %v4986_v43 = vmul.f32 %v4852_v61, %v3057_v35 }
 0x243   : > { %v2735_v5 = vpop.eup %2734  ;;  %v2303_v28 = vadd.f32 %v4494_v33, %v2268_v18  ;;  %v4973_v24 = vmul.f32 %v4915_v6, %v3057_v35 }
 0x244   : > { %v2041_v14 = vmul.f32 %v2735_v5, %v4896_v58  ;;  %2736 = vrsqrt.f32 %v1889_v44  ;;  %v2260_v11 = vmul.f32 %v4923_v52, %v2225_v1  ;;  %vm2047_vm0 = vweird.f32 %v2735_v5 }
 0x245   : > { %v1664_v63 = vpop.xlane.xlu0 %1663  ;;  %v2335_v59 = vpack.c.bf16 %v2303_v28, %v2303_v28  ;;  %v1531_v47 = vpop.xlane.xlu1 %1530  ;;  %vm2048_vm3 = vmor %vm2046_vm2, %vm2047_vm0  ;;  %vm2116_vm5 = vweird.f32 %v1889_v44 }
 0x246   : > { %v2042_v40 = vmul.f32 %v2735_v5, %v2041_v14  ;;  %v1746_v13 = vmul.f32 %v1664_v63, %v3057_v35  ;;  %v2295_v0 = vadd.f32 %v4935_v49, %v2260_v11  ;;  %v4939_v23 = vmul.f32 %v1531_v47, %v3057_v35 }
 0x247   : > { %2368 = vst.msk [vmem:[%s4527_s19 + $0x34] sm:$0xf] %vm2354_vm11, %v2335_v59 }
 0x248   : > { %v2043_v50 = vmul.f32 0.5, %v2042_v40  ;;  %v1810_v33 = vsub.f32 %v1746_v13, %v1778_v15  ;;  %v2327_v17 = vpack.c.bf16 %v2295_v0, %v2295_v0  ;;  %v1787_v62 = vmul.f32 %v4939_v23, %v4939_v23 }
 0x249   : > { %v1779_v15 = vmul.f32 %v4973_v24, %v4973_v24  ;;  %v4996_v0 = vmul.f32 %v4908_v2, %v3057_v35 }
 0x24a   : > { %v4943_v45 = vpop.xlane.xlu2 %1578  ;;  %v2737_v41 = vpop.eup %2736  ;;  %v2044_v38 = vsub.f32 1.5, %v2043_v50  ;;  %v4945_v16 = vadd.f32 1e-05, %v1810_v33  ;;  %2360 = vst.msk [vmem:[%s4527_s19 + $0x14] sm:$0xf] %vm2354_vm11, %v2327_v17 }
 0x24b   : > { %v2111_v46 = vmul.f32 %v2737_v41, %v1889_v44  ;;  %vm2117_vm4 = vweird.f32 %v2737_v41 }
 0x24c   : > { %v2045_v31 = vmul.f32 %v2735_v5, %v2044_v38  ;;  %2738 = vrsqrt.f32 %v4945_v16  ;;  %vm2118_vm6 = vmor %vm2116_vm5, %vm2117_vm4  ;;  %vm1966_vm8 = vweird.f32 %v4945_v16 }
 0x24d   : > { %v1691_v25 = vpop.xlane.xlu0 %1690  ;;  %v2112_v26 = vmul.f32 %v2737_v41, %v2111_v46  ;;  %v1712_v3 = vpop.xlane.xlu1 %1711  ;;  %v1801_v46 = vmul.f32 %v4986_v43, %v4986_v43 }
 0x24e   : > { %v1755_v53 = vmul.f32 %v1691_v25, %v3057_v35  ;;  %v2049_v58 = vsel %vm2048_vm3, %v2735_v5, %v2045_v31  ;;  %v1762_v27 = vmul.f32 %v1712_v3, %v3057_v35 }
 0x24f   : > { %v2234_v10 = vmul.f32 %v2049_v58, %v1850_v8  ;;  %v2113_v55 = vmul.f32 0.5, %v2112_v26  ;;  %v1802_v58 = vmul.f32 %v4996_v0, %v4996_v0 }
 0x250   : > { %v1819_v4 = vsub.f32 %v1755_v53, %v1787_v62  ;;  %v1826_v56 = vsub.f32 %v1762_v27, %v1794_v48  ;;  %v1842_v62 = vsub.f32 %v4304_v19, %v4918_v9  ;;  %v5018_v19 = vmul.f32 %v4943_v45, %v3057_v35 }
 0x251   : > { %v2269_v42 = vmul.f32 %v4923_v52, %v2234_v10  ;;  %v2114_v30 = vsub.f32 1.5, %v2113_v55 }
 0x252   : > { %v4962_v57 = vadd.f32 1e-05, %v1819_v4  ;;  %v1715_v60 = vpop.xlane.xlu2 %1714  ;;  %v2739_v36 = vpop.eup %2738  ;;  %v4975_v34 = vadd.f32 1e-05, %v1826_v56 }
 0x253   : > { %v2304_v37 = vadd.f32 %v4935_v49, %v2269_v42  ;;  %v2115_v54 = vmul.f32 %v2737_v41, %v2114_v30  ;;  %v1961_v12 = vmul.f32 %v2739_v36, %v4945_v16  ;;  %v1763_v14 = vmul.f32 %v1715_v60, %v3057_v35 }
 0x254   : > { %2740 = vrsqrt.f32 %v4962_v57  ;;  %vm1967_vm7 = vweird.f32 %v2739_v36  ;;  %vm2056_vm12 = vweird.f32 %v4962_v57  ;;  %vm2126_vm14 = vweird.f32 %v4975_v34 }
 0x255   : > { %v1555_v29 = vpop.xlane.xlu0 %1554  ;;  %v2336_v18 = vpack.c.bf16 %v2304_v37, %v2304_v37  ;;  %v2119_v1 = vsel %vm2118_vm6, %v2737_v41, %v2115_v54  ;;  %v1962_v44 = vmul.f32 %v2739_v36, %v1961_v12  ;;  %2742 = vrsqrt.f32 %v4975_v34  ;;  %v1667_v28 = vpop.xlane.xlu1 %1666  ;;  %vm1968_vm9 = vmor %vm1966_vm8, %vm1967_vm7 }
 0x256   : > { %v4978_v5 = vmul.f32 %v1555_v29, %v3057_v35  ;;  %v2241_v63 = vmul.f32 %v2119_v1, %v1857_v7  ;;  %v1747_v59 = vmul.f32 %v1667_v28, %v3057_v35  ;;  %v1851_v29 = vsub.f32 %v4400_v32, %v4939_v23 }
 0x257   : > { %2369 = vst.msk [vmem:[%s4527_s19 + $0x38] sm:$0xf] %vm2354_vm11, %v2336_v18  ;;  %v1963_v6 = vmul.f32 0.5, %v1962_v44  ;;  %v1803_v7 = vmul.f32 %v5018_v19, %v5018_v19  ;;  %v1858_v28 = vsub.f32 %v4354_v20, %v4952_v21 }
 0x258   : > { %v1795_v39 = vmul.f32 %v4978_v5, %v4978_v5  ;;  %v2276_v40 = vmul.f32 %v4923_v52, %v2241_v63  ;;  %v1811_v41 = vsub.f32 %v1747_v59, %v1779_v15 }
 0x259   : > { %v1964_v47 = vsub.f32 1.5, %v1963_v6 }
 0x25a   : > { %v2741_v11 = vpop.eup %2740  ;;  %v1827_v13 = vsub.f32 %v1763_v14, %v1795_v39  ;;  %v1733_v50 = vpop.xlane.xlu2 %1732  ;;  %v2311_v33 = vadd.f32 %v4935_v49, %v2276_v40  ;;  %v5009_v8 = vadd.f32 1e-05, %v1811_v41 }
 0x25b   : > { %v2051_v61 = vmul.f32 %v2741_v11, %v4962_v57  ;;  %v1769_v38 = vmul.f32 %v1733_v50, %v3057_v35  ;;  %v1965_v25 = vmul.f32 %v2739_v36, %v1964_v47  ;;  %v2743_v31 = vpop.eup %2742  ;;  %vm2057_vm10 = vweird.f32 %v2741_v11 }
 0x25c   : > { %v5000_v17 = vadd.f32 1e-05, %v1827_v13  ;;  %v2343_v53 = vpack.c.bf16 %v2311_v33, %v2311_v33  ;;  %v2121_v55 = vmul.f32 %v2743_v31, %v4975_v34  ;;  %vm2058_vm13 = vmor %vm2056_vm12, %vm2057_vm10  ;;  %vm2127_vm1 = vweird.f32 %v2743_v31 }
 0x25d   : > { %v2052_v2 = vmul.f32 %v2741_v11, %v2051_v61  ;;  %v1736_v26 = vpop.xlane.xlu0 %1735  ;;  %v1969_v4 = vsel %vm1968_vm9, %v2739_v36, %v1965_v25  ;;  %v1833_v9 = vsub.f32 %v1769_v38, %v1801_v46  ;;  %vm2128_vm15 = vmor %vm2126_vm14, %vm2127_vm1  ;;  %vm1976_vm5 = vweird.f32 %v5009_v8 }
 0x25e   : > { %2744 = vrsqrt.f32 %v5000_v17  ;;  %2376 = vst.msk [vmem:[%s4527_s19 + $0x54] sm:$0xf] %vm2354_vm11, %v2343_v53  ;;  %v2226_v16 = vmul.f32 %v1969_v4, %v1842_v62  ;;  %v2122_v48 = vmul.f32 %v2743_v31, %v2121_v55  ;;  %v1770_v27 = vmul.f32 %v1736_v26, %v3057_v35 }
 0x25f   : > { %v2053_v10 = vmul.f32 0.5, %v2052_v2  ;;  %2746 = vrsqrt.f32 %v5009_v8  ;;  %v5024_v30 = vadd.f32 1e-05, %v1833_v9  ;;  %v1739_v60 = vpop.xlane.xlu1 %1738  ;;  %vm2136_vm2 = vweird.f32 %v5000_v17 }
 0x260   : > { %v2261_v42 = vmul.f32 %v4923_v52, %v2226_v16  ;;  %v2123_v56 = vmul.f32 0.5, %v2122_v48  ;;  %v1834_v37 = vsub.f32 %v1770_v27, %v1802_v58  ;;  %v1771_v45 = vmul.f32 %v1739_v60, %v3057_v35 }
 0x261   : > { %v2054_v3 = vsub.f32 1.5, %v2053_v10  ;;  %2748 = vrsqrt.f32 %v5024_v30  ;;  %v1859_v62 = vsub.f32 %v4442_v22, %v4978_v5  ;;  %v5204_v10 = vld [vmem:[#allocation4_spill] sm:$0xff]  ;;  %vm2196_vm8 = vweird.f32 %v5024_v30 }
 0x262   : > { %v2296_v12 = vadd.f32 %v4935_v49, %v2261_v42  ;;  %v2124_v18 = vsub.f32 1.5, %v2123_v56  ;;  %v5035_v14 = vadd.f32 1e-05, %v1834_v37  ;;  %v1835_v39 = vsub.f32 %v1771_v45, %v1803_v7 }
 0x263   : > { %v2055_v36 = vmul.f32 %v2741_v11, %v2054_v3  ;;  %v1843_v55 = vsub.f32 %v5204_v10, %v4973_v24 }
 0x264   : > { %v2745_v54 = vpop.eup %2744  ;;  %v2328_v44 = vpack.c.bf16 %v2296_v12, %v2296_v12  ;;  %v2125_v32 = vmul.f32 %v2743_v31, %v2124_v18  ;;  %2750 = vrsqrt.f32 %v5035_v14  ;;  %v5045_v40 = vadd.f32 1e-05, %v1835_v39 }
 0x265   : > { %v2059_v57 = vsel %vm2058_vm13, %v2741_v11, %v2055_v36  ;;  %v2131_v1 = vmul.f32 %v2745_v54, %v5000_v17  ;;  %v2747_v35 = vpop.eup %2746  ;;  %vm2137_vm0 = vweird.f32 %v2745_v54  ;;  %v5205_v36 = vld [vmem:[#allocation11_spill] sm:$0xff]  ;;  %vm2206_vm12 = vweird.f32 %v5035_v14 }
 0x266   : > { %v2235_v63 = vmul.f32 %v2059_v57, %v1851_v29  ;;  %v1971_v6 = vmul.f32 %v2747_v35, %v5009_v8  ;;  %2361 = vst.msk [vmem:[%s4527_s19 + $0x18] sm:$0xf] %vm2354_vm11, %v2328_v44  ;;  %v2129_v15 = vsel %vm2128_vm15, %v2743_v31, %v2125_v32  ;;  %2752 = vrsqrt.f32 %v5045_v40  ;;  %vm2138_vm4 = vmor %vm2136_vm2, %vm2137_vm0 }
 0x267   : > { %v2132_v23 = vmul.f32 %v2745_v54, %v2131_v1  ;;  %v2749_v47 = vpop.eup %2748  ;;  %v2242_v61 = vmul.f32 %v2129_v15, %v1858_v28  ;;  %vm1977_vm3 = vweird.f32 %v2747_v35  ;;  %v1865_v56 = vsub.f32 %v5205_v36, %v4986_v43  ;;  %v5206_v1 = vld [vmem:[#allocation3_spill] sm:$0xff] }
 0x268   : > { %v2270_v11 = vmul.f32 %v4923_v52, %v2235_v63  ;;  %v1972_v59 = vmul.f32 %v2747_v35, %v1971_v6  ;;  %v2191_v50 = vmul.f32 %v2749_v47, %v5024_v30  ;;  %vm1978_vm6 = vmor %vm1976_vm5, %vm1977_vm3  ;;  %vm2197_vm7 = vweird.f32 %v2749_v47 }
 0x269   : > { %v2133_v13 = vmul.f32 0.5, %v2132_v23  ;;  %v2277_v41 = vmul.f32 %v4923_v52, %v2242_v61  ;;  %vm2198_vm9 = vmor %vm2196_vm8, %vm2197_vm7  ;;  %vm2216_vm14 = vweird.f32 %v5045_v40 }
 0x26a   : > { %v2305_v34 = vadd.f32 %v4935_v49, %v2270_v11  ;;  %v1973_v21 = vmul.f32 0.5, %v1972_v59  ;;  %v2192_v25 = vmul.f32 %v2749_v47, %v2191_v50  ;;  %v2751_v2 = vpop.eup %2750 }
 0x26b   : > { %v2134_v20 = vsub.f32 1.5, %v2133_v13  ;;  %v2312_v31 = vadd.f32 %v4935_v49, %v2277_v41  ;;  %v2201_v17 = vmul.f32 %v2751_v2, %v5035_v14  ;;  %vm2207_vm10 = vweird.f32 %v2751_v2 }
 0x26c   : > { %v2337_v33 = vpack.c.bf16 %v2305_v34, %v2305_v34  ;;  %v1974_v46 = vsub.f32 1.5, %v1973_v21  ;;  %v2193_v58 = vmul.f32 0.5, %v2192_v25  ;;  %v2753_v4 = vpop.eup %2752  ;;  %vm2208_vm1 = vmor %vm2206_vm12, %vm2207_vm10  ;;  %v1867_v14 = vsub.f32 %v4448_v51, %v5018_v19 }
 0x26d   : > { %v2135_v38 = vmul.f32 %v2745_v54, %v2134_v20  ;;  %v2344_v16 = vpack.c.bf16 %v2312_v31, %v2312_v31  ;;  %v2202_v5 = vmul.f32 %v2751_v2, %v2201_v17  ;;  %v2211_v48 = vmul.f32 %v2753_v4, %v5045_v40 }
 0x26e   : > { %2370 = vst.msk [vmem:[%s4527_s19 + $0x3c] sm:$0xf] %vm2354_vm11, %v2337_v33  ;;  %v1975_v26 = vmul.f32 %v2747_v35, %v1974_v46  ;;  %v2194_v22 = vsub.f32 1.5, %v2193_v58  ;;  %vm2217_vm13 = vweird.f32 %v2753_v4 }
 0x26f   : > { %v2139_v53 = vsel %vm2138_vm4, %v2745_v54, %v2135_v38  ;;  %2377 = vst.msk [vmem:[%s4527_s19 + $0x58] sm:$0xf] %vm2354_vm11, %v2344_v16  ;;  %v2203_v60 = vmul.f32 0.5, %v2202_v5  ;;  %v2212_v24 = vmul.f32 %v2753_v4, %v2211_v48  ;;  %vm2218_vm15 = vmor %vm2216_vm14, %vm2217_vm13 }
 0x270   : > { %v2243_v9 = vmul.f32 %v2139_v53, %v1859_v62  ;;  %v1979_v3 = vsel %vm1978_vm6, %v2747_v35, %v1975_v26  ;;  %v2195_v42 = vmul.f32 %v2749_v47, %v2194_v22  ;;  %v1866_v35 = vsub.f32 %v5206_v1, %v4996_v0 }
 0x271   : > { %v2227_v27 = vmul.f32 %v1979_v3, %v1843_v55  ;;  %v2204_v12 = vsub.f32 1.5, %v2203_v60  ;;  %v2213_v29 = vmul.f32 0.5, %v2212_v24 }
 0x272   : > { %v2278_v8 = vmul.f32 %v4923_v52, %v2243_v9  ;;  %v2199_v54 = vsel %vm2198_vm9, %v2749_v47, %v2195_v42 }
 0x273   : > { %v2262_v45 = vmul.f32 %v4923_v52, %v2227_v27  ;;  %v2249_v57 = vmul.f32 %v2199_v54, %v1865_v56  ;;  %v2205_v18 = vmul.f32 %v2751_v2, %v2204_v12  ;;  %v2214_v43 = vsub.f32 1.5, %v2213_v29 }
 0x274   : > { %v2313_v37 = vadd.f32 %v4935_v49, %v2278_v8 }
 0x275   : > { %v2297_v30 = vadd.f32 %v4935_v49, %v2262_v45  ;;  %v2284_v63 = vmul.f32 %v4923_v52, %v2249_v57  ;;  %v2209_v39 = vsel %vm2208_vm1, %v2751_v2, %v2205_v18  ;;  %v2215_v32 = vmul.f32 %v2753_v4, %v2214_v43 }
 0x276   : > { %v2345_v7 = vpack.c.bf16 %v2313_v37, %v2313_v37  ;;  %v2250_v23 = vmul.f32 %v2209_v39, %v1866_v35 }
 0x277   : > { %v2329_v44 = vpack.c.bf16 %v2297_v30, %v2297_v30  ;;  %v2319_v0 = vadd.f32 %v4935_v49, %v2284_v63  ;;  %v2219_v6 = vsel %vm2218_vm15, %v2753_v4, %v2215_v32 }
 0x278   : > { %2378 = vst.msk [vmem:[%s4527_s19 + $0x5c] sm:$0xf] %vm2354_vm11, %v2345_v7  ;;  %v2285_v11 = vmul.f32 %v4923_v52, %v2250_v23  ;;  %v2251_v15 = vmul.f32 %v2219_v6, %v1867_v14 }
 0x279   : > { %2362 = vst.msk [vmem:[%s4527_s19 + $0x1c] sm:$0xf] %vm2354_vm11, %v2329_v44  ;;  %v2351_v28 = vpack.c.bf16 %v2319_v0, %v2319_v0 }
 0x27a   : > { %v2320_v13 = vadd.f32 %v4935_v49, %v2285_v11  ;;  %v2286_v40 = vmul.f32 %v4923_v52, %v2251_v15 }
 0x27b   : > { %2384 = vst.msk [vmem:[%s4527_s19 + $0x74] sm:$0xf] %vm2354_vm11, %v2351_v28 }
 0x27c   : > { %v2352_v59 = vpack.c.bf16 %v2320_v13, %v2320_v13  ;;  %v2321_v51 = vadd.f32 %v4935_v49, %v2286_v40 }
 0x27e   : > { %2385 = vst.msk [vmem:[%s4527_s19 + $0x78] sm:$0xf] %vm2354_vm11, %v2352_v59  ;;  %v2353_v19 = vpack.c.bf16 %v2321_v51, %v2321_v51 }
 0x280   : > { %2386 = vst.msk [vmem:[%s4527_s19 + $0x7c] sm:$0xf] %vm2354_vm11, %v2353_v19 }
 0x281 PF: > { %s19_s27 = sadd.s32 1, %s2764_s27  }
 0x282   : > { %p16_p4 = scmp.ge.s32.totalorder %s19_s27, 4  }
 0x284   :  { %18 = sbr.rel (!%p16_p4) target bundleno = 1 (0x1), region = 90 }

// kernel: swin_mil_forward.5
= control target key start
LH: loop header
LB: loop body
LE: loop exit
PB: predicated region body
PF: predicated region fallthrough
CT: control target
= control target key end

     0   :  { %s1911_s24 = smov 0   ;;  %s3077_s0 = inlined_call_operand.vmem [shape: f32[128,384], index: 0, kind: input, shape index: {}]   ;;  %s3078_s1 = inlined_call_operand.vmem [shape: f32[1,384], index: 1, kind: input, shape index: {}]   ;;  %s3079_s2 = inlined_call_operand.vmem [shape: f32[1,384], index: 2, kind: input, shape index: {}]   ;;  %s3080_s3 = inlined_call_operand.vmem [shape: bf16[384,192], index: 3, kind: input, shape index: {}]   ;;  %s3081_s4 = inlined_call_operand.vmem [shape: f32[1,192], index: 4, kind: input, shape index: {}]   ;;  %s3082_s5 = inlined_call_operand.vmem [shape: f32[1,192], index: 5, kind: input, shape index: {}]   ;;  %s3083_s6 = inlined_call_operand.vmem [shape: f32[128,192], index: 6, kind: output, shape index: {0}]   ;;  %s3084_s7 = inlined_call_operand.vmem [shape: bf16[128,192], index: 7, kind: output, shape index: {1}]  }
   0x1 LB: > { %s1541_s25 = sadd.s32 4294967295, %s1867_s24   ;;  %p1545_p0 = scmp.ge.s32.totalorder %s1867_s24, 1  ;;  %s1867_s24 = sphi %s1911_s24, %s18_s24  }
   0x2   : > { %p242_p1 = scmp.lt.s32.totalorder %s1867_s24, 3 }
   0x4   : > { %p243_p2 = pnand %p1545_p0, %p242_p1 }
   0x6   : > { %246 = sbr.rel (%p243_p2) target bundleno = 573 (0x23d), region = 44 }
   0xb   : > { %s1546_s26 = sshll.u32 %s1541_s25, 3 }
   0xc   : > { %p283_p3 = scmp.lt.s32.totalorder %s1546_s26, 15 }
   0xe   : > { %s3112_s26 = smov (!%p283_p3, %s1546_s26), 15 }
   0xf   : > { %s1814_s27 = smul.u32 24, %s3112_s26  ;;  %s1748_s15 = sshll.u32 %s3112_s26, 4 }
  0x10   : > { %s2766_s18 = scalar_lea.vmem %s3083_s6, %s1748_s15  ;;  %s1749_s23 = sshll.u32 %s3112_s26, 3 }
  0x11   : > { %s1925_s30 = scalar_lea.vmem %s3077_s0, %s1814_s27  ;;  %s2961_s28 = scalar_lea.vmem %s3084_s7, %s1749_s23 }
  0x12   : > { %v1928_v0 = vld [vmem:[%s1925_s30 + $0x60] sm:$0xff]  ;;  %v1931_v1 = vld [vmem:[%s1925_s30 + $0x68] sm:$0xff]  ;;  %v1934_v2 = vld [vmem:[%s1925_s30 + $0x70] sm:$0xff] }
  0x13   : > { %v345_v3 = vadd.f32 %v1931_v1, %v1928_v0  ;;  %v388_v4 = vmul.f32 %v1928_v0, %v1928_v0  ;;  %v389_v5 = vmul.f32 %v1931_v1, %v1931_v1  ;;  %v390_v6 = vmul.f32 %v1934_v2, %v1934_v2  ;;  %v1945_v7 = vld [vmem:[%s1925_s30] sm:$0xff]  ;;  %v1948_v8 = vld [vmem:[%s1925_s30 + $0x8] sm:$0xff]  ;;  %v1951_v9 = vld [vmem:[%s1925_s30 + $0x10] sm:$0xff] }
  0x14   : > { %v329_v10 = vadd.f32 %v1948_v8, %v1945_v7  ;;  %v1956_v11 = vld [vmem:[%s1925_s30 + $0x78] sm:$0xff]  ;;  %v1959_v12 = vld [vmem:[%s1925_s30 + $0x80] sm:$0xff]  ;;  %v1972_v19 = vld [vmem:[%s1925_s30 + $0x88] sm:$0xff]  ;;  %v376_v28 = vmul.f32 %v1945_v7, %v1945_v7  ;;  %v377_v29 = vmul.f32 %v1948_v8, %v1948_v8  ;;  %v378_v36 = vmul.f32 %v1951_v9, %v1951_v9 }
  0x15   : > { %v346_v13 = vadd.f32 %v345_v3, %v1934_v2  ;;  %v416_v14 = vadd.f32 %v389_v5, %v388_v4  ;;  %v391_v15 = vmul.f32 %v1956_v11, %v1956_v11  ;;  %v1965_v16 = vld [vmem:[%s1925_s30 + $0x18] sm:$0xff]  ;;  %v1968_v17 = vld [vmem:[%s1925_s30 + $0x20] sm:$0xff]  ;;  %v392_v20 = vmul.f32 %v1959_v12, %v1959_v12  ;;  %v1983_v26 = vld [vmem:[%s1925_s30 + $0x28] sm:$0xff] }
  0x16   : > { %v330_v18 = vadd.f32 %v329_v10, %v1951_v9  ;;  %v349_v22 = vadd.f32 %v1959_v12, %v1956_v11  ;;  %v333_v23 = vadd.f32 %v1968_v17, %v1965_v16  ;;  %v393_v24 = vmul.f32 %v1972_v19, %v1972_v19  ;;  %v1996_v34 = vld [vmem:[%s1925_s30 + $0x90] sm:$0xff]  ;;  %v1999_v35 = vld [vmem:[%s1925_s30 + $0x98] sm:$0xff]  ;;  %v2008_v41 = vld [vmem:[%s1925_s30 + $0xa0] sm:$0xff] }
  0x17   : > { %347 = vadd.xlane.f32.xlu0 %v346_v13  ;;  %v417_v21 = vadd.f32 %v416_v14, %v390_v6  ;;  %v420_v25 = vadd.f32 %v392_v20, %v391_v15  ;;  %v379_v32 = vmul.f32 %v1965_v16, %v1965_v16  ;;  %v380_v33 = vmul.f32 %v1968_v17, %v1968_v17  ;;  %v2011_v42 = vld [vmem:[%s1925_s30 + $0xa8] sm:$0xff]  ;;  %v2014_v43 = vld [vmem:[%s1925_s30 + $0xb0] sm:$0xff]  ;;  %v2022_v49 = vld [vmem:[%s1925_s30 + $0xb8] sm:$0xff] }
  0x18   : > { %331 = vadd.xlane.f32.xlu2 %v330_v18  ;;  %v350_v27 = vadd.f32 %v349_v22, %v1972_v19  ;;  %v334_v30 = vadd.f32 %v333_v23, %v1983_v26  ;;  %v400_v37 = vadd.f32 %v377_v29, %v376_v28  ;;  %v353_v38 = vadd.f32 %v1999_v35, %v1996_v34  ;;  %v2035_v57 = vld [vmem:[%s1925_s30 + $0x30] sm:$0xff]  ;;  %v2038_v58 = vld [vmem:[%s1925_s30 + $0x38] sm:$0xff]  ;;  %v2046_v3 = vld [vmem:[%s1925_s30 + $0x40] sm:$0xff] }
  0x19   : > { %418 = vadd.xlane.f32.xlu1 %v417_v21  ;;  %v421_v31 = vadd.f32 %v420_v25, %v393_v24  ;;  %v381_v39 = vmul.f32 %v1983_v26, %v1983_v26  ;;  %v404_v40 = vadd.f32 %v380_v33, %v379_v32  ;;  %v397_v46 = vmul.f32 %v2011_v42, %v2011_v42  ;;  %v2049_v4 = vld [vmem:[%s1925_s30 + $0x48] sm:$0xff]  ;;  %v2052_v5 = vld [vmem:[%s1925_s30 + $0x50] sm:$0xff]  ;;  %v2061_v15 = vld [vmem:[%s1925_s30 + $0x58] sm:$0xff] }
  0x1a   : > { %v401_v44 = vadd.f32 %v400_v37, %v378_v36  ;;  %v354_v45 = vadd.f32 %v353_v38, %v2008_v41  ;;  %v398_v47 = vmul.f32 %v2014_v43, %v2014_v43  ;;  %v394_v50 = vmul.f32 %v1996_v34, %v1996_v34  ;;  %v1676_v32 = vld [vmem:[%s3080_s3 + $0xf0] sm:$0xf]  ;;  %v1781_v36 = vld [vmem:[%s3080_s3 + $0xf4] sm:$0xf0] }
  0x1b   : > { %v405_v48 = vadd.f32 %v404_v40, %v381_v39  ;;  %v395_v51 = vmul.f32 %v1999_v35, %v1999_v35  ;;  %v357_v52 = vadd.f32 %v2014_v43, %v2011_v42  ;;  %v399_v53 = vmul.f32 %v2022_v49, %v2022_v49  ;;  %v1604_v39 = vld [vmem:[%s3080_s3 + $0x60] sm:$0xf]  ;;  %v1763_v40 = vld [vmem:[%s3080_s3 + $0x64] sm:$0xf0] }
  0x1c   : > { %v428_v54 = vadd.f32 %v398_v47, %v397_v46  ;;  %v396_v55 = vmul.f32 %v2008_v41, %v2008_v41  ;;  %v382_v61 = vmul.f32 %v2035_v57, %v2035_v57  ;;  %v383_v62 = vmul.f32 %v2038_v58, %v2038_v58  ;;  %v1779_v46 = vld [vmem:[%s3080_s3 + $0xe4] sm:$0xf0] }
  0x1d   : > { %v424_v56 = vadd.f32 %v395_v51, %v394_v50  ;;  %v358_v59 = vadd.f32 %v357_v52, %v2022_v49  ;;  %v337_v6 = vadd.f32 %v2038_v58, %v2035_v57  ;;  %v384_v10 = vmul.f32 %v2046_v3, %v2046_v3  ;;  %v1596_v50 = vld [vmem:[%s3080_s3 + $0x50] sm:$0xf]  ;;  %v1761_v51 = vld [vmem:[%s3080_s3 + $0x54] sm:$0xf0] }
  0x1e   : > { %v429_v60 = vadd.f32 %v428_v54, %v399_v53  ;;  %v408_v13 = vadd.f32 %v383_v62, %v382_v61  ;;  %v341_v14 = vadd.f32 %v2052_v5, %v2049_v4  ;;  %v385_v20 = vmul.f32 %v2049_v4, %v2049_v4  ;;  %v1660_v52 = vld [vmem:[%s3080_s3 + $0xd0] sm:$0xf]  ;;  %v1777_v54 = vld [vmem:[%s3080_s3 + $0xd4] sm:$0xf0]  ;;  %v1652_v61 = vld [vmem:[%s3080_s3 + $0xc0] sm:$0xf] }
  0x1f   : > { %351 = vadd.xlane.f32.xlu0 %v350_v27  ;;  %v425_v63 = vadd.f32 %v424_v56, %v396_v55  ;;  %v338_v18 = vadd.f32 %v337_v6, %v2046_v3  ;;  %v386_v21 = vmul.f32 %v2052_v5, %v2052_v5  ;;  %v387_v24 = vmul.f32 %v2061_v15, %v2061_v15 }
  0x20   : > { %335 = vadd.xlane.f32.xlu2 %v334_v30  ;;  %v409_v22 = vadd.f32 %v408_v13, %v384_v10  ;;  %v342_v23 = vadd.f32 %v341_v14, %v2061_v15  ;;  %v1869_v28 = vmov 384.0   ;;  %v1612_v30 = vld [vmem:[%s3080_s3 + $0x70] sm:$0xf]  ;;  %v1677_v37 = vor.u32 %v1781_v36, %v1676_v32  ;;  %v1757_v14 = vld [vmem:[%s3080_s3 + $0x34] sm:$0xf0] }
  0x21   : > { %422 = vadd.xlane.f32.xlu1 %v421_v31  ;;  %v412_v25 = vadd.f32 %v386_v21, %v385_v20  ;;  %1825 = vrcp.f32 %v1869_v28  ;;  %v1765_v31 = vld [vmem:[%s3080_s3 + $0x74] sm:$0xf0]  ;;  %v1597_v53 = vor.u32 %v1761_v51, %v1596_v50  ;;  %v1661_v55 = vor.u32 %v1777_v54, %v1660_v52  ;;  %v1580_v13 = vld [vmem:[%s3080_s3 + $0x30] sm:$0xf]  ;;  %v1556_v50 = vld [vmem:[%s3080_s3] sm:$0xf] }
  0x22   : > { %v1613_v33 = vor.u32 %v1765_v31, %v1612_v30  ;;  %1806 = vmatpush.bf16.msra.mxu3 %v1677_v37  ;;  %983 = vmatpush.bf16.msra.mxu1 %v1677_v37  ;;  %v1581_v20 = vor.u32 %v1757_v14, %v1580_v13  ;;  %v1773_v21 = vld [vmem:[%s3080_s3 + $0xb4] sm:$0xf0]  ;;  %v1564_v37 = vld [vmem:[%s3080_s3 + $0x10] sm:$0xf]  ;;  %v1751_v51 = vld [vmem:[%s3080_s3 + $0x4] sm:$0xf0] }
  0x23   : > { %v413_v27 = vadd.f32 %v412_v25, %v387_v24  ;;  %v1572_v24 = vld [vmem:[%s3080_s3 + $0x20] sm:$0xf]  ;;  %v1755_v25 = vld [vmem:[%s3080_s3 + $0x24] sm:$0xf0] }
  0x24   : > { %1798 = vmatpush.bf16.msra.mxu2 %v1613_v33  ;;  %954 = vmatpush.bf16.msra.mxu0 %v1613_v33  ;;  %v1573_v28 = vor.u32 %v1755_v25, %v1572_v24  ;;  %v1620_v52 = vld [vmem:[%s3080_s3 + $0x80] sm:$0xf]  ;;  %v1767_v54 = vld [vmem:[%s3080_s3 + $0x84] sm:$0xf0] }
  0x27   : > { %402 = vadd.xlane.f32.xlu0 %v401_v44  ;;  %v1826_v29 = vpop.eup %1825  ;;  %v1668_v44 = vld [vmem:[%s3080_s3 + $0xe0] sm:$0xf] }
  0x28   : > { %355 = vadd.xlane.f32.xlu2 %v354_v45  ;;  %v362_v38 = vmul.f32 384.0, %v1826_v29  ;;  %v1605_v45 = vor.u32 %v1763_v40, %v1604_v39  ;;  %v1669_v47 = vor.u32 %v1779_v46, %v1668_v44  ;;  %vm366_vm0 = vweird.f32 %v1826_v29  ;;  %v1628_v39 = vld [vmem:[%s3080_s3 + $0x90] sm:$0xf]  ;;  %v1769_v44 = vld [vmem:[%s3080_s3 + $0x94] sm:$0xf0] }
  0x29   : > { %406 = vadd.xlane.f32.xlu1 %v405_v48 }
  0x2a   : > { %v363_v48 = vsub.f32 1.0, %v362_v38  ;;  %1799 = vmatpush.bf16.msra.mxu2 %v1605_v45  ;;  %955 = vmatpush.bf16.msra.mxu0 %v1605_v45  ;;  %v1753_v38 = vld [vmem:[%s3080_s3 + $0x14] sm:$0xf0] }
  0x2b   : > { %1807 = vmatpush.bf16.msra.mxu3 %v1669_v47  ;;  %984 = vmatpush.bf16.msra.mxu1 %v1669_v47  ;;  %v1565_v46 = vor.u32 %v1753_v38, %v1564_v37  ;;  %v1629_v47 = vor.u32 %v1769_v44, %v1628_v39  ;;  %v1764_v37 = vld [vmem:[%s3080_s3 + $0x74] sm:$0xf]  ;;  %v1614_v38 = vld [vmem:[%s3080_s3 + $0x78] sm:$0xf0] }
  0x2c   : > { %v364_v56 = vmul.f32 %v1826_v29, %v363_v48  ;;  %v1617_v44 = vor.u32 %v1764_v37, %v1614_v38  ;;  %v1724_v38 = vld [vmem:[%s3080_s3 + $0x150] sm:$0xf] }
  0x2e   : > { %1800 = vmatpush.bf16.msra.mxu2 %v1597_v53  ;;  %956 = vmatpush.bf16.msra.mxu0 %v1597_v53  ;;  %v365_v10 = vadd.f32 %v1826_v29, %v364_v56  ;;  %v1557_v53 = vor.u32 %v1751_v51, %v1556_v50 }
  0x2f   : > { %359 = vadd.xlane.f32.xlu0 %v358_v59  ;;  %1808 = vmatpush.bf16.msra.mxu3 %v1661_v55  ;;  %v1588_v59 = vld [vmem:[%s3080_s3 + $0x40] sm:$0xf] }
  0x30   : > { %430 = vadd.xlane.f32.xlu2 %v429_v60  ;;  %v1759_v60 = vld [vmem:[%s3080_s3 + $0x44] sm:$0xf0]  ;;  %985 = vmatpush.bf16.msra.mxu1 %v1661_v55 }
  0x31   : > { %426 = vadd.xlane.f32.xlu1 %v425_v63  ;;  %v1589_v62 = vor.u32 %v1759_v60, %v1588_v59  ;;  %v1775_v63 = vld [vmem:[%s3080_s3 + $0xc4] sm:$0xf0]  ;;  %v1621_v59 = vor.u32 %v1767_v54, %v1620_v52  ;;  %v1732_v52 = vld [vmem:[%s3080_s3 + $0x160] sm:$0xf]  ;;  %v1762_v54 = vld [vmem:[%s3080_s3 + $0x64] sm:$0xf] }
  0x32   : > { %v1653_v6 = vor.u32 %v1775_v63, %v1652_v61 }
  0x33   : > { %1801 = vmatpush.bf16.msra.mxu2 %v1589_v62  ;;  %957 = vmatpush.bf16.msra.mxu0 %v1589_v62 }
  0x34   : > { %1809 = vmatpush.bf16.msra.mxu3 %v1653_v6  ;;  %986 = vmatpush.bf16.msra.mxu1 %v1653_v6 }
  0x37   : > { %339 = vadd.xlane.f32.xlu0 %v338_v18  ;;  %v1644_v18 = vld [vmem:[%s3080_s3 + $0xb0] sm:$0xf]  ;;  %1802 = vmatpush.bf16.msra.mxu2 %v1581_v20 }
  0x38   : > { %410 = vadd.xlane.f32.xlu2 %v409_v22  ;;  %v1645_v22 = vor.u32 %v1773_v21, %v1644_v18  ;;  %958 = vmatpush.bf16.msra.mxu0 %v1581_v20  ;;  %v2193_v18 = vld [vmem:[%s3078_s1] sm:$0x7] }
  0x39   : > { %343 = vadd.xlane.f32.xlu1 %v342_v23  ;;  %v2131_v23 = vsel %vm366_vm0, %v1826_v29, %v365_v10  ;;  %v1771_v29 = vld [vmem:[%s3080_s3 + $0xa4] sm:$0xf0]  ;;  %v2198_v20 = vld [vmem:[%s3079_s2] sm:$0x7] }
  0x3a   : > { %1810 = vmatpush.bf16.msra.mxu3 %v1645_v22  ;;  %987 = vmatpush.bf16.msra.mxu1 %v1645_v22 }
  0x3b   : > { %1803 = vmatpush.bf16.msra.mxu2 %v1573_v28 }
  0x3c   : > { %959 = vmatpush.bf16.msra.mxu0 %v1573_v28  ;;  %v1797_v28 = vld [vmem:[%s3080_s3 + $0x174] sm:$0xf0] }
  0x3f   : > { %414 = vadd.xlane.f32.xlu0 %v413_v27  ;;  %v1636_v27 = vld [vmem:[%s3080_s3 + $0xa0] sm:$0xf]  ;;  %1804 = vmatpush.bf16.msra.mxu2 %v1565_v46 }
  0x40   : > { %v1637_v31 = vor.u32 %v1771_v29, %v1636_v27  ;;  %960 = vmatpush.bf16.msra.mxu0 %v1565_v46  ;;  %v1740_v27 = vld [vmem:[%s3080_s3 + $0x170] sm:$0xf] }
  0x42   : > { %1811 = vmatpush.bf16.msra.mxu3 %v1637_v31  ;;  %988 = vmatpush.bf16.msra.mxu1 %v1637_v31 }
  0x43   : > { %1805 = vmatpush.bf16.msra.mxu2 %v1557_v53 }
  0x44   : > { %961 = vmatpush.bf16.msra.mxu0 %v1557_v53  ;;  %v1795_v53 = vld [vmem:[%s3080_s3 + $0x164] sm:$0xf0] }
  0x46   : > { %1812 = vmatpush.bf16.msra.mxu3 %v1629_v47  ;;  %989 = vmatpush.bf16.msra.mxu1 %v1629_v47 }
  0x4a   : > { %1813 = vmatpush.bf16.msra.mxu3 %v1621_v59  ;;  %990 = vmatpush.bf16.msra.mxu1 %v1621_v59 }
  0x4e   : > { %1041 = vmatpush.bf16.msrb.mxu3 %v1617_v44  ;;  %v1760_v44 = vld [vmem:[%s3080_s3 + $0x54] sm:$0xf] }
  0x8a   : > { %v348_v30 = vpop.xlane.xlu0 %347 }
  0x8b   : > { %v2146_v32 = vmul.f32 %v2131_v23, %v348_v30  ;;  %v332_v33 = vpop.xlane.xlu2 %331 }
  0x8c   : > { %v419_v36 = vpop.xlane.xlu1 %418  ;;  %v2183_v6 = vmul.f32 %v2131_v23, %v332_v33 }
  0x8d   : > { %v436_v40 = vmul.f32 %v419_v36, %v2131_v23  ;;  %v444_v45 = vmul.f32 %v2146_v32, %v2146_v32  ;;  %v1741_v36 = vor.u32 %v1797_v28, %v1740_v27  ;;  %v468_v50 = vsub.f32 %v1928_v0, %v2146_v32 }
  0x8e   : > { %v440_v25 = vmul.f32 %v2183_v6, %v2183_v6 }
  0x8f   : > { %v452_v48 = vsub.f32 %v436_v40, %v444_v45  ;;  %v2225_v40 = vperm.slane %v2193_v18, 0  ;;  %1012 = vmatpush.bf16.msrb.mxu2 %v1741_v36 }
  0x91   : > { %v2175_v55 = vadd.f32 1e-05, %v452_v48  ;;  %v2230_v48 = vperm.slane %v2198_v20, 0 }
  0x92   : > { %v352_v56 = vpop.xlane.xlu0 %351 }
  0x93   : > { %v2178_v60 = vmul.f32 %v2131_v23, %v352_v56  ;;  %v336_v61 = vpop.xlane.xlu2 %335  ;;  %1827 = vrsqrt.f32 %v2175_v55  ;;  %vm534_vm2 = vweird.f32 %v2175_v55 }
  0x94   : > { %v423_v62 = vpop.xlane.xlu1 %422  ;;  %v2188_v13 = vmul.f32 %v2131_v23, %v336_v61 }
  0x95   : > { %v437_v63 = vmul.f32 %v423_v62, %v2131_v23  ;;  %v445_v10 = vmul.f32 %v2178_v60, %v2178_v60  ;;  %v1733_v62 = vor.u32 %v1795_v53, %v1732_v52  ;;  %v1598_v53 = vld [vmem:[%s3080_s3 + $0x58] sm:$0xf0] }
  0x96   : > { %v441_v31 = vmul.f32 %v2188_v13, %v2188_v13 }
  0x97   : > { %v453_v14 = vsub.f32 %v437_v63, %v445_v10  ;;  %v1606_v63 = vld [vmem:[%s3080_s3 + $0x68] sm:$0xf0]  ;;  %v469_v10 = vsub.f32 %v1931_v1, %v2146_v32  ;;  %1013 = vmatpush.bf16.msrb.mxu2 %v1733_v62 }
  0x99   : > { %v2200_v21 = vpop.eup %1827  ;;  %v2202_v22 = vadd.f32 1e-05, %v453_v14  ;;  %v1601_v14 = vor.u32 %v1760_v44, %v1598_v53  ;;  %v1791_v44 = vld [vmem:[%s3080_s3 + $0x144] sm:$0xf0] }
  0x9a   : > { %v403_v24 = vpop.xlane.xlu0 %402  ;;  %v529_v29 = vmul.f32 %v2200_v21, %v2175_v55  ;;  %vm535_vm1 = vweird.f32 %v2200_v21 }
  0x9b   : > { %v432_v30 = vmul.f32 %v403_v24, %v2131_v23  ;;  %v356_v33 = vpop.xlane.xlu2 %355  ;;  %1829 = vrsqrt.f32 %v2202_v22  ;;  %v2256_v24 = vperm.slane %v2193_v18, 1  ;;  %vm536_vm3 = vmor %vm534_vm2, %vm535_vm1  ;;  %vm544_vm4 = vweird.f32 %v2202_v22 }
  0x9c   : > { %v407_v39 = vpop.xlane.xlu1 %406  ;;  %v530_v45 = vmul.f32 %v2200_v21, %v529_v29  ;;  %v2235_v51 = vmul.f32 %v2131_v23, %v356_v33  ;;  %v2262_v29 = vperm.slane %v2198_v20, 1 }
  0x9d   : > { %v448_v46 = vsub.f32 %v432_v30, %v440_v25  ;;  %v433_v47 = vmul.f32 %v407_v39, %v2131_v23  ;;  %v1609_v25 = vor.u32 %v1762_v54, %v1606_v63  ;;  %v1793_v39 = vld [vmem:[%s3080_s3 + $0x154] sm:$0xf0]  ;;  %v471_v63 = vsub.f32 %v1956_v11, %v2178_v60 }
  0x9e   : > { %v531_v56 = vmul.f32 0.5, %v530_v45  ;;  %v1725_v62 = vor.u32 %v1793_v39, %v1724_v38 }
  0x9f   : > { %v2246_v59 = vadd.f32 1e-05, %v448_v46  ;;  %v449_v61 = vsub.f32 %v433_v47, %v441_v31  ;;  %1042 = vmatpush.bf16.msrb.mxu3 %v1609_v25  ;;  %v446_v47 = vmul.f32 %v2235_v51, %v2235_v51 }
  0xa0   : > { %v532_v27 = vsub.f32 1.5, %v531_v56  ;;  %1014 = vmatpush.bf16.msrb.mxu2 %v1725_v62 }
  0xa1   : > { %1831 = vrsqrt.f32 %v2246_v59  ;;  %v2259_v28 = vadd.f32 1e-05, %v449_v61  ;;  %v2264_v30 = vpop.eup %1829  ;;  %vm494_vm6 = vweird.f32 %v2246_v59 }
  0xa2   : > { %v360_v37 = vpop.xlane.xlu0 %359  ;;  %v533_v45 = vmul.f32 %v2200_v21, %v532_v27  ;;  %v539_v46 = vmul.f32 %v2264_v30, %v2202_v22  ;;  %vm545_vm5 = vweird.f32 %v2264_v30 }
  0xa3   : > { %1833 = vrsqrt.f32 %v2259_v28  ;;  %v431_v52 = vpop.xlane.xlu2 %430  ;;  %v2293_v54 = vmul.f32 %v2131_v23, %v360_v37  ;;  %1043 = vmatpush.bf16.msrb.mxu3 %v1601_v14  ;;  %vm504_vm7 = vweird.f32 %v2259_v28  ;;  %vm546_vm8 = vmor %vm544_vm4, %vm545_vm5 }
  0xa4   : > { %v427_v56 = vpop.xlane.xlu1 %426  ;;  %v439_v61 = vmul.f32 %v431_v52, %v2131_v23  ;;  %v540_v25 = vmul.f32 %v2264_v30, %v539_v46  ;;  %v2309_v39 = vsel %vm536_vm3, %v2200_v21, %v533_v45  ;;  %v1716_v46 = vld [vmem:[%s3080_s3 + $0x140] sm:$0xf] }
  0xa5   : > { %v438_v27 = vmul.f32 %v427_v56, %v2131_v23  ;;  %v447_v38 = vmul.f32 %v2293_v54, %v2293_v54  ;;  %v1717_v33 = vor.u32 %v1791_v44, %v1716_v46  ;;  %v580_v14 = vmul.f32 %v2309_v39, %v468_v50 }
  0xa6   : > { %v541_v53 = vmul.f32 0.5, %v540_v25  ;;  %v581_v50 = vmul.f32 %v2309_v39, %v469_v10 }
  0xa7   : > { %v2317_v52 = vpop.eup %1831  ;;  %v454_v21 = vsub.f32 %v438_v27, %v446_v47  ;;  %v455_v62 = vsub.f32 %v439_v61, %v447_v38  ;;  %1015 = vmatpush.bf16.msrb.mxu2 %v1717_v33  ;;  %v1758_v33 = vld [vmem:[%s3080_s3 + $0x44] sm:$0xf]  ;;  %v611_v10 = vmul.f32 %v2225_v40, %v580_v14 }
  0xa8   : > { %v489_v45 = vmul.f32 %v2317_v52, %v2246_v59  ;;  %v542_v31 = vsub.f32 1.5, %v541_v53  ;;  %v612_v14 = vmul.f32 %v2256_v24, %v581_v50  ;;  %vm495_vm9 = vweird.f32 %v2317_v52 }
  0xa9   : > { %v2326_v37 = vpop.eup %1833  ;;  %v2330_v55 = vadd.f32 1e-05, %v454_v21  ;;  %v2340_v27 = vadd.f32 1e-05, %v455_v62  ;;  %v1590_v62 = vld [vmem:[%s3080_s3 + $0x48] sm:$0xf0]  ;;  %vm496_vm12 = vmor %vm494_vm6, %vm495_vm9 }
  0xaa   : > { %v490_v47 = vmul.f32 %v2317_v52, %v489_v45  ;;  %v499_v61 = vmul.f32 %v2326_v37, %v2259_v28  ;;  %v340_v38 = vpop.xlane.xlu0 %339  ;;  %v543_v46 = vmul.f32 %v2264_v30, %v542_v31  ;;  %v1593_v56 = vor.u32 %v1758_v33, %v1590_v62 }
  0xab   : > { %1835 = vrsqrt.f32 %v2330_v55  ;;  %v2345_v44 = vmul.f32 %v2131_v23, %v340_v38  ;;  %v411_v0 = vpop.xlane.xlu2 %410  ;;  %vm505_vm10 = vweird.f32 %v2326_v37  ;;  %vm554_vm11 = vweird.f32 %v2330_v55 }
  0xac   : > { %v491_v53 = vmul.f32 0.5, %v490_v47  ;;  %v500_v21 = vmul.f32 %v2326_v37, %v499_v61  ;;  %1837 = vrsqrt.f32 %v2340_v27  ;;  %v344_v31 = vpop.xlane.xlu1 %343  ;;  %v434_v38 = vmul.f32 %v411_v0, %v2131_v23  ;;  %1044 = vmatpush.bf16.msrb.mxu3 %v1593_v56  ;;  %vm506_vm14 = vmor %vm504_vm7, %vm505_vm10 }
  0xad   : > { %v442_v1 = vmul.f32 %v2345_v44, %v2345_v44  ;;  %v2372_v36 = vmul.f32 %v2131_v23, %v344_v31  ;;  %v2377_v25 = vsel %vm546_vm8, %v2264_v30, %v543_v46  ;;  %v643_v56 = vadd.f32 %v2262_v29, %v612_v14 }
  0xae   : > { %v492_v47 = vsub.f32 1.5, %v491_v53  ;;  %v501_v61 = vmul.f32 0.5, %v500_v21  ;;  %v583_v46 = vmul.f32 %v2377_v25, %v471_v63  ;;  %vm564_vm0 = vweird.f32 %v2340_v27 }
  0xaf   : > { %v450_v21 = vsub.f32 %v434_v38, %v442_v1  ;;  %v443_v30 = vmul.f32 %v2372_v36, %v2372_v36  ;;  %vm1129_vm9 = vcmask 523264  }
  0xb0   : > { %v502_v22 = vsub.f32 1.5, %v501_v61  ;;  %v493_v31 = vmul.f32 %v2317_v52, %v492_v47  ;;  %v642_v61 = vadd.f32 %v2230_v48, %v611_v10  ;;  %v614_v63 = vmul.f32 %v2225_v40, %v583_v46 }
  0xb1   : > { %v2383_v0 = vpop.eup %1835  ;;  %v2397_v1 = vadd.f32 1e-05, %v450_v21  ;;  %v3089_v10 = vsub.f32 %v1959_v12, %v2178_v60  ;;  %v3090_v12 = vsub.f32 %v1945_v7, %v2183_v6  ;;  %v3093_v7 = vsub.f32 %v1948_v8, %v2183_v6  ;;  %v1796_v8 = vld [vmem:[%s3080_s3 + $0x174] sm:$0xf] }
  0xb2   : > { %v1838_v50 = vpop.eup %1837  ;;  %v503_v33 = vmul.f32 %v2326_v37, %v502_v22  ;;  %v549_v62 = vmul.f32 %v2383_v0, %v2330_v55  ;;  %v415_v47 = vpop.xlane.xlu0 %414  ;;  %vm555_vm13 = vweird.f32 %v2383_v0  ;;  %v645_v59 = vadd.f32 %v2230_v48, %v614_v63 }
  0xb3   : > { %v559_v38 = vmul.f32 %v1838_v50, %v2340_v27  ;;  %v435_v11 = vmul.f32 %v415_v47, %v2131_v23  ;;  %1839 = vrsqrt.f32 %v2397_v1  ;;  %v584_v23 = vmul.f32 %v2377_v25, %v3089_v10  ;;  %vm556_vm1 = vmor %vm554_vm11, %vm555_vm13 }
  0xb4   : > { %v550_v22 = vmul.f32 %v2383_v0, %v549_v62  ;;  %v2421_v46 = vsel %vm496_vm12, %v2317_v52, %v493_v31  ;;  %v2425_v53 = vsel %vm506_vm14, %v2326_v37, %v503_v33  ;;  %v3092_v52 = vsub.f32 %v1965_v16, %v2188_v13  ;;  %v1678_v16 = vld [vmem:[%s3080_s3 + $0xf8] sm:$0xf0] }
  0xb5   : > { %v560_v14 = vmul.f32 %v1838_v50, %v559_v38  ;;  %v451_v21 = vsub.f32 %v435_v11, %v443_v30  ;;  %v615_v47 = vmul.f32 %v2256_v24, %v584_v23  ;;  %v568_v10 = vmul.f32 %v2421_v46, %v3090_v12  ;;  %v1742_v23 = vld [vmem:[%s3080_s3 + $0x178] sm:$0xf0] }
  0xb6   : > { %v551_v62 = vmul.f32 0.5, %v550_v22  ;;  %v2433_v30 = vpack.c.bf16 %v645_v59, %v642_v61  ;;  %v571_v31 = vmul.f32 %v2425_v53, %v3092_v52  ;;  %v569_v33 = vmul.f32 %v2421_v46, %v3093_v7  ;;  %v1780_v61 = vld [vmem:[%s3080_s3 + $0xf4] sm:$0xf] }
  0xb7   : > { %v561_v28 = vmul.f32 0.5, %v560_v14  ;;  %v2431_v45 = vadd.f32 1e-05, %v451_v21  ;;  %v646_v11 = vadd.f32 %v2262_v29, %v615_v47  ;;  %v599_v37 = vmul.f32 %v2225_v40, %v568_v10 }
  0xb8   : > { %3091 = vst [vmem:[#allocation2_spill] sm:$0xff] %v2433_v30  ;;  %v552_v38 = vsub.f32 1.5, %v551_v62  ;;  %vm565_vm15 = vweird.f32 %v1838_v50  ;;  %972 = vmatmul.bf16.vlgmr.msra.gmra.mxu2 %v2433_v30  ;;  %v602_v22 = vmul.f32 %v2225_v40, %v571_v31  ;;  %v3095_v62 = vsub.f32 %v1968_v17, %v2188_v13 }
  0xb9   : > { %v562_v63 = vsub.f32 1.5, %v561_v28  ;;  %1841 = vrsqrt.f32 %v2431_v45  ;;  %v2460_v14 = vpop.eup %1839  ;;  %v2464_v59 = vpack.c.bf16 %v646_v11, %v643_v56  ;;  %v630_v28 = vadd.f32 %v2230_v48, %v599_v37  ;;  %vm566_vm2 = vmor %vm564_vm0, %vm565_vm15 }
  0xba   : > { %v553_v21 = vmul.f32 %v2383_v0, %v552_v38  ;;  %v572_v47 = vmul.f32 %v2425_v53, %v3095_v62  ;;  %v509_v10 = vmul.f32 %v2460_v14, %v2397_v1  ;;  %v633_v27 = vadd.f32 %v2230_v48, %v602_v22 }
  0xbb   : > { %3094 = vst [vmem:[#allocation3_spill] sm:$0xff] %v2464_v59  ;;  %v563_v12 = vmul.f32 %v1838_v50, %v562_v63  ;;  %1001 = vmatmul.bf16.vlgmr.msra.gmra.mxu3 %v2464_v59  ;;  %v600_v17 = vmul.f32 %v2256_v24, %v569_v33  ;;  %v1681_v52 = vor.u32 %v1780_v61, %v1678_v16  ;;  %v1708_v16 = vld [vmem:[%s3080_s3 + $0x130] sm:$0xf]  ;;  %vm515_vm3 = vweird.f32 %v2460_v14 }
  0xbc   : > { %v603_v56 = vmul.f32 %v2256_v24, %v572_v47  ;;  %v1745_v31 = vor.u32 %v1796_v8, %v1742_v23  ;;  %v510_v55 = vmul.f32 %v2460_v14, %v509_v10  ;;  %v2483_v38 = vpack.c.bf16 %v633_v27, %v630_v28  ;;  %v1582_v10 = vld [vmem:[%s3080_s3 + $0x38] sm:$0xf0] }
  0xbd   : > { %v2486_v11 = vsel %vm556_vm1, %v2383_v0, %v553_v21  ;;  %v2488_v37 = vsel %vm566_vm2, %v1838_v50, %v563_v12  ;;  %v631_v7 = vadd.f32 %v2262_v29, %v600_v17  ;;  %1070 = vmatpush.bf16.msrb.mxu0 %v1681_v52  ;;  %v3097_v33 = vsub.f32 %v1996_v34, %v2235_v51  ;;  %v1789_v0 = vld [vmem:[%s3080_s3 + $0x134] sm:$0xf0]  ;;  %v1756_v50 = vld [vmem:[%s3080_s3 + $0x34] sm:$0xf]  ;;  %v1794_v17 = vld [vmem:[%s3080_s3 + $0x164] sm:$0xf] }
  0xbe   : > { %3096 = vst [vmem:[#allocation4_spill] sm:$0xff] %v2483_v38  ;;  %v634_v63 = vadd.f32 %v2262_v29, %v603_v56  ;;  %1099 = vmatpush.bf16.msrb.mxu1 %v1745_v31  ;;  %v511_v8 = vmul.f32 0.5, %v510_v55  ;;  %962 = vmatmul.bf16.vlgmr.msra.gmra.mxu0 %v2483_v38  ;;  %v3098_v34 = vsub.f32 %v2011_v42, %v2293_v54  ;;  %v1778_v42 = vld [vmem:[%s3080_s3 + $0xe4] sm:$0xf]  ;;  %v1734_v56 = vld [vmem:[%s3080_s3 + $0x168] sm:$0xf0]  ;;  %vm514_vm4 = vweird.f32 %v2397_v1 }
  0xbf   : > { %v586_v61 = vmul.f32 %v2486_v11, %v3097_v33  ;;  %v2505_v22 = vpop.eup %1841  ;;  %v3099_v21 = vsub.f32 %v1999_v35, %v2235_v51  ;;  %v3100_v47 = vsub.f32 %v2014_v43, %v2293_v54  ;;  %v1670_v43 = vld [vmem:[%s3080_s3 + $0xe8] sm:$0xf0]  ;;  %v1787_v33 = vld [vmem:[%s3080_s3 + $0x124] sm:$0xf0]  ;;  %v462_v30 = vsub.f32 %v2035_v57, %v2345_v44  ;;  %vm516_vm6 = vmor %vm514_vm4, %vm515_vm3 }
  0xc0   : > { %v589_v23 = vmul.f32 %v2488_v37, %v3098_v34  ;;  %v519_v35 = vmul.f32 %v2505_v22, %v2431_v45  ;;  %v2529_v28 = vpack.c.bf16 %v634_v63, %v631_v7  ;;  %v512_v52 = vsub.f32 1.5, %v511_v8  ;;  %v1700_v63 = vld [vmem:[%s3080_s3 + $0x120] sm:$0xf] }
  0xc1   : > { %v587_v62 = vmul.f32 %v2486_v11, %v3099_v21  ;;  %v590_v12 = vmul.f32 %v2488_v37, %v3100_v47  ;;  %v617_v27 = vmul.f32 %v2225_v40, %v586_v61  ;;  %v1709_v34 = vor.u32 %v1789_v0, %v1708_v16  ;;  %v1754_v21 = vld [vmem:[%s3080_s3 + $0x24] sm:$0xf]  ;;  %v1776_v47 = vld [vmem:[%s3080_s3 + $0xd4] sm:$0xf]  ;;  %v1662_v0 = vld [vmem:[%s3080_s3 + $0xd8] sm:$0xf0] }
  0xc2   : > { %3101 = vst [vmem:[#allocation5_spill] sm:$0xff] %v2529_v28  ;;  %v620_v31 = vmul.f32 %v2225_v40, %v589_v23  ;;  %v520_v61 = vmul.f32 %v2505_v22, %v519_v35  ;;  %991 = vmatmul.bf16.vlgmr.msra.gmra.mxu1 %v2529_v28  ;;  %v1585_v23 = vor.u32 %v1756_v50, %v1582_v10  ;;  %v1792_v50 = vld [vmem:[%s3080_s3 + $0x154] sm:$0xf]  ;;  %v1726_v10 = vld [vmem:[%s3080_s3 + $0x158] sm:$0xf0]  ;;  %vm525_vm5 = vweird.f32 %v2505_v22 }
  0xc3   : > { %v618_v55 = vmul.f32 %v2256_v24, %v587_v62  ;;  %v621_v7 = vmul.f32 %v2256_v24, %v590_v12  ;;  %v648_v8 = vadd.f32 %v2230_v48, %v617_v27  ;;  %v1574_v62 = vld [vmem:[%s3080_s3 + $0x28] sm:$0xf0]  ;;  %v513_v12 = vmul.f32 %v2460_v14, %v512_v52  ;;  %1016 = vmatpush.bf16.msrb.mxu2 %v1709_v34 }
  0xc4   : > { %v651_v35 = vadd.f32 %v2230_v48, %v620_v31  ;;  %v521_v59 = vmul.f32 0.5, %v520_v61  ;;  %1045 = vmatpush.bf16.msrb.mxu3 %v1585_v23  ;;  %v1673_v52 = vor.u32 %v1778_v42, %v1670_v43  ;;  %v1737_v31 = vor.u32 %v1794_v17, %v1734_v56  ;;  %v1785_v61 = vld [vmem:[%s3080_s3 + $0x114] sm:$0xf0]  ;;  %v1752_v42 = vld [vmem:[%s3080_s3 + $0x14] sm:$0xf] }
  0xc5   : > { %v649_v27 = vadd.f32 %v2262_v29, %v618_v55  ;;  %v652_v16 = vadd.f32 %v2262_v29, %v621_v7  ;;  %v1701_v55 = vor.u32 %v1787_v33, %v1700_v63  ;;  %v1692_v7 = vld [vmem:[%s3080_s3 + $0x110] sm:$0xf]  ;;  %v1577_v38 = vor.u32 %v1754_v21, %v1574_v62  ;;  %v1566_v43 = vld [vmem:[%s3080_s3 + $0x18] sm:$0xf0]  ;;  %v1774_v63 = vld [vmem:[%s3080_s3 + $0xc4] sm:$0xf] }
  0xc6   : > { %v2581_v28 = vpack.c.bf16 %v651_v35, %v648_v8  ;;  %v522_v17 = vsub.f32 1.5, %v521_v59  ;;  %1071 = vmatpush.bf16.msrb.mxu0 %v1673_v52  ;;  %1100 = vmatpush.bf16.msrb.mxu1 %v1737_v31  ;;  %v1665_v57 = vor.u32 %v1776_v47, %v1662_v0  ;;  %v1729_v56 = vor.u32 %v1792_v50, %v1726_v10  ;;  %v1654_v33 = vld [vmem:[%s3080_s3 + $0xc8] sm:$0xf0]  ;;  %v1790_v21 = vld [vmem:[%s3080_s3 + $0x144] sm:$0xf] }
  0xc7   : > { %v463_v8 = vsub.f32 %v2038_v58, %v2345_v44  ;;  %v465_v59 = vsub.f32 %v2049_v4, %v2372_v36  ;;  %v466_v34 = vsub.f32 %v2052_v5, %v2372_v36  ;;  %v2609_v23 = vpack.c.bf16 %v652_v16, %v649_v27  ;;  %v1718_v58 = vld [vmem:[%s3080_s3 + $0x148] sm:$0xf0]  ;;  %1017 = vmatpush.bf16.msrb.mxu2 %v1701_v55  ;;  %v1684_v35 = vld [vmem:[%s3080_s3 + $0x100] sm:$0xf]  ;;  %v1750_v27 = vld [vmem:[%s3080_s3 + $0x4] sm:$0xf] }
  0xc8   : > { %v523_v62 = vmul.f32 %v2505_v22, %v522_v17  ;;  %vm524_vm7 = vweird.f32 %v2431_v45  ;;  %1046 = vmatpush.bf16.msrb.mxu3 %v1577_v38  ;;  %v1693_v4 = vor.u32 %v1785_v61, %v1692_v7  ;;  %v2620_v1 = vsel %vm516_vm6, %v2460_v14, %v513_v12  ;;  %977 = vmatmul.bf16.gmra.mxu2 %v2581_v28  ;;  %v1783_v45 = vld [vmem:[%s3080_s3 + $0x104] sm:$0xf0]  ;;  %v1558_v16 = vld [vmem:[%s3080_s3 + $0x8] sm:$0xf0]  ;;  %v1788_v61 = vld [vmem:[%s3080_s3 + $0x134] sm:$0xf] }
  0xc9   : > { %vm526_vm8 = vmor %vm524_vm7, %vm525_vm5  ;;  %v1569_v5 = vor.u32 %v1752_v42, %v1566_v43  ;;  %v1657_v47 = vor.u32 %v1774_v63, %v1654_v33  ;;  %v574_v38 = vmul.f32 %v2620_v1, %v462_v30  ;;  %v575_v14 = vmul.f32 %v2620_v1, %v463_v8  ;;  %v1772_v30 = vld [vmem:[%s3080_s3 + $0xb4] sm:$0xf]  ;;  %v1786_v33 = vld [vmem:[%s3080_s3 + $0x124] sm:$0xf] }
  0xca   : > { %1072 = vmatpush.bf16.msrb.mxu0 %v1665_v57  ;;  %1101 = vmatpush.bf16.msrb.mxu1 %v1729_v56  ;;  %v1721_v12 = vor.u32 %v1790_v21, %v1718_v58  ;;  %v2640_v0 = vsel %vm526_vm8, %v2505_v22, %v523_v62  ;;  %v3102_v50 = vsub.f32 %v1983_v26, %v2188_v13  ;;  %v1646_v22 = vld [vmem:[%s3080_s3 + $0xb8] sm:$0xf0]  ;;  %v2670_v17 = vperm.slane %v2193_v18, 2  ;;  %v1702_v8 = vld [vmem:[%s3080_s3 + $0x128] sm:$0xf0] }
  0xcb   : > { %v577_v52 = vmul.f32 %v2640_v0, %v465_v59  ;;  %v605_v31 = vmul.f32 %v2225_v40, %v574_v38  ;;  %v578_v55 = vmul.f32 %v2640_v0, %v466_v34  ;;  %v606_v7 = vmul.f32 %v2256_v24, %v575_v14  ;;  %v1710_v26 = vld [vmem:[%s3080_s3 + $0x138] sm:$0xf0]  ;;  %1006 = vmatmul.bf16.gmra.mxu3 %v2609_v23 }
  0xcc   : > { %v573_v10 = vmul.f32 %v2425_v53, %v3102_v50  ;;  %v473_v13 = vsub.f32 %v1972_v19, %v2178_v60  ;;  %1018 = vmatpush.bf16.msrb.mxu2 %v1693_v4  ;;  %v1685_v53 = vor.u32 %v1783_v45, %v1684_v35  ;;  %v3103_v42 = vsub.f32 %v1951_v9, %v2183_v6  ;;  %v1770_v60 = vld [vmem:[%s3080_s3 + $0xa4] sm:$0xf]  ;;  %v1638_v9 = vld [vmem:[%s3080_s3 + $0xa8] sm:$0xf0] }
  0xcd   : > { %v476_v57 = vsub.f32 %v2008_v41, %v2235_v51  ;;  %1047 = vmatpush.bf16.msrb.mxu3 %v1569_v5  ;;  %v1561_v56 = vor.u32 %v1750_v27, %v1558_v16  ;;  %v608_v63 = vmul.f32 %v2225_v40, %v577_v52  ;;  %v609_v19 = vmul.f32 %v2256_v24, %v578_v55  ;;  %v1766_v50 = vld [vmem:[%s3080_s3 + $0x84] sm:$0xf]  ;;  %v1686_v55 = vld [vmem:[%s3080_s3 + $0x108] sm:$0xf0] }
  0xce   : > { %v570_v43 = vmul.f32 %v2421_v46, %v3103_v42  ;;  %1073 = vmatpush.bf16.msrb.mxu0 %v1657_v47  ;;  %1102 = vmatpush.bf16.msrb.mxu1 %v1721_v12  ;;  %v1649_v6 = vor.u32 %v1772_v30, %v1646_v22  ;;  %v1713_v18 = vor.u32 %v1788_v61, %v1710_v26  ;;  %vm1436_vm14 = vcmask 1043456  }
  0xcf   : > { %v604_v41 = vmul.f32 %v2670_v17, %v573_v10  ;;  %v636_v51 = vadd.f32 %v2230_v48, %v605_v31  ;;  %v639_v40 = vadd.f32 %v2230_v48, %v608_v63  ;;  %v637_v24 = vadd.f32 %v2262_v29, %v606_v7  ;;  %v1782_v31 = vld [vmem:[%s3080_s3 + $0x104] sm:$0xf] }
  0xd0   : > { %v640_v46 = vadd.f32 %v2262_v29, %v609_v19  ;;  %v479_v59 = vsub.f32 %v2022_v49, %v2293_v54  ;;  %1019 = vmatpush.bf16.msrb.mxu2 %v1685_v53  ;;  %v601_v34 = vmul.f32 %v2670_v17, %v570_v43  ;;  %v626_v48 = vperm.slane %v2198_v20, 2  ;;  %v1768_v54 = vld [vmem:[%s3080_s3 + $0x94] sm:$0xf] }
  0xd1   : > { %v1641_v21 = vor.u32 %v1770_v60, %v1638_v9  ;;  %1048 = vmatpush.bf16.msrb.mxu3 %v1561_v56  ;;  %v657_v58 = vpack.c.bf16 %v639_v40, %v636_v51  ;;  %v3104_v62 = vsub.f32 %v1934_v2, %v2146_v32  ;;  %v585_v5 = vmul.f32 %v2377_v25, %v473_v13  ;;  %v1630_v2 = vld [vmem:[%s3080_s3 + $0x98] sm:$0xf0]  ;;  %v1784_v32 = vld [vmem:[%s3080_s3 + $0x114] sm:$0xf] }
  0xd2   : > { %v658_v29 = vpack.c.bf16 %v640_v46, %v637_v24  ;;  %1074 = vmatpush.bf16.msrb.mxu0 %v1649_v6  ;;  %1103 = vmatpush.bf16.msrb.mxu1 %v1713_v18  ;;  %v635_v47 = vadd.f32 %v626_v48, %v604_v41  ;;  %v1705_v49 = vor.u32 %v1786_v33, %v1702_v8  ;;  %vm1437_vm15 = vcmask 523268  }
  0xd3   : > { %v582_v4 = vmul.f32 %v2309_v39, %v3104_v62  ;;  %v588_v20 = vmul.f32 %v2486_v11, %v476_v57  ;;  %967 = vmatmul.bf16.gmra.mxu0 %v657_v58  ;;  %v1694_v39 = vld [vmem:[%s3080_s3 + $0x118] sm:$0xf0]  ;;  %v616_v35 = vmul.f32 %v2670_v17, %v585_v5  ;;  %v591_v11 = vmul.f32 %v2488_v37, %v479_v59  ;;  %v1622_v37 = vld [vmem:[%s3080_s3 + $0x88] sm:$0xf0]  ;;  %v3105_v57 = vld [vmem:[#allocation4_spill] sm:$0xff] }
  0xd4   : > { %996 = vmatmul.bf16.gmra.mxu1 %v658_v29  ;;  %v632_v38 = vadd.f32 %v626_v48, %v601_v34  ;;  %v1633_v16 = vor.u32 %v1768_v54, %v1630_v2  ;;  %v1697_v30 = vor.u32 %v1784_v32, %v1694_v39  ;;  %v467_v61 = vsub.f32 %v2061_v15, %v2372_v36  ;;  %v3106_v36 = vld [vmem:[#allocation5_spill] sm:$0xff]  ;;  %vm2963_vm1 = vmor %vm1437_vm15, %vm1436_vm14 }
  0xd5   : > { %v613_v25 = vmul.f32 %v2670_v17, %v582_v4  ;;  %v619_v45 = vmul.f32 %v2670_v17, %v588_v20  ;;  %v647_v12 = vadd.f32 %v626_v48, %v616_v35  ;;  %v622_v27 = vmul.f32 %v2670_v17, %v591_v11 }
  0xd6   : > { %1075 = vmatpush.bf16.msrb.mxu0 %v1641_v21  ;;  %1104 = vmatpush.bf16.msrb.mxu1 %v1705_v49  ;;  %v656_v52 = vpack.c.bf16 %v635_v47, %v632_v38  ;;  %v1625_v13 = vor.u32 %v1766_v50, %v1622_v37  ;;  %v1689_v53 = vor.u32 %v1782_v31, %v1686_v55 }
  0xd7   : > { %v644_v14 = vadd.f32 %v626_v48, %v613_v25  ;;  %v650_v10 = vadd.f32 %v626_v48, %v619_v45  ;;  %v653_v22 = vadd.f32 %v626_v48, %v622_v27  ;;  %v464_v42 = vsub.f32 %v2046_v3, %v2345_v44  ;;  %v3107_v3 = vld [vmem:[#allocation2_spill] sm:$0xff]  ;;  %v3108_v44 = vld [vmem:[#allocation3_spill] sm:$0xff] }
  0xd8   : > { %1020 = vmatmul.bf16.vlgmr.msrb.gmra.mxu2 %v656_v52  ;;  %v579_v43 = vmul.f32 %v2640_v0, %v467_v61 }
  0xd9   : > { %v662_v7 = vpack.c.bf16 %v647_v12, %v644_v14  ;;  %v665_v26 = vpack.c.bf16 %v653_v22, %v650_v10  ;;  %v576_v56 = vmul.f32 %v2620_v1, %v464_v42 }
  0xda   : > { %1076 = vmatpush.bf16.msrb.mxu0 %v1633_v16  ;;  %1105 = vmatpush.bf16.msrb.mxu1 %v1697_v30  ;;  %v610_v63 = vmul.f32 %v2670_v17, %v579_v43 }
  0xdb   : > { %1049 = vmatmul.bf16.vlgmr.msrb.gmra.mxu3 %v3105_v57  ;;  %v607_v15 = vmul.f32 %v2670_v17, %v576_v56 }
  0xdc   : > { %v641_v19 = vadd.f32 %v626_v48, %v610_v63 }
  0xdd   : > { %v638_v60 = vadd.f32 %v626_v48, %v607_v15 }
  0xde   : > { %1077 = vmatpush.bf16.msrb.mxu0 %v1625_v13  ;;  %1106 = vmatpush.bf16.msrb.mxu1 %v1689_v53 }
  0xdf   : > { %v659_v9 = vpack.c.bf16 %v641_v19, %v638_v60 }
  0xe3   : > { %1078 = vmatmul.bf16.vlgmr.msrb.gmra.mxu0 %v3106_v36 }
  0xe4   : > { %1107 = vmatmul.bf16.vlgmr.msrb.gmra.mxu1 %v656_v52 }
  0xe8   : > { %1025 = vmatmul.bf16.gmra.mxu2 %v659_v9 }
  0xeb   : > { %1054 = vmatmul.bf16.gmra.mxu3 %v657_v58 }
  0xf3   : > { %1083 = vmatmul.bf16.gmra.mxu0 %v658_v29 }
  0xf4   : > { %1112 = vmatmul.bf16.gmra.mxu1 %v659_v9 }
  0xf8   : > { %1030 = vmatmul.bf16.gmra.mxu2 %v662_v7 }
  0xfb   : > { %1059 = vmatmul.bf16.gmra.mxu3 %v3107_v3 }
 0x103   : > { %1088 = vmatmul.bf16.gmra.mxu0 %v3108_v44 }
 0x104   : > { %1117 = vmatmul.bf16.gmra.mxu1 %v662_v7 }
 0x108   : > { %1035 = vmatmul.bf16.gmra.mxu2 %v665_v26 }
 0x10b   : > { %1064 = vmatmul.bf16.gmra.mxu3 %v2581_v28 }
 0x113   : > { %1093 = vmatmul.bf16.gmra.mxu0 %v2609_v23 }
 0x114   : > { %1122 = vmatmul.bf16.gmra.mxu1 %v665_v26 }
 0x13b   : > { %v2746_v1 = vpop.f32.mrf.mxu2  ;;  %v963_v0 = vpop.f32.mrf.mxu0 }
 0x13e   : > { %v2748_v17 = vpop.f32.mrf.mxu3 }
 0x13f   : > { %v992_v6 = vpop.f32.mrf.mxu1 }
 0x140   : > { %v993_v48 = vadd.f32 %v992_v6, %v963_v0  ;;  %v1003_v6 = vadd.f32 %v2748_v17, %v2746_v1 }
 0x143   : > { %v2750_v18 = vpop.f32.mrf.mxu2  ;;  %v965_v51 = vpop.f32.mrf.mxu0 }
 0x146   : > { %v2752_v41 = vpop.f32.mrf.mxu3 }
 0x147   : > { %v994_v40 = vpop.f32.mrf.mxu1 }
 0x148   : > { %v995_v47 = vadd.f32 %v994_v40, %v965_v51 }
 0x14b   : > { %v2754_v24 = vpop.f32.mrf.mxu2 }
 0x14e   : > { %v2756_v46 = vpop.f32.mrf.mxu3 }
 0x150   : > { %v968_v28 = vpop.f32.mrf.mxu0 }
 0x151   : > { %v997_v23 = vpop.f32.mrf.mxu1 }
 0x152   : > { %v998_v27 = vadd.f32 %v997_v23, %v968_v28 }
 0x153   : > { %v2758_v33 = vpop.f32.mrf.mxu2 }
 0x156   : > { %v2760_v8 = vpop.f32.mrf.mxu3 }
 0x158   : > { %v970_v59 = vpop.f32.mrf.mxu0 }
 0x159   : > { %v999_v34 = vpop.f32.mrf.mxu1 }
 0x15a   : > { %v1000_v53 = vadd.f32 %v999_v34, %v970_v59 }
 0x15b   : > { %v1021_v21 = vpop.f32.mrf.mxu2 }
 0x15c   : > { %v2768_v58 = vadd.f32 %v1021_v21, %v993_v48 }
 0x15e   : > { %1128 = vst [vmem:[%s2766_s18] sm:$0xff] %v2768_v58  ;;  %v1050_v29 = vpop.f32.mrf.mxu3  ;;  %v1194_v25 = vmul.f32 %v2768_v58, %v2768_v58 }
 0x160   : > { %v1079_v62 = vpop.f32.mrf.mxu0 }
 0x161   : > { %v1108_v4 = vpop.f32.mrf.mxu1  ;;  %v1080_v5 = vadd.f32 %v1079_v62, %v1050_v29 }
 0x163   : > { %v2772_v49 = vadd.f32 %v1108_v4, %v1080_v5  ;;  %v1023_v54 = vpop.f32.mrf.mxu2  ;;  %v1005_v5 = vadd.f32 %v2752_v41, %v2750_v18 }
 0x164   : > { %v2774_v20 = vadd.f32 %v1023_v54, %v995_v47 }
 0x165   : > { %1130 = vst.msk [vmem:[%s2766_s18 + $0x8] sm:$0xff] %vm1129_vm9, %v2772_v49  ;;  %v1147_v2 = vsel %vm1129_vm9, %v2772_v49, 0.0  ;;  %v1195_v32 = vmul.f32 %v2772_v49, %v2772_v49 }
 0x166   : > { %v1148_v39 = vadd.f32 %v1147_v2, %v2768_v58  ;;  %1131 = vst [vmem:[%s2766_s18 + $0x10] sm:$0xff] %v2774_v20  ;;  %v1052_v35 = vpop.f32.mrf.mxu3  ;;  %v1196_v31 = vmul.f32 %v2774_v20, %v2774_v20 }
 0x167   : > { %v1210_v11 = vsel %vm1129_vm9, %v1195_v32, 0.0 }
 0x168   : > { %v1081_v45 = vpop.f32.mrf.mxu0  ;;  %1149 = vadd.xlane.f32.xlu1 %v1148_v39  ;;  %v1211_v14 = vadd.f32 %v1210_v11, %v1194_v25 }
 0x169   : > { %v1110_v38 = vpop.f32.mrf.mxu1  ;;  %v1082_v12 = vadd.f32 %v1081_v45, %v1052_v35 }
 0x16a   : > { %1212 = vadd.xlane.f32.xlu0 %v1211_v14 }
 0x16b   : > { %v2789_v16 = vadd.f32 %v1110_v38, %v1082_v12  ;;  %v1026_v30 = vpop.f32.mrf.mxu2  ;;  %v1008_v12 = vadd.f32 %v2756_v46, %v2754_v24 }
 0x16c   : > { %v2791_v50 = vadd.f32 %v1026_v30, %v998_v27 }
 0x16d   : > { %1132 = vst.msk [vmem:[%s2766_s18 + $0x18] sm:$0xff] %vm1129_vm9, %v2789_v16  ;;  %v1151_v10 = vsel %vm1129_vm9, %v2789_v16, 0.0  ;;  %v1197_v52 = vmul.f32 %v2789_v16, %v2789_v16 }
 0x16e   : > { %v1152_v37 = vadd.f32 %v1151_v10, %v2774_v20  ;;  %1133 = vst [vmem:[%s2766_s18 + $0x20] sm:$0xff] %v2791_v50  ;;  %v1055_v55 = vpop.f32.mrf.mxu3  ;;  %v1198_v36 = vmul.f32 %v2791_v50, %v2791_v50 }
 0x16f   : > { %v1214_v7 = vsel %vm1129_vm9, %v1197_v52, 0.0 }
 0x170   : > { %v1084_v22 = vpop.f32.mrf.mxu0  ;;  %1153 = vadd.xlane.f32.xlu2 %v1152_v37  ;;  %v1215_v26 = vadd.f32 %v1214_v7, %v1196_v31  ;;  %v1010_v7 = vadd.f32 %v2760_v8, %v2758_v33 }
 0x171   : > { %v1113_v61 = vpop.f32.mrf.mxu1  ;;  %v1085_v13 = vadd.f32 %v1084_v22, %v1055_v55 }
 0x172   : > { %1216 = vadd.xlane.f32.xlu1 %v1215_v26 }
 0x173   : > { %v2806_v42 = vadd.f32 %v1113_v61, %v1085_v13  ;;  %v1028_v43 = vpop.f32.mrf.mxu2 }
 0x174   : > { %v2808_v57 = vadd.f32 %v1028_v43, %v1000_v53 }
 0x175   : > { %1134 = vst.msk [vmem:[%s2766_s18 + $0x28] sm:$0xff] %vm1129_vm9, %v2806_v42  ;;  %v1155_v56 = vsel %vm1129_vm9, %v2806_v42, 0.0  ;;  %v1199_v63 = vmul.f32 %v2806_v42, %v2806_v42 }
 0x176   : > { %v1156_v15 = vadd.f32 %v1155_v56, %v2791_v50  ;;  %1135 = vst [vmem:[%s2766_s18 + $0x30] sm:$0xff] %v2808_v57  ;;  %v1057_v19 = vpop.f32.mrf.mxu3  ;;  %v1200_v1 = vmul.f32 %v2808_v57, %v2808_v57 }
 0x177   : > { %v1218_v60 = vsel %vm1129_vm9, %v1199_v63, 0.0 }
 0x178   : > { %v1086_v9 = vpop.f32.mrf.mxu0  ;;  %1157 = vadd.xlane.f32.xlu0 %v1156_v15  ;;  %v1219_v44 = vadd.f32 %v1218_v60, %v1198_v36 }
 0x179   : > { %v1115_v3 = vpop.f32.mrf.mxu1  ;;  %v1087_v0 = vadd.f32 %v1086_v9, %v1057_v19 }
 0x17a   : > { %1220 = vadd.xlane.f32.xlu2 %v1219_v44 }
 0x17b   : > { %v2825_v51 = vadd.f32 %v1115_v3, %v1087_v0  ;;  %v1031_v40 = vpop.f32.mrf.mxu2 }
 0x17c   : > { %v2827_v28 = vadd.f32 %v1031_v40, %v1003_v6 }
 0x17d   : > { %1136 = vst.msk [vmem:[%s2766_s18 + $0x38] sm:$0xff] %vm1129_vm9, %v2825_v51  ;;  %v1159_v23 = vsel %vm1129_vm9, %v2825_v51, 0.0  ;;  %v1201_v59 = vmul.f32 %v2825_v51, %v2825_v51 }
 0x17e   : > { %v1160_v34 = vadd.f32 %v1159_v23, %v2808_v57  ;;  %1137 = vst [vmem:[%s2766_s18 + $0x40] sm:$0xff] %v2827_v28  ;;  %v1060_v17 = vpop.f32.mrf.mxu3  ;;  %v1202_v18 = vmul.f32 %v2827_v28, %v2827_v28 }
 0x17f   : > { %v1222_v48 = vsel %vm1129_vm9, %v1201_v59, 0.0 }
 0x180   : > { %v1089_v21 = vpop.f32.mrf.mxu0  ;;  %1161 = vadd.xlane.f32.xlu1 %v1160_v34  ;;  %v1223_v62 = vadd.f32 %v1222_v48, %v1200_v1 }
 0x181   : > { %v1118_v29 = vpop.f32.mrf.mxu1  ;;  %v1090_v4 = vadd.f32 %v1089_v21, %v1060_v17  ;;  %v1870_v17 = vmov 192.0  }
 0x182   : > { %1224 = vadd.xlane.f32.xlu0 %v1223_v62  ;;  %1843 = vrcp.f32 %v1870_v17 }
 0x183   : > { %v2844_v47 = vadd.f32 %v1118_v29, %v1090_v4  ;;  %v1033_v54 = vpop.f32.mrf.mxu2 }
 0x184   : > { %v2846_v2 = vadd.f32 %v1033_v54, %v1005_v5 }
 0x185   : > { %1138 = vst.msk [vmem:[%s2766_s18 + $0x48] sm:$0xff] %vm1129_vm9, %v2844_v47  ;;  %v1163_v32 = vsel %vm1129_vm9, %v2844_v47, 0.0  ;;  %v1203_v39 = vmul.f32 %v2844_v47, %v2844_v47 }
 0x186   : > { %v1164_v25 = vadd.f32 %v1163_v32, %v2827_v28  ;;  %1139 = vst [vmem:[%s2766_s18 + $0x50] sm:$0xff] %v2846_v2  ;;  %v1062_v41 = vpop.f32.mrf.mxu3  ;;  %v1204_v34 = vmul.f32 %v2846_v2, %v2846_v2 }
 0x187   : > { %v1226_v35 = vsel %vm1129_vm9, %v1203_v39, 0.0 }
 0x188   : > { %v1091_v11 = vpop.f32.mrf.mxu0  ;;  %1165 = vadd.xlane.f32.xlu2 %v1164_v25  ;;  %v1227_v38 = vadd.f32 %v1226_v35, %v1202_v18  ;;  %v1844_v48 = vpop.eup %1843 }
 0x189   : > { %v1120_v45 = vpop.f32.mrf.mxu1  ;;  %v1092_v14 = vadd.f32 %v1091_v11, %v1062_v41  ;;  %v1180_v21 = vmul.f32 192.0, %v1844_v48  ;;  %vm1184_vm10 = vweird.f32 %v1844_v48 }
 0x18a   : > { %1228 = vadd.xlane.f32.xlu1 %v1227_v38 }
 0x18b   : > { %v2863_v27 = vadd.f32 %v1120_v45, %v1092_v14  ;;  %v1036_v30 = vpop.f32.mrf.mxu2  ;;  %v1181_v29 = vsub.f32 1.0, %v1180_v21 }
 0x18c   : > { %v2865_v10 = vadd.f32 %v1036_v30, %v1008_v12 }
 0x18d   : > { %1140 = vst.msk [vmem:[%s2766_s18 + $0x58] sm:$0xff] %vm1129_vm9, %v2863_v27  ;;  %v1167_v52 = vsel %vm1129_vm9, %v2863_v27, 0.0  ;;  %v1205_v40 = vmul.f32 %v2863_v27, %v2863_v27  ;;  %v1182_v62 = vmul.f32 %v1844_v48, %v1181_v29 }
 0x18e   : > { %v1168_v37 = vadd.f32 %v1167_v52, %v2846_v2  ;;  %1141 = vst [vmem:[%s2766_s18 + $0x60] sm:$0xff] %v2865_v10  ;;  %v1065_v31 = vpop.f32.mrf.mxu3  ;;  %v1206_v33 = vmul.f32 %v2865_v10, %v2865_v10 }
 0x18f   : > { %v1230_v59 = vsel %vm1129_vm9, %v1205_v40, 0.0  ;;  %v1183_v4 = vadd.f32 %v1844_v48, %v1182_v62 }
 0x190   : > { %v1094_v55 = vpop.f32.mrf.mxu0  ;;  %1169 = vadd.xlane.f32.xlu0 %v1168_v37  ;;  %v1231_v1 = vadd.f32 %v1230_v59, %v1204_v34 }
 0x191   : > { %v1123_v24 = vpop.f32.mrf.mxu1  ;;  %v1095_v46 = vadd.f32 %v1094_v55, %v1065_v31  ;;  %v2912_v5 = vsel %vm1184_vm10, %v1844_v48, %v1183_v4 }
 0x193   : > { %v2877_v22 = vadd.f32 %v1123_v24, %v1095_v46  ;;  %v1038_v61 = vpop.f32.mrf.mxu2 }
 0x194   : > { %v2879_v26 = vadd.f32 %v1038_v61, %v1010_v7 }
 0x195   : > { %1142 = vst.msk [vmem:[%s2766_s18 + $0x68] sm:$0xff] %vm1129_vm9, %v2877_v22  ;;  %v1171_v13 = vsel %vm1129_vm9, %v2877_v22, 0.0  ;;  %v1207_v53 = vmul.f32 %v2877_v22, %v2877_v22 }
 0x196   : > { %v1172_v43 = vadd.f32 %v1171_v13, %v2865_v10  ;;  %1143 = vst [vmem:[%s2766_s18 + $0x70] sm:$0xff] %v2879_v26  ;;  %v1067_v56 = vpop.f32.mrf.mxu3  ;;  %v1208_v0 = vmul.f32 %v2879_v26, %v2879_v26 }
 0x197   : > { %v1234_v8 = vsel %vm1129_vm9, %v1207_v53, 0.0  ;;  %v1145_v53 = vld [vmem:[%s3081_s4] sm:$0x3] }
 0x198   : > { %v1096_v63 = vpop.f32.mrf.mxu0  ;;  %1173 = vadd.xlane.f32.xlu1 %v1172_v43  ;;  %v1235_v15 = vadd.f32 %v1234_v8, %v1206_v33 }
 0x199   : > { %v1097_v36 = vadd.f32 %v1096_v63, %v1067_v56  ;;  %v1125_v19 = vpop.f32.mrf.mxu1  ;;  %v2931_v63 = vperm.slane %v1145_v53, 0 }
 0x19a   : > { %1236 = vadd.xlane.f32.xlu0 %v1235_v15 }
 0x19b   : > { %v2894_v60 = vadd.f32 %v1125_v19, %v1097_v36  ;;  %v1146_v36 = vld [vmem:[%s3082_s5] sm:$0x3]  ;;  %v2938_v19 = vperm.slane %v1145_v53, 1 }
 0x19c   : > { %v2948_v17 = vperm.slane %v1146_v36, 1 }
 0x19d   : > { %1144 = vst.msk [vmem:[%s2766_s18 + $0x78] sm:$0xff] %vm1129_vm9, %v2894_v60  ;;  %v1175_v9 = vsel %vm1129_vm9, %v2894_v60, 0.0  ;;  %v1209_v3 = vmul.f32 %v2894_v60, %v2894_v60 }
 0x19e   : > { %v1176_v44 = vadd.f32 %v1175_v9, %v2879_v26 }
 0x19f   : > { %v1238_v6 = vsel %vm1129_vm9, %v1209_v3, 0.0 }
 0x1a0   : > { %1177 = vadd.xlane.f32.xlu2 %v1176_v44  ;;  %v1239_v23 = vadd.f32 %v1238_v6, %v1208_v0 }
 0x1a2   : > { %1240 = vadd.xlane.f32.xlu1 %v1239_v23 }
 0x1a8   : > { %1232 = vadd.xlane.f32.xlu2 %v1231_v1  ;;  %v2946_v1 = vperm.slane %v1146_v36, 0 }
 0x1db   : > { %v1150_v54 = vpop.xlane.xlu1 %1149 }
 0x1dc   : > { %v1186_v32 = vmul.f32 %v2912_v5, %v1150_v54 }
 0x1dd   : > { %v1213_v39 = vpop.xlane.xlu0 %1212 }
 0x1de   : > { %v1242_v25 = vmul.f32 %v1213_v39, %v2912_v5  ;;  %v1250_v18 = vmul.f32 %v1186_v32, %v1186_v32  ;;  %v1266_v0 = vsub.f32 %v2768_v58, %v1186_v32  ;;  %v1267_v6 = vsub.f32 %v2772_v49, %v1186_v32 }
 0x1e0   : > { %v1258_v41 = vsub.f32 %v1242_v25, %v1250_v18 }
 0x1e2   : > { %v1282_v35 = vadd.f32 1e-05, %v1258_v41 }
 0x1e3   : > { %v1154_v11 = vpop.xlane.xlu2 %1153 }
 0x1e4   : > { %1845 = vrsqrt.f32 %v1282_v35  ;;  %v2917_v45 = vmul.f32 %v2912_v5, %v1154_v11  ;;  %vm1296_vm12 = vweird.f32 %v1282_v35 }
 0x1e5   : > { %v1217_v38 = vpop.xlane.xlu1 %1216 }
 0x1e6   : > { %v1251_v14 = vmul.f32 %v2917_v45, %v2917_v45  ;;  %v1243_v12 = vmul.f32 %v1217_v38, %v2912_v5 }
 0x1e8   : > { %v1259_v30 = vsub.f32 %v1243_v12, %v1251_v14 }
 0x1ea   : > { %v1846_v52 = vpop.eup %1845  ;;  %v1283_v37 = vadd.f32 1e-05, %v1259_v30  ;;  %v1268_v30 = vsub.f32 %v2774_v20, %v2917_v45 }
 0x1eb   : > { %v1291_v31 = vmul.f32 %v1846_v52, %v1282_v35  ;;  %v1158_v55 = vpop.xlane.xlu0 %1157  ;;  %vm1297_vm11 = vweird.f32 %v1846_v52 }
 0x1ec   : > { %1847 = vrsqrt.f32 %v1283_v37  ;;  %v2923_v24 = vmul.f32 %v2912_v5, %v1158_v55  ;;  %vm1298_vm13 = vmor %vm1296_vm12, %vm1297_vm11  ;;  %vm1306_vm2 = vweird.f32 %v1283_v37 }
 0x1ed   : > { %v1292_v46 = vmul.f32 %v1846_v52, %v1291_v31  ;;  %v1221_v7 = vpop.xlane.xlu2 %1220 }
 0x1ee   : > { %v1244_v61 = vmul.f32 %v1221_v7, %v2912_v5  ;;  %v1252_v13 = vmul.f32 %v2923_v24, %v2923_v24 }
 0x1ef   : > { %v1293_v43 = vmul.f32 0.5, %v1292_v46 }
 0x1f0   : > { %v1260_v33 = vsub.f32 %v1244_v61, %v1252_v13 }
 0x1f1   : > { %v1294_v8 = vsub.f32 1.5, %v1293_v43 }
 0x1f2   : > { %v1848_v56 = vpop.eup %1847  ;;  %v2933_v15 = vadd.f32 1e-05, %v1260_v33 }
 0x1f3   : > { %v1295_v9 = vmul.f32 %v1846_v52, %v1294_v8  ;;  %v1301_v3 = vmul.f32 %v1848_v56, %v1283_v37  ;;  %v1162_v44 = vpop.xlane.xlu1 %1161  ;;  %vm1307_vm0 = vweird.f32 %v1848_v56 }
 0x1f4   : > { %1849 = vrsqrt.f32 %v2933_v15  ;;  %v2944_v40 = vmul.f32 %v2912_v5, %v1162_v44  ;;  %vm1308_vm3 = vmor %vm1306_vm2, %vm1307_vm0  ;;  %vm1316_vm5 = vweird.f32 %v2933_v15 }
 0x1f5   : > { %v1299_v23 = vsel %vm1298_vm13, %v1846_v52, %v1295_v9  ;;  %v1302_v59 = vmul.f32 %v1848_v56, %v1301_v3  ;;  %v1225_v34 = vpop.xlane.xlu0 %1224  ;;  %v1269_v52 = vsub.f32 %v2789_v16, %v2917_v45 }
 0x1f6   : > { %v1370_v48 = vmul.f32 %v1299_v23, %v1266_v0  ;;  %v1371_v21 = vmul.f32 %v1299_v23, %v1267_v6  ;;  %v1245_v58 = vmul.f32 %v1225_v34, %v2912_v5  ;;  %v1253_v49 = vmul.f32 %v2944_v40, %v2944_v40 }
 0x1f7   : > { %v1303_v29 = vmul.f32 0.5, %v1302_v59  ;;  %v1270_v0 = vsub.f32 %v2791_v50, %v2923_v24  ;;  %v1271_v6 = vsub.f32 %v2806_v42, %v2923_v24 }
 0x1f8   : > { %v1391_v62 = vmul.f32 %v2931_v63, %v1370_v48  ;;  %v1392_v4 = vmul.f32 %v2938_v19, %v1371_v21  ;;  %v1261_v32 = vsub.f32 %v1245_v58, %v1253_v49 }
 0x1f9   : > { %v1304_v54 = vsub.f32 1.5, %v1303_v29 }
 0x1fa   : > { %v1850_v39 = vpop.eup %1849  ;;  %v1412_v25 = vadd.f32 %v2946_v1, %v1391_v62  ;;  %v1413_v18 = vadd.f32 %v2948_v17, %v1392_v4  ;;  %v1285_v38 = vadd.f32 1e-05, %v1261_v32 }
 0x1fb   : > { %v1305_v35 = vmul.f32 %v1848_v56, %v1304_v54  ;;  %v1311_v11 = vmul.f32 %v1850_v39, %v2933_v15  ;;  %v1166_v14 = vpop.xlane.xlu2 %1165  ;;  %vm1317_vm4 = vweird.f32 %v1850_v39 }
 0x1fc   : > { %v1428_v12 = vpack.c.bf16 %v1413_v18, %v1412_v25  ;;  %v2974_v31 = vmul.f32 %v2912_v5, %v1166_v14  ;;  %1851 = vrsqrt.f32 %v1285_v38  ;;  %vm1318_vm6 = vmor %vm1316_vm5, %vm1317_vm4  ;;  %vm1326_vm8 = vweird.f32 %v1285_v38 }
 0x1fd   : > { %v1309_v55 = vsel %vm1308_vm3, %v1848_v56, %v1305_v35  ;;  %v1312_v46 = vmul.f32 %v1850_v39, %v1311_v11  ;;  %v1229_v37 = vpop.xlane.xlu1 %1228  ;;  %v1272_v25 = vsub.f32 %v2808_v57, %v2944_v40  ;;  %v1273_v18 = vsub.f32 %v2825_v51, %v2944_v40 }
 0x1fe   : > { %1439 = vst.msk [vmem:[%s2961_s28] sm:$0xff] %vm2963_vm1, %v1428_v12  ;;  %v1372_v7 = vmul.f32 %v1309_v55, %v1268_v30  ;;  %v1373_v61 = vmul.f32 %v1309_v55, %v1269_v52  ;;  %v1254_v20 = vmul.f32 %v2974_v31, %v2974_v31  ;;  %v1246_v16 = vmul.f32 %v1229_v37, %v2912_v5 }
 0x1ff   : > { %v1313_v13 = vmul.f32 0.5, %v1312_v46 }
 0x200   : > { %v1393_v45 = vmul.f32 %v2931_v63, %v1372_v7  ;;  %v1394_v53 = vmul.f32 %v2938_v19, %v1373_v61  ;;  %v1262_v33 = vsub.f32 %v1246_v16, %v1254_v20 }
 0x201   : > { %v1314_v43 = vsub.f32 1.5, %v1313_v13 }
 0x202   : > { %v1414_v8 = vadd.f32 %v2946_v1, %v1393_v45  ;;  %v1415_v56 = vadd.f32 %v2948_v17, %v1394_v53  ;;  %v1852_v36 = vpop.eup %1851  ;;  %v1286_v3 = vadd.f32 1e-05, %v1262_v33  ;;  %v1275_v33 = vsub.f32 %v2844_v47, %v2974_v31 }
 0x203   : > { %v1315_v9 = vmul.f32 %v1850_v39, %v1314_v43  ;;  %v1321_v23 = vmul.f32 %v1852_v36, %v1285_v38  ;;  %v1170_v34 = vpop.xlane.xlu0 %1169  ;;  %vm1327_vm7 = vweird.f32 %v1852_v36  ;;  %v1274_v43 = vsub.f32 %v2827_v28, %v2974_v31 }
 0x204   : > { %v1429_v44 = vpack.c.bf16 %v1415_v56, %v1414_v8  ;;  %1853 = vrsqrt.f32 %v1286_v3  ;;  %vm1328_vm9 = vmor %vm1326_vm8, %vm1327_vm7  ;;  %vm1336_vm11 = vweird.f32 %v1286_v3 }
 0x205   : > { %v1319_v59 = vsel %vm1318_vm6, %v1850_v39, %v1315_v9  ;;  %v1322_v29 = vmul.f32 %v1852_v36, %v1321_v23 }
 0x206   : > { %1440 = vst.msk [vmem:[%s2961_s28 + $0x8] sm:$0xff] %vm2963_vm1, %v1429_v44  ;;  %v1374_v48 = vmul.f32 %v1319_v59, %v1270_v0  ;;  %v1375_v21 = vmul.f32 %v1319_v59, %v1271_v6  ;;  %v3028_v44 = vmul.f32 %v2912_v5, %v1170_v34 }
 0x207   : > { %v1323_v49 = vmul.f32 0.5, %v1322_v29 }
 0x208   : > { %v1395_v15 = vmul.f32 %v2931_v63, %v1374_v48  ;;  %v1396_v58 = vmul.f32 %v2938_v19, %v1375_v21  ;;  %v1255_v34 = vmul.f32 %v3028_v44, %v3028_v44 }
 0x209   : > { %v1324_v24 = vsub.f32 1.5, %v1323_v49 }
 0x20a   : > { %v1416_v50 = vadd.f32 %v2946_v1, %v1395_v15  ;;  %v1417_v42 = vadd.f32 %v2948_v17, %v1396_v58  ;;  %v1854_v62 = vpop.eup %1853 }
 0x20b   : > { %v1174_v4 = vpop.xlane.xlu1 %1173  ;;  %v1325_v32 = vmul.f32 %v1852_v36, %v1324_v24  ;;  %v1331_v39 = vmul.f32 %v1854_v62, %v1286_v3  ;;  %vm1337_vm10 = vweird.f32 %v1854_v62 }
 0x20c   : > { %v1430_v54 = vpack.c.bf16 %v1417_v42, %v1416_v50  ;;  %v3003_v35 = vmul.f32 %v2912_v5, %v1174_v4  ;;  %vm1338_vm12 = vmor %vm1336_vm11, %vm1337_vm10 }
 0x20d   : > { %v1237_v11 = vpop.xlane.xlu0 %1236  ;;  %v1329_v14 = vsel %vm1328_vm9, %v1852_v36, %v1325_v32  ;;  %v1332_v12 = vmul.f32 %v1854_v62, %v1331_v39 }
 0x20e   : > { %1441 = vst.msk [vmem:[%s2961_s28 + $0x10] sm:$0xff] %vm2963_vm1, %v1430_v54  ;;  %v1248_v30 = vmul.f32 %v1237_v11, %v2912_v5  ;;  %v1376_v38 = vmul.f32 %v1329_v14, %v1272_v25  ;;  %v1377_v52 = vmul.f32 %v1329_v14, %v1273_v18  ;;  %v1256_v57 = vmul.f32 %v3003_v35, %v3003_v35 }
 0x20f   : > { %v1333_v55 = vmul.f32 0.5, %v1332_v12  ;;  %v1278_v32 = vsub.f32 %v2865_v10, %v3003_v35  ;;  %v1279_v39 = vsub.f32 %v2877_v22, %v3003_v35 }
 0x210   : > { %v1397_v51 = vmul.f32 %v2931_v63, %v1376_v38  ;;  %v1398_v40 = vmul.f32 %v2938_v19, %v1377_v52  ;;  %v1264_v37 = vsub.f32 %v1248_v30, %v1256_v57 }
 0x211   : > { %v1334_v46 = vsub.f32 1.5, %v1333_v55 }
 0x212   : > { %v1418_v7 = vadd.f32 %v2946_v1, %v1397_v51  ;;  %v1419_v61 = vadd.f32 %v2948_v17, %v1398_v40  ;;  %v1288_v16 = vadd.f32 1e-05, %v1264_v37 }
 0x213   : > { %v1178_v13 = vpop.xlane.xlu2 %1177  ;;  %v1335_v20 = vmul.f32 %v1854_v62, %v1334_v46 }
 0x214   : > { %v3016_v45 = vmul.f32 %v2912_v5, %v1178_v13  ;;  %v1431_v53 = vpack.c.bf16 %v1419_v61, %v1418_v7  ;;  %1855 = vrsqrt.f32 %v1288_v16  ;;  %vm1356_vm14 = vweird.f32 %v1288_v16 }
 0x215   : > { %v1241_v8 = vpop.xlane.xlu1 %1240  ;;  %v1339_v56 = vsel %vm1338_vm12, %v1854_v62, %v1335_v20 }
 0x216   : > { %1442 = vst.msk [vmem:[%s2961_s28 + $0x18] sm:$0xff] %vm2963_vm1, %v1431_v53  ;;  %v1378_v36 = vmul.f32 %v1339_v56, %v1274_v43  ;;  %v1379_v9 = vmul.f32 %v1339_v56, %v1275_v33  ;;  %v1257_v3 = vmul.f32 %v3016_v45, %v3016_v45  ;;  %v1249_v28 = vmul.f32 %v1241_v8, %v2912_v5 }
 0x217   : > { %v1280_v37 = vsub.f32 %v2879_v26, %v3016_v45  ;;  %v1281_v7 = vsub.f32 %v2894_v60, %v3016_v45  ;;  %v1276_v43 = vsub.f32 %v2846_v2, %v3028_v44  ;;  %v1277_v26 = vsub.f32 %v2863_v27, %v3028_v44 }
 0x218   : > { %v1399_v47 = vmul.f32 %v2931_v63, %v1378_v36  ;;  %v1400_v31 = vmul.f32 %v2938_v19, %v1379_v9  ;;  %v1265_v0 = vsub.f32 %v1249_v28, %v1257_v3 }
 0x21a   : > { %v1420_v6 = vadd.f32 %v2946_v1, %v1399_v47  ;;  %v1421_v23 = vadd.f32 %v2948_v17, %v1400_v31  ;;  %v1856_v48 = vpop.eup %1855  ;;  %v1289_v21 = vadd.f32 1e-05, %v1265_v0 }
 0x21b   : > { %v1233_v59 = vpop.xlane.xlu2 %1232  ;;  %v1351_v58 = vmul.f32 %v1856_v48, %v1288_v16  ;;  %vm1357_vm13 = vweird.f32 %v1856_v48 }
 0x21c   : > { %v1247_v29 = vmul.f32 %v1233_v59, %v2912_v5  ;;  %v1432_v15 = vpack.c.bf16 %v1421_v23, %v1420_v6  ;;  %1857 = vrsqrt.f32 %v1289_v21  ;;  %vm1358_vm15 = vmor %vm1356_vm14, %vm1357_vm13  ;;  %vm1366_vm2 = vweird.f32 %v1289_v21 }
 0x21d   : > { %v1352_v50 = vmul.f32 %v1856_v48, %v1351_v58 }
 0x21e   : > { %v1263_v49 = vsub.f32 %v1247_v29, %v1255_v34  ;;  %1443 = vst.msk [vmem:[%s2961_s28 + $0x20] sm:$0xff] %vm2963_vm1, %v1432_v15 }
 0x21f   : > { %v1353_v24 = vmul.f32 0.5, %v1352_v50 }
 0x220   : > { %v1287_v42 = vadd.f32 1e-05, %v1263_v49 }
 0x221   : > { %v1354_v62 = vsub.f32 1.5, %v1353_v24 }
 0x222   : > { %1859 = vrsqrt.f32 %v1287_v42  ;;  %v1858_v4 = vpop.eup %1857  ;;  %vm1346_vm5 = vweird.f32 %v1287_v42 }
 0x223   : > { %v1355_v54 = vmul.f32 %v1856_v48, %v1354_v62  ;;  %v1361_v5 = vmul.f32 %v1858_v4, %v1289_v21  ;;  %vm1367_vm0 = vweird.f32 %v1858_v4 }
 0x224   : > { %vm1368_vm3 = vmor %vm1366_vm2, %vm1367_vm0 }
 0x225   : > { %v1359_v25 = vsel %vm1358_vm15, %v1856_v48, %v1355_v54  ;;  %v1362_v18 = vmul.f32 %v1858_v4, %v1361_v5 }
 0x226   : > { %v1382_v14 = vmul.f32 %v1359_v25, %v1278_v32  ;;  %v1383_v12 = vmul.f32 %v1359_v25, %v1279_v39 }
 0x227   : > { %v1363_v30 = vmul.f32 0.5, %v1362_v18 }
 0x228   : > { %v1860_v11 = vpop.eup %1859  ;;  %v1403_v52 = vmul.f32 %v2931_v63, %v1382_v14  ;;  %v1404_v55 = vmul.f32 %v2938_v19, %v1383_v12 }
 0x229   : > { %v1341_v38 = vmul.f32 %v1860_v11, %v1287_v42  ;;  %v1364_v57 = vsub.f32 1.5, %v1363_v30  ;;  %vm1347_vm4 = vweird.f32 %v1860_v11 }
 0x22a   : > { %v1424_v10 = vadd.f32 %v2946_v1, %v1403_v52  ;;  %v1425_v22 = vadd.f32 %v2948_v17, %v1404_v55  ;;  %vm1348_vm6 = vmor %vm1346_vm5, %vm1347_vm4 }
 0x22b   : > { %v1342_v51 = vmul.f32 %v1860_v11, %v1341_v38  ;;  %v1365_v35 = vmul.f32 %v1858_v4, %v1364_v57 }
 0x22c   : > { %v1434_v46 = vpack.c.bf16 %v1425_v22, %v1424_v10 }
 0x22d   : > { %v1343_v40 = vmul.f32 0.5, %v1342_v51  ;;  %v1369_v61 = vsel %vm1368_vm3, %v1858_v4, %v1365_v35 }
 0x22e   : > { %1445 = vst.msk [vmem:[%s2961_s28 + $0x30] sm:$0xff] %vm2963_vm1, %v1434_v46  ;;  %v1384_v20 = vmul.f32 %v1369_v61, %v1280_v37  ;;  %v1385_v16 = vmul.f32 %v1369_v61, %v1281_v7 }
 0x22f   : > { %v1344_v13 = vsub.f32 1.5, %v1343_v40 }
 0x230   : > { %v1405_v60 = vmul.f32 %v2931_v63, %v1384_v20  ;;  %v1406_v45 = vmul.f32 %v2938_v19, %v1385_v16 }
 0x231   : > { %v1345_v53 = vmul.f32 %v1860_v11, %v1344_v13 }
 0x232   : > { %v1426_v8 = vadd.f32 %v2946_v1, %v1405_v60  ;;  %v1427_v56 = vadd.f32 %v2948_v17, %v1406_v45 }
 0x233   : > { %v1349_v33 = vsel %vm1348_vm6, %v1860_v11, %v1345_v53 }
 0x234   : > { %v1380_v36 = vmul.f32 %v1349_v33, %v1276_v43  ;;  %v1381_v9 = vmul.f32 %v1349_v33, %v1277_v26  ;;  %v1435_v3 = vpack.c.bf16 %v1427_v56, %v1426_v8 }
 0x236   : > { %v1401_v28 = vmul.f32 %v2931_v63, %v1380_v36  ;;  %v1402_v2 = vmul.f32 %v2938_v19, %v1381_v9  ;;  %1446 = vst.msk [vmem:[%s2961_s28 + $0x38] sm:$0xff] %vm2963_vm1, %v1435_v3 }
 0x238   : > { %v1422_v27 = vadd.f32 %v2946_v1, %v1401_v28  ;;  %v1423_v44 = vadd.f32 %v2948_v17, %v1402_v2 }
 0x23a   : > { %v1433_v47 = vpack.c.bf16 %v1423_v44, %v1422_v27 }
 0x23c   : > { %1444 = vst.msk [vmem:[%s2961_s28 + $0x28] sm:$0xff] %vm2963_vm1, %v1433_v47 }
 0x23d PF: > { %s18_s24 = sadd.s32 1, %s1867_s24  }
 0x23e   : > { %p15_p4 = scmp.ge.s32.totalorder %s18_s24, 4  }
 0x240   :  { %17 = sbr.rel (!%p15_p4) target bundleno = 1 (0x1), region = 86 }

// kernel: swin_mil_forward.6
= control target key start
LH: loop header
LB: loop body
LE: loop exit
PB: predicated region body
PF: predicated region fallthrough
CT: control target
= control target key end

     0   :  { %s4001_s0 = inlined_call_operand.vmem [shape: f32[32,768], index: 0, kind: input, shape index: {}]   ;;  %s4002_s1 = inlined_call_operand.vmem [shape: f32[1,768], index: 1, kind: input, shape index: {}]   ;;  %s4003_s2 = inlined_call_operand.vmem [shape: f32[1,768], index: 2, kind: input, shape index: {}]   ;;  %s4004_s3 = inlined_call_operand.vmem [shape: bf16[768,384], index: 3, kind: input, shape index: {}]   ;;  %s4005_s4 = inlined_call_operand.vmem [shape: f32[1,384], index: 4, kind: input, shape index: {}]   ;;  %s4006_s5 = inlined_call_operand.vmem [shape: f32[1,384], index: 5, kind: input, shape index: {}]   ;;  %s4007_s6 = inlined_call_operand.hbm [shape: f32[32,384], index: 6, kind: output, shape index: {0}]   ;;  %s4008_s7 = inlined_call_operand.vmem [shape: f32[32,384], index: 7, kind: output, shape index: {1}]  }
   0x1   :  { %4009 = sst [smem:[#allocation5_spill]] %s4001_s0 }
   0x2   :  { %13 = vsyncpa [#allocation3], 0 }
   0x3   :  { %15 = vsyncpa [#allocation3 + $0x1], 0  ;;  %s2808_s24 = smov 0   ;;  %s2810_s25 = smov 0  }
   0x4   :  { %s2812_s26 = smov 0   ;;  %s2814_s27 = smov 0  }
   0x5 LB: > { %s2829_s28 = sadd.s32 4294967295, %s2762_s27   ;;  %s1908_s29 = sadd.s32 4294967294, %s2762_s27   ;;  %s2762_s27 = sphi %s2814_s27, %s4016_s27   ;;  %s2758_s26 = sphi %s2812_s26, %s4015_s26   ;;  %s2754_s25 = sphi %s2810_s25, %s4014_s25   ;;  %s2750_s24 = sphi %s2808_s24, %s4013_s24  }
   0x6   : > { %s2833_s30 = sadd.s32 1, %s2762_s27   ;;  %s159_s8 = sadd.s32 1, %s2758_s26 }
   0x7   : > { %s156_s9 = ssub.s32 %s2762_s27, %s2833_s30  ;;  %p169_p0 = scmp.ne.s32.totalorder %s2758_s26, %s2754_s25 }
   0x8   : > { %p157_p1 = scmp.eq.s32.totalorder %s156_s9, 0  ;;  %p170_p2 = scmp.eq.s32.totalorder %s2829_s28, 1 }
   0x9   : > { %p175_p3 = scmp.ne.s32.totalorder %s2754_s25, %s2750_s24  ;;  %p176_p4 = scmp.eq.s32.totalorder %s1908_s29, 1 }
   0xa   : > { %s2844_s10 = scalar_select %p157_p1, %s2758_s26, %s159_s8  }
   0xb   : > { %p2846_p5 = por %p170_p2, %p169_p0  ;;  %p2850_p6 = por %p176_p4, %p175_p3 }
   0xc   : > { %p1911_p7 = scmp.ge.s32.totalorder %s2762_s27, 1  ;;  %p245_p8 = scmp.lt.s32.totalorder %s2762_s27, 3 }
   0xe   : > { %p246_p9 = pnand %p1911_p7, %p245_p8 }
   0xf   : > { %s1912_s13 = sshll.u32 (!%p246_p9), %s2829_s28, 1  ;;  %s4012_s0 = sld [smem:[#allocation5_spill]] (!%p246_p9) }
  0x10   : > { %249 = sbr.rel (%p246_p9) target bundleno = 586 (0x24a), region = 44  ;;  %p285_p10 = scmp.lt.s32.totalorder (!%p246_p9), %s1912_s13, 3 }
  0x11   : > { %s273_s16 = sand.u32 (!%p246_p9), 1, %s2754_s25   ;;  %s2644_s19 = smul.u32 (!%p246_p9), 48, %s2829_s28 }
  0x12   : > { %s2641_s17 = smul.u32 (!%p246_p9), 48, %s273_s16  ;;  %s1794_s23 = scalar_lea.sflag (!%p246_p9), [#allocation3], %s273_s16 }
  0x13   : > { %s1812_s20 = scalar_lea.hbm (!%p246_p9), %s4007_s6, %s2644_s19  ;;  %s2720_s28 = scalar_lea.hbm (!%p246_p9), %s4007_s6, 96 }
  0x14   : > { %s3909_s18 = scalar_lea.vmem (!%p246_p9), [#allocation2], %s2641_s17  ;;  %s1815_s22 = sshll.u32 (!%p246_p9), %s1812_s20, 4  ;;  %s1816_s22 = int_to_ptr.hbm [resolvable:$true] %s1815_s22 }
  0x15   : > { %v2002_v0 = vld [vmem:[%s4004_s3 + $0xa8] sm:$0xf]  ;;  %v2519_v1 = vld [vmem:[%s4004_s3 + $0xb0] sm:$0xf0]  ;;  %s4018_s13 = smov (!%p285_p10, %s1912_s13), 3  ;;  %s1813_s21 = sshll.u32 %s3909_s18, 4  ;;  %s1814_s21 = int_to_ptr.vmem [resolvable:$true] %s1813_s21 }
  0x16   : > { %v2003_v2 = vor.u32 %v2519_v1, %v2002_v0  ;;  %v2098_v3 = vld [vmem:[%s4004_s3 + $0x168] sm:$0xf]  ;;  %v2543_v4 = vld [vmem:[%s4004_s3 + $0x170] sm:$0xf0]  ;;  %v1990_v11 = vld [vmem:[%s4004_s3 + $0x90] sm:$0xf] }
  0x17   : > { %v2099_v5 = vor.u32 %v2543_v4, %v2098_v3  ;;  %v2194_v6 = vld [vmem:[%s4004_s3 + $0x228] sm:$0xf]  ;;  %v2567_v7 = vld [vmem:[%s4004_s3 + $0x230] sm:$0xf0]  ;;  %v2516_v13 = vld [vmem:[%s4004_s3 + $0x98] sm:$0xf0] }
  0x18   : > { %v2290_v8 = vld [vmem:[%s4004_s3 + $0x2e8] sm:$0xf]  ;;  %1430 = vmatpush.bf16.msra.mxu0 %v2003_v2  ;;  %v2195_v9 = vor.u32 %v2567_v7, %v2194_v6  ;;  %v2591_v10 = vld [vmem:[%s4004_s3 + $0x2f0] sm:$0xf0]  ;;  %v2086_v14 = vld [vmem:[%s4004_s3 + $0x150] sm:$0xf]  ;;  %v1991_v16 = vor.u32 %v2516_v13, %v1990_v11 }
  0x19   : > { %1444 = vmatpush.bf16.msra.mxu1 %v2099_v5  ;;  %v2291_v12 = vor.u32 %v2591_v10, %v2290_v8  ;;  %v2540_v15 = vld [vmem:[%s4004_s3 + $0x158] sm:$0xf0]  ;;  %s2642_s8 = smul.u32 48, %s4018_s13  ;;  %v2182_v18 = vld [vmem:[%s4004_s3 + $0x210] sm:$0xf]  ;;  %s2714_s29 = sshra.s32 %s1816_s22, 4  ;;  %s2715_s29 = int_to_ptr.hbm [resolvable:$true] %s2714_s29 }
  0x1a   : > { %1458 = vmatpush.bf16.msra.mxu2 %v2195_v9  ;;  %v2087_v17 = vor.u32 %v2540_v15, %v2086_v14  ;;  %v2564_v19 = vld [vmem:[%s4004_s3 + $0x218] sm:$0xf0]  ;;  %v2278_v21 = vld [vmem:[%s4004_s3 + $0x2d0] sm:$0xf]  ;;  %v1978_v23 = vld [vmem:[%s4004_s3 + $0x78] sm:$0xf]  ;;  %p2721_p0 = scmp.lt.s32.totalorder %s2715_s29, %s4007_s6 }
  0x1b   : > { %1472 = vmatpush.bf16.msra.mxu3 %v2291_v12  ;;  %v2183_v20 = vor.u32 %v2564_v19, %v2182_v18  ;;  %v2588_v22 = vld [vmem:[%s4004_s3 + $0x2d8] sm:$0xf0]  ;;  %s2914_s9 = scalar_lea.vmem %s4012_s0, %s2642_s8  ;;  %v2513_v25 = vld [vmem:[%s4004_s3 + $0x80] sm:$0xf0]  ;;  %v2074_v26 = vld [vmem:[%s4004_s3 + $0x138] sm:$0xf] }
  0x1c   : > { %1431 = vmatpush.bf16.msra.mxu0 %v1991_v16  ;;  %v2279_v24 = vor.u32 %v2588_v22, %v2278_v21  ;;  %v2537_v27 = vld [vmem:[%s4004_s3 + $0x140] sm:$0xf0]  ;;  %v2929_v29 = vld [vmem:[%s2914_s9 + $0x8] sm:$0xff]  ;;  %v2932_v30 = vld [vmem:[%s2914_s9 + $0x10] sm:$0xff]  ;;  %v1979_v31 = vor.u32 %v2513_v25, %v1978_v23  ;;  %s2716_s14 = scalar_lea.hbm %s2715_s29, 48 }
  0x1d   : > { %v2926_v28 = vld [vmem:[%s2914_s9] sm:$0xff]  ;;  %1445 = vmatpush.bf16.msra.mxu1 %v2087_v17  ;;  %v2075_v32 = vor.u32 %v2537_v27, %v2074_v26  ;;  %v2935_v33 = vld [vmem:[%s2914_s9 + $0x18] sm:$0xff]  ;;  %v2941_v35 = vld [vmem:[%s2914_s9 + $0x28] sm:$0xff]  ;;  %v337_v38 = vmul.f32 %v2929_v29, %v2929_v29  ;;  %v338_v39 = vmul.f32 %v2932_v30, %v2932_v30  ;;  %p2717_p11 = scmp.ne.s32.totalorder %s2715_s29, %s2716_s14  ;;  %p2722_p1 = scmp.lt.s32.totalorder %s2720_s28, %s2716_s14 }
  0x1e   : > { %v2938_v34 = vld [vmem:[%s2914_s9 + $0x20] sm:$0xff]  ;;  %v313_v36 = vadd.f32 %v2929_v29, %v2926_v28  ;;  %v336_v37 = vmul.f32 %v2926_v28, %v2926_v28  ;;  %1459 = vmatpush.bf16.msra.mxu2 %v2183_v20  ;;  %v339_v40 = vmul.f32 %v2935_v33, %v2935_v33  ;;  %v2954_v41 = vld [vmem:[%s2914_s9 + $0x30] sm:$0xff]  ;;  %v2957_v42 = vld [vmem:[%s2914_s9 + $0x38] sm:$0xff]  ;;  %v341_v50 = vmul.f32 %v2941_v35, %v2941_v35 }
  0x1f   : > { %v2960_v43 = vld [vmem:[%s2914_s9 + $0x40] sm:$0xff]  ;;  %1473 = vmatpush.bf16.msra.mxu3 %v2279_v24  ;;  %v2964_v46 = vld [vmem:[%s2914_s9 + $0x48] sm:$0xff]  ;;  %v320_v47 = vadd.f32 %v2957_v42, %v2954_v41  ;;  %v342_v48 = vmul.f32 %v2954_v41, %v2954_v41  ;;  %v340_v49 = vmul.f32 %v2938_v34, %v2938_v34  ;;  %v2975_v51 = vld [vmem:[%s2914_s9 + $0x50] sm:$0xff]  ;;  %v343_v52 = vmul.f32 %v2957_v42, %v2957_v42  ;;  %p2718_p12 = pnand %p2717_p11, %p2846_p5  ;;  %p2723_p2 = por %p2722_p1, %p2721_p0 }
  0x20   : > { %v314_v44 = vadd.f32 %v313_v36, %v2932_v30  ;;  %v348_v45 = vadd.f32 %v337_v38, %v336_v37  ;;  %1432 = vmatpush.bf16.msra.mxu0 %v1979_v31  ;;  %v344_v53 = vmul.f32 %v2960_v43, %v2960_v43  ;;  %v2170_v54 = vld [vmem:[%s4004_s3 + $0x1f8] sm:$0xf]  ;;  %v2561_v55 = vld [vmem:[%s4004_s3 + $0x200] sm:$0xf0]  ;;  %v345_v60 = vmul.f32 %v2964_v46, %v2964_v46  ;;  %v1966_v62 = vld [vmem:[%s4004_s3 + $0x60] sm:$0xf] }
  0x21   : > { %1446 = vmatpush.bf16.msra.mxu1 %v2075_v32  ;;  %v2266_v56 = vld [vmem:[%s4004_s3 + $0x2b8] sm:$0xf]  ;;  %v321_v59 = vadd.f32 %v320_v47, %v2960_v43  ;;  %v2585_v61 = vld [vmem:[%s4004_s3 + $0x2c0] sm:$0xf0]  ;;  %v2510_v63 = vld [vmem:[%s4004_s3 + $0x68] sm:$0xf0]  ;;  %v355_v0 = vadd.f32 %v343_v52, %v342_v48  ;;  %v2171_v1 = vor.u32 %v2561_v55, %v2170_v54  ;;  %v346_v19 = vmul.f32 %v2975_v51, %v2975_v51  ;;  %p2719_p13 = pneg %p2718_p12 }
  0x22   : > { %v315_v57 = vadd.f32 %v314_v44, %v2935_v33  ;;  %v349_v58 = vadd.f32 %v348_v45, %v338_v39  ;;  %v2267_v2 = vor.u32 %v2585_v61, %v2266_v56  ;;  %v1967_v3 = vor.u32 %v2510_v63, %v1966_v62  ;;  %v2062_v4 = vld [vmem:[%s4004_s3 + $0x120] sm:$0xf]  ;;  %v2534_v5 = vld [vmem:[%s4004_s3 + $0x128] sm:$0xf0]  ;;  %v3027_v20 = vld [vmem:[%s2914_s9 + $0x58] sm:$0xff] }
  0x23   : > { %v2158_v6 = vld [vmem:[%s4004_s3 + $0x1e0] sm:$0xf]  ;;  %v322_v9 = vadd.f32 %v321_v59, %v2964_v46  ;;  %v2063_v10 = vor.u32 %v2534_v5, %v2062_v4  ;;  %v2558_v11 = vld [vmem:[%s4004_s3 + $0x1e8] sm:$0xf0]  ;;  %v356_v14 = vadd.f32 %v355_v0, %v344_v53  ;;  %1460 = vmatpush.bf16.msra.mxu2 %v2171_v1  ;;  %v347_v24 = vmul.f32 %v3027_v20, %v3027_v20  ;;  %v1954_v31 = vld [vmem:[%s4004_s3 + $0x48] sm:$0xf]  ;;  %p2724_p3 = pnand %p2723_p2, %p2719_p13 }
  0x24   : > { %v316_v7 = vadd.f32 %v315_v57, %v2938_v34  ;;  %v350_v8 = vadd.f32 %v349_v58, %v339_v40  ;;  %v2254_v12 = vld [vmem:[%s4004_s3 + $0x2a0] sm:$0xf]  ;;  %v2582_v13 = vld [vmem:[%s4004_s3 + $0x2a8] sm:$0xf0]  ;;  %1474 = vmatpush.bf16.msra.mxu3 %v2267_v2  ;;  %v2159_v15 = vor.u32 %v2558_v11, %v2158_v6  ;;  %1433 = vmatpush.bf16.msra.mxu0 %v1967_v3  ;;  %v2507_v32 = vld [vmem:[%s4004_s3 + $0x50] sm:$0xf0] }
  0x25   : > { %v2255_v16 = vor.u32 %v2582_v13, %v2254_v12  ;;  %1447 = vmatpush.bf16.msra.mxu1 %v2063_v10  ;;  %v357_v21 = vadd.f32 %v356_v14, %v345_v60  ;;  %v323_v23 = vadd.f32 %v322_v9, %v2975_v51  ;;  %v2050_v36 = vld [vmem:[%s4004_s3 + $0x108] sm:$0xf]  ;;  %v1955_v37 = vor.u32 %v2507_v32, %v1954_v31  ;;  %v2531_v38 = vld [vmem:[%s4004_s3 + $0x110] sm:$0xf0]  ;;  %v1942_v52 = vld [vmem:[%s4004_s3 + $0x30] sm:$0xf] }
  0x26   : > { %v317_v17 = vadd.f32 %v316_v7, %v2941_v35  ;;  %v351_v18 = vadd.f32 %v350_v8, %v340_v49  ;;  %v2146_v39 = vld [vmem:[%s4004_s3 + $0x1c8] sm:$0xf]  ;;  %v2555_v40 = vld [vmem:[%s4004_s3 + $0x1d0] sm:$0xf0]  ;;  %v2764_v44 = vmov 768.0   ;;  %v2051_v45 = vor.u32 %v2531_v38, %v2050_v36 }
  0x27   : > { %1461 = vmatpush.bf16.msra.mxu2 %v2159_v15  ;;  %v358_v25 = vadd.f32 %v357_v21, %v346_v19  ;;  %v324_v26 = vadd.f32 %v323_v23, %v3027_v20  ;;  %2688 = vrcp.f32 %v2764_v44  ;;  %v2147_v47 = vor.u32 %v2555_v40, %v2146_v39  ;;  %v2242_v48 = vld [vmem:[%s4004_s3 + $0x288] sm:$0xf]  ;;  %v2579_v49 = vld [vmem:[%s4004_s3 + $0x290] sm:$0xf0]  ;;  %v2504_v53 = vld [vmem:[%s4004_s3 + $0x38] sm:$0xf0] }
  0x28   : > { %318 = vadd.xlane.f32.xlu0 %v317_v17  ;;  %v352_v22 = vadd.f32 %v351_v18, %v341_v50  ;;  %1475 = vmatpush.bf16.msra.mxu3 %v2255_v16  ;;  %v2243_v50 = vor.u32 %v2579_v49, %v2242_v48  ;;  %v2038_v54 = vld [vmem:[%s4004_s3 + $0xf0] sm:$0xf]  ;;  %v1943_v55 = vor.u32 %v2504_v53, %v1942_v52  ;;  %v2528_v56 = vld [vmem:[%s4004_s3 + $0xf8] sm:$0xf0]  ;;  %v1930_v1 = vld [vmem:[%s4004_s3 + $0x18] sm:$0xf] }
  0x29   : > { %v359_v27 = vadd.f32 %v358_v25, %v347_v24  ;;  %1434 = vmatpush.bf16.msra.mxu0 %v1955_v37  ;;  %1448 = vmatpush.bf16.msra.mxu1 %v2051_v45  ;;  %v2134_v57 = vld [vmem:[%s4004_s3 + $0x1b0] sm:$0xf]  ;;  %v2552_v58 = vld [vmem:[%s4004_s3 + $0x1b8] sm:$0xf0]  ;;  %v2039_v59 = vor.u32 %v2528_v56, %v2038_v54  ;;  %v2501_v2 = vld [vmem:[%s4004_s3 + $0x20] sm:$0xf0] }
  0x2a   : > { %353 = vadd.xlane.f32.xlu1 %v352_v22  ;;  %v2135_v60 = vor.u32 %v2552_v58, %v2134_v57  ;;  %v2230_v61 = vld [vmem:[%s4004_s3 + $0x270] sm:$0xf]  ;;  %v2576_v62 = vld [vmem:[%s4004_s3 + $0x278] sm:$0xf0]  ;;  %v2026_v3 = vld [vmem:[%s4004_s3 + $0xd8] sm:$0xf]  ;;  %v1931_v4 = vor.u32 %v2501_v2, %v1930_v1 }
  0x2b   : > { %1462 = vmatpush.bf16.msra.mxu2 %v2147_v47  ;;  %v2231_v63 = vor.u32 %v2576_v62, %v2230_v61  ;;  %v2525_v5 = vld [vmem:[%s4004_s3 + $0xe0] sm:$0xf0]  ;;  %v2122_v6 = vld [vmem:[%s4004_s3 + $0x198] sm:$0xf]  ;;  %v1918_v14 = vld [vmem:[%s4004_s3] sm:$0xf] }
  0x2c   : > { %1476 = vmatpush.bf16.msra.mxu3 %v2243_v50  ;;  %v2549_v7 = vld [vmem:[%s4004_s3 + $0x1a0] sm:$0xf0]  ;;  %v2027_v8 = vor.u32 %v2525_v5, %v2026_v3  ;;  %v2218_v10 = vld [vmem:[%s4004_s3 + $0x258] sm:$0xf]  ;;  %v2498_v15 = vld [vmem:[%s4004_s3 + $0x8] sm:$0xf0] }
  0x2d   : > { %1435 = vmatpush.bf16.msra.mxu0 %v1943_v55  ;;  %v3081_v0 = vpop.eup %2688  ;;  %1449 = vmatpush.bf16.msra.mxu1 %v2039_v59  ;;  %v2123_v9 = vor.u32 %v2549_v7, %v2122_v6  ;;  %v2573_v11 = vld [vmem:[%s4004_s3 + $0x260] sm:$0xf0]  ;;  %v2014_v16 = vld [vmem:[%s4004_s3 + $0xc0] sm:$0xf]  ;;  %v1919_v17 = vor.u32 %v2498_v15, %v1918_v14  ;;  %v2522_v18 = vld [vmem:[%s4004_s3 + $0xc8] sm:$0xf0] }
  0x2e   : > { %v3108_v12 = vmul.f32 768.0, %v3081_v0  ;;  %v2219_v13 = vor.u32 %v2573_v11, %v2218_v10  ;;  %v2110_v19 = vld [vmem:[%s4004_s3 + $0x180] sm:$0xf]  ;;  %v2546_v21 = vld [vmem:[%s4004_s3 + $0x188] sm:$0xf0]  ;;  %v2015_v22 = vor.u32 %v2522_v18, %v2014_v16  ;;  %vm332_vm0 = vweird.f32 %v3081_v0 }
  0x2f   : > { %1463 = vmatpush.bf16.msra.mxu2 %v2135_v60  ;;  %v2111_v23 = vor.u32 %v2546_v21, %v2110_v19  ;;  %v2206_v24 = vld [vmem:[%s4004_s3 + $0x240] sm:$0xf]  ;;  %v2570_v25 = vld [vmem:[%s4004_s3 + $0x248] sm:$0xf0]  ;;  %v2615_v31 = vld [vmem:[%s4004_s3 + $0x3b0] sm:$0xf0] }
  0x30   : > { %325 = vadd.xlane.f32.xlu0 %v324_v26  ;;  %1477 = vmatpush.bf16.msra.mxu3 %v2231_v63  ;;  %v2386_v26 = vld [vmem:[%s4004_s3 + $0x3a8] sm:$0xf]  ;;  %v2639_v36 = vld [vmem:[%s4004_s3 + $0x470] sm:$0xf0]  ;;  %v2518_v39 = vld [vmem:[%s4004_s3 + $0xac] sm:$0xf] }
  0x31   : > { %1436 = vmatpush.bf16.msra.mxu0 %v1931_v4  ;;  %1450 = vmatpush.bf16.msra.mxu1 %v2027_v8  ;;  %v2482_v32 = vld [vmem:[%s4004_s3 + $0x468] sm:$0xf]  ;;  %v2387_v37 = vor.u32 %v2615_v31, %v2386_v26  ;;  %v2004_v40 = vld [vmem:[%s4004_s3 + $0xb4] sm:$0xf0]  ;;  %v2542_v44 = vld [vmem:[%s4004_s3 + $0x16c] sm:$0xf] }
  0x32   : > { %360 = vadd.xlane.f32.xlu1 %v359_v27  ;;  %v2207_v27 = vor.u32 %v2570_v25, %v2206_v24  ;;  %v2483_v38 = vor.u32 %v2639_v36, %v2482_v32  ;;  %v2007_v45 = vor.u32 %v2518_v39, %v2004_v40  ;;  %v2100_v47 = vld [vmem:[%s4004_s3 + $0x174] sm:$0xf0]  ;;  %v2374_v48 = vld [vmem:[%s4004_s3 + $0x390] sm:$0xf]  ;;  %v2612_v49 = vld [vmem:[%s4004_s3 + $0x398] sm:$0xf0] }
  0x33   : > { %1464 = vmatpush.bf16.msra.mxu2 %v2123_v9  ;;  %v2103_v50 = vor.u32 %v2542_v44, %v2100_v47  ;;  %v2375_v52 = vor.u32 %v2612_v49, %v2374_v48  ;;  %v2470_v53 = vld [vmem:[%s4004_s3 + $0x450] sm:$0xf]  ;;  %v2636_v54 = vld [vmem:[%s4004_s3 + $0x458] sm:$0xf0]  ;;  %v2515_v55 = vld [vmem:[%s4004_s3 + $0x94] sm:$0xf] }
  0x34   : > { %1478 = vmatpush.bf16.msra.mxu3 %v2219_v13  ;;  %v2471_v56 = vor.u32 %v2636_v54, %v2470_v53  ;;  %v1992_v57 = vld [vmem:[%s4004_s3 + $0x9c] sm:$0xf0]  ;;  %v2539_v58 = vld [vmem:[%s4004_s3 + $0x154] sm:$0xf]  ;;  %v329_v60 = vsub.f32 1.0, %v3108_v12 }
  0x35   : > { %1437 = vmatpush.bf16.msra.mxu0 %v1919_v17  ;;  %1451 = vmatpush.bf16.msra.mxu1 %v2015_v22  ;;  %v2088_v59 = vld [vmem:[%s4004_s3 + $0x15c] sm:$0xf0]  ;;  %v1995_v61 = vor.u32 %v2515_v55, %v1992_v57  ;;  %v2362_v63 = vld [vmem:[%s4004_s3 + $0x378] sm:$0xf]  ;;  %v2609_v1 = vld [vmem:[%s4004_s3 + $0x380] sm:$0xf0] }
  0x36   : > { %v2091_v62 = vor.u32 %v2539_v58, %v2088_v59  ;;  %v2458_v2 = vld [vmem:[%s4004_s3 + $0x438] sm:$0xf]  ;;  %v2363_v3 = vor.u32 %v2609_v1, %v2362_v63  ;;  %v2633_v4 = vld [vmem:[%s4004_s3 + $0x440] sm:$0xf0]  ;;  %v2512_v5 = vld [vmem:[%s4004_s3 + $0x7c] sm:$0xf]  ;;  %v330_v11 = vmul.f32 %v3081_v0, %v329_v60 }
  0x37   : > { %1465 = vmatpush.bf16.msra.mxu2 %v2111_v23  ;;  %v1980_v6 = vld [vmem:[%s4004_s3 + $0x84] sm:$0xf0]  ;;  %v2459_v7 = vor.u32 %v2633_v4, %v2458_v2  ;;  %v2536_v9 = vld [vmem:[%s4004_s3 + $0x13c] sm:$0xf]  ;;  %v2350_v13 = vld [vmem:[%s4004_s3 + $0x360] sm:$0xf] }
  0x38   : > { %1479 = vmatpush.bf16.msra.mxu3 %v2207_v27  ;;  %v1983_v8 = vor.u32 %v2512_v5, %v1980_v6  ;;  %v2076_v10 = vld [vmem:[%s4004_s3 + $0x144] sm:$0xf0]  ;;  %v2606_v14 = vld [vmem:[%s4004_s3 + $0x368] sm:$0xf0]  ;;  %v2446_v15 = vld [vmem:[%s4004_s3 + $0x420] sm:$0xf]  ;;  %v331_v25 = vadd.f32 %v3081_v0, %v330_v11 }
  0x39   : > { %1486 = vmatpush.bf16.msrb.mxu0 %v2387_v37  ;;  %1500 = vmatpush.bf16.msrb.mxu1 %v2483_v38  ;;  %v2079_v12 = vor.u32 %v2536_v9, %v2076_v10  ;;  %v2351_v16 = vor.u32 %v2606_v14, %v2350_v13  ;;  %v2630_v17 = vld [vmem:[%s4004_s3 + $0x428] sm:$0xf0]  ;;  %v2509_v18 = vld [vmem:[%s4004_s3 + $0x64] sm:$0xf]  ;;  %v1968_v19 = vld [vmem:[%s4004_s3 + $0x6c] sm:$0xf0] }
  0x3a   : > { %v2447_v21 = vor.u32 %v2630_v17, %v2446_v15  ;;  %v1971_v22 = vor.u32 %v2509_v18, %v1968_v19  ;;  %v2533_v23 = vld [vmem:[%s4004_s3 + $0x124] sm:$0xf]  ;;  %v2064_v24 = vld [vmem:[%s4004_s3 + $0x12c] sm:$0xf0]  ;;  %v2338_v27 = vld [vmem:[%s4004_s3 + $0x348] sm:$0xf]  ;;  %v333_v48 = vsel %vm332_vm0, %v3081_v0, %v331_v25 }
  0x3b   : > { %1514 = vmatpush.bf16.msrb.mxu2 %v2007_v45  ;;  %v2067_v26 = vor.u32 %v2533_v23, %v2064_v24  ;;  %v2603_v31 = vld [vmem:[%s4004_s3 + $0x350] sm:$0xf0]  ;;  %v2434_v32 = vld [vmem:[%s4004_s3 + $0x408] sm:$0xf]  ;;  %v2506_v38 = vld [vmem:[%s4004_s3 + $0x4c] sm:$0xf] }
  0x3c   : > { %1528 = vmatpush.bf16.msrb.mxu3 %v2103_v50  ;;  %v2339_v36 = vor.u32 %v2603_v31, %v2338_v27  ;;  %v2627_v37 = vld [vmem:[%s4004_s3 + $0x410] sm:$0xf0]  ;;  %v1956_v39 = vld [vmem:[%s4004_s3 + $0x54] sm:$0xf0]  ;;  %v2530_v45 = vld [vmem:[%s4004_s3 + $0x10c] sm:$0xf] }
  0x3d   : > { %1487 = vmatpush.bf16.msrb.mxu0 %v2375_v52  ;;  %1501 = vmatpush.bf16.msrb.mxu1 %v2471_v56  ;;  %v2435_v40 = vor.u32 %v2627_v37, %v2434_v32  ;;  %v1959_v44 = vor.u32 %v2506_v38, %v1956_v39  ;;  %v2052_v47 = vld [vmem:[%s4004_s3 + $0x114] sm:$0xf0]  ;;  %v2326_v50 = vld [vmem:[%s4004_s3 + $0x330] sm:$0xf]  ;;  %v2600_v52 = vld [vmem:[%s4004_s3 + $0x338] sm:$0xf0] }
  0x3e   : > { %v2055_v49 = vor.u32 %v2530_v45, %v2052_v47  ;;  %v2422_v53 = vld [vmem:[%s4004_s3 + $0x3f0] sm:$0xf]  ;;  %v2327_v55 = vor.u32 %v2600_v52, %v2326_v50  ;;  %v2624_v0 = vld [vmem:[%s4004_s3 + $0x3f8] sm:$0xf0]  ;;  %v2503_v56 = vld [vmem:[%s4004_s3 + $0x34] sm:$0xf] }
  0x3f   : > { %1515 = vmatpush.bf16.msrb.mxu2 %v1995_v61  ;;  %v1944_v57 = vld [vmem:[%s4004_s3 + $0x3c] sm:$0xf0]  ;;  %v2423_v59 = vor.u32 %v2624_v0, %v2422_v53  ;;  %v2527_v61 = vld [vmem:[%s4004_s3 + $0xf4] sm:$0xf]  ;;  %v2314_v2 = vld [vmem:[%s4004_s3 + $0x318] sm:$0xf] }
  0x40   : > { %1529 = vmatpush.bf16.msrb.mxu3 %v2091_v62  ;;  %v1947_v60 = vor.u32 %v2503_v56, %v1944_v57  ;;  %v2040_v62 = vld [vmem:[%s4004_s3 + $0xfc] sm:$0xf0]  ;;  %v2410_v4 = vld [vmem:[%s4004_s3 + $0x3d8] sm:$0xf]  ;;  %v1932_v9 = vld [vmem:[%s4004_s3 + $0x24] sm:$0xf0] }
  0x41   : > { %1488 = vmatpush.bf16.msrb.mxu0 %v2363_v3  ;;  %1502 = vmatpush.bf16.msrb.mxu1 %v2459_v7  ;;  %v2043_v1 = vor.u32 %v2527_v61, %v2040_v62  ;;  %v2597_v3 = vld [vmem:[%s4004_s3 + $0x320] sm:$0xf0]  ;;  %v2028_v13 = vld [vmem:[%s4004_s3 + $0xe4] sm:$0xf0]  ;;  %v2302_v14 = vld [vmem:[%s4004_s3 + $0x300] sm:$0xf] }
  0x42   : > { %v2621_v7 = vld [vmem:[%s4004_s3 + $0x3e0] sm:$0xf0]  ;;  %v2315_v10 = vor.u32 %v2597_v3, %v2314_v2  ;;  %v2594_v17 = vld [vmem:[%s4004_s3 + $0x308] sm:$0xf0]  ;;  %v2398_v18 = vld [vmem:[%s4004_s3 + $0x3c0] sm:$0xf] }
  0x43   : > { %1516 = vmatpush.bf16.msrb.mxu2 %v1983_v8  ;;  %v2500_v8 = vld [vmem:[%s4004_s3 + $0x1c] sm:$0xf]  ;;  %v2411_v11 = vor.u32 %v2621_v7, %v2410_v4  ;;  %v2618_v19 = vld [vmem:[%s4004_s3 + $0x3c8] sm:$0xf0]  ;;  %v1920_v23 = vld [vmem:[%s4004_s3 + $0xc] sm:$0xf0]  ;;  %v2303_v31 = vor.u32 %v2594_v17, %v2302_v14 }
  0x44   : > { %1530 = vmatpush.bf16.msrb.mxu3 %v2079_v12  ;;  %v2524_v12 = vld [vmem:[%s4004_s3 + $0xdc] sm:$0xf]  ;;  %v2521_v25 = vld [vmem:[%s4004_s3 + $0xc4] sm:$0xf]  ;;  %v2399_v32 = vor.u32 %v2618_v19, %v2398_v18 }
  0x45   : > { %1489 = vmatpush.bf16.msrb.mxu0 %v2351_v16  ;;  %1503 = vmatpush.bf16.msrb.mxu1 %v2447_v21  ;;  %v1935_v16 = vor.u32 %v2500_v8, %v1932_v9  ;;  %v2031_v21 = vor.u32 %v2524_v12, %v2028_v13  ;;  %v3342_v56 = vld [vmem:[%s4002_s1] sm:$0x3f] }
  0x46   : > { %v415_v61 = vperm.slane %v3342_v56, 0  ;;  %v416_v62 = vperm.slane %v3342_v56, 1 }
  0x47   : > { %1517 = vmatpush.bf16.msrb.mxu2 %v1971_v22  ;;  %v2497_v22 = vld [vmem:[%s4004_s3 + $0x4] sm:$0xf] }
  0x48   : > { %1531 = vmatpush.bf16.msrb.mxu3 %v2067_v26  ;;  %v2016_v26 = vld [vmem:[%s4004_s3 + $0xcc] sm:$0xf0]  ;;  %v1923_v37 = vor.u32 %v2497_v22, %v1920_v23 }
  0x49   : > { %1490 = vmatpush.bf16.msrb.mxu0 %v2339_v36  ;;  %1504 = vmatpush.bf16.msrb.mxu1 %v2435_v40  ;;  %v2019_v39 = vor.u32 %v2521_v25, %v2016_v26  ;;  %v2566_v26 = vld [vmem:[%s4004_s3 + $0x22c] sm:$0xf] }
  0x4b   : > { %1518 = vmatpush.bf16.msrb.mxu2 %v1959_v44 }
  0x4c   : > { %1532 = vmatpush.bf16.msrb.mxu3 %v2055_v49 }
  0x4d   : > { %1491 = vmatpush.bf16.msrb.mxu0 %v2327_v55  ;;  %1505 = vmatpush.bf16.msrb.mxu1 %v2423_v59 }
  0x4f   : > { %1519 = vmatpush.bf16.msrb.mxu2 %v1947_v60 }
  0x50   : > { %1533 = vmatpush.bf16.msrb.mxu3 %v2043_v1  ;;  %v3353_v1 = vld [vmem:[%s4003_s2] sm:$0x3f] }
  0x51   : > { %1492 = vmatpush.bf16.msrb.mxu0 %v2315_v10  ;;  %1506 = vmatpush.bf16.msrb.mxu1 %v2411_v11  ;;  %v440_v10 = vperm.slane %v3353_v1, 0  ;;  %v443_v13 = vperm.slane %v3353_v1, 3 }
  0x53   : > { %1520 = vmatpush.bf16.msrb.mxu2 %v1935_v16 }
  0x54   : > { %1534 = vmatpush.bf16.msrb.mxu3 %v2031_v21 }
  0x55   : > { %1493 = vmatpush.bf16.msrb.mxu0 %v2303_v31  ;;  %1507 = vmatpush.bf16.msrb.mxu1 %v2399_v32 }
  0x57   : > { %1521 = vmatpush.bf16.msrb.mxu2 %v1923_v37  ;;  %v2292_v37 = vld [vmem:[%s4004_s3 + $0x2f4] sm:$0xf0] }
  0x58   : > { %1535 = vmatpush.bf16.msrb.mxu3 %v2019_v39 }
  0x9b   : > { %v319_v54 = vpop.xlane.xlu0 %318 }
  0x9c   : > { %v3277_v58 = vmul.f32 %v333_v48, %v319_v54 }
  0x9d   : > { %v354_v63 = vpop.xlane.xlu1 %353 }
  0x9e   : > { %v362_v5 = vmul.f32 %v354_v63, %v333_v48  ;;  %v364_v6 = vmul.f32 %v3277_v58, %v3277_v58  ;;  %v368_v60 = vsub.f32 %v2926_v28, %v3277_v58  ;;  %v369_v2 = vsub.f32 %v2929_v29, %v3277_v58 }
  0x9f   : > { %v370_v3 = vsub.f32 %v2932_v30, %v3277_v58  ;;  %v371_v4 = vsub.f32 %v2935_v33, %v3277_v58  ;;  %v441_v30 = vperm.slane %v3353_v1, 1  ;;  %v442_v33 = vperm.slane %v3353_v1, 2 }
  0xa0   : > { %v366_v15 = vsub.f32 %v362_v5, %v364_v6  ;;  %v417_v5 = vperm.slane %v3342_v56, 2  ;;  %v418_v6 = vperm.slane %v3342_v56, 3 }
  0xa2   : > { %v380_v24 = vadd.f32 1e-05, %v366_v15 }
  0xa3   : > { %v326_v27 = vpop.xlane.xlu0 %325 }
  0xa4   : > { %2690 = vrsqrt.f32 %v380_v24  ;;  %v3335_v36 = vmul.f32 %v333_v48, %v326_v27  ;;  %vm388_vm2 = vweird.f32 %v380_v24 }
  0xa5   : > { %v361_v38 = vpop.xlane.xlu1 %360 }
  0xa6   : > { %v363_v40 = vmul.f32 %v361_v38, %v333_v48  ;;  %v365_v44 = vmul.f32 %v3335_v36, %v3335_v36  ;;  %v374_v12 = vsub.f32 %v2954_v41, %v3335_v36  ;;  %v375_v15 = vsub.f32 %v2957_v42, %v3335_v36 }
  0xa7   : > { %v376_v16 = vsub.f32 %v2960_v43, %v3335_v36  ;;  %v377_v17 = vsub.f32 %v2964_v46, %v3335_v36  ;;  %v2196_v43 = vld [vmem:[%s4004_s3 + $0x234] sm:$0xf0]  ;;  %v2590_v46 = vld [vmem:[%s4004_s3 + $0x2ec] sm:$0xf] }
  0xa8   : > { %v367_v45 = vsub.f32 %v363_v40, %v365_v44 }
  0xaa   : > { %v2691_v47 = vpop.eup %2690  ;;  %v381_v49 = vadd.f32 1e-05, %v367_v45  ;;  %v2614_v45 = vld [vmem:[%s4004_s3 + $0x3ac] sm:$0xf] }
  0xab   : > { %v383_v50 = vmul.f32 %v2691_v47, %v380_v24  ;;  %vm389_vm1 = vweird.f32 %v2691_v47 }
  0xac   : > { %2692 = vrsqrt.f32 %v381_v49  ;;  %vm390_vm3 = vmor %vm388_vm2, %vm389_vm1  ;;  %vm398_vm5 = vweird.f32 %v381_v49 }
  0xad   : > { %v384_v52 = vmul.f32 %v2691_v47, %v383_v50 }
  0xaf   : > { %v385_v53 = vmul.f32 0.5, %v384_v52 }
  0xb1   : > { %v386_v54 = vsub.f32 1.5, %v385_v53  ;;  %v2388_v53 = vld [vmem:[%s4004_s3 + $0x3b4] sm:$0xf0] }
  0xb2   : > { %v2693_v55 = vpop.eup %2692 }
  0xb3   : > { %v387_v0 = vmul.f32 %v2691_v47, %v386_v54  ;;  %v393_v48 = vmul.f32 %v2693_v55, %v381_v49  ;;  %vm399_vm4 = vweird.f32 %v2693_v55  ;;  %v2638_v54 = vld [vmem:[%s4004_s3 + $0x46c] sm:$0xf] }
  0xb4   : > { %vm400_vm6 = vmor %vm398_vm5, %vm399_vm4 }
  0xb5   : > { %v3344_v57 = vsel %vm390_vm3, %v2691_v47, %v387_v0  ;;  %v394_v59 = vmul.f32 %v2693_v55, %v393_v48  ;;  %v2199_v0 = vor.u32 %v2566_v26, %v2196_v43  ;;  %v2295_v48 = vor.u32 %v2590_v46, %v2292_v37  ;;  %v2160_v26 = vld [vmem:[%s4004_s3 + $0x1ec] sm:$0xf0]  ;;  %v2581_v43 = vld [vmem:[%s4004_s3 + $0x2a4] sm:$0xf] }
  0xb6   : > { %v402_v28 = vmul.f32 %v3344_v57, %v368_v60  ;;  %v403_v8 = vmul.f32 %v3344_v57, %v369_v2  ;;  %v404_v9 = vmul.f32 %v3344_v57, %v370_v3  ;;  %v405_v29 = vmul.f32 %v3344_v57, %v371_v4  ;;  %v2184_v2 = vld [vmem:[%s4004_s3 + $0x21c] sm:$0xf0]  ;;  %v2256_v46 = vld [vmem:[%s4004_s3 + $0x2ac] sm:$0xf0]  ;;  %v2605_v37 = vld [vmem:[%s4004_s3 + $0x364] sm:$0xf] }
  0xb7   : > { %v395_v63 = vmul.f32 0.5, %v394_v59  ;;  %v2391_v3 = vor.u32 %v2614_v45, %v2388_v53  ;;  %v2148_v53 = vld [vmem:[%s4004_s3 + $0x1d4] sm:$0xf0] }
  0xb8   : > { %v427_v14 = vmul.f32 %v415_v61, %v402_v28  ;;  %v428_v19 = vmul.f32 %v416_v62, %v403_v8  ;;  %v429_v21 = vmul.f32 %v417_v5, %v404_v9  ;;  %v430_v22 = vmul.f32 %v418_v6, %v405_v29  ;;  %v2587_v28 = vld [vmem:[%s4004_s3 + $0x2d4] sm:$0xf]  ;;  %v2472_v9 = vld [vmem:[%s4004_s3 + $0x45c] sm:$0xf0] }
  0xb9   : > { %v396_v7 = vsub.f32 1.5, %v395_v63  ;;  %v2563_v63 = vld [vmem:[%s4004_s3 + $0x214] sm:$0xf]  ;;  %v378_v29 = vsub.f32 %v2975_v51, %v3335_v36  ;;  %v2560_v51 = vld [vmem:[%s4004_s3 + $0x1fc] sm:$0xf] }
  0xba   : > { %v452_v38 = vadd.f32 %v440_v10, %v427_v14  ;;  %v453_v39 = vadd.f32 %v441_v30, %v428_v19  ;;  %v454_v40 = vadd.f32 %v442_v33, %v429_v21  ;;  %v455_v44 = vadd.f32 %v443_v13, %v430_v22  ;;  %v2635_v8 = vld [vmem:[%s4004_s3 + $0x454] sm:$0xf]  ;;  %v2460_v19 = vld [vmem:[%s4004_s3 + $0x444] sm:$0xf0] }
  0xbb   : > { %v397_v11 = vmul.f32 %v2693_v55, %v396_v7  ;;  %v2376_v7 = vld [vmem:[%s4004_s3 + $0x39c] sm:$0xf0] }
  0xbd   : > { %v401_v18 = vsel %vm400_vm6, %v2693_v55, %v397_v11  ;;  %v2484_v55 = vld [vmem:[%s4004_s3 + $0x474] sm:$0xf0]  ;;  %v419_v11 = vperm.slane %v3342_v56, 4 }
  0xbe   : > { %v408_v23 = vmul.f32 %v401_v18, %v374_v12  ;;  %v409_v41 = vmul.f32 %v401_v18, %v375_v15  ;;  %v410_v24 = vmul.f32 %v401_v18, %v376_v16  ;;  %v411_v25 = vmul.f32 %v401_v18, %v377_v17  ;;  %v2608_v17 = vld [vmem:[%s4004_s3 + $0x37c] sm:$0xf] }
  0xbf   : > { %v2487_v4 = vor.u32 %v2638_v54, %v2484_v55  ;;  %v373_v12 = vsub.f32 %v2941_v35, %v3277_v58  ;;  %v2475_v16 = vor.u32 %v2635_v8, %v2472_v9  ;;  %v2584_v35 = vld [vmem:[%s4004_s3 + $0x2bc] sm:$0xf] }
  0xc0   : > { %v433_v27 = vmul.f32 %v415_v61, %v408_v23  ;;  %v434_v42 = vmul.f32 %v416_v62, %v409_v41  ;;  %v435_v31 = vmul.f32 %v417_v5, %v410_v24  ;;  %v436_v32 = vmul.f32 %v418_v6, %v411_v25  ;;  %v2280_v5 = vld [vmem:[%s4004_s3 + $0x2dc] sm:$0xf0]  ;;  %v2611_v6 = vld [vmem:[%s4004_s3 + $0x394] sm:$0xf]  ;;  %v2557_v25 = vld [vmem:[%s4004_s3 + $0x1e4] sm:$0xf] }
  0xc1   : > { %v2379_v15 = vor.u32 %v2611_v6, %v2376_v7  ;;  %v407_v22 = vmul.f32 %v3344_v57, %v373_v12  ;;  %v444_v41 = vperm.slane %v3353_v1, 4  ;;  %v2163_v45 = vor.u32 %v2557_v25, %v2160_v26  ;;  %v2232_v12 = vld [vmem:[%s4004_s3 + $0x27c] sm:$0xf0]  ;;  %v2112_v25 = vld [vmem:[%s4004_s3 + $0x18c] sm:$0xf0] }
  0xc2   : > { %v458_v47 = vadd.f32 %v440_v10, %v433_v27  ;;  %v459_v49 = vadd.f32 %v441_v30, %v434_v42  ;;  %v460_v50 = vadd.f32 %v442_v33, %v435_v31  ;;  %v461_v52 = vadd.f32 %v443_v13, %v436_v32  ;;  %v2569_v26 = vld [vmem:[%s4004_s3 + $0x244] sm:$0xf] }
  0xc3   : > { %v379_v10 = vsub.f32 %v3027_v20, %v3335_v36  ;;  %v2187_v30 = vor.u32 %v2563_v63, %v2184_v2  ;;  %v372_v33 = vsub.f32 %v2938_v34, %v3277_v58  ;;  %v2283_v13 = vor.u32 %v2587_v28, %v2280_v5  ;;  %v2172_v20 = vld [vmem:[%s4004_s3 + $0x204] sm:$0xf0]  ;;  %v2602_v63 = vld [vmem:[%s4004_s3 + $0x34c] sm:$0xf]  ;;  %v2436_v5 = vld [vmem:[%s4004_s3 + $0x414] sm:$0xf0] }
  0xc4   : > { %v3404_v59 = vpack.c.bf16 %v458_v47, %v452_v38  ;;  %v3406_v60 = vpack.c.bf16 %v459_v49, %v453_v39  ;;  %v3408_v61 = vpack.c.bf16 %v460_v50, %v454_v40  ;;  %v3410_v62 = vpack.c.bf16 %v461_v52, %v455_v44  ;;  %v2268_v58 = vld [vmem:[%s4004_s3 + $0x2c4] sm:$0xf0]  ;;  %v2629_v38 = vld [vmem:[%s4004_s3 + $0x424] sm:$0xf]  ;;  %v2448_v39 = vld [vmem:[%s4004_s3 + $0x42c] sm:$0xf0] }
  0xc5   : > { %v412_v36 = vmul.f32 %v401_v18, %v378_v29  ;;  %v413_v14 = vmul.f32 %v401_v18, %v379_v10  ;;  %v420_v34 = vperm.slane %v3342_v56, 5  ;;  %v2364_v56 = vld [vmem:[%s4004_s3 + $0x384] sm:$0xf0]  ;;  %v2632_v18 = vld [vmem:[%s4004_s3 + $0x43c] sm:$0xf]  ;;  %v406_v21 = vmul.f32 %v3344_v57, %v372_v33 }
  0xc6   : > { %1438 = vmatmul.bf16.vlgmr.msra.gmra.mxu0 %v3404_v59  ;;  %1452 = vmatmul.bf16.vlgmr.msra.gmra.mxu1 %v3406_v60  ;;  %v2175_v23 = vor.u32 %v2560_v51, %v2172_v20  ;;  %v2271_v24 = vor.u32 %v2584_v35, %v2268_v58  ;;  %v445_v31 = vperm.slane %v3353_v1, 5  ;;  %v2367_v57 = vor.u32 %v2608_v17, %v2364_v56  ;;  %v2352_v1 = vld [vmem:[%s4004_s3 + $0x36c] sm:$0xf0]  ;;  %v2554_v52 = vld [vmem:[%s4004_s3 + $0x1cc] sm:$0xf] }
  0xc7   : > { %1466 = vmatmul.bf16.vlgmr.msra.gmra.mxu2 %v3408_v61  ;;  %1480 = vmatmul.bf16.vlgmr.msra.gmra.mxu3 %v3410_v62  ;;  %v437_v27 = vmul.f32 %v419_v11, %v412_v36  ;;  %v438_v42 = vmul.f32 %v420_v34, %v413_v14  ;;  %v2463_v32 = vor.u32 %v2632_v18, %v2460_v19  ;;  %v2626_v28 = vld [vmem:[%s4004_s3 + $0x40c] sm:$0xf]  ;;  %v2551_v29 = vld [vmem:[%s4004_s3 + $0x1b4] sm:$0xf]  ;;  %v2136_v10 = vld [vmem:[%s4004_s3 + $0x1bc] sm:$0xf0] }
  0xc8   : > { %1542 = vmatpush.bf16.msra.mxu0 %v2199_v0  ;;  %1556 = vmatpush.bf16.msra.mxu1 %v2295_v48  ;;  %v431_v40 = vmul.f32 %v419_v11, %v406_v21  ;;  %v432_v44 = vmul.f32 %v420_v34, %v407_v22  ;;  %v2259_v47 = vor.u32 %v2581_v43, %v2256_v46  ;;  %v2578_v0 = vld [vmem:[%s4004_s3 + $0x28c] sm:$0xf]  ;;  %v2244_v48 = vld [vmem:[%s4004_s3 + $0x294] sm:$0xf0]  ;;  %v2575_v11 = vld [vmem:[%s4004_s3 + $0x274] sm:$0xf] }
  0xc9   : > { %1570 = vmatpush.bf16.msra.mxu2 %v2391_v3  ;;  %1584 = vmatpush.bf16.msra.mxu3 %v2487_v4  ;;  %v462_v49 = vadd.f32 %v444_v41, %v437_v27  ;;  %v463_v50 = vadd.f32 %v445_v31, %v438_v42  ;;  %v2355_v54 = vor.u32 %v2605_v37, %v2352_v1  ;;  %v2340_v4 = vld [vmem:[%s4004_s3 + $0x354] sm:$0xf0]  ;;  %v2328_v51 = vld [vmem:[%s4004_s3 + $0x33c] sm:$0xf0]  ;;  %v2623_v20 = vld [vmem:[%s4004_s3 + $0x3f4] sm:$0xf] }
  0xca   : > { %v2451_v55 = vor.u32 %v2629_v38, %v2448_v39  ;;  %v456_v2 = vadd.f32 %v444_v41, %v431_v40  ;;  %v457_v3 = vadd.f32 %v445_v31, %v432_v44  ;;  %v2151_v6 = vor.u32 %v2554_v52, %v2148_v53  ;;  %v2424_v36 = vld [vmem:[%s4004_s3 + $0x3fc] sm:$0xf0]  ;;  %v2572_v17 = vld [vmem:[%s4004_s3 + $0x25c] sm:$0xf]  ;;  %v2220_v56 = vld [vmem:[%s4004_s3 + $0x264] sm:$0xf0] }
  0xcb   : > { %v2247_v9 = vor.u32 %v2578_v0, %v2244_v48  ;;  %v2439_v33 = vor.u32 %v2626_v28, %v2436_v5  ;;  %v2139_v14 = vor.u32 %v2551_v29, %v2136_v10  ;;  %v2235_v34 = vor.u32 %v2575_v11, %v2232_v12  ;;  %v2596_v18 = vld [vmem:[%s4004_s3 + $0x31c] sm:$0xf]  ;;  %v2316_v19 = vld [vmem:[%s4004_s3 + $0x324] sm:$0xf0]  ;;  %v2208_v27 = vld [vmem:[%s4004_s3 + $0x24c] sm:$0xf0] }
  0xcc   : > { %1543 = vmatpush.bf16.msra.mxu0 %v2187_v30  ;;  %1557 = vmatpush.bf16.msra.mxu1 %v2283_v13  ;;  %v3526_v7 = vpack.c.bf16 %v462_v49, %v456_v2  ;;  %v3528_v8 = vpack.c.bf16 %v463_v50, %v457_v3  ;;  %v2343_v30 = vor.u32 %v2602_v63, %v2340_v4  ;;  %v2599_v13 = vld [vmem:[%s4004_s3 + $0x334] sm:$0xf]  ;;  %v2620_v21 = vld [vmem:[%s4004_s3 + $0x3dc] sm:$0xf]  ;;  %v2412_v22 = vld [vmem:[%s4004_s3 + $0x3e4] sm:$0xf0] }
  0xcd   : > { %1571 = vmatpush.bf16.msra.mxu2 %v2379_v15  ;;  %1585 = vmatpush.bf16.msra.mxu3 %v2475_v16  ;;  %v2548_v15 = vld [vmem:[%s4004_s3 + $0x19c] sm:$0xf]  ;;  %v2124_v16 = vld [vmem:[%s4004_s3 + $0x1a4] sm:$0xf0]  ;;  %v2331_v35 = vor.u32 %v2599_v13, %v2328_v51  ;;  %v2427_v58 = vor.u32 %v2623_v20, %v2424_v36  ;;  %v2319_v42 = vor.u32 %v2596_v18, %v2316_v19  ;;  %v2617_v43 = vld [vmem:[%s4004_s3 + $0x3c4] sm:$0xf] }
  0xce   : > { %v2127_v41 = vor.u32 %v2548_v15, %v2124_v16  ;;  %v2415_v31 = vor.u32 %v2620_v21, %v2412_v22  ;;  %v2400_v46 = vld [vmem:[%s4004_s3 + $0x3cc] sm:$0xf0]  ;;  %v2520_v1 = vld [vmem:[%s4004_s3 + $0xb8] sm:$0xf0]  ;;  %v1998_v0 = vld [vmem:[%s4004_s3 + $0x98] sm:$0xf] }
  0xcf   : > { %v2010_v37 = vld [vmem:[%s4004_s3 + $0xb0] sm:$0xf]  ;;  %v2544_v39 = vld [vmem:[%s4004_s3 + $0x178] sm:$0xf0]  ;;  %v2403_v53 = vor.u32 %v2617_v43, %v2400_v46  ;;  %v2517_v48 = vld [vmem:[%s4004_s3 + $0xa0] sm:$0xf0] }
  0xd0   : > { %1544 = vmatpush.bf16.msra.mxu0 %v2175_v23  ;;  %1558 = vmatpush.bf16.msra.mxu1 %v2271_v24  ;;  %v2545_v23 = vld [vmem:[%s4004_s3 + $0x184] sm:$0xf]  ;;  %v2223_v24 = vor.u32 %v2572_v17, %v2220_v56  ;;  %v2106_v38 = vld [vmem:[%s4004_s3 + $0x170] sm:$0xf]  ;;  %v2592_v50 = vld [vmem:[%s4004_s3 + $0x2f8] sm:$0xf0]  ;;  %v1999_v29 = vor.u32 %v2517_v48, %v1998_v0 }
  0xd1   : > { %1572 = vmatpush.bf16.msra.mxu2 %v2367_v57  ;;  %1586 = vmatpush.bf16.msra.mxu3 %v2463_v32  ;;  %v2593_v57 = vld [vmem:[%s4004_s3 + $0x304] sm:$0xf]  ;;  %v2304_v32 = vld [vmem:[%s4004_s3 + $0x30c] sm:$0xf0]  ;;  %v2115_v44 = vor.u32 %v2545_v23, %v2112_v25  ;;  %v2094_v3 = vld [vmem:[%s4004_s3 + $0x158] sm:$0xf] }
  0xd2   : > { %v2202_v40 = vld [vmem:[%s4004_s3 + $0x230] sm:$0xf]  ;;  %v2307_v52 = vor.u32 %v2593_v57, %v2304_v32  ;;  %v2541_v4 = vld [vmem:[%s4004_s3 + $0x160] sm:$0xf0]  ;;  %v2190_v28 = vld [vmem:[%s4004_s3 + $0x218] sm:$0xf] }
  0xd3   : > { %v2298_v49 = vld [vmem:[%s4004_s3 + $0x2f0] sm:$0xf]  ;;  %v2565_v5 = vld [vmem:[%s4004_s3 + $0x220] sm:$0xf0]  ;;  %v2095_v10 = vor.u32 %v2541_v4, %v2094_v3  ;;  %v2082_v13 = vld [vmem:[%s4004_s3 + $0x140] sm:$0xf] }
  0xd4   : > { %1545 = vmatpush.bf16.msra.mxu0 %v2163_v45  ;;  %1559 = vmatpush.bf16.msra.mxu1 %v2259_v47  ;;  %v2211_v45 = vor.u32 %v2569_v26, %v2208_v27  ;;  %v2568_v47 = vld [vmem:[%s4004_s3 + $0x238] sm:$0xf0]  ;;  %v2299_v2 = vor.u32 %v2592_v50, %v2298_v49  ;;  %v2191_v11 = vor.u32 %v2565_v5, %v2190_v28  ;;  %v2538_v51 = vld [vmem:[%s4004_s3 + $0x148] sm:$0xf0]  ;;  %v2178_v20 = vld [vmem:[%s4004_s3 + $0x200] sm:$0xf] }
  0xd5   : > { %1573 = vmatpush.bf16.msra.mxu2 %v2355_v54  ;;  %1587 = vmatpush.bf16.msra.mxu3 %v2451_v55  ;;  %v2011_v54 = vor.u32 %v2520_v1, %v2010_v37  ;;  %v2107_v55 = vor.u32 %v2544_v39, %v2106_v38  ;;  %v2203_v63 = vor.u32 %v2568_v47, %v2202_v40  ;;  %v2562_v36 = vld [vmem:[%s4004_s3 + $0x208] sm:$0xf0]  ;;  %v2070_v18 = vld [vmem:[%s4004_s3 + $0x128] sm:$0xf]  ;;  %v2535_v19 = vld [vmem:[%s4004_s3 + $0x130] sm:$0xf0] }
  0xd6   : > { %1494 = vmatmul.bf16.vlgmr.msrb.gmra.mxu0 %v3526_v7  ;;  %1508 = vmatmul.bf16.vlgmr.msrb.gmra.mxu1 %v3528_v8  ;;  %v2083_v16 = vor.u32 %v2538_v51, %v2082_v13  ;;  %v2179_v17 = vor.u32 %v2562_v36, %v2178_v20  ;;  %v2166_v21 = vld [vmem:[%s4004_s3 + $0x1e8] sm:$0xf]  ;;  %v2559_v22 = vld [vmem:[%s4004_s3 + $0x1f0] sm:$0xf0]  ;;  %v2071_v25 = vor.u32 %v2535_v19, %v2070_v18  ;;  %v1962_v26 = vld [vmem:[%s4004_s3 + $0x50] sm:$0xf] }
  0xd7   : > { %1522 = vmatmul.bf16.vlgmr.msrb.gmra.mxu2 %v3404_v59  ;;  %1536 = vmatmul.bf16.vlgmr.msrb.gmra.mxu3 %v3406_v60  ;;  %v2262_v23 = vld [vmem:[%s4004_s3 + $0x2a8] sm:$0xf]  ;;  %v2508_v27 = vld [vmem:[%s4004_s3 + $0x58] sm:$0xf0]  ;;  %v2058_v57 = vld [vmem:[%s4004_s3 + $0x110] sm:$0xf] }
  0xd8   : > { %1546 = vmatpush.bf16.msra.mxu0 %v2151_v6  ;;  %1560 = vmatpush.bf16.msra.mxu1 %v2247_v9  ;;  %v2286_v6 = vld [vmem:[%s4004_s3 + $0x2d8] sm:$0xf]  ;;  %v2589_v9 = vld [vmem:[%s4004_s3 + $0x2e0] sm:$0xf0]  ;;  %v2532_v32 = vld [vmem:[%s4004_s3 + $0x118] sm:$0xf0]  ;;  %v1963_v38 = vor.u32 %v2508_v27, %v1962_v26 }
  0xd9   : > { %1574 = vmatpush.bf16.msra.mxu2 %v2343_v30  ;;  %1588 = vmatpush.bf16.msra.mxu3 %v2439_v33  ;;  %v1986_v30 = vld [vmem:[%s4004_s3 + $0x80] sm:$0xf]  ;;  %v2514_v33 = vld [vmem:[%s4004_s3 + $0x88] sm:$0xf0]  ;;  %v2287_v12 = vor.u32 %v2589_v9, %v2286_v6  ;;  %v2154_v43 = vld [vmem:[%s4004_s3 + $0x1d0] sm:$0xf]  ;;  %v2059_v39 = vor.u32 %v2532_v32, %v2058_v57 }
  0xda   : > { %v1987_v15 = vor.u32 %v2514_v33, %v1986_v30  ;;  %v2556_v46 = vld [vmem:[%s4004_s3 + $0x1d8] sm:$0xf0]  ;;  %v2250_v37 = vld [vmem:[%s4004_s3 + $0x290] sm:$0xf]  ;;  %v1950_v40 = vld [vmem:[%s4004_s3 + $0x38] sm:$0xf] }
  0xdb   : > { %v2580_v1 = vld [vmem:[%s4004_s3 + $0x298] sm:$0xf0]  ;;  %v2046_v49 = vld [vmem:[%s4004_s3 + $0xf8] sm:$0xf]  ;;  %v2529_v50 = vld [vmem:[%s4004_s3 + $0x100] sm:$0xf0] }
  0xdc   : > { %1547 = vmatpush.bf16.msra.mxu0 %v2139_v14  ;;  %1561 = vmatpush.bf16.msra.mxu1 %v2235_v34  ;;  %v2274_v14 = vld [vmem:[%s4004_s3 + $0x2c0] sm:$0xf]  ;;  %v2586_v34 = vld [vmem:[%s4004_s3 + $0x2c8] sm:$0xf0]  ;;  %v2251_v47 = vor.u32 %v2580_v1, %v2250_v37  ;;  %v2047_v48 = vor.u32 %v2529_v50, %v2046_v49  ;;  %v2022_v13 = vld [vmem:[%s4004_s3 + $0xc8] sm:$0xf] }
  0xdd   : > { %1575 = vmatpush.bf16.msra.mxu2 %v2331_v35  ;;  %1589 = vmatpush.bf16.msra.mxu3 %v2427_v58  ;;  %v1974_v35 = vld [vmem:[%s4004_s3 + $0x68] sm:$0xf]  ;;  %v2511_v58 = vld [vmem:[%s4004_s3 + $0x70] sm:$0xf0]  ;;  %v2275_v56 = vor.u32 %v2586_v34, %v2274_v14  ;;  %v2034_v28 = vld [vmem:[%s4004_s3 + $0xe0] sm:$0xf] }
  0xde   : > { %v2526_v5 = vld [vmem:[%s4004_s3 + $0xe8] sm:$0xf0]  ;;  %v2130_v6 = vld [vmem:[%s4004_s3 + $0x1a0] sm:$0xf]  ;;  %v2523_v36 = vld [vmem:[%s4004_s3 + $0xd0] sm:$0xf0] }
  0xdf   : > { %v2550_v9 = vld [vmem:[%s4004_s3 + $0x1a8] sm:$0xf0]  ;;  %v2035_v33 = vor.u32 %v2526_v5, %v2034_v28  ;;  %v2118_v14 = vld [vmem:[%s4004_s3 + $0x188] sm:$0xf]  ;;  %v2547_v34 = vld [vmem:[%s4004_s3 + $0x190] sm:$0xf0]  ;;  %v2023_v19 = vor.u32 %v2523_v36, %v2022_v13 }
  0xe0   : > { %1548 = vmatpush.bf16.msra.mxu0 %v2127_v41  ;;  %1562 = vmatpush.bf16.msra.mxu1 %v2223_v24  ;;  %v2583_v41 = vld [vmem:[%s4004_s3 + $0x2b0] sm:$0xf0]  ;;  %v1975_v24 = vor.u32 %v2511_v58, %v1974_v35  ;;  %v2131_v51 = vor.u32 %v2550_v9, %v2130_v6  ;;  %v2394_v35 = vld [vmem:[%s4004_s3 + $0x3b0] sm:$0xf]  ;;  %v2616_v58 = vld [vmem:[%s4004_s3 + $0x3b8] sm:$0xf0] }
  0xe1   : > { %1576 = vmatpush.bf16.msra.mxu2 %v2319_v42  ;;  %1590 = vmatpush.bf16.msra.mxu3 %v2415_v31  ;;  %v2167_v42 = vor.u32 %v2559_v22, %v2166_v21  ;;  %v2263_v31 = vor.u32 %v2583_v41, %v2262_v23  ;;  %v2119_v21 = vor.u32 %v2547_v34, %v2118_v14  ;;  %v2478_v26 = vld [vmem:[%s4004_s3 + $0x458] sm:$0xf]  ;;  %v2637_v27 = vld [vmem:[%s4004_s3 + $0x460] sm:$0xf0]  ;;  %v2370_v57 = vld [vmem:[%s4004_s3 + $0x380] sm:$0xf] }
  0xe2   : > { %v2395_v23 = vor.u32 %v2616_v58, %v2394_v35  ;;  %v2610_v32 = vld [vmem:[%s4004_s3 + $0x388] sm:$0xf0]  ;;  %v2358_v37 = vld [vmem:[%s4004_s3 + $0x368] sm:$0xf]  ;;  %v2607_v1 = vld [vmem:[%s4004_s3 + $0x370] sm:$0xf0] }
  0xe3   : > { %v2310_v6 = vld [vmem:[%s4004_s3 + $0x308] sm:$0xf]  ;;  %v2595_v9 = vld [vmem:[%s4004_s3 + $0x310] sm:$0xf0] }
  0xe4   : > { %1549 = vmatpush.bf16.msra.mxu0 %v2115_v44  ;;  %1563 = vmatpush.bf16.msra.mxu1 %v2211_v45  ;;  %v2505_v44 = vld [vmem:[%s4004_s3 + $0x40] sm:$0xf0]  ;;  %v2155_v45 = vor.u32 %v2556_v46, %v2154_v43  ;;  %v2466_v43 = vld [vmem:[%s4004_s3 + $0x440] sm:$0xf]  ;;  %v2634_v46 = vld [vmem:[%s4004_s3 + $0x448] sm:$0xf0] }
  0xe5   : > { %1577 = vmatpush.bf16.msra.mxu2 %v2307_v52  ;;  %1591 = vmatpush.bf16.msra.mxu3 %v2403_v53  ;;  %v2142_v52 = vld [vmem:[%s4004_s3 + $0x1b8] sm:$0xf]  ;;  %v2553_v53 = vld [vmem:[%s4004_s3 + $0x1c0] sm:$0xf0]  ;;  %v1951_v0 = vor.u32 %v2505_v44, %v1950_v40  ;;  %v2346_v40 = vld [vmem:[%s4004_s3 + $0x350] sm:$0xf] }
  0xe6   : > { %v2143_v3 = vor.u32 %v2553_v53, %v2142_v52  ;;  %v2604_v44 = vld [vmem:[%s4004_s3 + $0x358] sm:$0xf0]  ;;  %v2334_v52 = vld [vmem:[%s4004_s3 + $0x338] sm:$0xf]  ;;  %v2601_v53 = vld [vmem:[%s4004_s3 + $0x340] sm:$0xf0] }
  0xe7   : > { %1550 = vmatmul.bf16.vlgmr.msra.gmra.mxu0 %v3408_v61  ;;  %1564 = vmatmul.bf16.vlgmr.msra.gmra.mxu1 %v3410_v62  ;;  %v2347_v49 = vor.u32 %v2604_v44, %v2346_v40 }
  0xe8   : > { %1598 = vmatpush.bf16.msrb.mxu0 %v2011_v54  ;;  %1612 = vmatpush.bf16.msrb.mxu1 %v2107_v55  ;;  %v2238_v54 = vld [vmem:[%s4004_s3 + $0x278] sm:$0xf]  ;;  %v2577_v55 = vld [vmem:[%s4004_s3 + $0x280] sm:$0xf0] }
  0xe9   : > { %1626 = vmatpush.bf16.msrb.mxu2 %v2203_v63  ;;  %1640 = vmatpush.bf16.msrb.mxu3 %v2299_v2  ;;  %v1938_v63 = vld [vmem:[%s4004_s3 + $0x20] sm:$0xf]  ;;  %v2502_v2 = vld [vmem:[%s4004_s3 + $0x28] sm:$0xf0]  ;;  %v2239_v4 = vor.u32 %v2577_v55, %v2238_v54  ;;  %v2430_v54 = vld [vmem:[%s4004_s3 + $0x3f8] sm:$0xf] }
  0xea   : > { %1578 = vmatmul.bf16.vlgmr.msra.gmra.mxu2 %v3526_v7  ;;  %1592 = vmatmul.bf16.vlgmr.msra.gmra.mxu3 %v3528_v8  ;;  %v1939_v30 = vor.u32 %v2502_v2, %v1938_v63  ;;  %v2625_v55 = vld [vmem:[%s4004_s3 + $0x400] sm:$0xf0]  ;;  %v2322_v63 = vld [vmem:[%s4004_s3 + $0x320] sm:$0xf]  ;;  %v2598_v2 = vld [vmem:[%s4004_s3 + $0x328] sm:$0xf0] }
  0xeb   : > { %v2323_v28 = vor.u32 %v2598_v2, %v2322_v63 }
  0xec   : > { %1599 = vmatpush.bf16.msrb.mxu0 %v1999_v29  ;;  %1613 = vmatpush.bf16.msrb.mxu1 %v2095_v10  ;;  %v2226_v29 = vld [vmem:[%s4004_s3 + $0x260] sm:$0xf]  ;;  %v2574_v10 = vld [vmem:[%s4004_s3 + $0x268] sm:$0xf0] }
  0xed   : > { %1627 = vmatpush.bf16.msrb.mxu2 %v2191_v11  ;;  %1641 = vmatpush.bf16.msrb.mxu3 %v2287_v12  ;;  %v1926_v11 = vld [vmem:[%s4004_s3 + $0x8] sm:$0xf]  ;;  %v2499_v12 = vld [vmem:[%s4004_s3 + $0x10] sm:$0xf0]  ;;  %v2227_v20 = vor.u32 %v2574_v10, %v2226_v29 }
  0xee   : > { %v1927_v18 = vor.u32 %v2499_v12, %v1926_v11  ;;  %v2406_v29 = vld [vmem:[%s4004_s3 + $0x3c8] sm:$0xf]  ;;  %v2619_v10 = vld [vmem:[%s4004_s3 + $0x3d0] sm:$0xf0] }
  0xf0   : > { %1600 = vmatpush.bf16.msrb.mxu0 %v1987_v15  ;;  %1614 = vmatpush.bf16.msrb.mxu1 %v2083_v16  ;;  %v2214_v15 = vld [vmem:[%s4004_s3 + $0x248] sm:$0xf]  ;;  %v2571_v16 = vld [vmem:[%s4004_s3 + $0x250] sm:$0xf0] }
  0xf1   : > { %1628 = vmatpush.bf16.msrb.mxu2 %v2179_v17  ;;  %1642 = vmatpush.bf16.msrb.mxu3 %v2275_v56  ;;  %v2490_v17 = vld [vmem:[%s4004_s3 + $0x470] sm:$0xf]  ;;  %v2640_v56 = vld [vmem:[%s4004_s3 + $0x478] sm:$0xf0]  ;;  %v2215_v22 = vor.u32 %v2571_v16, %v2214_v15 }
  0xf2   : > { %v2491_v41 = vor.u32 %v2640_v56, %v2490_v17 }
  0xf4   : > { %1601 = vmatpush.bf16.msrb.mxu0 %v1975_v24  ;;  %1615 = vmatpush.bf16.msrb.mxu1 %v2071_v25  ;;  %v2382_v24 = vld [vmem:[%s4004_s3 + $0x398] sm:$0xf]  ;;  %v2613_v25 = vld [vmem:[%s4004_s3 + $0x3a0] sm:$0xf0] }
  0xf5   : > { %1629 = vmatpush.bf16.msrb.mxu2 %v2167_v42  ;;  %1643 = vmatpush.bf16.msrb.mxu3 %v2263_v31  ;;  %v2383_v42 = vor.u32 %v2613_v25, %v2382_v24  ;;  %v2479_v31 = vor.u32 %v2637_v27, %v2478_v26 }
  0xf8   : > { %1602 = vmatpush.bf16.msrb.mxu0 %v1963_v38  ;;  %1616 = vmatpush.bf16.msrb.mxu1 %v2059_v39  ;;  %v2454_v38 = vld [vmem:[%s4004_s3 + $0x428] sm:$0xf] }
  0xf9   : > { %1630 = vmatpush.bf16.msrb.mxu2 %v2155_v45  ;;  %1644 = vmatpush.bf16.msrb.mxu3 %v2251_v47  ;;  %v2442_v45 = vld [vmem:[%s4004_s3 + $0x410] sm:$0xf]  ;;  %v2628_v47 = vld [vmem:[%s4004_s3 + $0x418] sm:$0xf0] }
  0xfa   : > { %v2443_v50 = vor.u32 %v2628_v47, %v2442_v45 }
  0xfc   : > { %1603 = vmatpush.bf16.msrb.mxu0 %v1951_v0  ;;  %1617 = vmatpush.bf16.msrb.mxu1 %v2047_v48  ;;  %v2335_v0 = vor.u32 %v2601_v53, %v2334_v52  ;;  %v2431_v48 = vor.u32 %v2625_v55, %v2430_v54 }
  0xfd   : > { %1631 = vmatpush.bf16.msrb.mxu2 %v2143_v3  ;;  %1645 = vmatpush.bf16.msrb.mxu3 %v2239_v4  ;;  %v2418_v3 = vld [vmem:[%s4004_s3 + $0x3e0] sm:$0xf]  ;;  %v2622_v4 = vld [vmem:[%s4004_s3 + $0x3e8] sm:$0xf0] }
  0xfe   : > { %v2419_v5 = vor.u32 %v2622_v4, %v2418_v3 }
 0x100   : > { %1604 = vmatpush.bf16.msrb.mxu0 %v1939_v30  ;;  %1618 = vmatpush.bf16.msrb.mxu1 %v2035_v33  ;;  %v2311_v30 = vor.u32 %v2595_v9, %v2310_v6  ;;  %v2407_v33 = vor.u32 %v2619_v10, %v2406_v29 }
 0x101   : > { %1632 = vmatpush.bf16.msrb.mxu2 %v2131_v51  ;;  %1646 = vmatpush.bf16.msrb.mxu3 %v2227_v20 }
 0x104   : > { %1605 = vmatpush.bf16.msrb.mxu0 %v1927_v18  ;;  %1619 = vmatpush.bf16.msrb.mxu1 %v2023_v19 }
 0x105   : > { %1633 = vmatpush.bf16.msrb.mxu2 %v2119_v21  ;;  %1647 = vmatpush.bf16.msrb.mxu3 %v2215_v22 }
 0x107   : > { %1606 = vmatmul.bf16.vlgmr.msrb.gmra.mxu0 %v3404_v59  ;;  %1620 = vmatmul.bf16.vlgmr.msrb.gmra.mxu1 %v3406_v60  ;;  %v2371_v59 = vor.u32 %v2610_v32, %v2370_v57  ;;  %v2467_v60 = vor.u32 %v2634_v46, %v2466_v43 }
 0x108   : > { %1654 = vmatpush.bf16.msra.mxu0 %v2395_v23  ;;  %1668 = vmatpush.bf16.msra.mxu1 %v2491_v41 }
 0x109   : > { %1634 = vmatmul.bf16.vlgmr.msrb.gmra.mxu2 %v3408_v61  ;;  %1648 = vmatmul.bf16.vlgmr.msrb.gmra.mxu3 %v3410_v62  ;;  %v2631_v61 = vld [vmem:[%s4004_s3 + $0x430] sm:$0xf0]  ;;  %v2359_v62 = vor.u32 %v2607_v1, %v2358_v37 }
 0x10a   : > { %v2455_v39 = vor.u32 %v2631_v61, %v2454_v38 }
 0x10c   : > { %1655 = vmatpush.bf16.msra.mxu0 %v2383_v42  ;;  %1669 = vmatpush.bf16.msra.mxu1 %v2479_v31 }
 0x110   : > { %1656 = vmatpush.bf16.msra.mxu0 %v2371_v59  ;;  %1670 = vmatpush.bf16.msra.mxu1 %v2467_v60 }
 0x114   : > { %1657 = vmatpush.bf16.msra.mxu0 %v2359_v62  ;;  %1671 = vmatpush.bf16.msra.mxu1 %v2455_v39 }
 0x118   : > { %1658 = vmatpush.bf16.msra.mxu0 %v2347_v49  ;;  %1672 = vmatpush.bf16.msra.mxu1 %v2443_v50 }
 0x11c   : > { %1659 = vmatpush.bf16.msra.mxu0 %v2335_v0  ;;  %1673 = vmatpush.bf16.msra.mxu1 %v2431_v48 }
 0x120   : > { %1660 = vmatpush.bf16.msra.mxu0 %v2323_v28  ;;  %1674 = vmatpush.bf16.msra.mxu1 %v2419_v5 }
 0x124   : > { %1661 = vmatpush.bf16.msra.mxu0 %v2311_v30  ;;  %1675 = vmatpush.bf16.msra.mxu1 %v2407_v33 }
 0x127   : > { %1662 = vmatmul.bf16.vlgmr.msra.gmra.mxu0 %v3526_v7  ;;  %1676 = vmatmul.bf16.vlgmr.msra.gmra.mxu1 %v3528_v8 }
 0x143   : > { %v1439_v11 = vpop.f32.mrf.mxu0  ;;  %v1453_v12 = vpop.f32.mrf.mxu1 }
 0x144   : > { %v1454_v14 = vadd.f32 %v1453_v12, %v1439_v11 }
 0x14a   : > { %v1467_v13 = vpop.f32.mrf.mxu2  ;;  %v1481_v51 = vpop.f32.mrf.mxu3 }
 0x14b   : > { %v1441_v20 = vpop.f32.mrf.mxu0  ;;  %v1455_v36 = vpop.f32.mrf.mxu1  ;;  %v1468_v34 = vadd.f32 %v1467_v13, %v1454_v14 }
 0x14c   : > { %v1456_v56 = vadd.f32 %v1455_v36, %v1441_v20 }
 0x14d   : > { %v1482_v15 = vadd.f32 %v1481_v51, %v1468_v34 }
 0x152   : > { %v1469_v16 = vpop.f32.mrf.mxu2  ;;  %v1483_v35 = vpop.f32.mrf.mxu3 }
 0x153   : > { %v1495_v58 = vpop.f32.mrf.mxu0  ;;  %v1509_v17 = vpop.f32.mrf.mxu1  ;;  %v1470_v18 = vadd.f32 %v1469_v16, %v1456_v56 }
 0x154   : > { %v1496_v7 = vadd.f32 %v1495_v58, %v1482_v15 }
 0x155   : > { %v1484_v19 = vadd.f32 %v1483_v35, %v1470_v18 }
 0x156   : > { %v3907_v8 = vadd.f32 %v1509_v17, %v1496_v7 }
 0x158   : > { %1682 = vst [vmem:[%s3909_s18] sm:$0xff] %v3907_v8  ;;  %v1707_v30 = vmul.f32 %v3907_v8, %v3907_v8 }
 0x15a   : > { %v1523_v21 = vpop.f32.mrf.mxu2  ;;  %v1537_v22 = vpop.f32.mrf.mxu3 }
 0x15b   : > { %v1497_v23 = vpop.f32.mrf.mxu0  ;;  %v1511_v24 = vpop.f32.mrf.mxu1  ;;  %v1538_v42 = vadd.f32 %v1537_v22, %v1523_v21 }
 0x15c   : > { %v1498_v41 = vadd.f32 %v1497_v23, %v1484_v19 }
 0x15e   : > { %v3913_v25 = vadd.f32 %v1511_v24, %v1498_v41 }
 0x160   : > { %1685 = vst [vmem:[%s3909_s18 + $0x18] sm:$0xff] %v3913_v25  ;;  %v1710_v58 = vmul.f32 %v3913_v25, %v3913_v25 }
 0x162   : > { %v1525_v26 = vpop.f32.mrf.mxu2  ;;  %v1539_v27 = vpop.f32.mrf.mxu3 }
 0x163   : > { %v1540_v60 = vadd.f32 %v1539_v27, %v1525_v26 }
 0x164   : > { %v1551_v31 = vpop.f32.mrf.mxu0  ;;  %v1565_v32 = vpop.f32.mrf.mxu1 }
 0x165   : > { %v1552_v57 = vadd.f32 %v1551_v31, %v1538_v42 }
 0x167   : > { %v1566_v43 = vadd.f32 %v1565_v32, %v1552_v57 }
 0x16c   : > { %v1553_v1 = vpop.f32.mrf.mxu0  ;;  %v1567_v62 = vpop.f32.mrf.mxu1 }
 0x16d   : > { %v1579_v46 = vpop.f32.mrf.mxu2  ;;  %v1593_v59 = vpop.f32.mrf.mxu3  ;;  %v1554_v61 = vadd.f32 %v1553_v1, %v1540_v60 }
 0x16e   : > { %v1580_v37 = vadd.f32 %v1579_v46, %v1566_v43 }
 0x16f   : > { %v1568_v39 = vadd.f32 %v1567_v62, %v1554_v61 }
 0x170   : > { %v3917_v38 = vadd.f32 %v1593_v59, %v1580_v37 }
 0x172   : > { %1683 = vst [vmem:[%s3909_s18 + $0x8] sm:$0xff] %v3917_v38  ;;  %v1708_v6 = vmul.f32 %v3917_v38, %v3917_v38  ;;  %v1690_v10 = vadd.f32 %v3917_v38, %v3907_v8 }
 0x174   : > { %v1713_v12 = vadd.f32 %v1708_v6, %v1707_v30 }
 0x175   : > { %v1581_v40 = vpop.f32.mrf.mxu2  ;;  %v1595_v45 = vpop.f32.mrf.mxu3 }
 0x176   : > { %v1582_v44 = vadd.f32 %v1581_v40, %v1568_v39 }
 0x178   : > { %v3921_v47 = vadd.f32 %v1595_v45, %v1582_v44 }
 0x17a   : > { %1686 = vst [vmem:[%s3909_s18 + $0x20] sm:$0xff] %v3921_v47  ;;  %v1711_v34 = vmul.f32 %v3921_v47, %v3921_v47  ;;  %v1694_v35 = vadd.f32 %v3921_v47, %v3913_v25 }
 0x17c   : > { %v1717_v7 = vadd.f32 %v1711_v34, %v1710_v58 }
 0x184   : > { %v1607_v49 = vpop.f32.mrf.mxu0  ;;  %v1621_v50 = vpop.f32.mrf.mxu1 }
 0x185   : > { %v1622_v55 = vadd.f32 %v1621_v50, %v1607_v49 }
 0x18c   : > { %v1635_v52 = vpop.f32.mrf.mxu2  ;;  %v1609_v53 = vpop.f32.mrf.mxu0 }
 0x18d   : > { %v1623_v54 = vpop.f32.mrf.mxu1  ;;  %v1636_v0 = vadd.f32 %v1635_v52, %v1622_v55  ;;  %v1649_v48 = vpop.f32.mrf.mxu3 }
 0x18e   : > { %v1624_v28 = vadd.f32 %v1623_v54, %v1609_v53 }
 0x18f   : > { %v1650_v63 = vadd.f32 %v1649_v48, %v1636_v0 }
 0x194   : > { %v1637_v2 = vpop.f32.mrf.mxu2 }
 0x195   : > { %v1638_v9 = vadd.f32 %v1637_v2, %v1624_v28  ;;  %v1651_v13 = vpop.f32.mrf.mxu3 }
 0x197   : > { %v1652_v51 = vadd.f32 %v1651_v13, %v1638_v9 }
 0x1a4   : > { %v1663_v3 = vpop.f32.mrf.mxu0  ;;  %v1677_v4 = vpop.f32.mrf.mxu1 }
 0x1a5   : > { %v1664_v5 = vadd.f32 %v1663_v3, %v1650_v63 }
 0x1a7   : > { %v3927_v29 = vadd.f32 %v1677_v4, %v1664_v5 }
 0x1a9   : > { %1684 = vst [vmem:[%s3909_s18 + $0x10] sm:$0xff] %v3927_v29  ;;  %v1691_v33 = vadd.f32 %v1690_v10, %v3927_v29  ;;  %v1709_v11 = vmul.f32 %v3927_v29, %v3927_v29 }
 0x1ab   : > { %1692 = vadd.xlane.f32.xlu2 %v1691_v33  ;;  %v1714_v20 = vadd.f32 %v1713_v12, %v1709_v11 }
 0x1ac   : > { %v1665_v36 = vpop.f32.mrf.mxu0  ;;  %v1679_v15 = vpop.f32.mrf.mxu1 }
 0x1ad   : > { %v1666_v14 = vadd.f32 %v1665_v36, %v1652_v51  ;;  %1715 = vadd.xlane.f32.xlu0 %v1714_v20 }
 0x1af   : > { %v3940_v16 = vadd.f32 %v1679_v15, %v1666_v14 }
 0x1b1   : > { %1687 = vst [vmem:[%s3909_s18 + $0x28] sm:$0xff] %v3940_v16  ;;  %v1695_v17 = vadd.f32 %v1694_v35, %v3940_v16  ;;  %v1712_v56 = vmul.f32 %v3940_v16, %v3940_v16 }
 0x1b3   : > { %1696 = vadd.xlane.f32.xlu2 %v1695_v17  ;;  %v1718_v18 = vadd.f32 %v1717_v7, %v1712_v56 }
 0x1b5   : > { %1719 = vadd.xlane.f32.xlu1 %v1718_v18 }
 0x1b6   : > { %2727 = shalt.err (!%p2724_p3)
}
 0x1b7   : > { %s2765_s16 = smov 384   ;;  %s2766_s18 = smov 24   ;;  %v2767_v19 = vmov 384.0   ;;  %v1688_v49 = vld [vmem:[%s4005_s4] sm:$0x7] }
 0x1b8   : > { %2645 = dma.vmem_to_hbm [thread:$0]  (%p2846_p5), %s1814_s21, 768, %s1816_s22, %s1794_s23, %s2765_s16, %s2765_s16, %s2766_s18   ;;  %2694 = vrcp.f32 %v2767_v19  ;;  %v1762_v55 = vperm.slane %v1688_v49, 0  ;;  %v1763_v0 = vperm.slane %v1688_v49, 1  ;;  %v1764_v28 = vperm.slane %v1688_v49, 2 }
 0x1b9   : > { %v1689_v54 = vld [vmem:[%s4006_s5] sm:$0x7]  ;;  %s2643_s20 = smul.u32 24, %s4018_s13 }
 0x1ba   : > { %v1775_v5 = vperm.slane %v1689_v54, 0  ;;  %v1776_v6 = vperm.slane %v1689_v54, 1  ;;  %v1777_v30 = vperm.slane %v1689_v54, 2 }
 0x1bb   : > { %s297_s23 = scalar_lea.vmem %s4008_s7, %s2643_s20 }
 0x1be   : > { %v2695_v21 = vpop.eup %2694 }
 0x1bf   : > { %v1699_v22 = vmul.f32 384.0, %v2695_v21  ;;  %vm1703_vm7 = vweird.f32 %v2695_v21 }
 0x1c1   : > { %v1700_v23 = vsub.f32 1.0, %v1699_v22 }
 0x1c3   : > { %v1701_v41 = vmul.f32 %v2695_v21, %v1700_v23 }
 0x1c5   : > { %v1702_v24 = vadd.f32 %v2695_v21, %v1701_v41 }
 0x1c7   : > { %v1704_v26 = vsel %vm1703_vm7, %v2695_v21, %v1702_v24 }
 0x21e   : > { %v1693_v27 = vpop.xlane.xlu2 %1692 }
 0x21f   : > { %v1705_v42 = vmul.f32 %v1704_v26, %v1693_v27 }
 0x220   : > { %v1716_v31 = vpop.xlane.xlu0 %1715 }
 0x221   : > { %v1721_v57 = vmul.f32 %v1716_v31, %v1704_v26  ;;  %v1723_v32 = vmul.f32 %v1705_v42, %v1705_v42  ;;  %v1727_v2 = vsub.f32 %v3907_v8, %v1705_v42  ;;  %v1728_v3 = vsub.f32 %v3917_v38, %v1705_v42 }
 0x222   : > { %v1729_v4 = vsub.f32 %v3927_v29, %v1705_v42 }
 0x223   : > { %v1725_v43 = vsub.f32 %v1721_v57, %v1723_v32 }
 0x225   : > { %v1733_v46 = vadd.f32 1e-05, %v1725_v43 }
 0x226   : > { %v1697_v59 = vpop.xlane.xlu2 %1696 }
 0x227   : > { %v1706_v60 = vmul.f32 %v1704_v26, %v1697_v59  ;;  %2696 = vrsqrt.f32 %v1733_v46  ;;  %vm1741_vm9 = vweird.f32 %v1733_v46 }
 0x228   : > { %v1720_v37 = vpop.xlane.xlu1 %1719 }
 0x229   : > { %v1722_v1 = vmul.f32 %v1720_v37, %v1704_v26  ;;  %v1724_v61 = vmul.f32 %v1706_v60, %v1706_v60  ;;  %v1730_v15 = vsub.f32 %v3913_v25, %v1706_v60  ;;  %v1731_v35 = vsub.f32 %v3921_v47, %v1706_v60 }
 0x22a   : > { %v1732_v58 = vsub.f32 %v3940_v16, %v1706_v60 }
 0x22b   : > { %v1726_v62 = vsub.f32 %v1722_v1, %v1724_v61 }
 0x22d   : > { %v2697_v39 = vpop.eup %2696  ;;  %v1734_v40 = vadd.f32 1e-05, %v1726_v62 }
 0x22e   : > { %v1736_v44 = vmul.f32 %v2697_v39, %v1733_v46  ;;  %vm1742_vm8 = vweird.f32 %v2697_v39 }
 0x22f   : > { %2698 = vrsqrt.f32 %v1734_v40  ;;  %vm1743_vm10 = vmor %vm1741_vm9, %vm1742_vm8  ;;  %vm1751_vm12 = vweird.f32 %v1734_v40 }
 0x230   : > { %v1737_v45 = vmul.f32 %v2697_v39, %v1736_v44 }
 0x232   : > { %v1738_v50 = vmul.f32 0.5, %v1737_v45 }
 0x234   : > { %v1739_v52 = vsub.f32 1.5, %v1738_v50 }
 0x235   : > { %v2699_v53 = vpop.eup %2698 }
 0x236   : > { %v1740_v48 = vmul.f32 %v2697_v39, %v1739_v52  ;;  %v1746_v63 = vmul.f32 %v2699_v53, %v1734_v40  ;;  %vm1752_vm11 = vweird.f32 %v2699_v53 }
 0x237   : > { %vm1753_vm13 = vmor %vm1751_vm12, %vm1752_vm11 }
 0x238   : > { %v1744_v9 = vsel %vm1743_vm10, %v2697_v39, %v1740_v48  ;;  %v1747_v10 = vmul.f32 %v2699_v53, %v1746_v63 }
 0x239   : > { %v1755_v33 = vmul.f32 %v1744_v9, %v1727_v2  ;;  %v1756_v11 = vmul.f32 %v1744_v9, %v1728_v3  ;;  %v1757_v12 = vmul.f32 %v1744_v9, %v1729_v4 }
 0x23a   : > { %v1748_v13 = vmul.f32 0.5, %v1747_v10 }
 0x23b   : > { %v1768_v51 = vmul.f32 %v1762_v55, %v1755_v33  ;;  %v1769_v20 = vmul.f32 %v1763_v0, %v1756_v11  ;;  %v1770_v36 = vmul.f32 %v1764_v28, %v1757_v12 }
 0x23c   : > { %v1749_v8 = vsub.f32 1.5, %v1748_v13 }
 0x23d   : > { %v1781_v38 = vadd.f32 %v1775_v5, %v1768_v51  ;;  %v1782_v29 = vadd.f32 %v1776_v6, %v1769_v20  ;;  %v1783_v14 = vadd.f32 %v1777_v30, %v1770_v36 }
 0x23e   : > { %v1750_v34 = vmul.f32 %v2699_v53, %v1749_v8 }
 0x23f   : > { %1787 = vst [vmem:[%s297_s23] sm:$0xff] %v1781_v38 }
 0x240   : > { %1788 = vst [vmem:[%s297_s23 + $0x8] sm:$0xff] %v1782_v29  ;;  %v1754_v17 = vsel %vm1753_vm13, %v2699_v53, %v1750_v34 }
 0x241   : > { %1789 = vst [vmem:[%s297_s23 + $0x10] sm:$0xff] %v1783_v14  ;;  %v1758_v56 = vmul.f32 %v1754_v17, %v1730_v15  ;;  %v1759_v7 = vmul.f32 %v1754_v17, %v1731_v35  ;;  %v1760_v18 = vmul.f32 %v1754_v17, %v1732_v58 }
 0x243   : > { %v1771_v19 = vmul.f32 %v1762_v55, %v1758_v56  ;;  %v1772_v21 = vmul.f32 %v1763_v0, %v1759_v7  ;;  %v1773_v22 = vmul.f32 %v1764_v28, %v1760_v18 }
 0x245   : > { %v1784_v23 = vadd.f32 %v1775_v5, %v1771_v19  ;;  %v1785_v41 = vadd.f32 %v1776_v6, %v1772_v21  ;;  %v1786_v24 = vadd.f32 %v1777_v30, %v1773_v22 }
 0x247   : > { %1790 = vst [vmem:[%s297_s23 + $0x18] sm:$0xff] %v1784_v23 }
 0x248   : > { %1791 = vst [vmem:[%s297_s23 + $0x20] sm:$0xff] %v1785_v41 }
 0x249   : > { %1792 = vst [vmem:[%s297_s23 + $0x28] sm:$0xff] %v1786_v24 }
 0x24a PF: > { %p2651_p4 = scmp.ge.s32.totalorder %s2762_s27, 2  ;;  %s1834_s13 = sand.u32 1, %s2750_s24  }
 0x24b   : > { %s1835_s29 = scalar_lea.sflag [#allocation3], %s1834_s13 }
 0x24c   : > { %p2648_p5 = pnand %p2651_p4, %p2850_p6 }
 0x24e   : > { %p2649_p7 = pneg %p2648_p5 }
 0x250   : > { %2745 = dma.done.wait (%p2649_p7), %s1835_s29, 768  }
 0x251   : > { %2747 = vsyncadd (%p2649_p7), %s1835_s29, 4294966528  ;;  %p18_p8 = scmp.ge.s32.totalorder %s2833_s30, 4   ;;  %s4013_s24 = smov %s2754_s25 }
 0x252   : > { %s4014_s25 = smov %s2758_s26  ;;  %s4015_s26 = smov %s2844_s10 }
 0x253   : > { %s4016_s27 = smov %s2833_s30  ;;  %20 = sbr.rel (!%p18_p8) target bundleno = 5 (0x5), region = 91 }
 0x258   :  { %1850 = vsyncpa [#allocation3], 1 }
 0x259   :  { %1852 = vsyncpa [#allocation3 + $0x1], 1 }

// kernel: swin_mil_forward.7
= control target key start
LH: loop header
LB: loop body
LE: loop exit
PB: predicated region body
PF: predicated region fallthrough
CT: control target
= control target key end

     0   :  { %s6698_s24 = smov 0   ;;  %s6700_s25 = smov 0   ;;  %s8086_s0 = inlined_call_operand.vmem [shape: bf16[2,16,1536], index: 0, kind: input, shape index: {}]   ;;  %s8087_s1 = inlined_call_operand.vmem [shape: bf16[2,8,1536], index: 1, kind: input, shape index: {}]   ;;  %s8088_s2 = inlined_call_operand.vmem [shape: bf16[2,4,1536], index: 2, kind: input, shape index: {}]   ;;  %s8089_s3 = inlined_call_operand.vmem [shape: bf16[3,1536,128], index: 3, kind: input, shape index: {}]   ;;  %s8090_s4 = inlined_call_operand.vmem [shape: f32[3,64,16], index: 4, kind: input, shape index: {}]   ;;  %s8091_s5 = inlined_call_operand.vmem [shape: f32[3,1,128], index: 5, kind: input, shape index: {}]   ;;  %s8092_s6 = inlined_call_operand.vmem [shape: bf16[3,2,64,128], index: 6, kind: output, shape index: {0}]   ;;  %s8093_s7 = inlined_call_operand.vmem [shape: f32[2,64,128], index: 7, kind: output, shape index: {1}]  }
   0x1   :  { %s6702_s26 = smov 0   ;;  %s6704_s27 = smov 0  }
   0x2   :  { %s6706_s28 = smov 0  }
   0x3 LB: > { %s4418_s29 = sadd.s32 4294967295, %s6656_s28   ;;  %s30_s30 = sadd.s32 1, %s6652_s27  ;;  %s6656_s28 = sphi %s6706_s28, %s18_s28   ;;  %s6652_s27 = sphi %s6704_s27, %s8108_s27   ;;  %s6648_s26 = sphi %s6702_s26, %s8107_s26   ;;  %s6644_s25 = sphi %s6700_s25, %s8106_s25   ;;  %s6640_s24 = sphi %s6698_s24, %s8105_s24  }
   0x4   : > { %p32_p0 = scmp.ge.s32.totalorder %s30_s30, 2  ;;  %s190_s8 = sadd.s32 1, %s6644_s25 }
   0x5   : > { %p200_p1 = scmp.ne.s32.totalorder %s6644_s25, %s6640_s24  ;;  %p201_p2 = scmp.eq.s32.totalorder %s4418_s29, 1 }
   0x6   : > { %s8110_s30 = smov (%p32_p0, %s30_s30), 0  ;;  %p4424_p4 = scmp.ge.s32.totalorder %s6656_s28, 1 }
   0x7   : > { %p6730_p3 = por %p201_p2, %p200_p1  ;;  %s185_s10 = ssub.s32 %s6652_s27, %s8110_s30 }
   0x8   : > { %p293_p5 = scmp.lt.s32.totalorder %s6656_s28, 3  ;;  %p188_p6 = scmp.eq.s32.totalorder %s185_s10, 0 }
   0xa   : > { %p294_p7 = pnand %p4424_p4, %p293_p5 }
   0xb   : > { %s6739_s11 = scalar_select %p188_p6, %s6644_s25, %s190_s8  }
   0xc   : > { %297 = sbr.rel (%p294_p7) target bundleno = 937 (0x3a9), region = 44  ;;  %p349_p8 = scmp.lt.s32.totalorder (!%p294_p7), %s6648_s26, 1 }
   0xd   : > { %s336_s18 = sand.u32 (!%p294_p7), 1, %s6640_s24  }
   0xe   : > { %s7463_s29 = smul.u32 (!%p294_p7), 96, %s336_s18 }
  0x10   : > { %s7499_s17 = scalar_lea.vmem (!%p294_p7), [#allocation2], %s7463_s29 }
  0x11   : > { %v6121_v0 = vld [vmem:[%s8089_s3 + $0x38] sm:$0xff]  ;;  %v6120_v2 = vld [vmem:[%s8089_s3 + $0x30] sm:$0xff]  ;;  %v6119_v6 = vld [vmem:[%s8089_s3 + $0x28] sm:$0xff]  ;;  %s6791_s14 = scalar_select %p349_p8, %s6648_s26, 1  ;;  %vm1399_vm0 = vcmask 130048  }
  0x12   : > { %v6129_v1 = vld [vmem:[%s8089_s3 + $0x78] sm:$0xff]  ;;  %1219 = vmatpush.bf16.msra.mxu2 %v6121_v0  ;;  %v6128_v3 = vld [vmem:[%s8089_s3 + $0x70] sm:$0xff]  ;;  %v6127_v7 = vld [vmem:[%s8089_s3 + $0x68] sm:$0xff] }
  0x13   : > { %1233 = vmatpush.bf16.msra.mxu1 %v6129_v1  ;;  %v6145_v4 = vld [vmem:[%s8089_s3 + $0xf8] sm:$0xff]  ;;  %v6144_v5 = vld [vmem:[%s8089_s3 + $0xf0] sm:$0xff]  ;;  %v6143_v9 = vld [vmem:[%s8089_s3 + $0xe8] sm:$0xff]  ;;  %s6476_s23 = smul.u32 96, %s6791_s14  ;;  %s6101_s24 = sshll.u32 %s6791_s14, 6 }
  0x14   : > { %1261 = vmatpush.bf16.msra.mxu3 %v6145_v4  ;;  %v6153_v8 = vld [vmem:[%s8089_s3 + $0x138] sm:$0xff]  ;;  %v6118_v10 = vld [vmem:[%s8089_s3 + $0x20] sm:$0xff]  ;;  %v6152_v12 = vld [vmem:[%s8089_s3 + $0x130] sm:$0xff]  ;;  %s6477_s12 = smul.u32 48, %s6791_s14 }
  0x15   : > { %1275 = vmatpush.bf16.msra.mxu0 %v6153_v8  ;;  %v6126_v11 = vld [vmem:[%s8089_s3 + $0x60] sm:$0xff]  ;;  %v6117_v14 = vld [vmem:[%s8089_s3 + $0x18] sm:$0xff]  ;;  %v6151_v16 = vld [vmem:[%s8089_s3 + $0x128] sm:$0xff]  ;;  %s6821_s20 = scalar_lea.vmem %s8086_s0, %s6476_s23  ;;  %s6478_s18 = smul.u32 24, %s6791_s14 }
  0x16   : > { %1220 = vmatpush.bf16.msra.mxu2 %v6120_v2  ;;  %v6142_v13 = vld [vmem:[%s8089_s3 + $0xe0] sm:$0xff]  ;;  %v6125_v15 = vld [vmem:[%s8089_s3 + $0x58] sm:$0xff]  ;;  %v6116_v18 = vld [vmem:[%s8089_s3 + $0x10] sm:$0xff]  ;;  %s7169_s21 = scalar_lea.vmem %s8087_s1, %s6477_s12  ;;  %s6402_s14 = sshll.u32 (%p6730_p3), %s6648_s26, 5 }
  0x17   : > { %1234 = vmatpush.bf16.msra.mxu1 %v6128_v3  ;;  %v6141_v17 = vld [vmem:[%s8089_s3 + $0xd8] sm:$0xff]  ;;  %v6124_v19 = vld [vmem:[%s8089_s3 + $0x50] sm:$0xff]  ;;  %v6150_v20 = vld [vmem:[%s8089_s3 + $0x120] sm:$0xff]  ;;  %s4133_s10 = scalar_lea.vmem (%p6730_p3), %s8092_s6, %s6402_s14 }
  0x18   : > { %1262 = vmatpush.bf16.msra.mxu3 %v6144_v5  ;;  %v6140_v21 = vld [vmem:[%s8089_s3 + $0xd0] sm:$0xff]  ;;  %v6115_v22 = vld [vmem:[%s8089_s3 + $0x8] sm:$0xff]  ;;  %v6149_v24 = vld [vmem:[%s8089_s3 + $0x118] sm:$0xff] }
  0x19   : > { %1276 = vmatpush.bf16.msra.mxu0 %v6152_v12  ;;  %v6123_v23 = vld [vmem:[%s8089_s3 + $0x48] sm:$0xff]  ;;  %v6114_v25 = vld [vmem:[%s8089_s3] sm:$0xff]  ;;  %v6137_v26 = vld [vmem:[%s8089_s3 + $0xb8] sm:$0xff] }
  0x1a   : > { %1221 = vmatpush.bf16.msra.mxu2 %v6119_v6  ;;  %v6139_v27 = vld [vmem:[%s8089_s3 + $0xc8] sm:$0xff]  ;;  %v6122_v28 = vld [vmem:[%s8089_s3 + $0x40] sm:$0xff]  ;;  %v6108_v30 = vld [vmem:[%s6821_s20 + $0x2c] sm:$0xf0] }
  0x1b   : > { %1235 = vmatpush.bf16.msra.mxu1 %v6127_v7  ;;  %v4432_v29 = vld [vmem:[%s6821_s20] sm:$0xf]  ;;  %v6102_v31 = vld [vmem:[%s6821_s20 + $0x4] sm:$0xf]  ;;  %v4434_v32 = vld [vmem:[%s6821_s20 + $0x30] sm:$0xf0] }
  0x1c   : > { %1263 = vmatpush.bf16.msra.mxu3 %v6143_v9  ;;  %v6148_v33 = vld [vmem:[%s8089_s3 + $0x110] sm:$0xff]  ;;  %v6161_v34 = vld [vmem:[%s8089_s3 + $0x178] sm:$0xff]  ;;  %v4433_v35 = vor.u32 %v6108_v30, %v4432_v29  ;;  %v6138_v36 = vld [vmem:[%s8089_s3 + $0xc0] sm:$0xff]  ;;  %v4437_v40 = vor.u32 %v6102_v31, %v4434_v32 }
  0x1d   : > { %1277 = vmatpush.bf16.msra.mxu0 %v6151_v16  ;;  %v6103_v37 = vld [vmem:[%s6821_s20 + $0xc] sm:$0xf]  ;;  %v4442_v38 = vld [vmem:[%s6821_s20 + $0x38] sm:$0xf0]  ;;  %v6136_v41 = vld [vmem:[%s8089_s3 + $0xb0] sm:$0xff] }
  0x1e   : > { %1222 = vmatpush.bf16.msra.mxu2 %v6118_v10  ;;  %v6177_v39 = vld [vmem:[%s8089_s3 + $0x1f8] sm:$0xff]  ;;  %v6147_v42 = vld [vmem:[%s8089_s3 + $0x108] sm:$0xff]  ;;  %v6160_v43 = vld [vmem:[%s8089_s3 + $0x170] sm:$0xff]  ;;  %v4445_v44 = vor.u32 %v6103_v37, %v4442_v38 }
  0x1f   : > { %1236 = vmatpush.bf16.msra.mxu1 %v6126_v11  ;;  %v6176_v45 = vld [vmem:[%s8089_s3 + $0x1f0] sm:$0xff]  ;;  %v6135_v46 = vld [vmem:[%s8089_s3 + $0xa8] sm:$0xff]  ;;  %v6146_v47 = vld [vmem:[%s8089_s3 + $0x100] sm:$0xff] }
  0x20   : > { %1264 = vmatpush.bf16.msra.mxu3 %v6142_v13  ;;  %v6159_v48 = vld [vmem:[%s8089_s3 + $0x168] sm:$0xff]  ;;  %v6185_v49 = vld [vmem:[%s8089_s3 + $0x238] sm:$0xff]  ;;  %v4448_v50 = vld [vmem:[%s6821_s20 + $0x10] sm:$0xf] }
  0x21   : > { %1278 = vmatpush.bf16.msra.mxu0 %v6150_v20  ;;  %v6110_v51 = vld [vmem:[%s6821_s20 + $0x3c] sm:$0xf0]  ;;  %v6175_v52 = vld [vmem:[%s8089_s3 + $0x1e8] sm:$0xff]  ;;  %v6184_v56 = vld [vmem:[%s8089_s3 + $0x230] sm:$0xff] }
  0x22   : > { %1223 = vmatpush.bf16.msra.mxu2 %v6117_v14  ;;  %v4449_v53 = vor.u32 %v6110_v51, %v4448_v50  ;;  %v6134_v54 = vld [vmem:[%s8089_s3 + $0xa0] sm:$0xff]  ;;  %v6133_v58 = vld [vmem:[%s8089_s3 + $0x98] sm:$0xff]  ;;  %v6183_v60 = vld [vmem:[%s8089_s3 + $0x228] sm:$0xff] }
  0x23   : > { %1237 = vmatpush.bf16.msra.mxu1 %v6125_v15  ;;  %v6158_v55 = vld [vmem:[%s8089_s3 + $0x160] sm:$0xff]  ;;  %v6157_v59 = vld [vmem:[%s8089_s3 + $0x158] sm:$0xff]  ;;  %v6132_v62 = vld [vmem:[%s8089_s3 + $0x90] sm:$0xff] }
  0x24   : > { %1265 = vmatpush.bf16.msra.mxu3 %v6141_v17  ;;  %v6174_v57 = vld [vmem:[%s8089_s3 + $0x1e0] sm:$0xff]  ;;  %v6173_v61 = vld [vmem:[%s8089_s3 + $0x1d8] sm:$0xff]  ;;  %v6156_v63 = vld [vmem:[%s8089_s3 + $0x150] sm:$0xff] }
  0x25   : > { %1279 = vmatpush.bf16.msra.mxu0 %v6149_v24  ;;  %v6182_v0 = vld [vmem:[%s8089_s3 + $0x220] sm:$0xff]  ;;  %v6172_v1 = vld [vmem:[%s8089_s3 + $0x1d0] sm:$0xff]  ;;  %v6131_v2 = vld [vmem:[%s8089_s3 + $0x88] sm:$0xff] }
  0x26   : > { %1224 = vmatpush.bf16.msra.mxu2 %v6116_v18  ;;  %v6155_v3 = vld [vmem:[%s8089_s3 + $0x148] sm:$0xff]  ;;  %v6181_v4 = vld [vmem:[%s8089_s3 + $0x218] sm:$0xff]  ;;  %v6130_v5 = vld [vmem:[%s8089_s3 + $0x80] sm:$0xff] }
  0x27   : > { %1238 = vmatpush.bf16.msra.mxu1 %v6124_v19  ;;  %v6171_v6 = vld [vmem:[%s8089_s3 + $0x1c8] sm:$0xff]  ;;  %v6169_v7 = vld [vmem:[%s8089_s3 + $0x1b8] sm:$0xff]  ;;  %v6154_v10 = vld [vmem:[%s8089_s3 + $0x140] sm:$0xff] }
  0x28   : > { %1266 = vmatpush.bf16.msra.mxu3 %v6140_v21  ;;  %v4440_v8 = vld [vmem:[%s6821_s20 + $0x8] sm:$0xf]  ;;  %v6109_v9 = vld [vmem:[%s6821_s20 + $0x34] sm:$0xf0]  ;;  %v6104_v11 = vld [vmem:[%s6821_s20 + $0x14] sm:$0xf] }
  0x29   : > { %1280 = vmatpush.bf16.msra.mxu0 %v6148_v33  ;;  %v4450_v12 = vld [vmem:[%s6821_s20 + $0x40] sm:$0xf0]  ;;  %v6193_v13 = vld [vmem:[%s8089_s3 + $0x278] sm:$0xff]  ;;  %v6180_v14 = vld [vmem:[%s8089_s3 + $0x210] sm:$0xff]  ;;  %v4441_v15 = vor.u32 %v6109_v9, %v4440_v8 }
  0x2a   : > { %1225 = vmatpush.bf16.msra.mxu2 %v6115_v22  ;;  %v6170_v16 = vld [vmem:[%s8089_s3 + $0x1c0] sm:$0xff]  ;;  %v6105_v17 = vld [vmem:[%s6821_s20 + $0x1c] sm:$0xf]  ;;  %v4458_v18 = vld [vmem:[%s6821_s20 + $0x48] sm:$0xf0]  ;;  %v4453_v19 = vor.u32 %v6104_v11, %v4450_v12 }
  0x2b   : > { %1239 = vmatpush.bf16.msra.mxu1 %v6123_v23  ;;  %v6209_v20 = vld [vmem:[%s8089_s3 + $0x2f8] sm:$0xff]  ;;  %v6168_v21 = vld [vmem:[%s8089_s3 + $0x1b0] sm:$0xff]  ;;  %v4461_v23 = vor.u32 %v6105_v17, %v4458_v18  ;;  %v6179_v24 = vld [vmem:[%s8089_s3 + $0x208] sm:$0xff] }
  0x2c   : > { %1267 = vmatpush.bf16.msra.mxu3 %v6139_v27  ;;  %v6192_v22 = vld [vmem:[%s8089_s3 + $0x270] sm:$0xff]  ;;  %v6191_v27 = vld [vmem:[%s8089_s3 + $0x268] sm:$0xff]  ;;  %v4464_v29 = vld [vmem:[%s6821_s20 + $0x20] sm:$0xf] }
  0x2d   : > { %1281 = vmatpush.bf16.msra.mxu0 %v6147_v42  ;;  %v6112_v30 = vld [vmem:[%s6821_s20 + $0x4c] sm:$0xf0]  ;;  %v6207_v31 = vld [vmem:[%s8089_s3 + $0x2e8] sm:$0xff]  ;;  %v6166_v32 = vld [vmem:[%s8089_s3 + $0x1a0] sm:$0xff] }
  0x2e   : > { %1226 = vmatpush.bf16.msra.mxu2 %v6114_v25  ;;  %v6208_v25 = vld [vmem:[%s8089_s3 + $0x2f0] sm:$0xff]  ;;  %v6190_v33 = vld [vmem:[%s8089_s3 + $0x260] sm:$0xff]  ;;  %v6189_v37 = vld [vmem:[%s8089_s3 + $0x258] sm:$0xff] }
  0x2f   : > { %1240 = vmatpush.bf16.msra.mxu1 %v6122_v28  ;;  %v6178_v28 = vld [vmem:[%s8089_s3 + $0x200] sm:$0xff]  ;;  %v6205_v38 = vld [vmem:[%s8089_s3 + $0x2d8] sm:$0xff]  ;;  %v6163_v42 = vld [vmem:[%s8089_s3 + $0x188] sm:$0xff] }
  0x30   : > { %1268 = vmatpush.bf16.msra.mxu3 %v6138_v36  ;;  %v6165_v36 = vld [vmem:[%s8089_s3 + $0x198] sm:$0xff]  ;;  %v6106_v50 = vld [vmem:[%s6821_s20 + $0x24] sm:$0xf]  ;;  %v4466_v51 = vld [vmem:[%s6821_s20 + $0x50] sm:$0xf0] }
  0x31   : > { %1227 = vmatmul.bf16.vlgmr.msra.gmra.mxu2 %v4433_v35  ;;  %1282 = vmatpush.bf16.msra.mxu0 %v6146_v47  ;;  %v6206_v35 = vld [vmem:[%s8089_s3 + $0x2e0] sm:$0xff]  ;;  %v4456_v47 = vld [vmem:[%s6821_s20 + $0x18] sm:$0xf]  ;;  %v6215_v8 = vld [vmem:[%s8089_s3 + $0x328] sm:$0xff] }
  0x32   : > { %1247 = vmatpush.bf16.msrb.mxu2 %v6137_v26  ;;  %1241 = vmatmul.bf16.vlgmr.msra.gmra.mxu1 %v4437_v40  ;;  %v6167_v26 = vld [vmem:[%s8089_s3 + $0x1a8] sm:$0xff]  ;;  %v6188_v40 = vld [vmem:[%s8089_s3 + $0x250] sm:$0xff]  ;;  %v6233_v9 = vld [vmem:[%s8089_s3 + $0x3b8] sm:$0xff] }
  0x33   : > { %1289 = vmatpush.bf16.msrb.mxu1 %v6161_v34  ;;  %1269 = vmatmul.bf16.vlgmr.msra.gmra.mxu3 %v4445_v44  ;;  %v4465_v34 = vor.u32 %v6112_v30, %v4464_v29  ;;  %v6162_v44 = vld [vmem:[%s8089_s3 + $0x180] sm:$0xff]  ;;  %v6232_v12 = vld [vmem:[%s8089_s3 + $0x3b0] sm:$0xff]  ;;  %v6241_v30 = vld [vmem:[%s8089_s3 + $0x3f8] sm:$0xff] }
  0x34   : > { %1317 = vmatpush.bf16.msrb.mxu3 %v6177_v39  ;;  %1283 = vmatmul.bf16.vlgmr.msra.gmra.mxu0 %v4449_v53  ;;  %v6164_v39 = vld [vmem:[%s8089_s3 + $0x190] sm:$0xff]  ;;  %v6202_v53 = vld [vmem:[%s8089_s3 + $0x2c0] sm:$0xff] }
  0x35   : > { %1331 = vmatpush.bf16.msrb.mxu0 %v6185_v49  ;;  %v6186_v49 = vld [vmem:[%s8089_s3 + $0x240] sm:$0xff]  ;;  %v6228_v29 = vld [vmem:[%s8089_s3 + $0x390] sm:$0xff] }
  0x36   : > { %1248 = vmatpush.bf16.msrb.mxu2 %v6136_v41  ;;  %v6204_v41 = vld [vmem:[%s8089_s3 + $0x2d0] sm:$0xff]  ;;  %v6214_v11 = vld [vmem:[%s8089_s3 + $0x320] sm:$0xff] }
  0x37   : > { %1290 = vmatpush.bf16.msrb.mxu1 %v6160_v43  ;;  %v6187_v43 = vld [vmem:[%s8089_s3 + $0x248] sm:$0xff]  ;;  %v6222_v17 = vld [vmem:[%s8089_s3 + $0x360] sm:$0xff] }
  0x38   : > { %1318 = vmatpush.bf16.msrb.mxu3 %v6176_v45  ;;  %v6203_v45 = vld [vmem:[%s8089_s3 + $0x2c8] sm:$0xff] }
  0x39   : > { %1332 = vmatpush.bf16.msrb.mxu0 %v6184_v56  ;;  %v4469_v56 = vor.u32 %v6106_v50, %v4466_v51  ;;  %v6247_v51 = vld [vmem:[%s8089_s3 + $0x428] sm:$0xff] }
  0x3a   : > { %1249 = vmatpush.bf16.msrb.mxu2 %v6135_v46  ;;  %v6201_v46 = vld [vmem:[%s8089_s3 + $0x2b8] sm:$0xff] }
  0x3b   : > { %1291 = vmatpush.bf16.msrb.mxu1 %v6159_v48  ;;  %v6111_v48 = vld [vmem:[%s6821_s20 + $0x44] sm:$0xf0] }
  0x3c   : > { %1319 = vmatpush.bf16.msrb.mxu3 %v6175_v52  ;;  %v4457_v52 = vor.u32 %v6111_v48, %v4456_v47  ;;  %v6256_v47 = vld [vmem:[%s8089_s3 + $0x470] sm:$0xff] }
  0x3d   : > { %1333 = vmatpush.bf16.msrb.mxu0 %v6183_v60  ;;  %v6198_v60 = vld [vmem:[%s8089_s3 + $0x2a0] sm:$0xff] }
  0x3e   : > { %1250 = vmatpush.bf16.msrb.mxu2 %v6134_v54  ;;  %v6107_v54 = vld [vmem:[%s6821_s20 + $0x2c] sm:$0xf] }
  0x3f   : > { %1292 = vmatpush.bf16.msrb.mxu1 %v6158_v55  ;;  %v4474_v55 = vld [vmem:[%s6821_s20 + $0x58] sm:$0xf0] }
  0x40   : > { %1320 = vmatpush.bf16.msrb.mxu3 %v6174_v57  ;;  %v6200_v57 = vld [vmem:[%s8089_s3 + $0x2b0] sm:$0xff] }
  0x41   : > { %1334 = vmatpush.bf16.msrb.mxu0 %v6182_v0  ;;  %v6194_v0 = vld [vmem:[%s8089_s3 + $0x280] sm:$0xff] }
  0x42   : > { %1251 = vmatpush.bf16.msrb.mxu2 %v6133_v58  ;;  %v4477_v58 = vor.u32 %v6107_v54, %v4474_v55  ;;  %v6237_v54 = vld [vmem:[%s8089_s3 + $0x3d8] sm:$0xff]  ;;  %v6255_v55 = vld [vmem:[%s8089_s3 + $0x468] sm:$0xff] }
  0x43   : > { %1293 = vmatpush.bf16.msrb.mxu1 %v6157_v59  ;;  %v6199_v59 = vld [vmem:[%s8089_s3 + $0x2a8] sm:$0xff] }
  0x44   : > { %1321 = vmatpush.bf16.msrb.mxu3 %v6173_v61  ;;  %v6197_v61 = vld [vmem:[%s8089_s3 + $0x298] sm:$0xff] }
  0x45   : > { %1335 = vmatpush.bf16.msrb.mxu0 %v6181_v4  ;;  %v6217_v4 = vld [vmem:[%s8089_s3 + $0x338] sm:$0xff] }
  0x46   : > { %1252 = vmatpush.bf16.msrb.mxu2 %v6132_v62  ;;  %v6196_v62 = vld [vmem:[%s8089_s3 + $0x290] sm:$0xff] }
  0x47   : > { %1294 = vmatpush.bf16.msrb.mxu1 %v6156_v63  ;;  %v6195_v63 = vld [vmem:[%s8089_s3 + $0x288] sm:$0xff] }
  0x48   : > { %1322 = vmatpush.bf16.msrb.mxu3 %v6172_v1  ;;  %v4472_v1 = vld [vmem:[%s6821_s20 + $0x28] sm:$0xf] }
  0x49   : > { %1336 = vmatpush.bf16.msrb.mxu0 %v6180_v14 }
  0x4a   : > { %1253 = vmatpush.bf16.msrb.mxu2 %v6131_v2  ;;  %v6113_v2 = vld [vmem:[%s6821_s20 + $0x54] sm:$0xf0]  ;;  %s7576_s20 = scalar_lea.vmem %s8088_s2, %s6478_s18 }
  0x4b   : > { %1295 = vmatpush.bf16.msrb.mxu1 %v6155_v3  ;;  %v4473_v3 = vor.u32 %v6113_v2, %v4472_v1  ;;  %v7191_v1 = vld [vmem:[%s7169_s21 + $0x8] sm:$0xff] }
  0x4c   : > { %1323 = vmatpush.bf16.msrb.mxu3 %v6171_v6 }
  0x4d   : > { %1337 = vmatpush.bf16.msrb.mxu0 %v6179_v24  ;;  %v6220_v24 = vld [vmem:[%s8089_s3 + $0x350] sm:$0xff] }
  0x4e   : > { %1254 = vmatpush.bf16.msrb.mxu2 %v6130_v5  ;;  %v6216_v5 = vld [vmem:[%s8089_s3 + $0x330] sm:$0xff] }
  0x4f   : > { %1296 = vmatpush.bf16.msrb.mxu1 %v6154_v10  ;;  %v6224_v10 = vld [vmem:[%s8089_s3 + $0x370] sm:$0xff] }
  0x50   : > { %1324 = vmatpush.bf16.msrb.mxu3 %v6170_v16  ;;  %v6231_v16 = vld [vmem:[%s8089_s3 + $0x3a8] sm:$0xff] }
  0x51   : > { %1255 = vmatmul.bf16.vlgmr.msrb.gmra.mxu2 %v4441_v15  ;;  %1338 = vmatpush.bf16.msrb.mxu0 %v6178_v28  ;;  %v6213_v15 = vld [vmem:[%s8089_s3 + $0x318] sm:$0xff]  ;;  %v6210_v28 = vld [vmem:[%s8089_s3 + $0x300] sm:$0xff] }
  0x52   : > { %1303 = vmatpush.bf16.msra.mxu2 %v6169_v7  ;;  %1297 = vmatmul.bf16.vlgmr.msrb.gmra.mxu1 %v4453_v19  ;;  %v6225_v7 = vld [vmem:[%s8089_s3 + $0x378] sm:$0xff]  ;;  %v6212_v19 = vld [vmem:[%s8089_s3 + $0x310] sm:$0xff] }
  0x53   : > { %1345 = vmatpush.bf16.msra.mxu1 %v6193_v13  ;;  %1325 = vmatmul.bf16.vlgmr.msrb.gmra.mxu3 %v4461_v23  ;;  %v6223_v13 = vld [vmem:[%s8089_s3 + $0x368] sm:$0xff]  ;;  %v6229_v23 = vld [vmem:[%s8089_s3 + $0x398] sm:$0xff] }
  0x54   : > { %1373 = vmatpush.bf16.msra.mxu3 %v6209_v20  ;;  %1339 = vmatmul.bf16.vlgmr.msrb.gmra.mxu0 %v4465_v34  ;;  %v6230_v20 = vld [vmem:[%s8089_s3 + $0x3a0] sm:$0xff]  ;;  %v6240_v34 = vld [vmem:[%s8089_s3 + $0x3f0] sm:$0xff] }
  0x56   : > { %1304 = vmatpush.bf16.msra.mxu2 %v6168_v21  ;;  %v6221_v21 = vld [vmem:[%s8089_s3 + $0x358] sm:$0xff] }
  0x57   : > { %1346 = vmatpush.bf16.msra.mxu1 %v6192_v22  ;;  %v6211_v22 = vld [vmem:[%s8089_s3 + $0x308] sm:$0xff] }
  0x58   : > { %1374 = vmatpush.bf16.msra.mxu3 %v6208_v25 }
  0x5a   : > { %1305 = vmatpush.bf16.msra.mxu2 %v6167_v26 }
  0x5b   : > { %1347 = vmatpush.bf16.msra.mxu1 %v6191_v27 }
  0x5c   : > { %1375 = vmatpush.bf16.msra.mxu3 %v6207_v31  ;;  %v6219_v31 = vld [vmem:[%s8089_s3 + $0x348] sm:$0xff] }
  0x5e   : > { %1306 = vmatpush.bf16.msra.mxu2 %v6166_v32  ;;  %v6227_v32 = vld [vmem:[%s8089_s3 + $0x388] sm:$0xff] }
  0x5f   : > { %1348 = vmatpush.bf16.msra.mxu1 %v6190_v33 }
  0x60   : > { %1376 = vmatpush.bf16.msra.mxu3 %v6206_v35  ;;  %v6218_v35 = vld [vmem:[%s8089_s3 + $0x340] sm:$0xff] }
  0x62   : > { %1307 = vmatpush.bf16.msra.mxu2 %v6165_v36  ;;  %v6249_v36 = vld [vmem:[%s8089_s3 + $0x438] sm:$0xff] }
  0x63   : > { %1349 = vmatpush.bf16.msra.mxu1 %v6189_v37 }
  0x64   : > { %1377 = vmatpush.bf16.msra.mxu3 %v6205_v38 }
  0x66   : > { %1308 = vmatpush.bf16.msra.mxu2 %v6164_v39  ;;  %v6226_v39 = vld [vmem:[%s8089_s3 + $0x380] sm:$0xff] }
  0x67   : > { %1350 = vmatpush.bf16.msra.mxu1 %v6188_v40  ;;  %v6239_v40 = vld [vmem:[%s8089_s3 + $0x3e8] sm:$0xff] }
  0x68   : > { %1378 = vmatpush.bf16.msra.mxu3 %v6204_v41  ;;  %v6257_v41 = vld [vmem:[%s8089_s3 + $0x478] sm:$0xff] }
  0x6a   : > { %1309 = vmatpush.bf16.msra.mxu2 %v6163_v42 }
  0x6b   : > { %1351 = vmatpush.bf16.msra.mxu1 %v6187_v43 }
  0x6c   : > { %1379 = vmatpush.bf16.msra.mxu3 %v6203_v45 }
  0x6e   : > { %1310 = vmatpush.bf16.msra.mxu2 %v6162_v44  ;;  %v6248_v44 = vld [vmem:[%s8089_s3 + $0x430] sm:$0xff] }
  0x6f   : > { %1352 = vmatpush.bf16.msra.mxu1 %v6186_v49 }
  0x70   : > { %1380 = vmatpush.bf16.msra.mxu3 %v6202_v53 }
  0x71   : > { %1311 = vmatmul.bf16.vlgmr.msra.gmra.mxu2 %v4457_v52 }
  0x72   : > { %1359 = vmatpush.bf16.msrb.mxu2 %v6201_v46  ;;  %1353 = vmatmul.bf16.vlgmr.msra.gmra.mxu1 %v4469_v56  ;;  %v6238_v46 = vld [vmem:[%s8089_s3 + $0x3e0] sm:$0xff] }
  0x73   : > { %1381 = vmatmul.bf16.vlgmr.msra.gmra.mxu3 %v4477_v58  ;;  %2450 = vmatpush.bf16.msrb.mxu1 %v6217_v4  ;;  %v6246_v56 = vld [vmem:[%s8089_s3 + $0x420] sm:$0xff] }
  0x74   : > { %2476 = vmatpush.bf16.msrb.mxu3 %v6233_v9  ;;  %v6235_v9 = vld [vmem:[%s8089_s3 + $0x3c8] sm:$0xff] }
  0x76   : > { %1360 = vmatpush.bf16.msrb.mxu2 %v6200_v57 }
  0x77   : > { %2451 = vmatpush.bf16.msrb.mxu1 %v6216_v5 }
  0x78   : > { %2477 = vmatpush.bf16.msrb.mxu3 %v6232_v12 }
  0x7a   : > { %1361 = vmatpush.bf16.msrb.mxu2 %v6199_v59  ;;  %v6236_v59 = vld [vmem:[%s8089_s3 + $0x3d0] sm:$0xff] }
  0x7b   : > { %2452 = vmatpush.bf16.msrb.mxu1 %v6215_v8 }
  0x7c   : > { %2478 = vmatpush.bf16.msrb.mxu3 %v6231_v16 }
  0x7e   : > { %1362 = vmatpush.bf16.msrb.mxu2 %v6198_v60  ;;  %v6254_v60 = vld [vmem:[%s8089_s3 + $0x460] sm:$0xff] }
  0x7f   : > { %2453 = vmatpush.bf16.msrb.mxu1 %v6214_v11 }
  0x80   : > { %2479 = vmatpush.bf16.msrb.mxu3 %v6230_v20  ;;  %v6273_v20 = vld [vmem:[%s8089_s3 + $0x4f8] sm:$0xff] }
  0x82   : > { %1363 = vmatpush.bf16.msrb.mxu2 %v6197_v61  ;;  %v1633_v61 = vld [vmem:[%s7169_s21] sm:$0xff] }
  0x83   : > { %2454 = vmatpush.bf16.msrb.mxu1 %v6213_v15  ;;  %v1838_v8 = vunpack.c.l.b16 %v1633_v61 }
  0x84   : > { %2480 = vmatpush.bf16.msrb.mxu3 %v6229_v23  ;;  %v6243_v23 = vld [vmem:[%s8089_s3 + $0x408] sm:$0xff] }
  0x86   : > { %1364 = vmatpush.bf16.msrb.mxu2 %v6196_v62 }
  0x87   : > { %2455 = vmatpush.bf16.msrb.mxu1 %v6212_v19 }
  0x88   : > { %2481 = vmatpush.bf16.msrb.mxu3 %v6228_v29 }
  0x8a   : > { %1365 = vmatpush.bf16.msrb.mxu2 %v6195_v63  ;;  %v1839_v63 = vunpack.c.h.b16 %v1633_v61  ;;  %v6288_v61 = vld [vmem:[%s8089_s3 + $0x570] sm:$0xff] }
  0x8b   : > { %2456 = vmatpush.bf16.msrb.mxu1 %v6211_v22 }
  0x8c   : > { %2482 = vmatpush.bf16.msrb.mxu3 %v6227_v32  ;;  %v1851_v2 = vpack.c.b16 %v1839_v63, %v1839_v63  ;;  %v6250_v32 = vld [vmem:[%s8089_s3 + $0x440] sm:$0xff]  ;;  %v6267_v63 = vld [vmem:[%s8089_s3 + $0x4c8] sm:$0xff] }
  0x8e   : > { %1366 = vmatpush.bf16.msrb.mxu2 %v6194_v0  ;;  %v6245_v0 = vld [vmem:[%s8089_s3 + $0x418] sm:$0xff] }
  0x8f   : > { %2457 = vmatpush.bf16.msrb.mxu1 %v6210_v28 }
  0x90   : > { %2483 = vmatpush.bf16.msrb.mxu3 %v6226_v39 }
  0x91   : > { %1367 = vmatmul.bf16.vlgmr.msrb.gmra.mxu2 %v4473_v3  ;;  %v1840_v3 = vunpack.c.l.b16 %v7191_v1 }
  0x92   : > { %2463 = vmatpush.bf16.msra.mxu2 %v6225_v7 }
  0x93   : > { %2489 = vmatpush.bf16.msra.mxu1 %v6241_v30  ;;  %v1852_v7 = vpack.c.b16 %v1840_v3, %v1840_v3  ;;  %v6272_v30 = vld [vmem:[%s8089_s3 + $0x4f0] sm:$0xff]  ;;  %v6266_v3 = vld [vmem:[%s8089_s3 + $0x4c0] sm:$0xff] }
  0x94   : > { %2515 = vmatpush.bf16.msra.mxu3 %v6257_v41 }
  0x95   : > { %2484 = vmatmul.bf16.vlgmr.msrb.gmra.mxu3 %v1852_v7  ;;  %v6286_v7 = vld [vmem:[%s8089_s3 + $0x560] sm:$0xff] }
  0x96   : > { %2464 = vmatpush.bf16.msra.mxu2 %v6224_v10  ;;  %v6253_v10 = vld [vmem:[%s8089_s3 + $0x458] sm:$0xff] }
  0x97   : > { %2490 = vmatpush.bf16.msra.mxu1 %v6240_v34 }
  0x98   : > { %2516 = vmatpush.bf16.msra.mxu3 %v6256_v47  ;;  %v6270_v47 = vld [vmem:[%s8089_s3 + $0x4e0] sm:$0xff] }
  0x9a   : > { %2465 = vmatpush.bf16.msra.mxu2 %v6223_v13  ;;  %v1850_v13 = vpack.c.b16 %v1838_v8, %v1838_v8  ;;  %v6277_v8 = vld [vmem:[%s8089_s3 + $0x518] sm:$0xff] }
  0x9b   : > { %2491 = vmatpush.bf16.msra.mxu1 %v6239_v40 }
  0x9c   : > { %2517 = vmatpush.bf16.msra.mxu3 %v6255_v55  ;;  %2458 = vmatmul.bf16.vlgmr.msrb.gmra.mxu1 %v1850_v13  ;;  %v1387_v55 = vld [vmem:[%s8090_s4] sm:$0xff]  ;;  %v6276_v13 = vld [vmem:[%s8089_s3 + $0x510] sm:$0xff] }
  0x9e   : > { %2466 = vmatpush.bf16.msra.mxu2 %v6222_v17  ;;  %v6234_v17 = vld [vmem:[%s8089_s3 + $0x3c0] sm:$0xff] }
  0x9f   : > { %2492 = vmatpush.bf16.msra.mxu1 %v6238_v46 }
  0xa0   : > { %2518 = vmatpush.bf16.msra.mxu3 %v6254_v60  ;;  %v6264_v60 = vld [vmem:[%s8089_s3 + $0x4b0] sm:$0xff] }
  0xa2   : > { %2467 = vmatpush.bf16.msra.mxu2 %v6221_v21 }
  0xa3   : > { %2493 = vmatpush.bf16.msra.mxu1 %v6237_v54 }
  0xa4   : > { %2519 = vmatpush.bf16.msra.mxu3 %v6253_v10  ;;  %v1389_v10 = vld [vmem:[%s8090_s4 + $0x10] sm:$0xff] }
  0xa6   : > { %2468 = vmatpush.bf16.msra.mxu2 %v6220_v24 }
  0xa7   : > { %2494 = vmatpush.bf16.msra.mxu1 %v6236_v59  ;;  %v6280_v59 = vld [vmem:[%s8089_s3 + $0x530] sm:$0xff] }
  0xaa   : > { %2469 = vmatpush.bf16.msra.mxu2 %v6219_v31  ;;  %v6242_v31 = vld [vmem:[%s8089_s3 + $0x400] sm:$0xff] }
  0xab   : > { %2495 = vmatpush.bf16.msra.mxu1 %v6235_v9  ;;  %v6304_v9 = vld [vmem:[%s8089_s3 + $0x5f0] sm:$0xff] }
  0xae   : > { %2470 = vmatpush.bf16.msra.mxu2 %v6218_v35  ;;  %v6271_v35 = vld [vmem:[%s8089_s3 + $0x4e8] sm:$0xff] }
  0xaf   : > { %v1242_v18 = vpop.f32.mrf.mxu1  ;;  %2496 = vmatpush.bf16.msra.mxu1 %v6234_v17  ;;  %v6275_v17 = vld [vmem:[%s8089_s3 + $0x508] sm:$0xff] }
  0xb1   : > { %v1284_v33 = vpop.f32.mrf.mxu0  ;;  %2471 = vmatmul.bf16.vlgmr.msra.gmra.mxu2 %v1851_v2  ;;  %v6287_v2 = vld [vmem:[%s8089_s3 + $0x568] sm:$0xff] }
  0xb2   : > { %2502 = vmatpush.bf16.msrb.mxu2 %v6249_v36 }
  0xb3   : > { %2541 = vmatpush.bf16.msrb.mxu1 %v6273_v20  ;;  %v6259_v20 = vld [vmem:[%s8089_s3 + $0x488] sm:$0xff] }
  0xb4   : > { %v7069_v6 = vpop.f32.mrf.mxu2 }
  0xb5   : > { %v1243_v43 = vadd.f32 %v1242_v18, %v7069_v6  ;;  %v6252_v18 = vld [vmem:[%s8089_s3 + $0x450] sm:$0xff] }
  0xb6   : > { %v1270_v26 = vpop.f32.mrf.mxu3  ;;  %2503 = vmatpush.bf16.msrb.mxu2 %v6248_v44  ;;  %2520 = vmatpush.bf16.msra.mxu3 %v6252_v18  ;;  %v6302_v18 = vld [vmem:[%s8089_s3 + $0x5e0] sm:$0xff] }
  0xb7   : > { %v1244_v27 = vpop.f32.mrf.mxu1  ;;  %2542 = vmatpush.bf16.msrb.mxu1 %v6272_v30  ;;  %v6297_v30 = vld [vmem:[%s8089_s3 + $0x5b8] sm:$0xff] }
  0xb9   : > { %v1286_v50 = vpop.f32.mrf.mxu0 }
  0xba   : > { %2504 = vmatpush.bf16.msrb.mxu2 %v6247_v51 }
  0xbb   : > { %2543 = vmatpush.bf16.msrb.mxu1 %v6271_v35  ;;  %v1391_v35 = vld [vmem:[%s8090_s4 + $0x20] sm:$0xff] }
  0xbc   : > { %v1230_v14 = vpop.f32.mrf.mxu2 }
  0xbd   : > { %v1245_v45 = vadd.f32 %v1244_v27, %v1230_v14  ;;  %v6244_v14 = vld [vmem:[%s8089_s3 + $0x410] sm:$0xff]  ;;  %v6251_v27 = vld [vmem:[%s8089_s3 + $0x448] sm:$0xff] }
  0xbe   : > { %v1272_v38 = vpop.f32.mrf.mxu3  ;;  %2505 = vmatpush.bf16.msrb.mxu2 %v6246_v56  ;;  %2521 = vmatpush.bf16.msra.mxu3 %v6251_v27  ;;  %v6265_v56 = vld [vmem:[%s8089_s3 + $0x4b8] sm:$0xff]  ;;  %v6258_v27 = vld [vmem:[%s8089_s3 + $0x480] sm:$0xff] }
  0xbf   : > { %2544 = vmatpush.bf16.msrb.mxu1 %v6270_v47  ;;  %v1393_v47 = vld [vmem:[%s8090_s4 + $0x30] sm:$0xff] }
  0xc2   : > { %2506 = vmatpush.bf16.msrb.mxu2 %v6245_v0  ;;  %2522 = vmatpush.bf16.msra.mxu3 %v6250_v32  ;;  %v1388_v0 = vld [vmem:[%s8090_s4 + $0x8] sm:$0xff] }
  0xc6   : > { %2507 = vmatpush.bf16.msrb.mxu2 %v6244_v14  ;;  %v6303_v14 = vld [vmem:[%s8089_s3 + $0x5e8] sm:$0xff] }
  0xca   : > { %2508 = vmatpush.bf16.msrb.mxu2 %v6243_v23  ;;  %v6283_v23 = vld [vmem:[%s8089_s3 + $0x548] sm:$0xff] }
  0xce   : > { %2509 = vmatpush.bf16.msrb.mxu2 %v6242_v31 }
  0xcf   : > { %v1298_v42 = vpop.f32.mrf.mxu1 }
  0xd1   : > { %v1340_v6 = vpop.f32.mrf.mxu0 }
  0xd4   : > { %v1256_v25 = vpop.f32.mrf.mxu2 }
  0xd5   : > { %v1257_v48 = vadd.f32 %v1256_v25, %v1243_v43 }
  0xd6   : > { %v1326_v53 = vpop.f32.mrf.mxu3 }
  0xd7   : > { %v1271_v57 = vadd.f32 %v1270_v26, %v1257_v48  ;;  %v1300_v62 = vpop.f32.mrf.mxu1 }
  0xd9   : > { %v1285_v4 = vadd.f32 %v1284_v33, %v1271_v57  ;;  %v1342_v26 = vpop.f32.mrf.mxu0  ;;  %v1635_v33 = vld [vmem:[%s7169_s21 + $0x10] sm:$0xff]  ;;  %v6289_v57 = vld [vmem:[%s8089_s3 + $0x578] sm:$0xff] }
  0xda   : > { %v1842_v34 = vunpack.c.l.b16 %v1635_v33  ;;  %v1843_v40 = vunpack.c.h.b16 %v1635_v33  ;;  %2567 = vmatpush.bf16.msrb.mxu3 %v6289_v57  ;;  %v6300_v33 = vld [vmem:[%s8089_s3 + $0x5d0] sm:$0xff] }
  0xdb   : > { %v1299_v15 = vadd.f32 %v1298_v42, %v1285_v4  ;;  %v1841_v42 = vunpack.c.h.b16 %v7191_v1  ;;  %v6263_v1 = vld [vmem:[%s8089_s3 + $0x4a8] sm:$0xff]  ;;  %v6278_v4 = vld [vmem:[%s8089_s3 + $0x520] sm:$0xff] }
  0xdc   : > { %v1258_v37 = vpop.f32.mrf.mxu2  ;;  %v1854_v39 = vpack.c.b16 %v1842_v34, %v1842_v34  ;;  %v1855_v41 = vpack.c.b16 %v1843_v40, %v1843_v40  ;;  %v6295_v40 = vld [vmem:[%s8089_s3 + $0x5a8] sm:$0xff] }
  0xdd   : > { %v1259_v49 = vadd.f32 %v1258_v37, %v1245_v45  ;;  %v1853_v46 = vpack.c.b16 %v1841_v42, %v1841_v42  ;;  %v6298_v42 = vld [vmem:[%s8089_s3 + $0x5c0] sm:$0xff] }
  0xde   : > { %v1328_v12 = vpop.f32.mrf.mxu3  ;;  %2510 = vmatmul.bf16.vlgmr.msrb.gmra.mxu2 %v1854_v39  ;;  %2523 = vmatmul.bf16.vlgmr.msra.gmra.mxu3 %v1855_v41  ;;  %v1638_v39 = vld [vmem:[%s7169_s21 + $0x28] sm:$0xff] }
  0xdf   : > { %v1273_v58 = vadd.f32 %v1272_v38, %v1259_v49  ;;  %2497 = vmatmul.bf16.vlgmr.msra.gmra.mxu1 %v1853_v46  ;;  %2568 = vmatpush.bf16.msrb.mxu3 %v6288_v61  ;;  %v1849_v41 = vunpack.c.h.b16 %v1638_v39  ;;  %v6293_v46 = vld [vmem:[%s8089_s3 + $0x598] sm:$0xff] }
  0xe1   : > { %v1287_v5 = vadd.f32 %v1286_v50, %v1273_v58  ;;  %v6281_v50 = vld [vmem:[%s8089_s3 + $0x538] sm:$0xff]  ;;  %v6268_v58 = vld [vmem:[%s8089_s3 + $0x4d0] sm:$0xff] }
  0xe2   : > { %2554 = vmatpush.bf16.msra.mxu2 %v6281_v50  ;;  %v1394_v50 = vld [vmem:[%s8090_s4 + $0x38] sm:$0xff] }
  0xe3   : > { %v1301_v16 = vadd.f32 %v1300_v62, %v1287_v5  ;;  %v6279_v62 = vld [vmem:[%s8089_s3 + $0x528] sm:$0xff]  ;;  %v6305_v5 = vld [vmem:[%s8089_s3 + $0x5f8] sm:$0xff]  ;;  %2569 = vmatpush.bf16.msrb.mxu3 %v6287_v2  ;;  %v7405_v2 = vld [vmem:[%s8091_s5] ss:$0 sm:$0xff] }
  0xe6   : > { %2555 = vmatpush.bf16.msra.mxu2 %v6280_v59 }
  0xe7   : > { %2570 = vmatpush.bf16.msrb.mxu3 %v6286_v7 }
  0xea   : > { %2556 = vmatpush.bf16.msra.mxu2 %v6279_v62 }
  0xee   : > { %2557 = vmatpush.bf16.msra.mxu2 %v6278_v4 }
  0xef   : > { %v1354_v19 = vpop.f32.mrf.mxu1 }
  0xf2   : > { %2558 = vmatpush.bf16.msra.mxu2 %v6277_v8 }
  0xf4   : > { %v1312_v52 = vpop.f32.mrf.mxu2 }
  0xf5   : > { %v1313_v21 = vadd.f32 %v1312_v52, %v1299_v15  ;;  %v6260_v15 = vld [vmem:[%s8089_s3 + $0x490] sm:$0xff] }
  0xf6   : > { %v1382_v28 = vpop.f32.mrf.mxu3  ;;  %2559 = vmatpush.bf16.msra.mxu2 %v6276_v13 }
  0xf7   : > { %v1327_v24 = vadd.f32 %v1326_v53, %v1313_v21  ;;  %v1356_v38 = vpop.f32.mrf.mxu1  ;;  %v6269_v53 = vld [vmem:[%s8089_s3 + $0x4d8] sm:$0xff] }
  0xf8   : > { %2545 = vmatpush.bf16.msrb.mxu1 %v6269_v53  ;;  %v1636_v21 = vld [vmem:[%s7169_s21 + $0x18] sm:$0xff] }
  0xf9   : > { %v1341_v36 = vadd.f32 %v1340_v6, %v1327_v24  ;;  %v6262_v6 = vld [vmem:[%s8089_s3 + $0x4a0] sm:$0xff] }
  0xfa   : > { %2560 = vmatpush.bf16.msra.mxu2 %v6275_v17  ;;  %v6313_v17 = vld [vmem:[%s8089_s3 + $0x638] sm:$0xff] }
  0xfb   : > { %v1355_v43 = vadd.f32 %v1354_v19, %v1341_v36  ;;  %v1390_v19 = vld [vmem:[%s8090_s4 + $0x18] sm:$0xff]  ;;  %v6296_v36 = vld [vmem:[%s8089_s3 + $0x5b0] sm:$0xff] }
  0xfc   : > { %v1314_v11 = vpop.f32.mrf.mxu2  ;;  %2546 = vmatpush.bf16.msrb.mxu1 %v6268_v58 }
  0xfd   : > { %v1315_v22 = vadd.f32 %v1314_v11, %v1301_v16  ;;  %v6261_v11 = vld [vmem:[%s8089_s3 + $0x498] sm:$0xff]  ;;  %v6284_v16 = vld [vmem:[%s8089_s3 + $0x550] sm:$0xff] }
  0xfe   : > { %v1384_v51 = vpop.f32.mrf.mxu3 }
  0xff   : > { %v1329_v25 = vadd.f32 %v1328_v12, %v1315_v22  ;;  %v6285_v12 = vld [vmem:[%s8089_s3 + $0x558] sm:$0xff]  ;;  %v1845_v22 = vunpack.c.h.b16 %v1636_v21 }
 0x100   : > { %2547 = vmatpush.bf16.msrb.mxu1 %v6267_v63  ;;  %2571 = vmatpush.bf16.msrb.mxu3 %v6285_v12 }
 0x101   : > { %v1343_v37 = vadd.f32 %v1342_v26, %v1329_v25  ;;  %v1857_v24 = vpack.c.b16 %v1845_v22, %v1845_v22  ;;  %v6274_v25 = vld [vmem:[%s8089_s3 + $0x500] sm:$0xff]  ;;  %v6301_v26 = vld [vmem:[%s8089_s3 + $0x5d8] sm:$0xff] }
 0x102   : > { %2561 = vmatpush.bf16.msra.mxu2 %v6274_v25 }
 0x103   : > { %v1357_v44 = vadd.f32 %v1356_v38, %v1343_v37  ;;  %v6299_v38 = vld [vmem:[%s8089_s3 + $0x5c8] sm:$0xff] }
 0x104   : > { %2548 = vmatpush.bf16.msrb.mxu1 %v6266_v3  ;;  %2572 = vmatpush.bf16.msrb.mxu3 %v6284_v16 }
 0x107   : > { %2549 = vmatmul.bf16.vlgmr.msrb.gmra.mxu1 %v1857_v24  ;;  %v6311_v24 = vld [vmem:[%s8089_s3 + $0x628] sm:$0xff] }
 0x108   : > { %2593 = vmatpush.bf16.msra.mxu1 %v6305_v5  ;;  %2573 = vmatpush.bf16.msrb.mxu3 %v6283_v23 }
 0x10c   : > { %2594 = vmatpush.bf16.msra.mxu1 %v6304_v9 }
 0x110   : > { %2595 = vmatpush.bf16.msra.mxu1 %v6303_v14 }
 0x114   : > { %v1368_v29 = vpop.f32.mrf.mxu2  ;;  %2596 = vmatpush.bf16.msra.mxu1 %v6302_v18 }
 0x115   : > { %v1369_v48 = vadd.f32 %v1368_v29, %v1355_v43  ;;  %v1637_v29 = vld [vmem:[%s7169_s21 + $0x20] sm:$0xff]  ;;  %v1392_v43 = vld [vmem:[%s8090_s4 + $0x28] sm:$0xff] }
 0x116   : > { %v1846_v31 = vunpack.c.l.b16 %v1637_v29  ;;  %v1847_v34 = vunpack.c.h.b16 %v1637_v29  ;;  %v6310_v29 = vld [vmem:[%s8089_s3 + $0x620] sm:$0xff] }
 0x117   : > { %v1383_v54 = vadd.f32 %v1382_v28, %v1369_v48  ;;  %v6282_v28 = vld [vmem:[%s8089_s3 + $0x540] sm:$0xff]  ;;  %v6292_v48 = vld [vmem:[%s8089_s3 + $0x590] sm:$0xff] }
 0x118   : > { %2597 = vmatpush.bf16.msra.mxu1 %v6301_v26  ;;  %v1858_v32 = vpack.c.b16 %v1846_v31, %v1846_v31  ;;  %2574 = vmatpush.bf16.msrb.mxu3 %v6282_v28  ;;  %v1859_v37 = vpack.c.b16 %v1847_v34, %v1847_v34  ;;  %v2485_v58 = vpop.f32.mrf.mxu3 }
 0x11a   : > { %2562 = vmatmul.bf16.vlgmr.msra.gmra.mxu2 %v1858_v32 }
 0x11b   : > { %2575 = vmatmul.bf16.vlgmr.msrb.gmra.mxu3 %v1859_v37 }
 0x11c   : > { %v1370_v45 = vpop.f32.mrf.mxu2  ;;  %2598 = vmatpush.bf16.msra.mxu1 %v6300_v33  ;;  %3658 = vmatpush.bf16.msra.mxu3 %v6313_v17 }
 0x11d   : > { %v1371_v49 = vadd.f32 %v1370_v45, %v1357_v44  ;;  %v6294_v44 = vld [vmem:[%s8089_s3 + $0x5a0] sm:$0xff]  ;;  %v1861_v45 = vpack.c.b16 %v1849_v41, %v1849_v41 }
 0x11f   : > { %v1385_v52 = vadd.f32 %v1384_v51, %v1371_v49  ;;  %v6291_v49 = vld [vmem:[%s8089_s3 + $0x588] sm:$0xff]  ;;  %v6290_v51 = vld [vmem:[%s8089_s3 + $0x580] sm:$0xff] }
 0x120   : > { %2599 = vmatpush.bf16.msra.mxu1 %v6299_v38  ;;  %v2487_v61 = vpop.f32.mrf.mxu3 }
 0x121   : > { %1438 = vmatpush.msra.mxu0 %v1385_v52  ;;  %v1844_v52 = vunpack.c.l.b16 %v1636_v21 }
 0x123   : > { %1439 = vmatpush.msra.mxu0 %v1383_v54  ;;  %v1856_v53 = vpack.c.b16 %v1844_v52, %v1844_v52  ;;  %v1848_v54 = vunpack.c.l.b16 %v1638_v39 }
 0x124   : > { %4862 = vmatmul.msk.f32.vlgmr.msra.gmra.mxu0 %vm1399_vm0, %v1387_v55  ;;  %2600 = vmatpush.bf16.msra.mxu1 %v6298_v42 }
 0x125   : > { %2528 = vmatpush.bf16.msrb.mxu0 %v6265_v56  ;;  %v1860_v55 = vpack.c.b16 %v1848_v54, %v1848_v54  ;;  %v2459_v56 = vpop.f32.mrf.mxu1 }
 0x127   : > { %2601 = vmatmul.bf16.vlgmr.msra.gmra.mxu1 %v1861_v45 }
 0x129   : > { %2529 = vmatpush.bf16.msrb.mxu0 %v6264_v60 }
 0x12c   : > { %4863 = vmatmul.msk.f32.gmra.mxu0 %vm1399_vm0, %v1388_v0 }
 0x12d   : > { %2530 = vmatpush.bf16.msrb.mxu0 %v6263_v1  ;;  %v2461_v59 = vpop.f32.mrf.mxu1 }
 0x131   : > { %2531 = vmatpush.bf16.msrb.mxu0 %v6262_v6 }
 0x134   : > { %4864 = vmatmul.msk.f32.gmra.mxu0 %vm1399_vm0, %v1389_v10  ;;  %v2472_v57 = vpop.f32.mrf.mxu2 }
 0x135   : > { %2532 = vmatpush.bf16.msrb.mxu0 %v6261_v11  ;;  %v2473_v62 = vadd.f32 %v2472_v57, %v2459_v56 }
 0x137   : > { %v2486_v63 = vadd.f32 %v2485_v58, %v2473_v62  ;;  %v6307_v58 = vld [vmem:[%s8089_s3 + $0x608] sm:$0xff] }
 0x139   : > { %2533 = vmatpush.bf16.msrb.mxu0 %v6260_v15 }
 0x13c   : > { %4865 = vmatmul.msk.f32.gmra.mxu0 %vm1399_vm0, %v1390_v19  ;;  %v2474_v60 = vpop.f32.mrf.mxu2  ;;  %v6312_v19 = vld [vmem:[%s8089_s3 + $0x630] sm:$0xff] }
 0x13d   : > { %2534 = vmatpush.bf16.msrb.mxu0 %v6259_v20  ;;  %3659 = vmatpush.bf16.msra.mxu3 %v6312_v19 }
 0x141   : > { %2535 = vmatpush.bf16.msrb.mxu0 %v6258_v27  ;;  %3660 = vmatpush.bf16.msra.mxu3 %v6311_v24 }
 0x144   : > { %4866 = vmatmul.msk.f32.gmra.mxu0 %vm1399_vm0, %v1391_v35 }
 0x145   : > { %2580 = vmatpush.bf16.msra.mxu0 %v6297_v30  ;;  %3661 = vmatpush.bf16.msra.mxu3 %v6310_v29 }
 0x149   : > { %2581 = vmatpush.bf16.msra.mxu0 %v6296_v36  ;;  %v6309_v36 = vld [vmem:[%s8089_s3 + $0x618] sm:$0xff] }
 0x14a   : > { %3662 = vmatpush.bf16.msra.mxu3 %v6309_v36 }
 0x14c   : > { %4867 = vmatmul.msk.f32.gmra.mxu0 %vm1399_vm0, %v1392_v43  ;;  %v6308_v43 = vld [vmem:[%s8089_s3 + $0x610] sm:$0xff] }
 0x14d   : > { %2582 = vmatpush.bf16.msra.mxu0 %v6295_v40  ;;  %v6321_v40 = vld [vmem:[%s8089_s3 + $0x678] sm:$0xff] }
 0x14e   : > { %3663 = vmatpush.bf16.msra.mxu3 %v6308_v43 }
 0x151   : > { %2583 = vmatpush.bf16.msra.mxu0 %v6294_v44 }
 0x152   : > { %3664 = vmatpush.bf16.msra.mxu3 %v6307_v58 }
 0x154   : > { %4868 = vmatmul.msk.f32.gmra.mxu0 %vm1399_vm0, %v1393_v47 }
 0x155   : > { %2584 = vmatpush.bf16.msra.mxu0 %v6293_v46 }
 0x159   : > { %2585 = vmatpush.bf16.msra.mxu0 %v6292_v48 }
 0x15c   : > { %4869 = vmatmul.msk.f32.gmra.mxu0 %vm1399_vm0, %v1394_v50  ;;  %v2498_v0 = vpop.f32.mrf.mxu1 }
 0x15d   : > { %2586 = vmatpush.bf16.msra.mxu0 %v6291_v49  ;;  %v2499_v1 = vadd.f32 %v2498_v0, %v2486_v63 }
 0x161   : > { %2587 = vmatpush.bf16.msra.mxu0 %v6290_v51  ;;  %v2511_v3 = vpop.f32.mrf.mxu2  ;;  %v2524_v5 = vpop.f32.mrf.mxu3  ;;  %v6320_v51 = vld [vmem:[%s8089_s3 + $0x670] sm:$0xff] }
 0x162   : > { %v2512_v4 = vadd.f32 %v2511_v3, %v2499_v1  ;;  %v6319_v3 = vld [vmem:[%s8089_s3 + $0x668] sm:$0xff] }
 0x164   : > { %2536 = vmatmul.bf16.vlgmr.msrb.gmra.mxu0 %v1856_v53  ;;  %v7407_v7 = vadd.f32 %v2524_v5, %v2512_v4  ;;  %v2500_v10 = vpop.f32.mrf.mxu1 }
 0x165   : > { %3671 = vmatpush.bf16.msrb.mxu0 %v6321_v40  ;;  %v6306_v10 = vld [vmem:[%s8089_s3 + $0x600] sm:$0xff] }
 0x166   : > { %3665 = vmatpush.bf16.msra.mxu3 %v6306_v10 }
 0x169   : > { %v2513_v11 = vpop.f32.mrf.mxu2  ;;  %v2526_v12 = vpop.f32.mrf.mxu3  ;;  %3672 = vmatpush.bf16.msrb.mxu0 %v6320_v51  ;;  %v6334_v51 = vld [vmem:[%s8089_s3 + $0x6e0] sm:$0xff] }
 0x16a   : > { %v6337_v12 = vld [vmem:[%s8089_s3 + $0x6f8] sm:$0xff] }
 0x16b   : > { %3697 = vmatpush.bf16.msrb.mxu3 %v6337_v12 }
 0x16d   : > { %3673 = vmatpush.bf16.msrb.mxu0 %v6319_v3  ;;  %v6325_v3 = vld [vmem:[%s8089_s3 + $0x698] sm:$0xff] }
 0x174   : > { %2588 = vmatmul.bf16.vlgmr.msra.gmra.mxu0 %v1860_v55 }
 0x184   : > { %v7433_v35 = vpop.f32.mrf.mxu1 }
 0x18c   : > { %v2552_v57 = vpop.f32.mrf.mxu1 }
 0x19d   : > { %v7478_v1 = vpop.f32.mrf.mxu2 }
 0x1a1   : > { %v1441_v6 = vpop.f32.mrf.mxu0 }
 0x1a2   : > { %v1442_v8 = vadd.f32 %v7405_v2, %v1441_v6 }
 0x1a4   : > { %v4870_v9 = vmul.f32 -1.442695, %v1442_v8 }
 0x1a5   : > { %v2565_v24 = vpop.f32.mrf.mxu2 }
 0x1a6   : > { %6522 = vpow2.f32 %v4870_v9  ;;  %v7490_v9 = vpop.f32.mrf.mxu3 }
 0x1a9   : > { %v1444_v13 = vpop.f32.mrf.mxu0 }
 0x1aa   : > { %v1445_v14 = vadd.f32 %v7405_v2, %v1444_v13 }
 0x1ac   : > { %v6523_v15 = vpop.eup %6522  ;;  %v4871_v16 = vmul.f32 -1.442695, %v1445_v14  ;;  %v6318_v14 = vld [vmem:[%s8089_s3 + $0x660] sm:$0xff] }
 0x1ad   : > { %v7414_v18 = vadd.f32 1.0, %v6523_v15  ;;  %3674 = vmatpush.bf16.msrb.mxu0 %v6318_v14 }
 0x1ae   : > { %6524 = vpow2.f32 %v4871_v16 }
 0x1af   : > { %6526 = vrcp.f32 %v7414_v18  ;;  %vm1502_vm2 = vweird.f32 %v7414_v18  ;;  %v1506_v44 = vand.u32 2147483647, %v7414_v18  ;;  %v1508_v45 = vand.u32 2147483648, %v7414_v18 }
 0x1b1   : > { %v1447_v20 = vpop.f32.mrf.mxu0  ;;  %vm1507_vm6 = vcmp.eq.f32.partialorder %v1506_v44, 8.507059e+37  ;;  %v1509_v60 = vor.u32 1.1754944e-38, %v1508_v45 }
 0x1b2   : > { %v1448_v21 = vadd.f32 %v7405_v2, %v1447_v20 }
 0x1b4   : > { %v6525_v22 = vpop.eup %6524  ;;  %v4872_v23 = vmul.f32 -1.442695, %v1448_v21  ;;  %v6329_v21 = vld [vmem:[%s8089_s3 + $0x6b8] sm:$0xff] }
 0x1b5   : > { %v7424_v25 = vpop.eup %6526  ;;  %v1490_v26 = vadd.f32 1.0, %v6525_v22  ;;  %v6336_v22 = vld [vmem:[%s8089_s3 + $0x6f0] sm:$0xff]  ;;  %3684 = vmatpush.bf16.msrb.mxu1 %v6329_v21  ;;  %v6331_v21 = vld [vmem:[%s8089_s3 + $0x6c8] sm:$0xff] }
 0x1b6   : > { %v1498_v27 = vmul.f32 %v7424_v25, %v7414_v18  ;;  %6528 = vpow2.f32 %v4872_v23  ;;  %vm1503_vm1 = vweird.f32 %v7424_v25  ;;  %v7507_v18 = vpop.f32.mrf.mxu1  ;;  %3698 = vmatpush.bf16.msrb.mxu3 %v6336_v22 }
 0x1b7   : > { %6530 = vrcp.f32 %v1490_v26  ;;  %v1523_v46 = vand.u32 2147483648, %v1490_v26  ;;  %v1521_v49 = vand.u32 2147483647, %v1490_v26  ;;  %vm7459_vm4 = vmor %vm1502_vm2, %vm1503_vm1  ;;  %vm1517_vm5 = vweird.f32 %v1490_v26 }
 0x1b8   : > { %v1499_v28 = vsub.f32 1.0, %v1498_v27 }
 0x1b9   : > { %v1450_v30 = vpop.f32.mrf.mxu0  ;;  %v1524_v61 = vor.u32 1.1754944e-38, %v1523_v46  ;;  %vm1522_vm8 = vcmp.eq.f32.partialorder %v1521_v49, 8.507059e+37 }
 0x1ba   : > { %v1451_v31 = vadd.f32 %v7405_v2, %v1450_v30  ;;  %v1500_v33 = vmul.f32 %v7424_v25, %v1499_v28  ;;  %v2578_v28 = vpop.f32.mrf.mxu3 }
 0x1bc   : > { %v6529_v32 = vpop.eup %6528  ;;  %v4873_v34 = vmul.f32 -1.442695, %v1451_v31  ;;  %v1501_v41 = vadd.f32 %v7424_v25, %v1500_v33  ;;  %v6328_v33 = vld [vmem:[%s8089_s3 + $0x6b0] sm:$0xff] }
 0x1bd   : > { %v6531_v37 = vpop.eup %6530  ;;  %v7438_v38 = vadd.f32 1.0, %v6529_v32  ;;  %3685 = vmatpush.bf16.msrb.mxu1 %v6328_v33 }
 0x1be   : > { %v1513_v39 = vmul.f32 %v6531_v37, %v1490_v26  ;;  %6532 = vpow2.f32 %v4873_v34  ;;  %vm1518_vm3 = vweird.f32 %v6531_v37  ;;  %v1505_v54 = vsel %vm7459_vm4, %v7424_v25, %v1501_v41  ;;  %v6317_v25 = vld [vmem:[%s8089_s3 + $0x658] sm:$0xff]  ;;  %v6335_v34 = vld [vmem:[%s8089_s3 + $0x6e8] sm:$0xff]  ;;  %v2604_v45 = vpop.f32.mrf.mxu1 }
 0x1bf   : > { %6534 = vrcp.f32 %v7438_v38  ;;  %vm1519_vm7 = vmor %vm1517_vm5, %vm1518_vm3  ;;  %v7483_v4 = vsel %vm1507_vm6, %v1509_v60, %v1505_v54  ;;  %3675 = vmatpush.bf16.msrb.mxu0 %v6317_v25  ;;  %vm1532_vm10 = vweird.f32 %v7438_v38  ;;  %v1536_v29 = vand.u32 2147483647, %v7438_v38  ;;  %3699 = vmatpush.bf16.msrb.mxu3 %v6335_v34  ;;  %v6315_v54 = vld [vmem:[%s8089_s3 + $0x648] sm:$0xff]  ;;  %v6326_v60 = vld [vmem:[%s8089_s3 + $0x6a0] sm:$0xff] }
 0x1c0   : > { %v1514_v42 = vsub.f32 1.0, %v1513_v39  ;;  %v1538_v30 = vand.u32 2147483648, %v7438_v38  ;;  %v6343_v25 = vld [vmem:[%s8089_s3 + $0x728] sm:$0xff]  ;;  %v6342_v45 = vld [vmem:[%s8089_s3 + $0x720] sm:$0xff] }
 0x1c1   : > { %v1453_v47 = vpop.f32.mrf.mxu0  ;;  %vm1537_vm14 = vcmp.eq.f32.partialorder %v1536_v29, 8.507059e+37 }
 0x1c2   : > { %v1515_v48 = vmul.f32 %v6531_v37, %v1514_v42  ;;  %v1454_v50 = vadd.f32 %v7405_v2, %v1453_v47  ;;  %v1539_v47 = vor.u32 1.1754944e-38, %v1538_v30 }
 0x1c3   : > { %3700 = vmatpush.bf16.msrb.mxu3 %v6334_v51  ;;  %v6368_v51 = vld [vmem:[%s8089_s3 + $0x7f0] sm:$0xff] }
 0x1c4   : > { %v6533_v53 = vpop.eup %6532  ;;  %v1516_v55 = vadd.f32 %v6531_v37, %v1515_v48  ;;  %v4874_v56 = vmul.f32 -1.442695, %v1454_v50  ;;  %v6327_v50 = vld [vmem:[%s8089_s3 + $0x6a8] sm:$0xff] }
 0x1c5   : > { %v7471_v59 = vpop.eup %6534  ;;  %v7474_v62 = vadd.f32 1.0, %v6533_v53  ;;  %3686 = vmatpush.bf16.msrb.mxu1 %v6327_v50  ;;  %v6361_v50 = vld [vmem:[%s8089_s3 + $0x7b8] sm:$0xff] }
 0x1c6   : > { %v1520_v63 = vsel %vm1519_vm7, %v6531_v37, %v1516_v55  ;;  %v1528_v0 = vmul.f32 %v7471_v59, %v7438_v38  ;;  %6536 = vpow2.f32 %v4874_v56  ;;  %vm1533_vm9 = vweird.f32 %v7471_v59  ;;  %v6316_v38 = vld [vmem:[%s8089_s3 + $0x650] sm:$0xff] }
 0x1c7   : > { %v7485_v5 = vsel %vm1522_vm8, %v1524_v61, %v1520_v63  ;;  %6538 = vrcp.f32 %v7474_v62  ;;  %v1553_v31 = vand.u32 2147483648, %v7474_v62  ;;  %v1551_v37 = vand.u32 2147483647, %v7474_v62  ;;  %vm7541_vm12 = vmor %vm1532_vm10, %vm1533_vm9  ;;  %3676 = vmatpush.bf16.msrb.mxu0 %v6316_v38  ;;  %v6333_v61 = vld [vmem:[%s8089_s3 + $0x6d8] sm:$0xff]  ;;  %v6314_v63 = vld [vmem:[%s8089_s3 + $0x640] sm:$0xff] }
 0x1c8   : > { %v6406_v6 = vpack.c.bf16 %v7485_v5, %v7483_v4  ;;  %v1529_v8 = vsub.f32 1.0, %v1528_v0  ;;  %vm1547_vm13 = vweird.f32 %v7474_v62  ;;  %v6345_v0 = vld [vmem:[%s8089_s3 + $0x738] sm:$0xff]  ;;  %3701 = vmatpush.bf16.msrb.mxu3 %v6333_v61  ;;  %v6367_v61 = vld [vmem:[%s8089_s3 + $0x7e8] sm:$0xff] }
 0x1c9   : > { %v1456_v11 = vpop.f32.mrf.mxu0  ;;  %v1554_v48 = vor.u32 1.1754944e-38, %v1553_v31  ;;  %vm1552_vm0 = vcmp.eq.f32.partialorder %v1551_v37, 8.507059e+37  ;;  %3687 = vmatpush.bf16.msrb.mxu1 %v6326_v60  ;;  %v6323_v31 = vld [vmem:[%s8089_s3 + $0x688] sm:$0xff]  ;;  %v6360_v60 = vld [vmem:[%s8089_s3 + $0x7b0] sm:$0xff] }
 0x1ca   : > { %6407 = vst [vmem:[%s7499_s17] sm:$0xff] %v6406_v6   ;;  %v1457_v13 = vadd.f32 %v7405_v2, %v1456_v11  ;;  %v1530_v16 = vmul.f32 %v7471_v59, %v1529_v8  ;;  %v6332_v6 = vld [vmem:[%s8089_s3 + $0x6d0] sm:$0xff]  ;;  %v2855_v8 = vld [vmem:[%s7576_s20] sm:$0xff] }
 0x1cb   : > { %3677 = vmatpush.bf16.msrb.mxu0 %v6315_v54  ;;  %3052 = vst [vmem:[#allocation1] ss:$4 sm:$0xff] %v2855_v8  ;;  %v6341_v54 = vld [vmem:[%s8089_s3 + $0x718] sm:$0xff]  ;;  %v6359_v8 = vld [vmem:[%s8089_s3 + $0x7a8] sm:$0xff] }
 0x1cc   : > { %v6537_v15 = vpop.eup %6536  ;;  %v4875_v17 = vmul.f32 -1.442695, %v1457_v13  ;;  %v1531_v26 = vadd.f32 %v7471_v59, %v1530_v16  ;;  %3702 = vmatpush.bf16.msrb.mxu3 %v6332_v6  ;;  %v6324_v16 = vld [vmem:[%s8089_s3 + $0x690] sm:$0xff] }
 0x1cd   : > { %v6539_v19 = vpop.eup %6538  ;;  %v7509_v20 = vadd.f32 1.0, %v6537_v15  ;;  %3688 = vmatpush.bf16.msrb.mxu1 %v6325_v3  ;;  %v6344_v15 = vld [vmem:[%s8089_s3 + $0x730] sm:$0xff] }
 0x1ce   : > { %v1543_v23 = vmul.f32 %v6539_v19, %v7474_v62  ;;  %6540 = vpow2.f32 %v4875_v17  ;;  %vm1548_vm11 = vweird.f32 %v6539_v19  ;;  %v1535_v42 = vsel %vm7541_vm12, %v7471_v59, %v1531_v26 }
 0x1cf   : > { %6542 = vrcp.f32 %v7509_v20  ;;  %vm1549_vm15 = vmor %vm1547_vm13, %vm1548_vm11  ;;  %v7566_v55 = vsel %vm1537_vm14, %v1539_v47, %v1535_v42  ;;  %3678 = vmatpush.bf16.msrb.mxu0 %v6314_v63  ;;  %vm1562_vm2 = vweird.f32 %v7509_v20  ;;  %v1568_v22 = vand.u32 2147483648, %v7509_v20 }
 0x1d0   : > { %v1544_v27 = vsub.f32 1.0, %v1543_v23  ;;  %3703 = vmatpush.bf16.msrb.mxu3 %v6331_v21  ;;  %vm2620_vm14 = vcmask 64512  }
 0x1d1   : > { %v1459_v32 = vpop.f32.mrf.mxu0  ;;  %3689 = vmatpush.bf16.msrb.mxu1 %v6324_v16 }
 0x1d2   : > { %v1545_v36 = vmul.f32 %v6539_v19, %v1544_v27  ;;  %v1460_v39 = vadd.f32 %v7405_v2, %v1459_v32  ;;  %v1566_v27 = vand.u32 2147483647, %v7509_v20  ;;  %v3056_v30 = vld.sshfl [vmem:[#allocation1] sm:$0xff pattern:$0x73625140] }
 0x1d3   : > { %3710 = vmatpush.bf16.msra.mxu0 %v6345_v0  ;;  %v6330_v32 = vld [vmem:[%s8089_s3 + $0x6c0] sm:$0xff]  ;;  %3666 = vmatmul.bf16.vlgmr.msra.gmra.mxu3 %v3056_v30 }
 0x1d4   : > { %v6541_v41 = vpop.eup %6540  ;;  %v1546_v43 = vadd.f32 %v6539_v19, %v1545_v36  ;;  %v4876_v44 = vmul.f32 -1.442695, %v1460_v39  ;;  %v1569_v39 = vor.u32 1.1754944e-38, %v1568_v22  ;;  %vm1567_vm7 = vcmp.eq.f32.partialorder %v1566_v27, 8.507059e+37  ;;  %3704 = vmatpush.bf16.msrb.mxu3 %v6330_v32  ;;  %v6358_v27 = vld [vmem:[%s8089_s3 + $0x7a0] sm:$0xff] }
 0x1d5   : > { %v7550_v46 = vpop.eup %6542  ;;  %v7553_v49 = vadd.f32 1.0, %v6541_v41  ;;  %3690 = vmatpush.bf16.msrb.mxu1 %v6323_v31  ;;  %v2857_v31 = vld [vmem:[%s7576_s20 + $0x10] sm:$0xff] }
 0x1d6   : > { %v1550_v52 = vsel %vm1549_vm15, %v6539_v19, %v1546_v43  ;;  %v1558_v53 = vmul.f32 %v7550_v46, %v7509_v20  ;;  %6544 = vpow2.f32 %v4876_v44  ;;  %vm1563_vm1 = vweird.f32 %v7550_v46  ;;  %v3058_v32 = vld.sshfl [vmem:[#allocation1 + $0x10] sm:$0xff pattern:$0x73625140] }
 0x1d7   : > { %v7568_v56 = vsel %vm1552_vm0, %v1554_v48, %v1550_v52  ;;  %6546 = vrcp.f32 %v7553_v49  ;;  %v1583_v23 = vand.u32 2147483648, %v7553_v49  ;;  %3711 = vmatpush.bf16.msra.mxu0 %v6344_v15  ;;  %vm7623_vm3 = vmor %vm1562_vm2, %vm1563_vm1  ;;  %v1581_v29 = vand.u32 2147483647, %v7553_v49 }
 0x1d8   : > { %v6411_v57 = vpack.c.bf16 %v7568_v56, %v7566_v55  ;;  %v1559_v58 = vsub.f32 1.0, %v1558_v53  ;;  %vm1577_vm5 = vweird.f32 %v7553_v49  ;;  %v3057_v53 = vld.sshfl [vmem:[#allocation1 + $0x8] sm:$0xff pattern:$0x73625140] }
 0x1d9   : > { %v1462_v59 = vpop.f32.mrf.mxu0  ;;  %v1584_v38 = vor.u32 1.1754944e-38, %v1583_v23  ;;  %vm1582_vm8 = vcmp.eq.f32.partialorder %v1581_v29, 8.507059e+37  ;;  %3679 = vmatmul.bf16.vlgmr.msrb.gmra.mxu0 %v3057_v53  ;;  %v5454_v23 = vld [vmem:[%s8090_s4 + $0x40] sm:$0xff]  ;;  %v6376_v53 = vld [vmem:[%s8089_s3 + $0x830] sm:$0xff] }
 0x1da   : > { %6463 = vst [vmem:[%s7499_s17 + $0x8] sm:$0xff] %v6411_v57   ;;  %v1463_v62 = vadd.f32 %v7405_v2, %v1462_v59  ;;  %v1560_v10 = vmul.f32 %v7550_v46, %v1559_v58 }
 0x1db   : > { %3712 = vmatpush.bf16.msra.mxu0 %v6343_v25 }
 0x1dc   : > { %v6545_v2 = vpop.eup %6544  ;;  %v4877_v11 = vmul.f32 -1.442695, %v1463_v62  ;;  %v1561_v17 = vadd.f32 %v7550_v46, %v1560_v10 }
 0x1dd   : > { %v6547_v12 = vpop.eup %6546  ;;  %v7600_v13 = vadd.f32 1.0, %v6545_v2 }
 0x1de   : > { %v1573_v14 = vmul.f32 %v6547_v12, %v7553_v49  ;;  %6548 = vpow2.f32 %v4877_v11  ;;  %vm1578_vm4 = vweird.f32 %v6547_v12  ;;  %v1565_v20 = vsel %vm7623_vm3, %v7550_v46, %v1561_v17  ;;  %v6322_v46 = vld [vmem:[%s8089_s3 + $0x680] sm:$0xff]  ;;  %v3059_v11 = vld.sshfl [vmem:[#allocation1 + $0x18] sm:$0xff pattern:$0x73625140]  ;;  %v2856_v17 = vld [vmem:[%s7576_s20 + $0x8] sm:$0xff]  ;;  %s8023_s20 = scalar_lea.vmem %s8093_s7, %s6101_s24 }
 0x1df   : > { %6550 = vrcp.f32 %v7600_v13  ;;  %vm1579_vm6 = vmor %vm1577_vm5, %vm1578_vm4  ;;  %v7650_v43 = vsel %vm1567_vm7, %v1569_v39, %v1565_v20  ;;  %3713 = vmatpush.bf16.msra.mxu0 %v6342_v45  ;;  %3691 = vmatpush.bf16.msrb.mxu1 %v6322_v46  ;;  %v1596_v62 = vand.u32 2147483647, %v7600_v13  ;;  %v1598_v63 = vand.u32 2147483648, %v7600_v13  ;;  %3055 = vst [vmem:[#allocation1 + $0x20] ss:$4 sm:$0xff] %v2856_v17  ;;  %v6364_v39 = vld [vmem:[%s8089_s3 + $0x7d0] sm:$0xff] }
 0x1e0   : > { %v1574_v19 = vsub.f32 1.0, %v1573_v14  ;;  %vm1592_vm10 = vweird.f32 %v7600_v13  ;;  %3065 = vst [vmem:[#allocation1] ss:$4 sm:$0xff] %v2857_v31  ;;  %v6350_v45 = vld [vmem:[%s8089_s3 + $0x760] sm:$0xff]  ;;  %v6377_v46 = vld [vmem:[%s8089_s3 + $0x838] sm:$0xff]  ;;  %v6383_v17 = vld [vmem:[%s8089_s3 + $0x868] sm:$0xff] }
 0x1e1   : > { %v2537_v24 = vpop.f32.mrf.mxu0  ;;  %v1599_v25 = vor.u32 1.1754944e-38, %v1598_v63  ;;  %vm1597_vm0 = vcmp.eq.f32.partialorder %v1596_v62, 8.507059e+37  ;;  %v6347_v62 = vld [vmem:[%s8089_s3 + $0x748] sm:$0xff]  ;;  %v6374_v63 = vld [vmem:[%s8089_s3 + $0x820] sm:$0xff] }
 0x1e2   : > { %v1575_v28 = vmul.f32 %v6547_v12, %v1574_v19  ;;  %v2538_v36 = vadd.f32 %v2537_v24, %v7407_v7  ;;  %v6369_v7 = vld [vmem:[%s8089_s3 + $0x7f8] sm:$0xff]  ;;  %3692 = vmatmul.bf16.vlgmr.msrb.gmra.mxu1 %v3058_v32  ;;  %v6386_v31 = vld [vmem:[%s8089_s3 + $0x880] sm:$0xff] }
 0x1e3   : > { %3749 = vmatpush.bf16.msra.mxu3 %v6369_v7  ;;  %3736 = vmatpush.bf16.msra.mxu1 %v6361_v50  ;;  %v6353_v24 = vld [vmem:[%s8089_s3 + $0x778] sm:$0xff]  ;;  %v6363_v7 = vld [vmem:[%s8089_s3 + $0x7c8] sm:$0xff]  ;;  %v5456_v50 = vld [vmem:[%s8090_s4 + $0x50] sm:$0xff] }
 0x1e4   : > { %v6549_v33 = vpop.eup %6548  ;;  %v1576_v34 = vadd.f32 %v6547_v12, %v1575_v28  ;;  %v2551_v49 = vadd.f32 %v7433_v35, %v2538_v36  ;;  %3714 = vmatpush.bf16.msra.mxu0 %v6341_v54  ;;  %3705 = vmatmul.bf16.vlgmr.msrb.gmra.mxu3 %v3059_v11  ;;  %v6365_v28 = vld [vmem:[%s8089_s3 + $0x7d8] sm:$0xff] }
 0x1e5   : > { %v7640_v37 = vpop.eup %6550  ;;  %v7643_v40 = vadd.f32 1.0, %v6549_v33  ;;  %v6338_v33 = vld [vmem:[%s8089_s3 + $0x700] sm:$0xff]  ;;  %v6393_v54 = vld [vmem:[%s8089_s3 + $0x8b8] sm:$0xff] }
 0x1e6   : > { %v1580_v41 = vsel %vm1579_vm6, %v6547_v12, %v1576_v34  ;;  %v1588_v42 = vmul.f32 %v7640_v37, %v7600_v13  ;;  %v2564_v57 = vadd.f32 %v7478_v1, %v2551_v49  ;;  %v6340_v1 = vld [vmem:[%s8089_s3 + $0x710] sm:$0xff]  ;;  %vm1593_vm9 = vweird.f32 %v7640_v37  ;;  %v6366_v12 = vld [vmem:[%s8089_s3 + $0x7e0] sm:$0xff]  ;;  %v6401_v49 = vld [vmem:[%s8089_s3 + $0x8f8] sm:$0xff] }
 0x1e7   : > { %v7652_v44 = vsel %vm1582_vm8, %v1584_v38, %v1580_v41  ;;  %6552 = vrcp.f32 %v7643_v40  ;;  %3750 = vmatpush.bf16.msra.mxu3 %v6368_v51  ;;  %3737 = vmatpush.bf16.msra.mxu1 %v6360_v60  ;;  %v1613_v2 = vand.u32 2147483648, %v7643_v40  ;;  %v1611_v15 = vand.u32 2147483647, %v7643_v40  ;;  %vm7705_vm12 = vmor %vm1592_vm10, %vm1593_vm9  ;;  %v6352_v34 = vld [vmem:[%s8089_s3 + $0x770] sm:$0xff]  ;;  %v6351_v41 = vld [vmem:[%s8089_s3 + $0x768] sm:$0xff] }
 0x1e8   : > { %v6416_v47 = vpack.c.bf16 %v7652_v44, %v7650_v43  ;;  %v1589_v48 = vsub.f32 1.0, %v1588_v42  ;;  %v2577_v6 = vadd.f32 %v7490_v9, %v2564_v57  ;;  %3715 = vmatpush.bf16.msra.mxu0 %v6340_v1  ;;  %v6339_v9 = vld [vmem:[%s8089_s3 + $0x708] sm:$0xff]  ;;  %vm1607_vm13 = vweird.f32 %v7643_v40  ;;  %v3060_v38 = vld.sshfl [vmem:[#allocation1 + $0x20] sm:$0xff pattern:$0x73625140]  ;;  %v6356_v42 = vld [vmem:[%s8089_s3 + $0x790] sm:$0xff] }
 0x1e9   : > { %v2539_v52 = vpop.f32.mrf.mxu0  ;;  %v1614_v26 = vor.u32 1.1754944e-38, %v1613_v2  ;;  %vm1612_vm1 = vcmp.eq.f32.partialorder %v1611_v15, 8.507059e+37  ;;  %v6349_v51 = vld [vmem:[%s8089_s3 + $0x758] sm:$0xff]  ;;  %v6400_v57 = vld [vmem:[%s8089_s3 + $0x8f0] sm:$0xff]  ;;  %v6399_v60 = vld [vmem:[%s8089_s3 + $0x8e8] sm:$0xff] }
 0x1ea   : > { %6464 = vst [vmem:[%s7499_s17 + $0x10] sm:$0xff] %v6416_v47   ;;  %v1590_v35 = vmul.f32 %v7640_v37, %v1589_v48  ;;  %v6355_v47 = vld [vmem:[%s8089_s3 + $0x788] sm:$0xff]  ;;  %v6362_v48 = vld [vmem:[%s8089_s3 + $0x7c0] sm:$0xff]  ;;  %v6373_v2 = vld [vmem:[%s8089_s3 + $0x818] sm:$0xff] }
 0x1eb   : > { %3751 = vmatpush.bf16.msra.mxu3 %v6367_v61  ;;  %3738 = vmatpush.bf16.msra.mxu1 %v6359_v8  ;;  %v6354_v52 = vld [vmem:[%s8089_s3 + $0x780] sm:$0xff]  ;;  %v5457_v61 = vld [vmem:[%s8090_s4 + $0x58] sm:$0xff]  ;;  %v6391_v1 = vld [vmem:[%s8089_s3 + $0x8a8] sm:$0xff] }
 0x1ec   : > { %v1591_v0 = vadd.f32 %v7640_v37, %v1590_v35  ;;  %3716 = vmatpush.bf16.msra.mxu0 %v6339_v9  ;;  %v6348_v35 = vld [vmem:[%s8089_s3 + $0x750] sm:$0xff]  ;;  %v6385_v8 = vld [vmem:[%s8089_s3 + $0x878] sm:$0xff] }
 0x1ed   : > { %v6553_v58 = vpop.eup %6552  ;;  %v6397_v11 = vld [vmem:[%s8089_s3 + $0x8d8] sm:$0xff]  ;;  %v6384_v9 = vld [vmem:[%s8089_s3 + $0x870] sm:$0xff] }
 0x1ee   : > { %v1603_v59 = vmul.f32 %v6553_v58, %v7643_v40  ;;  %vm1608_vm11 = vweird.f32 %v6553_v58  ;;  %v1595_v19 = vsel %vm7705_vm12, %v7640_v37, %v1591_v0  ;;  %v6357_v37 = vld [vmem:[%s8089_s3 + $0x798] sm:$0xff]  ;;  %v5455_v40 = vld [vmem:[%s8090_s4 + $0x48] sm:$0xff]  ;;  %v6346_v0 = vld [vmem:[%s8089_s3 + $0x740] sm:$0xff] }
 0x1ef   : > { %vm1609_vm15 = vmor %vm1607_vm13, %vm1608_vm11  ;;  %3752 = vmatpush.bf16.msra.mxu3 %v6366_v12  ;;  %v7728_v29 = vsel %vm1597_vm0, %v1599_v25, %v1595_v19  ;;  %3739 = vmatpush.bf16.msra.mxu1 %v6358_v27  ;;  %v5458_v12 = vld [vmem:[%s8090_s4 + $0x60] sm:$0xff]  ;;  %v6372_v15 = vld [vmem:[%s8089_s3 + $0x810] sm:$0xff] }
 0x1f0   : > { %v1604_v3 = vsub.f32 1.0, %v1603_v59  ;;  %3717 = vmatpush.bf16.msra.mxu0 %v6338_v33  ;;  %v6392_v59 = vld [vmem:[%s8089_s3 + $0x8b0] sm:$0xff]  ;;  %v6371_v19 = vld [vmem:[%s8089_s3 + $0x808] sm:$0xff]  ;;  %v6370_v25 = vld [vmem:[%s8089_s3 + $0x800] sm:$0xff] }
 0x1f1   : > { %v2589_v10 = vpop.f32.mrf.mxu0  ;;  %v6396_v13 = vld [vmem:[%s8089_s3 + $0x8d0] sm:$0xff]  ;;  %v6381_v27 = vld [vmem:[%s8089_s3 + $0x858] sm:$0xff] }
 0x1f2   : > { %v1605_v14 = vmul.f32 %v6553_v58, %v1604_v3  ;;  %v2590_v16 = vadd.f32 %v2589_v10, %v2577_v6  ;;  %v6398_v3 = vld [vmem:[%s8089_s3 + $0x8e0] sm:$0xff]  ;;  %v3063_v6 = vld.sshfl [vmem:[#allocation1 + $0x38] sm:$0xff pattern:$0x73625140]  ;;  %v5460_v33 = vld [vmem:[%s8090_s4 + $0x70] sm:$0xff] }
 0x1f3   : > { %3753 = vmatpush.bf16.msra.mxu3 %v6365_v28  ;;  %3718 = vmatmul.bf16.vlgmr.msra.gmra.mxu0 %v3060_v38  ;;  %v6390_v10 = vld [vmem:[%s8089_s3 + $0x8a0] sm:$0xff]  ;;  %v3069_v32 = vld.sshfl [vmem:[#allocation1 + $0x18] sm:$0xff pattern:$0x73625140] }
 0x1f4   : > { %v1606_v21 = vadd.f32 %v6553_v58, %v1605_v14  ;;  %v2603_v22 = vadd.f32 %v7507_v18, %v2590_v16  ;;  %3740 = vmatpush.bf16.msra.mxu1 %v6357_v37  ;;  %3762 = vmatpush.bf16.msrb.mxu0 %v6377_v46  ;;  %v3062_v14 = vld.sshfl [vmem:[#allocation1 + $0x30] sm:$0xff pattern:$0x73625140]  ;;  %v6389_v16 = vld [vmem:[%s8089_s3 + $0x898] sm:$0xff] }
 0x1f5   : > { %v3066_v28 = vld.sshfl [vmem:[#allocation1] sm:$0xff pattern:$0x73625140]  ;;  %v5461_v37 = vld [vmem:[%s8090_s4 + $0x78] sm:$0xff] }
 0x1f6   : > { %v1610_v18 = vsel %vm1609_vm15, %v6553_v58, %v1606_v21  ;;  %2660 = vmatpush.msrb.mxu2 %v2603_v22  ;;  %v6375_v58 = vld [vmem:[%s8089_s3 + $0x828] sm:$0xff]  ;;  %v6388_v21 = vld [vmem:[%s8089_s3 + $0x890] sm:$0xff] }
 0x1f7   : > { %v7730_v30 = vsel %vm1612_vm1, %v1614_v26, %v1610_v18  ;;  %5463 = vmatmul.msk.f32.vlgmr.msrb.gmra.mxu2 %vm2620_vm14, %v5454_v23  ;;  %3754 = vmatpush.bf16.msra.mxu3 %v6364_v39  ;;  %v6395_v22 = vld [vmem:[%s8089_s3 + $0x8c8] sm:$0xff]  ;;  %v6394_v18 = vld [vmem:[%s8089_s3 + $0x8c0] sm:$0xff] }
 0x1f8   : > { %v6421_v20 = vpack.c.bf16 %v7730_v30, %v7728_v29  ;;  %3723 = vmatpush.bf16.msra.mxu2 %v6353_v24  ;;  %3741 = vmatpush.bf16.msra.mxu1 %v6356_v42  ;;  %v5459_v23 = vld [vmem:[%s8090_s4 + $0x68] sm:$0xff]  ;;  %v6382_v24 = vld [vmem:[%s8089_s3 + $0x860] sm:$0xff] }
 0x1f9   : > { %v2591_v36 = vpop.f32.mrf.mxu0  ;;  %3763 = vmatpush.bf16.msrb.mxu0 %v6376_v53  ;;  %v6387_v26 = vld [vmem:[%s8089_s3 + $0x888] sm:$0xff]  ;;  %v6378_v39 = vld [vmem:[%s8089_s3 + $0x840] sm:$0xff] }
 0x1fa   : > { %6465 = vst [vmem:[%s7499_s17 + $0x18] sm:$0xff] %v6421_v20   ;;  %v6380_v20 = vld [vmem:[%s8089_s3 + $0x850] sm:$0xff]  ;;  %v6379_v36 = vld [vmem:[%s8089_s3 + $0x848] sm:$0xff] }
 0x1fb   : > { %3755 = vmatpush.bf16.msra.mxu3 %v6363_v7  ;;  %v3061_v38 = vld.sshfl [vmem:[#allocation1 + $0x28] sm:$0xff pattern:$0x73625140] }
 0x1fc   : > { %3724 = vmatpush.bf16.msra.mxu2 %v6352_v34  ;;  %3742 = vmatpush.bf16.msra.mxu1 %v6355_v47  ;;  %v3068_v34 = vld.sshfl [vmem:[#allocation1 + $0x10] sm:$0xff pattern:$0x73625140] }
 0x1fd   : > { %3764 = vmatpush.bf16.msrb.mxu0 %v6375_v58 }
 0x1ff   : > { %5464 = vmatmul.msk.f32.gmra.mxu2 %vm2620_vm14, %v5455_v40  ;;  %3756 = vmatpush.bf16.msra.mxu3 %v6362_v48  ;;  %v3067_v40 = vld.sshfl [vmem:[#allocation1 + $0x8] sm:$0xff pattern:$0x73625140] }
 0x200   : > { %3725 = vmatpush.bf16.msra.mxu2 %v6351_v41  ;;  %3743 = vmatpush.bf16.msra.mxu1 %v6354_v52 }
 0x201   : > { %3765 = vmatpush.bf16.msrb.mxu0 %v6374_v63 }
 0x202   : > { %3757 = vmatmul.bf16.vlgmr.msra.gmra.mxu3 %v3063_v6 }
 0x203   : > { %3801 = vmatpush.bf16.msrb.mxu3 %v6401_v49  ;;  %3744 = vmatmul.bf16.vlgmr.msra.gmra.mxu1 %v3062_v14  ;;  %v7909_v49 = vld [vmem:[%s8091_s5 + $0x1] ss:$0 sm:$0xff] }
 0x204   : > { %3726 = vmatpush.bf16.msra.mxu2 %v6350_v45  ;;  %3788 = vmatpush.bf16.msrb.mxu1 %v6393_v54 }
 0x205   : > { %3766 = vmatpush.bf16.msrb.mxu0 %v6373_v2 }
 0x207   : > { %5465 = vmatmul.msk.f32.gmra.mxu2 %vm2620_vm14, %v5456_v50  ;;  %3802 = vmatpush.bf16.msrb.mxu3 %v6400_v57 }
 0x208   : > { %3727 = vmatpush.bf16.msra.mxu2 %v6349_v51  ;;  %3789 = vmatpush.bf16.msrb.mxu1 %v6392_v59 }
 0x209   : > { %3767 = vmatpush.bf16.msrb.mxu0 %v6372_v15 }
 0x20b   : > { %3803 = vmatpush.bf16.msrb.mxu3 %v6399_v60 }
 0x20c   : > { %3728 = vmatpush.bf16.msra.mxu2 %v6348_v35  ;;  %3790 = vmatpush.bf16.msrb.mxu1 %v6391_v1 }
 0x20d   : > { %3768 = vmatpush.bf16.msrb.mxu0 %v6371_v19 }
 0x20f   : > { %5466 = vmatmul.msk.f32.gmra.mxu2 %vm2620_vm14, %v5457_v61  ;;  %3804 = vmatpush.bf16.msrb.mxu3 %v6398_v3 }
 0x210   : > { %3729 = vmatpush.bf16.msra.mxu2 %v6347_v62  ;;  %3791 = vmatpush.bf16.msrb.mxu1 %v6390_v10 }
 0x211   : > { %3769 = vmatpush.bf16.msrb.mxu0 %v6370_v25 }
 0x213   : > { %3805 = vmatpush.bf16.msrb.mxu3 %v6397_v11 }
 0x214   : > { %3730 = vmatpush.bf16.msra.mxu2 %v6346_v0  ;;  %3792 = vmatpush.bf16.msrb.mxu1 %v6389_v16 }
 0x215   : > { %3770 = vmatmul.bf16.vlgmr.msrb.gmra.mxu0 %v3066_v28 }
 0x217   : > { %5467 = vmatmul.msk.f32.gmra.mxu2 %vm2620_vm14, %v5458_v12  ;;  %3806 = vmatpush.bf16.msrb.mxu3 %v6396_v13 }
 0x218   : > { %3775 = vmatpush.bf16.msrb.mxu2 %v6385_v8  ;;  %3793 = vmatpush.bf16.msrb.mxu1 %v6388_v21 }
 0x21b   : > { %3807 = vmatpush.bf16.msrb.mxu3 %v6395_v22 }
 0x21c   : > { %3776 = vmatpush.bf16.msrb.mxu2 %v6384_v9  ;;  %3794 = vmatpush.bf16.msrb.mxu1 %v6387_v26 }
 0x21f   : > { %5468 = vmatmul.msk.f32.gmra.mxu2 %vm2620_vm14, %v5459_v23  ;;  %3808 = vmatpush.bf16.msrb.mxu3 %v6394_v18 }
 0x220   : > { %3777 = vmatpush.bf16.msrb.mxu2 %v6383_v17  ;;  %3795 = vmatpush.bf16.msrb.mxu1 %v6386_v31 }
 0x222   : > { %3809 = vmatmul.bf16.vlgmr.msrb.gmra.mxu3 %v3069_v32  ;;  %v4067_v32 = vmul.f32 0.3, %v7483_v4 }
 0x223   : > { %3796 = vmatmul.bf16.vlgmr.msrb.gmra.mxu1 %v3068_v34 }
 0x224   : > { %3778 = vmatpush.bf16.msrb.mxu2 %v6382_v24 }
 0x227   : > { %5469 = vmatmul.msk.f32.gmra.mxu2 %vm2620_vm14, %v5460_v33 }
 0x228   : > { %3779 = vmatpush.bf16.msrb.mxu2 %v6381_v27 }
 0x22c   : > { %3780 = vmatpush.bf16.msrb.mxu2 %v6380_v20 }
 0x22f   : > { %5470 = vmatmul.msk.f32.gmra.mxu2 %vm2620_vm14, %v5461_v37 }
 0x230   : > { %3781 = vmatpush.bf16.msrb.mxu2 %v6379_v36 }
 0x234   : > { %3782 = vmatpush.bf16.msrb.mxu2 %v6378_v39 }
 0x237   : > { %3731 = vmatmul.bf16.vlgmr.msra.gmra.mxu2 %v3061_v38 }
 0x247   : > { %3783 = vmatmul.bf16.vlgmr.msrb.gmra.mxu2 %v3067_v40 }
 0x256   : > { %v3667_v41 = vpop.f32.mrf.mxu3  ;;  %v3680_v42 = vpop.f32.mrf.mxu0 }
 0x257   : > { %v3681_v46 = vadd.f32 %v3680_v42, %v3667_v41 }
 0x25e   : > { %v3669_v7 = vpop.f32.mrf.mxu3  ;;  %v3682_v45 = vpop.f32.mrf.mxu0 }
 0x25f   : > { %v3693_v47 = vpop.f32.mrf.mxu1 }
 0x260   : > { %v3694_v48 = vadd.f32 %v3693_v47, %v3681_v46 }
 0x267   : > { %v3706_v50 = vpop.f32.mrf.mxu3  ;;  %v3695_v58 = vpop.f32.mrf.mxu1 }
 0x268   : > { %v3707_v51 = vadd.f32 %v3706_v50, %v3694_v48 }
 0x26f   : > { %v3708_v59 = vpop.f32.mrf.mxu3 }
 0x270   : > { %v3719_v53 = vpop.f32.mrf.mxu0 }
 0x271   : > { %v7912_v35 = vadd.f32 %v3719_v53, %v3707_v51  ;;  %v4068_v53 = vmul.f32 0.3, %v7485_v5 }
 0x278   : > { %v3721_v61 = vpop.f32.mrf.mxu0 }
 0x27a   : > { %v2662_v52 = vpop.f32.mrf.mxu2 }
 0x27b   : > { %v2663_v54 = vadd.f32 %v7909_v49, %v2662_v52 }
 0x27d   : > { %v5471_v57 = vmul.f32 -1.442695, %v2663_v54 }
 0x27f   : > { %6554 = vpow2.f32 %v5471_v57 }
 0x280   : > { %v7917_v23 = vpop.f32.mrf.mxu1 }
 0x282   : > { %v2665_v60 = vpop.f32.mrf.mxu2 }
 0x283   : > { %v2666_v62 = vadd.f32 %v7909_v49, %v2665_v60 }
 0x285   : > { %v6555_v63 = vpop.eup %6554  ;;  %v5472_v1 = vmul.f32 -1.442695, %v2666_v62  ;;  %v7919_v28 = vpop.f32.mrf.mxu3 }
 0x286   : > { %v2710_v0 = vadd.f32 1.0, %v6555_v63 }
 0x287   : > { %6556 = vpow2.f32 %v5472_v1 }
 0x288   : > { %6558 = vrcp.f32 %v2710_v0  ;;  %v2729_v14 = vand.u32 2147483648, %v2710_v0  ;;  %v2727_v13 = vand.u32 2147483647, %v2710_v0  ;;  %vm2723_vm3 = vweird.f32 %v2710_v0  ;;  %v3747_v45 = vpop.f32.mrf.mxu1 }
 0x28a   : > { %v2668_v3 = vpop.f32.mrf.mxu2  ;;  %v2730_v25 = vor.u32 1.1754944e-38, %v2729_v14  ;;  %vm2728_vm5 = vcmp.eq.f32.partialorder %v2727_v13, 8.507059e+37 }
 0x28b   : > { %v2669_v6 = vadd.f32 %v7909_v49, %v2668_v3 }
 0x28d   : > { %v6557_v8 = vpop.eup %6556  ;;  %v5473_v2 = vmul.f32 -1.442695, %v2669_v6  ;;  %v3760_v51 = vpop.f32.mrf.mxu3 }
 0x28e   : > { %v6559_v10 = vpop.eup %6558  ;;  %v2711_v11 = vadd.f32 1.0, %v6557_v8 }
 0x28f   : > { %v2719_v12 = vmul.f32 %v6559_v10, %v2710_v0  ;;  %6560 = vpow2.f32 %v5473_v2  ;;  %vm2724_vm2 = vweird.f32 %v6559_v10 }
 0x290   : > { %6562 = vrcp.f32 %v2711_v11  ;;  %vm2725_vm4 = vmor %vm2723_vm3, %vm2724_vm2  ;;  %v2742_v34 = vand.u32 2147483647, %v2711_v11  ;;  %v2744_v36 = vand.u32 2147483648, %v2711_v11  ;;  %vm2738_vm7 = vweird.f32 %v2711_v11 }
 0x291   : > { %v2720_v9 = vsub.f32 1.0, %v2719_v12 }
 0x292   : > { %v2671_v15 = vpop.f32.mrf.mxu2  ;;  %v2745_v47 = vor.u32 1.1754944e-38, %v2744_v36  ;;  %vm2743_vm9 = vcmp.eq.f32.partialorder %v2742_v34, 8.507059e+37  ;;  %v7926_v59 = vpop.f32.mrf.mxu0 }
 0x293   : > { %v2721_v16 = vmul.f32 %v6559_v10, %v2720_v9  ;;  %v2672_v17 = vadd.f32 %v7909_v49, %v2671_v15  ;;  %v4069_v15 = vmul.f32 0.3, %v7566_v55 }
 0x295   : > { %v6561_v19 = vpop.eup %6560  ;;  %v2722_v21 = vadd.f32 %v6559_v10, %v2721_v16  ;;  %v5474_v22 = vmul.f32 -1.442695, %v2672_v17 }
 0x296   : > { %v6563_v24 = vpop.eup %6562  ;;  %v2712_v26 = vadd.f32 1.0, %v6561_v19 }
 0x297   : > { %v2726_v18 = vsel %vm2725_vm4, %v6559_v10, %v2722_v21  ;;  %v2734_v27 = vmul.f32 %v6563_v24, %v2711_v11  ;;  %6564 = vpow2.f32 %v5474_v22  ;;  %vm2739_vm6 = vweird.f32 %v6563_v24 }
 0x298   : > { %v2731_v31 = vsel %vm2728_vm5, %v2730_v25, %v2726_v18  ;;  %6566 = vrcp.f32 %v2712_v26  ;;  %vm2740_vm8 = vmor %vm2738_vm7, %vm2739_vm6  ;;  %v2757_v60 = vand.u32 2147483647, %v2712_v26  ;;  %v2759_v61 = vand.u32 2147483648, %v2712_v26 }
 0x299   : > { %v4075_v33 = vmul.f32 0.4, %v2731_v31  ;;  %v2735_v20 = vsub.f32 1.0, %v2734_v27  ;;  %vm2753_vm11 = vweird.f32 %v2712_v26 }
 0x29a   : > { %v2674_v37 = vpop.f32.mrf.mxu2  ;;  %v2760_v2 = vor.u32 1.1754944e-38, %v2759_v61  ;;  %vm2758_vm13 = vcmp.eq.f32.partialorder %v2757_v60, 8.507059e+37  ;;  %v3773_v19 = vpop.f32.mrf.mxu0 }
 0x29b   : > { %v7922_v39 = vadd.f32 %v4075_v33, %v4067_v32  ;;  %v2736_v38 = vmul.f32 %v6563_v24, %v2735_v20  ;;  %v2675_v40 = vadd.f32 %v7909_v49, %v2674_v37  ;;  %v4072_v19 = vmul.f32 0.3, %v7652_v44 }
 0x29d   : > { %v6565_v41 = vpop.eup %6564  ;;  %v2737_v42 = vadd.f32 %v6563_v24, %v2736_v38  ;;  %v5475_v7 = vmul.f32 -1.442695, %v2675_v40  ;;  %v4070_v40 = vmul.f32 0.3, %v7568_v56 }
 0x29e   : > { %v6567_v46 = vpop.eup %6566  ;;  %v2713_v4 = vadd.f32 1.0, %v6565_v41 }
 0x29f   : > { %v2741_v48 = vsel %vm2740_vm8, %v6563_v24, %v2737_v42  ;;  %v2749_v50 = vmul.f32 %v6567_v46, %v2712_v26  ;;  %6568 = vpow2.f32 %v5475_v7  ;;  %vm2754_vm10 = vweird.f32 %v6567_v46 }
 0x2a0   : > { %v2746_v52 = vsel %vm2743_vm9, %v2745_v47, %v2741_v48  ;;  %6570 = vrcp.f32 %v2713_v4  ;;  %vm2755_vm12 = vmor %vm2753_vm11, %vm2754_vm10  ;;  %v7932_v11 = vpop.f32.mrf.mxu1  ;;  %v2772_v21 = vand.u32 2147483647, %v2713_v4  ;;  %v2774_v22 = vand.u32 2147483648, %v2713_v4 }
 0x2a1   : > { %v6426_v54 = vpack.c.bf16 %v2746_v52, %v2731_v31  ;;  %v4076_v57 = vmul.f32 0.4, %v2746_v52  ;;  %v2750_v58 = vsub.f32 1.0, %v2749_v50  ;;  %vm2768_vm15 = vweird.f32 %v2713_v4 }
 0x2a2   : > { %v2677_v62 = vpop.f32.mrf.mxu2  ;;  %v2775_v55 = vor.u32 1.1754944e-38, %v2774_v22  ;;  %vm2773_vm1 = vcmp.eq.f32.partialorder %v2772_v21, 8.507059e+37 }
 0x2a3   : > { %6466 = vst [vmem:[%s7499_s17 + $0x20] sm:$0xff] %v6426_v54   ;;  %v7929_v63 = vadd.f32 %v4076_v57, %v4068_v53  ;;  %v2751_v1 = vmul.f32 %v6567_v46, %v2750_v58  ;;  %v2678_v0 = vadd.f32 %v7909_v49, %v2677_v62 }
 0x2a5   : > { %v6569_v3 = vpop.eup %6568  ;;  %v2752_v6 = vadd.f32 %v6567_v46, %v2751_v1  ;;  %v5476_v8 = vmul.f32 -1.442695, %v2678_v0  ;;  %v7935_v17 = vpop.f32.mrf.mxu3  ;;  %v4071_v1 = vmul.f32 0.3, %v7650_v43 }
 0x2a6   : > { %v6571_v5 = vpop.eup %6570  ;;  %v2714_v10 = vadd.f32 1.0, %v6569_v3 }
 0x2a7   : > { %v2756_v12 = vsel %vm2755_vm12, %v6567_v46, %v2752_v6  ;;  %v2764_v9 = vmul.f32 %v6571_v5, %v2713_v4  ;;  %6572 = vpow2.f32 %v5476_v8  ;;  %vm2769_vm14 = vweird.f32 %v6571_v5 }
 0x2a8   : > { %v2761_v14 = vsel %vm2758_vm13, %v2760_v2, %v2756_v12  ;;  %6574 = vrcp.f32 %v2714_v10  ;;  %vm2770_vm0 = vmor %vm2768_vm15, %vm2769_vm14  ;;  %v3799_v34 = vpop.f32.mrf.mxu1  ;;  %v2787_v46 = vand.u32 2147483647, %v2714_v10  ;;  %v2789_v47 = vand.u32 2147483648, %v2714_v10 }
 0x2a9   : > { %v4077_v16 = vmul.f32 0.4, %v2761_v14  ;;  %v2765_v13 = vsub.f32 1.0, %v2764_v9  ;;  %vm2783_vm3 = vweird.f32 %v2714_v10 }
 0x2aa   : > { %v2680_v24 = vpop.f32.mrf.mxu2  ;;  %v2790_v56 = vor.u32 1.1754944e-38, %v2789_v47  ;;  %vm2788_vm5 = vcmp.eq.f32.partialorder %v2787_v46, 8.507059e+37 }
 0x2ab   : > { %v7937_v25 = vadd.f32 %v4077_v16, %v4069_v15  ;;  %v2766_v26 = vmul.f32 %v6571_v5, %v2765_v13  ;;  %v2681_v18 = vadd.f32 %v7909_v49, %v2680_v24 }
 0x2ad   : > { %v6573_v27 = vpop.eup %6572  ;;  %v2767_v31 = vadd.f32 %v6571_v5, %v2766_v26  ;;  %v5477_v32 = vmul.f32 -1.442695, %v2681_v18  ;;  %v3812_v45 = vpop.f32.mrf.mxu3 }
 0x2ae   : > { %v6575_v33 = vpop.eup %6574  ;;  %v2715_v20 = vadd.f32 1.0, %v6573_v27 }
 0x2af   : > { %v2771_v36 = vsel %vm2770_vm0, %v6571_v5, %v2767_v31  ;;  %v2779_v37 = vmul.f32 %v6575_v33, %v2714_v10  ;;  %6576 = vpow2.f32 %v5477_v32  ;;  %vm2784_vm2 = vweird.f32 %v6575_v33 }
 0x2b0   : > { %v2776_v38 = vsel %vm2773_vm1, %v2775_v55, %v2771_v36  ;;  %6578 = vrcp.f32 %v2715_v20  ;;  %vm2785_vm4 = vmor %vm2783_vm3, %vm2784_vm2  ;;  %v2804_v6 = vand.u32 2147483648, %v2715_v20  ;;  %v2802_v2 = vand.u32 2147483647, %v2715_v20 }
 0x2b1   : > { %v6431_v41 = vpack.c.bf16 %v2776_v38, %v2761_v14  ;;  %v4078_v42 = vmul.f32 0.4, %v2776_v38  ;;  %v2780_v7 = vsub.f32 1.0, %v2779_v37  ;;  %vm2798_vm7 = vweird.f32 %v2715_v20 }
 0x2b2   : > { %v2683_v4 = vpop.f32.mrf.mxu2  ;;  %v2805_v15 = vor.u32 1.1754944e-38, %v2804_v6  ;;  %vm2803_vm9 = vcmp.eq.f32.partialorder %v2802_v2, 8.507059e+37  ;;  %vm3853_vm1 = vcmask 1043456   ;;  %vm3828_vm3 = vcmask 31744   ;;  %v8000_v6 = vld [vmem:[%s8091_s5 + $0x2] ss:$0 sm:$0xff] }
 0x2b3   : > { %6467 = vst [vmem:[%s7499_s17 + $0x28] sm:$0xff] %v6431_v41   ;;  %v7942_v48 = vadd.f32 %v4078_v42, %v4070_v40  ;;  %v2781_v50 = vmul.f32 %v6575_v33, %v2780_v7  ;;  %v2684_v51 = vadd.f32 %v7909_v49, %v2683_v4 }
 0x2b5   : > { %v6577_v52 = vpop.eup %6576  ;;  %v2782_v53 = vadd.f32 %v6575_v33, %v2781_v50  ;;  %v5478_v54 = vmul.f32 -1.442695, %v2684_v51 }
 0x2b6   : > { %v6579_v57 = vpop.eup %6578  ;;  %v2716_v58 = vadd.f32 1.0, %v6577_v52 }
 0x2b7   : > { %v2786_v60 = vsel %vm2785_vm4, %v6575_v33, %v2782_v53  ;;  %v2794_v61 = vmul.f32 %v6579_v57, %v2715_v20  ;;  %6580 = vpow2.f32 %v5478_v54  ;;  %vm2799_vm6 = vweird.f32 %v6579_v57  ;;  %v6063_v53 = vld [vmem:[%s8090_s4 + $0x80] sm:$0xff]  ;;  %v6070_v54 = vld [vmem:[%s8090_s4 + $0xb8] sm:$0xff] }
 0x2b8   : > { %v2791_v62 = vsel %vm2788_vm5, %v2790_v56, %v2786_v60  ;;  %6582 = vrcp.f32 %v2716_v58  ;;  %vm2800_vm8 = vmor %vm2798_vm7, %vm2799_vm6  ;;  %v2819_v27 = vand.u32 2147483648, %v2716_v58  ;;  %v2817_v33 = vand.u32 2147483647, %v2716_v58 }
 0x2b9   : > { %v4079_v0 = vmul.f32 0.4, %v2791_v62  ;;  %v2795_v3 = vsub.f32 1.0, %v2794_v61  ;;  %vm2813_vm11 = vweird.f32 %v2716_v58  ;;  %v6064_v61 = vld [vmem:[%s8090_s4 + $0x88] sm:$0xff] }
 0x2ba   : > { %v3732_v49 = vpop.f32.mrf.mxu2  ;;  %v2820_v34 = vor.u32 1.1754944e-38, %v2819_v27  ;;  %vm2818_vm13 = vcmp.eq.f32.partialorder %v2817_v33, 8.507059e+37 }
 0x2bb   : > { %v7946_v8 = vadd.f32 %v4079_v0, %v4071_v1  ;;  %v2796_v5 = vmul.f32 %v6579_v57, %v2795_v3  ;;  %v3733_v9 = vadd.f32 %v3732_v49, %v7912_v35  ;;  %v6067_v1 = vld [vmem:[%s8090_s4 + $0xa0] sm:$0xff]  ;;  %v6068_v0 = vld [vmem:[%s8090_s4 + $0xa8] sm:$0xff]  ;;  %v6069_v3 = vld [vmem:[%s8090_s4 + $0xb0] sm:$0xff] }
 0x2bd   : > { %v6581_v10 = vpop.eup %6580  ;;  %v2797_v12 = vadd.f32 %v6579_v57, %v2796_v5  ;;  %v3746_v18 = vadd.f32 %v7917_v23, %v3733_v9  ;;  %v4073_v23 = vmul.f32 0.3, %v7728_v29 }
 0x2be   : > { %v6583_v14 = vpop.eup %6582  ;;  %v2717_v16 = vadd.f32 1.0, %v6581_v10 }
 0x2bf   : > { %v2801_v43 = vsel %vm2800_vm8, %v6579_v57, %v2797_v12  ;;  %v2809_v13 = vmul.f32 %v6583_v14, %v2716_v58  ;;  %vm2814_vm10 = vweird.f32 %v6583_v14  ;;  %v3759_v20 = vadd.f32 %v7919_v28, %v3746_v18 }
 0x2c0   : > { %v2806_v21 = vsel %vm2803_vm9, %v2805_v15, %v2801_v43  ;;  %6584 = vrcp.f32 %v2717_v16  ;;  %vm2815_vm12 = vmor %vm2813_vm11, %vm2814_vm10  ;;  %v2832_v7 = vand.u32 2147483647, %v2717_v16  ;;  %v2834_v45 = vand.u32 2147483648, %v2717_v16 }
 0x2c1   : > { %v6436_v22 = vpack.c.bf16 %v2806_v21, %v2791_v62  ;;  %v4080_v24 = vmul.f32 0.4, %v2806_v21  ;;  %v2810_v26 = vsub.f32 1.0, %v2809_v13  ;;  %v3772_v42 = vadd.f32 %v7926_v59, %v3759_v20  ;;  %v6066_v62 = vld [vmem:[%s8090_s4 + $0x98] sm:$0xff] }
 0x2c2   : > { %v3734_v31 = vpop.f32.mrf.mxu2  ;;  %vm2828_vm15 = vweird.f32 %v2717_v16  ;;  %v2835_v52 = vor.u32 1.1754944e-38, %v2834_v45  ;;  %vm2833_vm2 = vcmp.eq.f32.partialorder %v2832_v7, 8.507059e+37 }
 0x2c3   : > { %6468 = vst [vmem:[%s7499_s17 + $0x30] sm:$0xff] %v6436_v22   ;;  %v7952_v35 = vadd.f32 %v4080_v24, %v4072_v19  ;;  %v2811_v32 = vmul.f32 %v6583_v14, %v2810_v26 }
 0x2c5   : > { %v2812_v55 = vadd.f32 %v6583_v14, %v2811_v32 }
 0x2c6   : > { %v6585_v44 = vpop.eup %6584 }
 0x2c7   : > { %v2816_v36 = vsel %vm2815_vm12, %v6583_v14, %v2812_v55  ;;  %v2824_v37 = vmul.f32 %v6585_v44, %v2717_v16  ;;  %vm2829_vm14 = vweird.f32 %v6585_v44 }
 0x2c8   : > { %v2821_v38 = vsel %vm2818_vm13, %v2820_v34, %v2816_v36  ;;  %vm2830_vm0 = vmor %vm2828_vm15, %vm2829_vm14 }
 0x2c9   : > { %v4081_v40 = vmul.f32 0.4, %v2821_v38  ;;  %v2825_v41 = vsub.f32 1.0, %v2824_v37 }
 0x2ca   : > { %v3784_v46 = vpop.f32.mrf.mxu2 }
 0x2cb   : > { %v7957_v47 = vadd.f32 %v4081_v40, %v4073_v23  ;;  %v2826_v4 = vmul.f32 %v6585_v44, %v2825_v41  ;;  %v3785_v28 = vadd.f32 %v3784_v46, %v3772_v42 }
 0x2cd   : > { %v2827_v50 = vadd.f32 %v6585_v44, %v2826_v4  ;;  %v3798_v51 = vadd.f32 %v7932_v11, %v3785_v28  ;;  %v4074_v11 = vmul.f32 0.3, %v7730_v30  ;;  %v6065_v30 = vld [vmem:[%s8090_s4 + $0x90] sm:$0xff] }
 0x2cf   : > { %v2831_v29 = vsel %vm2830_vm0, %v6585_v44, %v2827_v50  ;;  %v3811_v59 = vadd.f32 %v7935_v17, %v3798_v51 }
 0x2d0   : > { %v2836_v57 = vsel %vm2833_vm2, %v2835_v52, %v2831_v29 }
 0x2d1   : > { %v6441_v56 = vpack.c.bf16 %v2836_v57, %v2821_v38  ;;  %v4082_v58 = vmul.f32 0.4, %v2836_v57  ;;  %6072 = vmatpush.msk.msra.mxu0 %vm3853_vm1, %v3811_v59  ;;  %6474 = vmatpush.msk.msra.mxu1 %vm3853_vm1, %v3811_v59 }
 0x2d2   : > { %v3786_v60 = vpop.f32.mrf.mxu2  ;;  %6073 = vmatmul.msk.f32.vlgmr.msra.gmra.mxu0 %vm3828_vm3, %v6063_v53  ;;  %6080 = vmatmul.msk.f32.vlgmr.msra.gmra.mxu1 %vm3828_vm3, %v6070_v54 }
 0x2d3   : > { %6469 = vst [vmem:[%s7499_s17 + $0x38] sm:$0xff] %v6441_v56   ;;  %v7971_v17 = vadd.f32 %v4082_v58, %v4074_v11 }
 0x2da   : > { %6074 = vmatmul.msk.f32.gmra.mxu0 %vm3828_vm3, %v6064_v61 }
 0x2e2   : > { %6075 = vmatmul.msk.f32.gmra.mxu0 %vm3828_vm3, %v6065_v30 }
 0x2ea   : > { %6076 = vmatmul.msk.f32.gmra.mxu0 %vm3828_vm3, %v6066_v62 }
 0x2f2   : > { %6077 = vmatmul.msk.f32.gmra.mxu0 %vm3828_vm3, %v6067_v1 }
 0x2fa   : > { %6078 = vmatmul.msk.f32.gmra.mxu0 %vm3828_vm3, %v6068_v0 }
 0x302   : > { %6079 = vmatmul.msk.f32.gmra.mxu0 %vm3828_vm3, %v6069_v3 }
 0x34f   : > { %v3874_v49 = vpop.f32.mrf.mxu0  ;;  %v3895_v5 = vpop.f32.mrf.mxu1 }
 0x350   : > { %v3875_v2 = vadd.f32 %v8000_v6, %v3874_v49  ;;  %v3896_v10 = vadd.f32 %v8000_v6, %v3895_v5 }
 0x352   : > { %v6081_v12 = vmul.f32 -1.442695, %v3875_v2  ;;  %v6088_v9 = vmul.f32 -1.442695, %v3896_v10 }
 0x354   : > { %6586 = vpow2.f32 %v6081_v12 }
 0x355   : > { %6588 = vpow2.f32 %v6088_v9 }
 0x357   : > { %v3877_v14 = vpop.f32.mrf.mxu0 }
 0x358   : > { %v3878_v15 = vadd.f32 %v8000_v6, %v3877_v14 }
 0x35a   : > { %v6587_v16 = vpop.eup %6586  ;;  %v6082_v43 = vmul.f32 -1.442695, %v3878_v15 }
 0x35b   : > { %v6589_v13 = vpop.eup %6588  ;;  %v3922_v19 = vadd.f32 1.0, %v6587_v16 }
 0x35c   : > { %v3929_v21 = vadd.f32 1.0, %v6589_v13  ;;  %6590 = vpow2.f32 %v6082_v43 }
 0x35d   : > { %6592 = vrcp.f32 %v3922_v19  ;;  %v3941_v44 = vand.u32 2147483648, %v3922_v19  ;;  %v3939_v40 = vand.u32 2147483647, %v3922_v19  ;;  %vm3935_vm7 = vweird.f32 %v3922_v19 }
 0x35e   : > { %6594 = vrcp.f32 %v3929_v21  ;;  %v4046_v34 = vand.u32 2147483648, %v3929_v21  ;;  %vm4040_vm4 = vweird.f32 %v3929_v21  ;;  %v4044_v37 = vand.u32 2147483647, %v3929_v21 }
 0x35f   : > { %v3880_v22 = vpop.f32.mrf.mxu0  ;;  %v3942_v51 = vor.u32 1.1754944e-38, %v3941_v44  ;;  %vm3940_vm11 = vcmp.eq.f32.partialorder %v3939_v40, 8.507059e+37 }
 0x360   : > { %v3881_v24 = vadd.f32 %v8000_v6, %v3880_v22  ;;  %v4047_v4 = vor.u32 1.1754944e-38, %v4046_v34  ;;  %vm4045_vm10 = vcmp.eq.f32.partialorder %v4044_v37, 8.507059e+37 }
 0x362   : > { %v6591_v26 = vpop.eup %6590  ;;  %v6083_v18 = vmul.f32 -1.442695, %v3881_v24 }
 0x363   : > { %v6593_v27 = vpop.eup %6592  ;;  %v8006_v31 = vadd.f32 1.0, %v6591_v26 }
 0x364   : > { %v6595_v32 = vpop.eup %6594  ;;  %v3931_v33 = vmul.f32 %v6593_v27, %v3922_v19  ;;  %6596 = vpow2.f32 %v6083_v18  ;;  %vm3936_vm6 = vweird.f32 %v6593_v27 }
 0x365   : > { %v4036_v55 = vmul.f32 %v6595_v32, %v3929_v21  ;;  %6598 = vrcp.f32 %v8006_v31  ;;  %vm4041_vm5 = vweird.f32 %v6595_v32  ;;  %vm3937_vm9 = vmor %vm3935_vm7, %vm3936_vm6  ;;  %v3954_v61 = vand.u32 2147483647, %v8006_v31 }
 0x366   : > { %v3932_v20 = vsub.f32 1.0, %v3931_v33  ;;  %vm8010_vm8 = vmor %vm4040_vm4, %vm4041_vm5  ;;  %v3956_v30 = vand.u32 2147483648, %v8006_v31  ;;  %vm3950_vm13 = vweird.f32 %v8006_v31 }
 0x367   : > { %v4037_v36 = vsub.f32 1.0, %v4036_v55  ;;  %v3883_v38 = vpop.f32.mrf.mxu0  ;;  %vm3955_vm15 = vcmp.eq.f32.partialorder %v3954_v61, 8.507059e+37 }
 0x368   : > { %v3933_v23 = vmul.f32 %v6593_v27, %v3932_v20  ;;  %v3884_v41 = vadd.f32 %v8000_v6, %v3883_v38  ;;  %v3957_v9 = vor.u32 1.1754944e-38, %v3956_v30 }
 0x369   : > { %v4038_v42 = vmul.f32 %v6595_v32, %v4037_v36 }
 0x36a   : > { %v6597_v7 = vpop.eup %6596  ;;  %v3934_v45 = vadd.f32 %v6593_v27, %v3933_v23  ;;  %v6084_v28 = vmul.f32 -1.442695, %v3884_v41 }
 0x36b   : > { %v6599_v50 = vpop.eup %6598  ;;  %v4039_v52 = vadd.f32 %v6595_v32, %v4038_v42  ;;  %v3924_v29 = vadd.f32 1.0, %v6597_v7 }
 0x36c   : > { %v3938_v59 = vsel %vm3937_vm9, %v6593_v27, %v3934_v45  ;;  %v3946_v53 = vmul.f32 %v6599_v50, %v8006_v31  ;;  %6600 = vpow2.f32 %v6084_v28  ;;  %vm3951_vm12 = vweird.f32 %v6599_v50 }
 0x36d   : > { %v3943_v54 = vsel %vm3940_vm11, %v3942_v51, %v3938_v59  ;;  %v4043_v57 = vsel %vm8010_vm8, %v6595_v32, %v4039_v52  ;;  %6602 = vrcp.f32 %v3924_v29  ;;  %vm3952_vm14 = vmor %vm3950_vm13, %vm3951_vm12  ;;  %v3969_v19 = vand.u32 2147483647, %v3924_v29 }
 0x36e   : > { %v4091_v11 = vmul.f32 0.3, %v3943_v54  ;;  %v8018_v56 = vsel %vm4045_vm10, %v4047_v4, %v4043_v57  ;;  %v3947_v58 = vsub.f32 1.0, %v3946_v53  ;;  %v3971_v21 = vand.u32 2147483648, %v3924_v29 }
 0x36f   : > { %v4098_v60 = vmul.f32 0.3, %v8018_v56  ;;  %v3886_v62 = vpop.f32.mrf.mxu0  ;;  %vm3965_vm1 = vweird.f32 %v3924_v29  ;;  %vm3970_vm3 = vcmp.eq.f32.partialorder %v3969_v19, 8.507059e+37 }
 0x370   : > { %v4099_v1 = vadd.f32 %v4091_v11, %v7922_v39  ;;  %v3948_v0 = vmul.f32 %v6599_v50, %v3947_v58  ;;  %v3887_v3 = vadd.f32 %v8000_v6, %v3886_v62  ;;  %v3972_v55 = vor.u32 1.1754944e-38, %v3971_v21 }
 0x371   : > { %v4106_v49 = vadd.f32 %v4098_v60, %v7971_v17 }
 0x372   : > { %v6601_v5 = vpop.eup %6600  ;;  %4107 = vst [vmem:[%s8023_s20] sm:$0xff] %v4099_v1  ;;  %v3949_v2 = vadd.f32 %v6599_v50, %v3948_v0  ;;  %v6085_v10 = vmul.f32 -1.442695, %v3887_v3 }
 0x373   : > { %v6603_v12 = vpop.eup %6602  ;;  %4114 = vst [vmem:[%s8023_s20 + $0x38] sm:$0xff] %v4106_v49  ;;  %v3925_v14 = vadd.f32 1.0, %v6601_v5 }
 0x374   : > { %v3953_v15 = vsel %vm3952_vm14, %v6599_v50, %v3949_v2  ;;  %v3961_v39 = vmul.f32 %v6603_v12, %v3924_v29  ;;  %6604 = vpow2.f32 %v6085_v10  ;;  %vm3966_vm0 = vweird.f32 %v6603_v12 }
 0x375   : > { %v3958_v16 = vsel %vm3955_vm15, %v3957_v9, %v3953_v15  ;;  %6606 = vrcp.f32 %v3925_v14  ;;  %vm3967_vm2 = vmor %vm3965_vm1, %vm3966_vm0  ;;  %v3984_v38 = vand.u32 2147483647, %v3925_v14  ;;  %v3986_v23 = vand.u32 2147483648, %v3925_v14 }
 0x376   : > { %v6446_v17 = vpack.c.bf16 %v3958_v16, %v3943_v54  ;;  %v4092_v43 = vmul.f32 0.3, %v3958_v16  ;;  %v3962_v13 = vsub.f32 1.0, %v3961_v39  ;;  %vm3980_vm5 = vweird.f32 %v3925_v14 }
 0x377   : > { %v3889_v22 = vpop.f32.mrf.mxu0  ;;  %v3987_v50 = vor.u32 1.1754944e-38, %v3986_v23  ;;  %vm3985_vm7 = vcmp.eq.f32.partialorder %v3984_v38, 8.507059e+37 }
 0x378   : > { %6470 = vst [vmem:[%s7499_s17 + $0x40] sm:$0xff] %v6446_v17   ;;  %v4100_v24 = vadd.f32 %v4092_v43, %v7929_v63  ;;  %v3963_v26 = vmul.f32 %v6603_v12, %v3962_v13  ;;  %v3890_v18 = vadd.f32 %v8000_v6, %v3889_v22 }
 0x37a   : > { %v6605_v27 = vpop.eup %6604  ;;  %4108 = vst [vmem:[%s8023_s20 + $0x8] sm:$0xff] %v4100_v24  ;;  %v3964_v31 = vadd.f32 %v6603_v12, %v3963_v26  ;;  %v6086_v32 = vmul.f32 -1.442695, %v3890_v18 }
 0x37b   : > { %v6607_v33 = vpop.eup %6606  ;;  %v3926_v20 = vadd.f32 1.0, %v6605_v27 }
 0x37c   : > { %v3968_v44 = vsel %vm3967_vm2, %v6603_v12, %v3964_v31  ;;  %v3976_v34 = vmul.f32 %v6607_v33, %v3925_v14  ;;  %6608 = vpow2.f32 %v6086_v32  ;;  %vm3981_vm4 = vweird.f32 %v6607_v33 }
 0x37d   : > { %v3973_v36 = vsel %vm3970_vm3, %v3972_v55, %v3968_v44  ;;  %6610 = vrcp.f32 %v3926_v20  ;;  %vm3982_vm6 = vmor %vm3980_vm5, %vm3981_vm4  ;;  %v4001_v54 = vand.u32 2147483648, %v3926_v20  ;;  %v3999_v58 = vand.u32 2147483647, %v3926_v20  ;;  %v4162_v44 = vld [vmem:[%s7499_s17 + $0x18] sm:$0xff] (%p6730_p3)  }
 0x37e   : > { %v4093_v63 = vmul.f32 0.3, %v3973_v36  ;;  %v3977_v37 = vsub.f32 1.0, %v3976_v34  ;;  %vm3995_vm9 = vweird.f32 %v3926_v20  ;;  %v4166_v34 = vld [vmem:[%s7499_s17 + $0x20] sm:$0xff] (%p6730_p3)   ;;  %4163 = vst [vmem:[%s4133_s10 + $0x18] sm:$0xff] (%p6730_p3), %v4162_v44  }
 0x37f   : > { %v3892_v40 = vpop.f32.mrf.mxu0  ;;  %v4002_v62 = vor.u32 1.1754944e-38, %v4001_v54  ;;  %vm4000_vm11 = vcmp.eq.f32.partialorder %v3999_v58, 8.507059e+37  ;;  %4167 = vst [vmem:[%s4133_s10 + $0x40] sm:$0xff] (%p6730_p3), %v4166_v34   ;;  %v4182_v38 = vld [vmem:[%s7499_s17 + $0x40] sm:$0xff] (%p6730_p3)  }
 0x380   : > { %v4101_v41 = vadd.f32 %v4093_v63, %v7937_v25  ;;  %v3978_v42 = vmul.f32 %v6607_v33, %v3977_v37  ;;  %v3893_v7 = vadd.f32 %v8000_v6, %v3892_v40  ;;  %v4174_v63 = vld [vmem:[%s7499_s17 + $0x30] sm:$0xff] (%p6730_p3)   ;;  %v4178_v37 = vld [vmem:[%s7499_s17 + $0x38] sm:$0xff] (%p6730_p3)   ;;  %4183 = vst [vmem:[%s4133_s10 + $0x80] sm:$0xff] (%p6730_p3), %v4182_v38  }
 0x381   : > { %4175 = vst [vmem:[%s4133_s10 + $0x50] sm:$0xff] (%p6730_p3), %v4174_v63  }
 0x382   : > { %v6609_v45 = vpop.eup %6608  ;;  %4109 = vst [vmem:[%s8023_s20 + $0x10] sm:$0xff] %v4101_v41  ;;  %v3979_v46 = vadd.f32 %v6607_v33, %v3978_v42  ;;  %v6087_v4 = vmul.f32 -1.442695, %v3893_v7 }
 0x383   : > { %v6611_v28 = vpop.eup %6610  ;;  %v3927_v51 = vadd.f32 1.0, %v6609_v45  ;;  %4179 = vst [vmem:[%s4133_s10 + $0x58] sm:$0xff] (%p6730_p3), %v4178_v37  }
 0x384   : > { %v3983_v52 = vsel %vm3982_vm6, %v6607_v33, %v3979_v46  ;;  %v3991_v29 = vmul.f32 %v6611_v28, %v3926_v20  ;;  %6612 = vpow2.f32 %v6087_v4  ;;  %vm3996_vm8 = vweird.f32 %v6611_v28 }
 0x385   : > { %v3988_v25 = vsel %vm3985_vm7, %v3987_v50, %v3983_v52  ;;  %6614 = vrcp.f32 %v3927_v51  ;;  %vm3997_vm10 = vmor %vm3995_vm9, %vm3996_vm8  ;;  %v4014_v9 = vand.u32 2147483647, %v3927_v51  ;;  %vm4010_vm13 = vweird.f32 %v3927_v51 }
 0x386   : > { %v6451_v59 = vpack.c.bf16 %v3988_v25, %v3973_v36  ;;  %v4094_v53 = vmul.f32 0.3, %v3988_v25  ;;  %v3992_v6 = vsub.f32 1.0, %v3991_v29  ;;  %v4170_v36 = vld [vmem:[%s7499_s17 + $0x28] sm:$0xff] (%p6730_p3)  }
 0x387   : > { %vm4015_vm15 = vcmp.eq.f32.partialorder %v4014_v9, 8.507059e+37  ;;  %4171 = vst [vmem:[%s4133_s10 + $0x48] sm:$0xff] (%p6730_p3), %v4170_v36  }
 0x388   : > { %6471 = vst [vmem:[%s7499_s17 + $0x48] sm:$0xff] %v6451_v59   ;;  %v4102_v57 = vadd.f32 %v4094_v53, %v7942_v48  ;;  %v3993_v11 = vmul.f32 %v6611_v28, %v3992_v6  ;;  %v4016_v48 = vand.u32 2147483648, %v3927_v51 }
 0x38a   : > { %v6613_v60 = vpop.eup %6612  ;;  %4110 = vst [vmem:[%s8023_s20 + $0x18] sm:$0xff] %v4102_v57  ;;  %v3994_v61 = vadd.f32 %v6611_v28, %v3993_v11  ;;  %v4017_v39 = vor.u32 1.1754944e-38, %v4016_v48 }
 0x38b   : > { %v6615_v30 = vpop.eup %6614  ;;  %v3928_v1 = vadd.f32 1.0, %v6613_v60 }
 0x38c   : > { %v3998_v0 = vsel %vm3997_vm10, %v6611_v28, %v3994_v61  ;;  %v4006_v3 = vmul.f32 %v6615_v30, %v3927_v51  ;;  %vm4011_vm12 = vweird.f32 %v6615_v30 }
 0x38d   : > { %v4003_v49 = vsel %vm4000_vm11, %v4002_v62, %v3998_v0  ;;  %6616 = vrcp.f32 %v3928_v1  ;;  %vm4012_vm14 = vmor %vm4010_vm13, %vm4011_vm12  ;;  %v4031_v22 = vand.u32 2147483648, %v3928_v1  ;;  %v4029_v26 = vand.u32 2147483647, %v3928_v1 }
 0x38e   : > { %v4095_v5 = vmul.f32 0.3, %v4003_v49  ;;  %v4007_v2 = vsub.f32 1.0, %v4006_v3  ;;  %vm4025_vm1 = vweird.f32 %v3928_v1 }
 0x38f   : > { %v4032_v27 = vor.u32 1.1754944e-38, %v4031_v22  ;;  %vm4030_vm3 = vcmp.eq.f32.partialorder %v4029_v26, 8.507059e+37  ;;  %v4186_v23 = vld [vmem:[%s7499_s17 + $0x48] sm:$0xff] (%p6730_p3)  }
 0x390   : > { %v4103_v10 = vadd.f32 %v4095_v5, %v7946_v8  ;;  %v4008_v12 = vmul.f32 %v6615_v30, %v4007_v2  ;;  %4187 = vst [vmem:[%s4133_s10 + $0x88] sm:$0xff] (%p6730_p3), %v4186_v23  }
 0x392   : > { %4111 = vst [vmem:[%s8023_s20 + $0x20] sm:$0xff] %v4103_v10  ;;  %v4009_v14 = vadd.f32 %v6615_v30, %v4008_v12 }
 0x393   : > { %v6617_v15 = vpop.eup %6616 }
 0x394   : > { %v4013_v16 = vsel %vm4012_vm14, %v6615_v30, %v4009_v14  ;;  %v4021_v17 = vmul.f32 %v6617_v15, %v3928_v1  ;;  %vm4026_vm0 = vweird.f32 %v6617_v15 }
 0x395   : > { %v4018_v43 = vsel %vm4015_vm15, %v4017_v39, %v4013_v16  ;;  %vm4027_vm2 = vmor %vm4025_vm1, %vm4026_vm0 }
 0x396   : > { %v6456_v13 = vpack.c.bf16 %v4018_v43, %v4003_v49  ;;  %v4096_v19 = vmul.f32 0.3, %v4018_v43  ;;  %v4022_v21 = vsub.f32 1.0, %v4021_v17 }
 0x398   : > { %6472 = vst [vmem:[%s7499_s17 + $0x50] sm:$0xff] %v6456_v13   ;;  %v4104_v8 = vadd.f32 %v4096_v19, %v7952_v35  ;;  %v4023_v24 = vmul.f32 %v6617_v15, %v4022_v21  ;;  %v4150_v35 = vld [vmem:[%s7499_s17] sm:$0xff] (%p6730_p3)  }
 0x399   : > { %4151 = vst [vmem:[%s4133_s10] sm:$0xff] (%p6730_p3), %v4150_v35  }
 0x39a   : > { %4112 = vst [vmem:[%s8023_s20 + $0x28] sm:$0xff] %v4104_v8  ;;  %v4024_v18 = vadd.f32 %v6617_v15, %v4023_v24 }
 0x39c   : > { %v4028_v31 = vsel %vm4027_vm2, %v6617_v15, %v4024_v18 }
 0x39d   : > { %v4033_v32 = vsel %vm4030_vm3, %v4032_v27, %v4028_v31 }
 0x39e   : > { %v6461_v33 = vpack.c.bf16 %v8018_v56, %v4033_v32  ;;  %v4097_v55 = vmul.f32 0.3, %v4033_v32  ;;  %4129 = sbr.rel (!%p6730_p3) target bundleno = 937 (0x3a9), region = 48  ;;  %v4154_v56 = vld [vmem:[%s7499_s17 + $0x8] sm:$0xff] (%p6730_p3)  }
 0x39f   : > { %4155 = vst [vmem:[%s4133_s10 + $0x8] sm:$0xff] (%p6730_p3), %v4154_v56   ;;  %v4190_v40 = vld [vmem:[%s7499_s17 + $0x50] sm:$0xff] (%p6730_p3)  }
 0x3a0   : > { %6473 = vst [vmem:[%s7499_s17 + $0x58] sm:$0xff] %v6461_v33   ;;  %v4105_v20 = vadd.f32 %v4097_v55, %v7957_v47  ;;  %v4158_v47 = vld [vmem:[%s7499_s17 + $0x10] sm:$0xff] (%p6730_p3)  }
 0x3a1   : > { %4159 = vst [vmem:[%s4133_s10 + $0x10] sm:$0xff] (%p6730_p3), %v4158_v47  }
 0x3a2   : > { %4113 = vst [vmem:[%s8023_s20 + $0x30] sm:$0xff] %v4105_v20 }
 0x3a3   : > { %4191 = vst [vmem:[%s4133_s10 + $0x90] sm:$0xff] %v4190_v40  }
 0x3a7   : > { %v4194_v41 = vld [vmem:[%s7499_s17 + $0x58] sm:$0xff]  }
 0x3a8   : > { %4195 = vst [vmem:[%s4133_s10 + $0x98] sm:$0xff] %v4194_v41  }
 0x3a9 PF: > { %s18_s28 = sadd.s32 1, %s6656_s28   ;;  %s8105_s24 = smov %s6644_s25 }
 0x3aa   : > { %p15_p9 = scmp.ge.s32.totalorder %s18_s28, 4   ;;  %s8106_s25 = smov %s6739_s11 }
 0x3ab   : > { %s8107_s26 = smov %s6652_s27  ;;  %s8108_s27 = smov %s8110_s30 }
 0x3ac   :  { %17 = sbr.rel (!%p15_p9) target bundleno = 3 (0x3), region = 148 }

</bundles_post_ra>
